<compile_context>
chip_gen: v5e
topology: v5e:2x2
jax: 0.10.0
libtpu: 0.0.40
codegen_flags: <defaults>
</compile_context>

<pallas_src>
import numpy as np
import jax
import jax.numpy as jnp
from jax.experimental import pallas as pl
from jax.experimental.pallas import tpu as pltpu


# ----------------------------------------------------------------------------
# Spike generation on a PSP value held in vregs (no VMEM round trip)
# ----------------------------------------------------------------------------
def _spike_train(p, *, theta, decay, ref_scale):
    """p: (T, C) f32 PSP value.  Returns binary spikes {0,1} as (T, C) f32."""
    T, C = p.shape
    f32 = jnp.float32
    s1 = jnp.zeros((1, C), f32)
    s2 = jnp.zeros((1, C), f32)
    rows = []
    # Static unroll over time: keeps the serial membrane recurrence entirely
    # in registers and gives the scheduler cross-step visibility.
    for t in range(T):
        p_row = p[t:t + 1, :]                       # static slice of a value
        m = p_row + ref_scale * s2                  # psp + refractory feedback
        fired = (m >= theta).astype(f32)            # (1, C) in {0, 1}
        rows.append(fired)
        # 2-state recurrence reproducing ref(j) = ref_scale * j * decay**j
        s1_new = decay * (s1 + fired)
        s2 = decay * (s2 + s1 + fired)
        s1 = s1_new
    # single sublane-assembly (no per-row where-selects / masked stores)
    return jnp.concatenate(rows, axis=0)


# ----------------------------------------------------------------------------
# Fused 2-layer kernel: fc1 -> psp -> spike -> fc2 -> psp -> spike
# ----------------------------------------------------------------------------
def _make_fused_net_kernel(theta, inv_ts, decay, ref_scale):
    def kernel(x_ref, w1_ref, w2_ref, m_ref, o_ref):
        # x_ref : (T, Cin_p)   bf16 input spikes for one batch element
        # w1_ref: (Cin_p, C1)  bf16 layer-1 weights (grid-resident)
        # w2_ref: (C1, C2p)    bf16 layer-2 weights * (1/Ts) (grid-resident)
        # m_ref : (T, T)       f32 causal Toeplitz matrix of the SRM kernel
        # o_ref : (T, C2p)     f32 output spikes (values 0 or 1/Ts)
        f32 = jnp.float32

        # ---- layer 1: fc (MXU, bf16 in / f32 acc) -> psp -> spike ----------
        u1 = jnp.dot(x_ref[...], w1_ref[...], preferred_element_type=f32)
        p1 = jnp.dot(m_ref[...], u1, preferred_element_type=f32)
        s1 = _spike_train(p1, theta=theta, decay=decay, ref_scale=ref_scale)

        # ---- layer 2 (fused, no HBM round trip for s1) ----------------------
        # s1 is binary {0,1} (exact in bf16); the 1/Ts amplitude lives in w2.
        u2 = jnp.dot(s1.astype(w2_ref.dtype), w2_ref[...],
                     preferred_element_type=f32)
        p2 = jnp.dot(m_ref[...], u2, preferred_element_type=f32)
        s2 = _spike_train(p2, theta=theta, decay=decay, ref_scale=ref_scale)

        # lane-dense, full-tile store (C2p is a multiple of 128)
        o_ref[...] = (s2 * inv_ts).astype(o_ref.dtype)

    return kernel


# ----------------------------------------------------------------------------
# Full network forward (layout glue in plain JAX; 2 real transposes total)
# ----------------------------------------------------------------------------
def yqt_net_forward(spike_input, w1, w2, psp_mat, theta, Ts, tauRef):
    # spike_input: (N, Cin, 1, 1, T)  -- SLAYER NCHWT layout
    assert theta > 0.0, "zero-padded output columns require a positive threshold"
    N, Cin, _, _, T = spike_input.shape
    C1 = w1.shape[1]
    C2 = w2.shape[1]
    inv_ts = 1.0 / Ts
    decay = float(np.exp(-Ts / tauRef))
    ref_scale = float(-2.0 * theta * (Ts / tauRef) * np.e)

    # single layout change at the input boundary: NCHWT -> (N, T, Cin)
    x = spike_input.reshape(N, Cin, T).transpose(0, 2, 1)
    # pad the contraction dim to a full lane multiple (free: transpose already
    # relayouts x); padded columns meet zero weight rows, so no effect.
    Cin_p = ((Cin + 127) // 128) * 128
    x = jnp.pad(x, ((0, 0), (0, 0), (0, Cin_p - Cin)))
    # Input spikes are 0 or 1/Ts: exact in bf16 when Ts is a power of two.
    # TODO(synk): for non power-of-two Ts, binarize the input and fold 1/Ts
    # into w1 instead of casting 1/Ts-valued spikes to bf16.
    x = x.astype(jnp.bfloat16)

    w1p = jnp.pad(w1, ((0, Cin_p - Cin), (0, 0))).astype(jnp.bfloat16)

    # pad Cout=10 -> 128 lanes; fold the 1/Ts layer-1 spike amplitude into w2
    # so in-kernel layer-1 spikes stay exactly {0, 1}.
    C2p = ((C2 + 127) // 128) * 128
    w2p = jnp.pad(w2 * inv_ts, ((0, 0), (0, C2p - C2))).astype(jnp.bfloat16)

    kernel = _make_fused_net_kernel(float(theta), float(inv_ts),
                                    decay, ref_scale)

    out = pl.pallas_call(
        kernel,
        out_shape=jax.ShapeDtypeStruct((N, T, C2p), jnp.float32),
        grid=(N,),
        in_specs=[
            pl.BlockSpec((None, T, Cin_p), lambda n: (n, 0, 0)),
            pl.BlockSpec((Cin_p, C1), lambda n: (0, 0)),   # resident weights
            pl.BlockSpec((C1, C2p), lambda n: (0, 0)),     # resident weights
            pl.BlockSpec((T, T), lambda n: (0, 0)),        # resident psp matrix
        ],
        out_specs=pl.BlockSpec((None, T, C2p), lambda n: (n, 0, 0)),
        compiler_params=pltpu.CompilerParams(
            dimension_semantics=("parallel",),
            vmem_limit_bytes=32 * 1024 * 1024,
        ),
    )(x, w1p, w2p, psp_mat)

    s2 = out[..., :C2]                                   # drop padded lanes
    # back to SLAYER NCHWT layout
    return s2.transpose(0, 2, 1).reshape(N, C2, 1, 1, T)


if __name__ == "__main__":
    # ----- neuron / simulation params (typical N-MNIST SLAYER config) -----
    theta, tauSr, tauRef, Ts = 10.0, 10.0, 1.0, 1.0
    N, T = 2, 16
    Cin, C1, C2 = 34 * 34 * 2, 512, 10

    # ----- deterministic synthetic parameters & input -----
    key = jax.random.PRNGKey(0)
    k_in, k_w1, k_w2 = jax.random.split(key, 3)
    spike_input = (jax.random.uniform(k_in, (N, Cin, 1, 1, T)) < 0.3)
    spike_input = spike_input.astype(jnp.float32) * (1.0 / Ts)
    w1 = jax.random.normal(k_w1, (Cin, C1), jnp.float32) / jnp.sqrt(Cin)
    w2 = jax.random.normal(k_w2, (C1, C2), jnp.float32) / jnp.sqrt(C1)

    # ----- SRM (psp) causal Toeplitz matrix, built as glue in numpy -----
    t_axis = np.arange(T, dtype=np.float64) * Ts
    srm = (t_axis / tauSr) * np.exp(1.0 - t_axis / tauSr)
    psp_mat_np = np.zeros((T, T), np.float32)
    for i in range(T):
        for j in range(i + 1):
            psp_mat_np[i, j] = Ts * srm[i - j]
    psp_mat = jnp.asarray(psp_mat_np)

    fwd = jax.jit(yqt_net_forward, static_argnums=(4, 5, 6))
    out = fwd(spike_input, w1, w2, psp_mat, theta, Ts, tauRef)
    jax.block_until_ready(out)
    assert out.shape == (N, C2, 1, 1, T)
    print("KERNEL_OK")
</pallas_src>

<mosaic_0001>
module attributes {stable_mosaic.version = 11 : i64} {
  func.func @kernel(%arg0: i32, %arg1: memref<1x16x2432xbf16, #tpu.memory_space<vmem>>, %arg2: memref<2432x512xbf16, #tpu.memory_space<vmem>>, %arg3: memref<512x128xbf16, #tpu.memory_space<vmem>>, %arg4: memref<16x16xf32, #tpu.memory_space<vmem>>, %arg5: memref<1x16x128xf32, #tpu.memory_space<vmem>>) attributes {dimension_semantics = [#tpu.dimension_semantics<parallel>], iteration_bounds = array<i64: 2>, scalar_prefetch = 0 : i64, scratch_operands = 0 : i64, tpu.core_type = #tpu.core_type<tc>, window_params = [{transform_indices = @transform_0, window_bounds = array<i64: 1, 16, 2432>}, {pipeline_mode = #tpu.pipeline_mode<synchronous>, transform_indices = @transform_1, window_bounds = array<i64: 2432, 512>}, {pipeline_mode = #tpu.pipeline_mode<synchronous>, transform_indices = @transform_2, window_bounds = array<i64: 512, 128>}, {pipeline_mode = #tpu.pipeline_mode<synchronous>, transform_indices = @transform_3, window_bounds = array<i64: 16, 16>}, {transform_indices = @transform_4, window_bounds = array<i64: 1, 16, 128>}]} {
    %c0 = arith.constant 0 : index
    %c0_0 = arith.constant 0 : index
    %c0_1 = arith.constant 0 : index
    %0 = vector.load %arg1[%c0, %c0_0, %c0_1] : memref<1x16x2432xbf16, #tpu.memory_space<vmem>>, vector<1x16x2432xbf16>
    %1 = vector.shape_cast %0 : vector<1x16x2432xbf16> to vector<16x2432xbf16>
    %c0_2 = arith.constant 0 : index
    %c0_3 = arith.constant 0 : index
    %2 = vector.load %arg2[%c0_2, %c0_3] : memref<2432x512xbf16, #tpu.memory_space<vmem>>, vector<2432x512xbf16>
    %cst = arith.constant dense<0.000000e+00> : vector<16x512xf32>
    %3 = tpu.matmul %1, %2, %cst {dimension_numbers = #tpu.dot_dimension_numbers<[1], [0], [0], [1], [0, 0, 1, 1], [], []>} : vector<16x2432xbf16>, vector<2432x512xbf16>, vector<16x512xf32> -> vector<16x512xf32>
    %c0_4 = arith.constant 0 : index
    %c0_5 = arith.constant 0 : index
    %4 = vector.load %arg4[%c0_4, %c0_5] : memref<16x16xf32, #tpu.memory_space<vmem>>, vector<16x16xf32>
    %cst_6 = arith.constant dense<0.000000e+00> : vector<16x512xf32>
    %5 = tpu.matmul %4, %3, %cst_6 {dimension_numbers = #tpu.dot_dimension_numbers<[1], [0], [0], [1], [0, 0, 1, 1], [], []>} : vector<16x16xf32>, vector<16x512xf32>, vector<16x512xf32> -> vector<16x512xf32>
    %cst_7 = arith.constant 0.000000e+00 : f32
    %6 = vector.broadcast %cst_7 : f32 to vector<1x512xf32>
    %cst_8 = arith.constant 0.000000e+00 : f32
    %7 = vector.broadcast %cst_8 : f32 to vector<1x512xf32>
    %8 = vector.extract_strided_slice %5 {offsets = [0, 0], sizes = [1, 512], strides = [1, 1]} : vector<16x512xf32> to vector<1x512xf32>
    %cst_9 = arith.constant -54.3656349 : f32
    %9 = vector.broadcast %cst_9 : f32 to vector<1x512xf32>
    %10 = arith.mulf %9, %7 : vector<1x512xf32>
    %11 = arith.addf %8, %10 : vector<1x512xf32>
    %cst_10 = arith.constant 1.000000e+01 : f32
    %12 = vector.broadcast %cst_10 : f32 to vector<1x512xf32>
    %13 = arith.cmpf oge, %11, %12 : vector<1x512xf32>
    %14 = arith.extui %13 : vector<1x512xi1> to vector<1x512xi32>
    %15 = arith.sitofp %14 : vector<1x512xi32> to vector<1x512xf32>
    %16 = arith.addf %6, %15 : vector<1x512xf32>
    %cst_11 = arith.constant 0.36787945 : f32
    %17 = vector.broadcast %cst_11 : f32 to vector<1x512xf32>
    %18 = arith.mulf %17, %16 : vector<1x512xf32>
    %19 = arith.addf %7, %6 : vector<1x512xf32>
    %20 = arith.addf %19, %15 : vector<1x512xf32>
    %cst_12 = arith.constant 0.36787945 : f32
    %21 = vector.broadcast %cst_12 : f32 to vector<1x512xf32>
    %22 = arith.mulf %21, %20 : vector<1x512xf32>
    %23 = vector.extract_strided_slice %5 {offsets = [1, 0], sizes = [1, 512], strides = [1, 1]} : vector<16x512xf32> to vector<1x512xf32>
    %cst_13 = arith.constant -54.3656349 : f32
    %24 = vector.broadcast %cst_13 : f32 to vector<1x512xf32>
    %25 = arith.mulf %24, %22 : vector<1x512xf32>
    %26 = arith.addf %23, %25 : vector<1x512xf32>
    %cst_14 = arith.constant 1.000000e+01 : f32
    %27 = vector.broadcast %cst_14 : f32 to vector<1x512xf32>
    %28 = arith.cmpf oge, %26, %27 : vector<1x512xf32>
    %29 = arith.extui %28 : vector<1x512xi1> to vector<1x512xi32>
    %30 = arith.sitofp %29 : vector<1x512xi32> to vector<1x512xf32>
    %31 = arith.addf %18, %30 : vector<1x512xf32>
    %cst_15 = arith.constant 0.36787945 : f32
    %32 = vector.broadcast %cst_15 : f32 to vector<1x512xf32>
    %33 = arith.mulf %32, %31 : vector<1x512xf32>
    %34 = arith.addf %22, %18 : vector<1x512xf32>
    %35 = arith.addf %34, %30 : vector<1x512xf32>
    %cst_16 = arith.constant 0.36787945 : f32
    %36 = vector.broadcast %cst_16 : f32 to vector<1x512xf32>
    %37 = arith.mulf %36, %35 : vector<1x512xf32>
    %38 = vector.extract_strided_slice %5 {offsets = [2, 0], sizes = [1, 512], strides = [1, 1]} : vector<16x512xf32> to vector<1x512xf32>
    %cst_17 = arith.constant -54.3656349 : f32
    %39 = vector.broadcast %cst_17 : f32 to vector<1x512xf32>
    %40 = arith.mulf %39, %37 : vector<1x512xf32>
    %41 = arith.addf %38, %40 : vector<1x512xf32>
    %cst_18 = arith.constant 1.000000e+01 : f32
    %42 = vector.broadcast %cst_18 : f32 to vector<1x512xf32>
    %43 = arith.cmpf oge, %41, %42 : vector<1x512xf32>
    %44 = arith.extui %43 : vector<1x512xi1> to vector<1x512xi32>
    %45 = arith.sitofp %44 : vector<1x512xi32> to vector<1x512xf32>
    %46 = arith.addf %33, %45 : vector<1x512xf32>
    %cst_19 = arith.constant 0.36787945 : f32
    %47 = vector.broadcast %cst_19 : f32 to vector<1x512xf32>
    %48 = arith.mulf %47, %46 : vector<1x512xf32>
    %49 = arith.addf %37, %33 : vector<1x512xf32>
    %50 = arith.addf %49, %45 : vector<1x512xf32>
    %cst_20 = arith.constant 0.36787945 : f32
    %51 = vector.broadcast %cst_20 : f32 to vector<1x512xf32>
    %52 = arith.mulf %51, %50 : vector<1x512xf32>
    %53 = vector.extract_strided_slice %5 {offsets = [3, 0], sizes = [1, 512], strides = [1, 1]} : vector<16x512xf32> to vector<1x512xf32>
    %cst_21 = arith.constant -54.3656349 : f32
    %54 = vector.broadcast %cst_21 : f32 to vector<1x512xf32>
    %55 = arith.mulf %54, %52 : vector<1x512xf32>
    %56 = arith.addf %53, %55 : vector<1x512xf32>
    %cst_22 = arith.constant 1.000000e+01 : f32
    %57 = vector.broadcast %cst_22 : f32 to vector<1x512xf32>
    %58 = arith.cmpf oge, %56, %57 : vector<1x512xf32>
    %59 = arith.extui %58 : vector<1x512xi1> to vector<1x512xi32>
    %60 = arith.sitofp %59 : vector<1x512xi32> to vector<1x512xf32>
    %61 = arith.addf %48, %60 : vector<1x512xf32>
    %cst_23 = arith.constant 0.36787945 : f32
    %62 = vector.broadcast %cst_23 : f32 to vector<1x512xf32>
    %63 = arith.mulf %62, %61 : vector<1x512xf32>
    %64 = arith.addf %52, %48 : vector<1x512xf32>
    %65 = arith.addf %64, %60 : vector<1x512xf32>
    %cst_24 = arith.constant 0.36787945 : f32
    %66 = vector.broadcast %cst_24 : f32 to vector<1x512xf32>
    %67 = arith.mulf %66, %65 : vector<1x512xf32>
    %68 = vector.extract_strided_slice %5 {offsets = [4, 0], sizes = [1, 512], strides = [1, 1]} : vector<16x512xf32> to vector<1x512xf32>
    %cst_25 = arith.constant -54.3656349 : f32
    %69 = vector.broadcast %cst_25 : f32 to vector<1x512xf32>
    %70 = arith.mulf %69, %67 : vector<1x512xf32>
    %71 = arith.addf %68, %70 : vector<1x512xf32>
    %cst_26 = arith.constant 1.000000e+01 : f32
    %72 = vector.broadcast %cst_26 : f32 to vector<1x512xf32>
    %73 = arith.cmpf oge, %71, %72 : vector<1x512xf32>
    %74 = arith.extui %73 : vector<1x512xi1> to vector<1x512xi32>
    %75 = arith.sitofp %74 : vector<1x512xi32> to vector<1x512xf32>
    %76 = arith.addf %63, %75 : vector<1x512xf32>
    %cst_27 = arith.constant 0.36787945 : f32
    %77 = vector.broadcast %cst_27 : f32 to vector<1x512xf32>
    %78 = arith.mulf %77, %76 : vector<1x512xf32>
    %79 = arith.addf %67, %63 : vector<1x512xf32>
    %80 = arith.addf %79, %75 : vector<1x512xf32>
    %cst_28 = arith.constant 0.36787945 : f32
    %81 = vector.broadcast %cst_28 : f32 to vector<1x512xf32>
    %82 = arith.mulf %81, %80 : vector<1x512xf32>
    %83 = vector.extract_strided_slice %5 {offsets = [5, 0], sizes = [1, 512], strides = [1, 1]} : vector<16x512xf32> to vector<1x512xf32>
    %cst_29 = arith.constant -54.3656349 : f32
    %84 = vector.broadcast %cst_29 : f32 to vector<1x512xf32>
    %85 = arith.mulf %84, %82 : vector<1x512xf32>
    %86 = arith.addf %83, %85 : vector<1x512xf32>
    %cst_30 = arith.constant 1.000000e+01 : f32
    %87 = vector.broadcast %cst_30 : f32 to vector<1x512xf32>
    %88 = arith.cmpf oge, %86, %87 : vector<1x512xf32>
    %89 = arith.extui %88 : vector<1x512xi1> to vector<1x512xi32>
    %90 = arith.sitofp %89 : vector<1x512xi32> to vector<1x512xf32>
    %91 = arith.addf %78, %90 : vector<1x512xf32>
    %cst_31 = arith.constant 0.36787945 : f32
    %92 = vector.broadcast %cst_31 : f32 to vector<1x512xf32>
    %93 = arith.mulf %92, %91 : vector<1x512xf32>
    %94 = arith.addf %82, %78 : vector<1x512xf32>
    %95 = arith.addf %94, %90 : vector<1x512xf32>
    %cst_32 = arith.constant 0.36787945 : f32
    %96 = vector.broadcast %cst_32 : f32 to vector<1x512xf32>
    %97 = arith.mulf %96, %95 : vector<1x512xf32>
    %98 = vector.extract_strided_slice %5 {offsets = [6, 0], sizes = [1, 512], strides = [1, 1]} : vector<16x512xf32> to vector<1x512xf32>
    %cst_33 = arith.constant -54.3656349 : f32
    %99 = vector.broadcast %cst_33 : f32 to vector<1x512xf32>
    %100 = arith.mulf %99, %97 : vector<1x512xf32>
    %101 = arith.addf %98, %100 : vector<1x512xf32>
    %cst_34 = arith.constant 1.000000e+01 : f32
    %102 = vector.broadcast %cst_34 : f32 to vector<1x512xf32>
    %103 = arith.cmpf oge, %101, %102 : vector<1x512xf32>
    %104 = arith.extui %103 : vector<1x512xi1> to vector<1x512xi32>
    %105 = arith.sitofp %104 : vector<1x512xi32> to vector<1x512xf32>
    %106 = arith.addf %93, %105 : vector<1x512xf32>
    %cst_35 = arith.constant 0.36787945 : f32
    %107 = vector.broadcast %cst_35 : f32 to vector<1x512xf32>
    %108 = arith.mulf %107, %106 : vector<1x512xf32>
    %109 = arith.addf %97, %93 : vector<1x512xf32>
    %110 = arith.addf %109, %105 : vector<1x512xf32>
    %cst_36 = arith.constant 0.36787945 : f32
    %111 = vector.broadcast %cst_36 : f32 to vector<1x512xf32>
    %112 = arith.mulf %111, %110 : vector<1x512xf32>
    %113 = vector.extract_strided_slice %5 {offsets = [7, 0], sizes = [1, 512], strides = [1, 1]} : vector<16x512xf32> to vector<1x512xf32>
    %cst_37 = arith.constant -54.3656349 : f32
    %114 = vector.broadcast %cst_37 : f32 to vector<1x512xf32>
    %115 = arith.mulf %114, %112 : vector<1x512xf32>
    %116 = arith.addf %113, %115 : vector<1x512xf32>
    %cst_38 = arith.constant 1.000000e+01 : f32
    %117 = vector.broadcast %cst_38 : f32 to vector<1x512xf32>
    %118 = arith.cmpf oge, %116, %117 : vector<1x512xf32>
    %119 = arith.extui %118 : vector<1x512xi1> to vector<1x512xi32>
    %120 = arith.sitofp %119 : vector<1x512xi32> to vector<1x512xf32>
    %121 = arith.addf %108, %120 : vector<1x512xf32>
    %cst_39 = arith.constant 0.36787945 : f32
    %122 = vector.broadcast %cst_39 : f32 to vector<1x512xf32>
    %123 = arith.mulf %122, %121 : vector<1x512xf32>
    %124 = arith.addf %112, %108 : vector<1x512xf32>
    %125 = arith.addf %124, %120 : vector<1x512xf32>
    %cst_40 = arith.constant 0.36787945 : f32
    %126 = vector.broadcast %cst_40 : f32 to vector<1x512xf32>
    %127 = arith.mulf %126, %125 : vector<1x512xf32>
    %128 = vector.extract_strided_slice %5 {offsets = [8, 0], sizes = [1, 512], strides = [1, 1]} : vector<16x512xf32> to vector<1x512xf32>
    %cst_41 = arith.constant -54.3656349 : f32
    %129 = vector.broadcast %cst_41 : f32 to vector<1x512xf32>
    %130 = arith.mulf %129, %127 : vector<1x512xf32>
    %131 = arith.addf %128, %130 : vector<1x512xf32>
    %cst_42 = arith.constant 1.000000e+01 : f32
    %132 = vector.broadcast %cst_42 : f32 to vector<1x512xf32>
    %133 = arith.cmpf oge, %131, %132 : vector<1x512xf32>
    %134 = arith.extui %133 : vector<1x512xi1> to vector<1x512xi32>
    %135 = arith.sitofp %134 : vector<1x512xi32> to vector<1x512xf32>
    %136 = arith.addf %123, %135 : vector<1x512xf32>
    %cst_43 = arith.constant 0.36787945 : f32
    %137 = vector.broadcast %cst_43 : f32 to vector<1x512xf32>
    %138 = arith.mulf %137, %136 : vector<1x512xf32>
    %139 = arith.addf %127, %123 : vector<1x512xf32>
    %140 = arith.addf %139, %135 : vector<1x512xf32>
    %cst_44 = arith.constant 0.36787945 : f32
    %141 = vector.broadcast %cst_44 : f32 to vector<1x512xf32>
    %142 = arith.mulf %141, %140 : vector<1x512xf32>
    %143 = vector.extract_strided_slice %5 {offsets = [9, 0], sizes = [1, 512], strides = [1, 1]} : vector<16x512xf32> to vector<1x512xf32>
    %cst_45 = arith.constant -54.3656349 : f32
    %144 = vector.broadcast %cst_45 : f32 to vector<1x512xf32>
    %145 = arith.mulf %144, %142 : vector<1x512xf32>
    %146 = arith.addf %143, %145 : vector<1x512xf32>
    %cst_46 = arith.constant 1.000000e+01 : f32
    %147 = vector.broadcast %cst_46 : f32 to vector<1x512xf32>
    %148 = arith.cmpf oge, %146, %147 : vector<1x512xf32>
    %149 = arith.extui %148 : vector<1x512xi1> to vector<1x512xi32>
    %150 = arith.sitofp %149 : vector<1x512xi32> to vector<1x512xf32>
    %151 = arith.addf %138, %150 : vector<1x512xf32>
    %cst_47 = arith.constant 0.36787945 : f32
    %152 = vector.broadcast %cst_47 : f32 to vector<1x512xf32>
    %153 = arith.mulf %152, %151 : vector<1x512xf32>
    %154 = arith.addf %142, %138 : vector<1x512xf32>
    %155 = arith.addf %154, %150 : vector<1x512xf32>
    %cst_48 = arith.constant 0.36787945 : f32
    %156 = vector.broadcast %cst_48 : f32 to vector<1x512xf32>
    %157 = arith.mulf %156, %155 : vector<1x512xf32>
    %158 = vector.extract_strided_slice %5 {offsets = [10, 0], sizes = [1, 512], strides = [1, 1]} : vector<16x512xf32> to vector<1x512xf32>
    %cst_49 = arith.constant -54.3656349 : f32
    %159 = vector.broadcast %cst_49 : f32 to vector<1x512xf32>
    %160 = arith.mulf %159, %157 : vector<1x512xf32>
    %161 = arith.addf %158, %160 : vector<1x512xf32>
    %cst_50 = arith.constant 1.000000e+01 : f32
    %162 = vector.broadcast %cst_50 : f32 to vector<1x512xf32>
    %163 = arith.cmpf oge, %161, %162 : vector<1x512xf32>
    %164 = arith.extui %163 : vector<1x512xi1> to vector<1x512xi32>
    %165 = arith.sitofp %164 : vector<1x512xi32> to vector<1x512xf32>
    %166 = arith.addf %153, %165 : vector<1x512xf32>
    %cst_51 = arith.constant 0.36787945 : f32
    %167 = vector.broadcast %cst_51 : f32 to vector<1x512xf32>
    %168 = arith.mulf %167, %166 : vector<1x512xf32>
    %169 = arith.addf %157, %153 : vector<1x512xf32>
    %170 = arith.addf %169, %165 : vector<1x512xf32>
    %cst_52 = arith.constant 0.36787945 : f32
    %171 = vector.broadcast %cst_52 : f32 to vector<1x512xf32>
    %172 = arith.mulf %171, %170 : vector<1x512xf32>
    %173 = vector.extract_strided_slice %5 {offsets = [11, 0], sizes = [1, 512], strides = [1, 1]} : vector<16x512xf32> to vector<1x512xf32>
    %cst_53 = arith.constant -54.3656349 : f32
    %174 = vector.broadcast %cst_53 : f32 to vector<1x512xf32>
    %175 = arith.mulf %174, %172 : vector<1x512xf32>
    %176 = arith.addf %173, %175 : vector<1x512xf32>
    %cst_54 = arith.constant 1.000000e+01 : f32
    %177 = vector.broadcast %cst_54 : f32 to vector<1x512xf32>
    %178 = arith.cmpf oge, %176, %177 : vector<1x512xf32>
    %179 = arith.extui %178 : vector<1x512xi1> to vector<1x512xi32>
    %180 = arith.sitofp %179 : vector<1x512xi32> to vector<1x512xf32>
    %181 = arith.addf %168, %180 : vector<1x512xf32>
    %cst_55 = arith.constant 0.36787945 : f32
    %182 = vector.broadcast %cst_55 : f32 to vector<1x512xf32>
    %183 = arith.mulf %182, %181 : vector<1x512xf32>
    %184 = arith.addf %172, %168 : vector<1x512xf32>
    %185 = arith.addf %184, %180 : vector<1x512xf32>
    %cst_56 = arith.constant 0.36787945 : f32
    %186 = vector.broadcast %cst_56 : f32 to vector<1x512xf32>
    %187 = arith.mulf %186, %185 : vector<1x512xf32>
    %188 = vector.extract_strided_slice %5 {offsets = [12, 0], sizes = [1, 512], strides = [1, 1]} : vector<16x512xf32> to vector<1x512xf32>
    %cst_57 = arith.constant -54.3656349 : f32
    %189 = vector.broadcast %cst_57 : f32 to vector<1x512xf32>
    %190 = arith.mulf %189, %187 : vector<1x512xf32>
    %191 = arith.addf %188, %190 : vector<1x512xf32>
    %cst_58 = arith.constant 1.000000e+01 : f32
    %192 = vector.broadcast %cst_58 : f32 to vector<1x512xf32>
    %193 = arith.cmpf oge, %191, %192 : vector<1x512xf32>
    %194 = arith.extui %193 : vector<1x512xi1> to vector<1x512xi32>
    %195 = arith.sitofp %194 : vector<1x512xi32> to vector<1x512xf32>
    %196 = arith.addf %183, %195 : vector<1x512xf32>
    %cst_59 = arith.constant 0.36787945 : f32
    %197 = vector.broadcast %cst_59 : f32 to vector<1x512xf32>
    %198 = arith.mulf %197, %196 : vector<1x512xf32>
    %199 = arith.addf %187, %183 : vector<1x512xf32>
    %200 = arith.addf %199, %195 : vector<1x512xf32>
    %cst_60 = arith.constant 0.36787945 : f32
    %201 = vector.broadcast %cst_60 : f32 to vector<1x512xf32>
    %202 = arith.mulf %201, %200 : vector<1x512xf32>
    %203 = vector.extract_strided_slice %5 {offsets = [13, 0], sizes = [1, 512], strides = [1, 1]} : vector<16x512xf32> to vector<1x512xf32>
    %cst_61 = arith.constant -54.3656349 : f32
    %204 = vector.broadcast %cst_61 : f32 to vector<1x512xf32>
    %205 = arith.mulf %204, %202 : vector<1x512xf32>
    %206 = arith.addf %203, %205 : vector<1x512xf32>
    %cst_62 = arith.constant 1.000000e+01 : f32
    %207 = vector.broadcast %cst_62 : f32 to vector<1x512xf32>
    %208 = arith.cmpf oge, %206, %207 : vector<1x512xf32>
    %209 = arith.extui %208 : vector<1x512xi1> to vector<1x512xi32>
    %210 = arith.sitofp %209 : vector<1x512xi32> to vector<1x512xf32>
    %211 = arith.addf %198, %210 : vector<1x512xf32>
    %cst_63 = arith.constant 0.36787945 : f32
    %212 = vector.broadcast %cst_63 : f32 to vector<1x512xf32>
    %213 = arith.mulf %212, %211 : vector<1x512xf32>
    %214 = arith.addf %202, %198 : vector<1x512xf32>
    %215 = arith.addf %214, %210 : vector<1x512xf32>
    %cst_64 = arith.constant 0.36787945 : f32
    %216 = vector.broadcast %cst_64 : f32 to vector<1x512xf32>
    %217 = arith.mulf %216, %215 : vector<1x512xf32>
    %218 = vector.extract_strided_slice %5 {offsets = [14, 0], sizes = [1, 512], strides = [1, 1]} : vector<16x512xf32> to vector<1x512xf32>
    %cst_65 = arith.constant -54.3656349 : f32
    %219 = vector.broadcast %cst_65 : f32 to vector<1x512xf32>
    %220 = arith.mulf %219, %217 : vector<1x512xf32>
    %221 = arith.addf %218, %220 : vector<1x512xf32>
    %cst_66 = arith.constant 1.000000e+01 : f32
    %222 = vector.broadcast %cst_66 : f32 to vector<1x512xf32>
    %223 = arith.cmpf oge, %221, %222 : vector<1x512xf32>
    %224 = arith.extui %223 : vector<1x512xi1> to vector<1x512xi32>
    %225 = arith.sitofp %224 : vector<1x512xi32> to vector<1x512xf32>
    %226 = arith.addf %217, %213 : vector<1x512xf32>
    %227 = arith.addf %226, %225 : vector<1x512xf32>
    %cst_67 = arith.constant 0.36787945 : f32
    %228 = vector.broadcast %cst_67 : f32 to vector<1x512xf32>
    %229 = arith.mulf %228, %227 : vector<1x512xf32>
    %230 = vector.extract_strided_slice %5 {offsets = [15, 0], sizes = [1, 512], strides = [1, 1]} : vector<16x512xf32> to vector<1x512xf32>
    %cst_68 = arith.constant -54.3656349 : f32
    %231 = vector.broadcast %cst_68 : f32 to vector<1x512xf32>
    %232 = arith.mulf %231, %229 : vector<1x512xf32>
    %233 = arith.addf %230, %232 : vector<1x512xf32>
    %cst_69 = arith.constant 1.000000e+01 : f32
    %234 = vector.broadcast %cst_69 : f32 to vector<1x512xf32>
    %235 = arith.cmpf oge, %233, %234 : vector<1x512xf32>
    %236 = arith.extui %235 : vector<1x512xi1> to vector<1x512xi32>
    %237 = arith.sitofp %236 : vector<1x512xi32> to vector<1x512xf32>
    %238 = tpu.concatenate %15, %30, %45, %60, %75, %90, %105, %120, %135, %150, %165, %180, %195, %210, %225, %237 in 0 : vector<1x512xf32>, vector<1x512xf32>, vector<1x512xf32>, vector<1x512xf32>, vector<1x512xf32>, vector<1x512xf32>, vector<1x512xf32>, vector<1x512xf32>, vector<1x512xf32>, vector<1x512xf32>, vector<1x512xf32>, vector<1x512xf32>, vector<1x512xf32>, vector<1x512xf32>, vector<1x512xf32>, vector<1x512xf32> -> vector<16x512xf32>
    %239 = arith.truncf %238 : vector<16x512xf32> to vector<16x512xbf16>
    %c0_70 = arith.constant 0 : index
    %c0_71 = arith.constant 0 : index
    %240 = vector.load %arg3[%c0_70, %c0_71] : memref<512x128xbf16, #tpu.memory_space<vmem>>, vector<512x128xbf16>
    %cst_72 = arith.constant dense<0.000000e+00> : vector<16x128xf32>
    %241 = tpu.matmul %239, %240, %cst_72 {dimension_numbers = #tpu.dot_dimension_numbers<[1], [0], [0], [1], [0, 0, 1, 1], [], []>} : vector<16x512xbf16>, vector<512x128xbf16>, vector<16x128xf32> -> vector<16x128xf32>
    %c0_73 = arith.constant 0 : index
    %c0_74 = arith.constant 0 : index
    %242 = vector.load %arg4[%c0_73, %c0_74] : memref<16x16xf32, #tpu.memory_space<vmem>>, vector<16x16xf32>
    %cst_75 = arith.constant dense<0.000000e+00> : vector<16x128xf32>
    %243 = tpu.matmul %242, %241, %cst_75 {dimension_numbers = #tpu.dot_dimension_numbers<[1], [0], [0], [1], [0, 0, 1, 1], [], []>} : vector<16x16xf32>, vector<16x128xf32>, vector<16x128xf32> -> vector<16x128xf32>
    %cst_76 = arith.constant 0.000000e+00 : f32
    %244 = vector.broadcast %cst_76 : f32 to vector<1x128xf32>
    %cst_77 = arith.constant 0.000000e+00 : f32
    %245 = vector.broadcast %cst_77 : f32 to vector<1x128xf32>
    %246 = vector.extract_strided_slice %243 {offsets = [0, 0], sizes = [1, 128], strides = [1, 1]} : vector<16x128xf32> to vector<1x128xf32>
    %cst_78 = arith.constant -54.3656349 : f32
    %247 = vector.broadcast %cst_78 : f32 to vector<1x128xf32>
    %248 = arith.mulf %247, %245 : vector<1x128xf32>
    %249 = arith.addf %246, %248 : vector<1x128xf32>
    %cst_79 = arith.constant 1.000000e+01 : f32
    %250 = vector.broadcast %cst_79 : f32 to vector<1x128xf32>
    %251 = arith.cmpf oge, %249, %250 : vector<1x128xf32>
    %252 = arith.extui %251 : vector<1x128xi1> to vector<1x128xi32>
    %253 = arith.sitofp %252 : vector<1x128xi32> to vector<1x128xf32>
    %254 = arith.addf %244, %253 : vector<1x128xf32>
    %cst_80 = arith.constant 0.36787945 : f32
    %255 = vector.broadcast %cst_80 : f32 to vector<1x128xf32>
    %256 = arith.mulf %255, %254 : vector<1x128xf32>
    %257 = arith.addf %245, %244 : vector<1x128xf32>
    %258 = arith.addf %257, %253 : vector<1x128xf32>
    %cst_81 = arith.constant 0.36787945 : f32
    %259 = vector.broadcast %cst_81 : f32 to vector<1x128xf32>
    %260 = arith.mulf %259, %258 : vector<1x128xf32>
    %261 = vector.extract_strided_slice %243 {offsets = [1, 0], sizes = [1, 128], strides = [1, 1]} : vector<16x128xf32> to vector<1x128xf32>
    %cst_82 = arith.constant -54.3656349 : f32
    %262 = vector.broadcast %cst_82 : f32 to vector<1x128xf32>
    %263 = arith.mulf %262, %260 : vector<1x128xf32>
    %264 = arith.addf %261, %263 : vector<1x128xf32>
    %cst_83 = arith.constant 1.000000e+01 : f32
    %265 = vector.broadcast %cst_83 : f32 to vector<1x128xf32>
    %266 = arith.cmpf oge, %264, %265 : vector<1x128xf32>
    %267 = arith.extui %266 : vector<1x128xi1> to vector<1x128xi32>
    %268 = arith.sitofp %267 : vector<1x128xi32> to vector<1x128xf32>
    %269 = arith.addf %256, %268 : vector<1x128xf32>
    %cst_84 = arith.constant 0.36787945 : f32
    %270 = vector.broadcast %cst_84 : f32 to vector<1x128xf32>
    %271 = arith.mulf %270, %269 : vector<1x128xf32>
    %272 = arith.addf %260, %256 : vector<1x128xf32>
    %273 = arith.addf %272, %268 : vector<1x128xf32>
    %cst_85 = arith.constant 0.36787945 : f32
    %274 = vector.broadcast %cst_85 : f32 to vector<1x128xf32>
    %275 = arith.mulf %274, %273 : vector<1x128xf32>
    %276 = vector.extract_strided_slice %243 {offsets = [2, 0], sizes = [1, 128], strides = [1, 1]} : vector<16x128xf32> to vector<1x128xf32>
    %cst_86 = arith.constant -54.3656349 : f32
    %277 = vector.broadcast %cst_86 : f32 to vector<1x128xf32>
    %278 = arith.mulf %277, %275 : vector<1x128xf32>
    %279 = arith.addf %276, %278 : vector<1x128xf32>
    %cst_87 = arith.constant 1.000000e+01 : f32
    %280 = vector.broadcast %cst_87 : f32 to vector<1x128xf32>
    %281 = arith.cmpf oge, %279, %280 : vector<1x128xf32>
    %282 = arith.extui %281 : vector<1x128xi1> to vector<1x128xi32>
    %283 = arith.sitofp %282 : vector<1x128xi32> to vector<1x128xf32>
    %284 = arith.addf %271, %283 : vector<1x128xf32>
    %cst_88 = arith.constant 0.36787945 : f32
    %285 = vector.broadcast %cst_88 : f32 to vector<1x128xf32>
    %286 = arith.mulf %285, %284 : vector<1x128xf32>
    %287 = arith.addf %275, %271 : vector<1x128xf32>
    %288 = arith.addf %287, %283 : vector<1x128xf32>
    %cst_89 = arith.constant 0.36787945 : f32
    %289 = vector.broadcast %cst_89 : f32 to vector<1x128xf32>
    %290 = arith.mulf %289, %288 : vector<1x128xf32>
    %291 = vector.extract_strided_slice %243 {offsets = [3, 0], sizes = [1, 128], strides = [1, 1]} : vector<16x128xf32> to vector<1x128xf32>
    %cst_90 = arith.constant -54.3656349 : f32
    %292 = vector.broadcast %cst_90 : f32 to vector<1x128xf32>
    %293 = arith.mulf %292, %290 : vector<1x128xf32>
    %294 = arith.addf %291, %293 : vector<1x128xf32>
    %cst_91 = arith.constant 1.000000e+01 : f32
    %295 = vector.broadcast %cst_91 : f32 to vector<1x128xf32>
    %296 = arith.cmpf oge, %294, %295 : vector<1x128xf32>
    %297 = arith.extui %296 : vector<1x128xi1> to vector<1x128xi32>
    %298 = arith.sitofp %297 : vector<1x128xi32> to vector<1x128xf32>
    %299 = arith.addf %286, %298 : vector<1x128xf32>
    %cst_92 = arith.constant 0.36787945 : f32
    %300 = vector.broadcast %cst_92 : f32 to vector<1x128xf32>
    %301 = arith.mulf %300, %299 : vector<1x128xf32>
    %302 = arith.addf %290, %286 : vector<1x128xf32>
    %303 = arith.addf %302, %298 : vector<1x128xf32>
    %cst_93 = arith.constant 0.36787945 : f32
    %304 = vector.broadcast %cst_93 : f32 to vector<1x128xf32>
    %305 = arith.mulf %304, %303 : vector<1x128xf32>
    %306 = vector.extract_strided_slice %243 {offsets = [4, 0], sizes = [1, 128], strides = [1, 1]} : vector<16x128xf32> to vector<1x128xf32>
    %cst_94 = arith.constant -54.3656349 : f32
    %307 = vector.broadcast %cst_94 : f32 to vector<1x128xf32>
    %308 = arith.mulf %307, %305 : vector<1x128xf32>
    %309 = arith.addf %306, %308 : vector<1x128xf32>
    %cst_95 = arith.constant 1.000000e+01 : f32
    %310 = vector.broadcast %cst_95 : f32 to vector<1x128xf32>
    %311 = arith.cmpf oge, %309, %310 : vector<1x128xf32>
    %312 = arith.extui %311 : vector<1x128xi1> to vector<1x128xi32>
    %313 = arith.sitofp %312 : vector<1x128xi32> to vector<1x128xf32>
    %314 = arith.addf %301, %313 : vector<1x128xf32>
    %cst_96 = arith.constant 0.36787945 : f32
    %315 = vector.broadcast %cst_96 : f32 to vector<1x128xf32>
    %316 = arith.mulf %315, %314 : vector<1x128xf32>
    %317 = arith.addf %305, %301 : vector<1x128xf32>
    %318 = arith.addf %317, %313 : vector<1x128xf32>
    %cst_97 = arith.constant 0.36787945 : f32
    %319 = vector.broadcast %cst_97 : f32 to vector<1x128xf32>
    %320 = arith.mulf %319, %318 : vector<1x128xf32>
    %321 = vector.extract_strided_slice %243 {offsets = [5, 0], sizes = [1, 128], strides = [1, 1]} : vector<16x128xf32> to vector<1x128xf32>
    %cst_98 = arith.constant -54.3656349 : f32
    %322 = vector.broadcast %cst_98 : f32 to vector<1x128xf32>
    %323 = arith.mulf %322, %320 : vector<1x128xf32>
    %324 = arith.addf %321, %323 : vector<1x128xf32>
    %cst_99 = arith.constant 1.000000e+01 : f32
    %325 = vector.broadcast %cst_99 : f32 to vector<1x128xf32>
    %326 = arith.cmpf oge, %324, %325 : vector<1x128xf32>
    %327 = arith.extui %326 : vector<1x128xi1> to vector<1x128xi32>
    %328 = arith.sitofp %327 : vector<1x128xi32> to vector<1x128xf32>
    %329 = arith.addf %316, %328 : vector<1x128xf32>
    %cst_100 = arith.constant 0.36787945 : f32
    %330 = vector.broadcast %cst_100 : f32 to vector<1x128xf32>
    %331 = arith.mulf %330, %329 : vector<1x128xf32>
    %332 = arith.addf %320, %316 : vector<1x128xf32>
    %333 = arith.addf %332, %328 : vector<1x128xf32>
    %cst_101 = arith.constant 0.36787945 : f32
    %334 = vector.broadcast %cst_101 : f32 to vector<1x128xf32>
    %335 = arith.mulf %334, %333 : vector<1x128xf32>
    %336 = vector.extract_strided_slice %243 {offsets = [6, 0], sizes = [1, 128], strides = [1, 1]} : vector<16x128xf32> to vector<1x128xf32>
    %cst_102 = arith.constant -54.3656349 : f32
    %337 = vector.broadcast %cst_102 : f32 to vector<1x128xf32>
    %338 = arith.mulf %337, %335 : vector<1x128xf32>
    %339 = arith.addf %336, %338 : vector<1x128xf32>
    %cst_103 = arith.constant 1.000000e+01 : f32
    %340 = vector.broadcast %cst_103 : f32 to vector<1x128xf32>
    %341 = arith.cmpf oge, %339, %340 : vector<1x128xf32>
    %342 = arith.extui %341 : vector<1x128xi1> to vector<1x128xi32>
    %343 = arith.sitofp %342 : vector<1x128xi32> to vector<1x128xf32>
    %344 = arith.addf %331, %343 : vector<1x128xf32>
    %cst_104 = arith.constant 0.36787945 : f32
    %345 = vector.broadcast %cst_104 : f32 to vector<1x128xf32>
    %346 = arith.mulf %345, %344 : vector<1x128xf32>
    %347 = arith.addf %335, %331 : vector<1x128xf32>
    %348 = arith.addf %347, %343 : vector<1x128xf32>
    %cst_105 = arith.constant 0.36787945 : f32
    %349 = vector.broadcast %cst_105 : f32 to vector<1x128xf32>
    %350 = arith.mulf %349, %348 : vector<1x128xf32>
    %351 = vector.extract_strided_slice %243 {offsets = [7, 0], sizes = [1, 128], strides = [1, 1]} : vector<16x128xf32> to vector<1x128xf32>
    %cst_106 = arith.constant -54.3656349 : f32
    %352 = vector.broadcast %cst_106 : f32 to vector<1x128xf32>
    %353 = arith.mulf %352, %350 : vector<1x128xf32>
    %354 = arith.addf %351, %353 : vector<1x128xf32>
    %cst_107 = arith.constant 1.000000e+01 : f32
    %355 = vector.broadcast %cst_107 : f32 to vector<1x128xf32>
    %356 = arith.cmpf oge, %354, %355 : vector<1x128xf32>
    %357 = arith.extui %356 : vector<1x128xi1> to vector<1x128xi32>
    %358 = arith.sitofp %357 : vector<1x128xi32> to vector<1x128xf32>
    %359 = arith.addf %346, %358 : vector<1x128xf32>
    %cst_108 = arith.constant 0.36787945 : f32
    %360 = vector.broadcast %cst_108 : f32 to vector<1x128xf32>
    %361 = arith.mulf %360, %359 : vector<1x128xf32>
    %362 = arith.addf %350, %346 : vector<1x128xf32>
    %363 = arith.addf %362, %358 : vector<1x128xf32>
    %cst_109 = arith.constant 0.36787945 : f32
    %364 = vector.broadcast %cst_109 : f32 to vector<1x128xf32>
    %365 = arith.mulf %364, %363 : vector<1x128xf32>
    %366 = vector.extract_strided_slice %243 {offsets = [8, 0], sizes = [1, 128], strides = [1, 1]} : vector<16x128xf32> to vector<1x128xf32>
    %cst_110 = arith.constant -54.3656349 : f32
    %367 = vector.broadcast %cst_110 : f32 to vector<1x128xf32>
    %368 = arith.mulf %367, %365 : vector<1x128xf32>
    %369 = arith.addf %366, %368 : vector<1x128xf32>
    %cst_111 = arith.constant 1.000000e+01 : f32
    %370 = vector.broadcast %cst_111 : f32 to vector<1x128xf32>
    %371 = arith.cmpf oge, %369, %370 : vector<1x128xf32>
    %372 = arith.extui %371 : vector<1x128xi1> to vector<1x128xi32>
    %373 = arith.sitofp %372 : vector<1x128xi32> to vector<1x128xf32>
    %374 = arith.addf %361, %373 : vector<1x128xf32>
    %cst_112 = arith.constant 0.36787945 : f32
    %375 = vector.broadcast %cst_112 : f32 to vector<1x128xf32>
    %376 = arith.mulf %375, %374 : vector<1x128xf32>
    %377 = arith.addf %365, %361 : vector<1x128xf32>
    %378 = arith.addf %377, %373 : vector<1x128xf32>
    %cst_113 = arith.constant 0.36787945 : f32
    %379 = vector.broadcast %cst_113 : f32 to vector<1x128xf32>
    %380 = arith.mulf %379, %378 : vector<1x128xf32>
    %381 = vector.extract_strided_slice %243 {offsets = [9, 0], sizes = [1, 128], strides = [1, 1]} : vector<16x128xf32> to vector<1x128xf32>
    %cst_114 = arith.constant -54.3656349 : f32
    %382 = vector.broadcast %cst_114 : f32 to vector<1x128xf32>
    %383 = arith.mulf %382, %380 : vector<1x128xf32>
    %384 = arith.addf %381, %383 : vector<1x128xf32>
    %cst_115 = arith.constant 1.000000e+01 : f32
    %385 = vector.broadcast %cst_115 : f32 to vector<1x128xf32>
    %386 = arith.cmpf oge, %384, %385 : vector<1x128xf32>
    %387 = arith.extui %386 : vector<1x128xi1> to vector<1x128xi32>
    %388 = arith.sitofp %387 : vector<1x128xi32> to vector<1x128xf32>
    %389 = arith.addf %376, %388 : vector<1x128xf32>
    %cst_116 = arith.constant 0.36787945 : f32
    %390 = vector.broadcast %cst_116 : f32 to vector<1x128xf32>
    %391 = arith.mulf %390, %389 : vector<1x128xf32>
    %392 = arith.addf %380, %376 : vector<1x128xf32>
    %393 = arith.addf %392, %388 : vector<1x128xf32>
    %cst_117 = arith.constant 0.36787945 : f32
    %394 = vector.broadcast %cst_117 : f32 to vector<1x128xf32>
    %395 = arith.mulf %394, %393 : vector<1x128xf32>
    %396 = vector.extract_strided_slice %243 {offsets = [10, 0], sizes = [1, 128], strides = [1, 1]} : vector<16x128xf32> to vector<1x128xf32>
    %cst_118 = arith.constant -54.3656349 : f32
    %397 = vector.broadcast %cst_118 : f32 to vector<1x128xf32>
    %398 = arith.mulf %397, %395 : vector<1x128xf32>
    %399 = arith.addf %396, %398 : vector<1x128xf32>
    %cst_119 = arith.constant 1.000000e+01 : f32
    %400 = vector.broadcast %cst_119 : f32 to vector<1x128xf32>
    %401 = arith.cmpf oge, %399, %400 : vector<1x128xf32>
    %402 = arith.extui %401 : vector<1x128xi1> to vector<1x128xi32>
    %403 = arith.sitofp %402 : vector<1x128xi32> to vector<1x128xf32>
    %404 = arith.addf %391, %403 : vector<1x128xf32>
    %cst_120 = arith.constant 0.36787945 : f32
    %405 = vector.broadcast %cst_120 : f32 to vector<1x128xf32>
    %406 = arith.mulf %405, %404 : vector<1x128xf32>
    %407 = arith.addf %395, %391 : vector<1x128xf32>
    %408 = arith.addf %407, %403 : vector<1x128xf32>
    %cst_121 = arith.constant 0.36787945 : f32
    %409 = vector.broadcast %cst_121 : f32 to vector<1x128xf32>
    %410 = arith.mulf %409, %408 : vector<1x128xf32>
    %411 = vector.extract_strided_slice %243 {offsets = [11, 0], sizes = [1, 128], strides = [1, 1]} : vector<16x128xf32> to vector<1x128xf32>
    %cst_122 = arith.constant -54.3656349 : f32
    %412 = vector.broadcast %cst_122 : f32 to vector<1x128xf32>
    %413 = arith.mulf %412, %410 : vector<1x128xf32>
    %414 = arith.addf %411, %413 : vector<1x128xf32>
    %cst_123 = arith.constant 1.000000e+01 : f32
    %415 = vector.broadcast %cst_123 : f32 to vector<1x128xf32>
    %416 = arith.cmpf oge, %414, %415 : vector<1x128xf32>
    %417 = arith.extui %416 : vector<1x128xi1> to vector<1x128xi32>
    %418 = arith.sitofp %417 : vector<1x128xi32> to vector<1x128xf32>
    %419 = arith.addf %406, %418 : vector<1x128xf32>
    %cst_124 = arith.constant 0.36787945 : f32
    %420 = vector.broadcast %cst_124 : f32 to vector<1x128xf32>
    %421 = arith.mulf %420, %419 : vector<1x128xf32>
    %422 = arith.addf %410, %406 : vector<1x128xf32>
    %423 = arith.addf %422, %418 : vector<1x128xf32>
    %cst_125 = arith.constant 0.36787945 : f32
    %424 = vector.broadcast %cst_125 : f32 to vector<1x128xf32>
    %425 = arith.mulf %424, %423 : vector<1x128xf32>
    %426 = vector.extract_strided_slice %243 {offsets = [12, 0], sizes = [1, 128], strides = [1, 1]} : vector<16x128xf32> to vector<1x128xf32>
    %cst_126 = arith.constant -54.3656349 : f32
    %427 = vector.broadcast %cst_126 : f32 to vector<1x128xf32>
    %428 = arith.mulf %427, %425 : vector<1x128xf32>
    %429 = arith.addf %426, %428 : vector<1x128xf32>
    %cst_127 = arith.constant 1.000000e+01 : f32
    %430 = vector.broadcast %cst_127 : f32 to vector<1x128xf32>
    %431 = arith.cmpf oge, %429, %430 : vector<1x128xf32>
    %432 = arith.extui %431 : vector<1x128xi1> to vector<1x128xi32>
    %433 = arith.sitofp %432 : vector<1x128xi32> to vector<1x128xf32>
    %434 = arith.addf %421, %433 : vector<1x128xf32>
    %cst_128 = arith.constant 0.36787945 : f32
    %435 = vector.broadcast %cst_128 : f32 to vector<1x128xf32>
    %436 = arith.mulf %435, %434 : vector<1x128xf32>
    %437 = arith.addf %425, %421 : vector<1x128xf32>
    %438 = arith.addf %437, %433 : vector<1x128xf32>
    %cst_129 = arith.constant 0.36787945 : f32
    %439 = vector.broadcast %cst_129 : f32 to vector<1x128xf32>
    %440 = arith.mulf %439, %438 : vector<1x128xf32>
    %441 = vector.extract_strided_slice %243 {offsets = [13, 0], sizes = [1, 128], strides = [1, 1]} : vector<16x128xf32> to vector<1x128xf32>
    %cst_130 = arith.constant -54.3656349 : f32
    %442 = vector.broadcast %cst_130 : f32 to vector<1x128xf32>
    %443 = arith.mulf %442, %440 : vector<1x128xf32>
    %444 = arith.addf %441, %443 : vector<1x128xf32>
    %cst_131 = arith.constant 1.000000e+01 : f32
    %445 = vector.broadcast %cst_131 : f32 to vector<1x128xf32>
    %446 = arith.cmpf oge, %444, %445 : vector<1x128xf32>
    %447 = arith.extui %446 : vector<1x128xi1> to vector<1x128xi32>
    %448 = arith.sitofp %447 : vector<1x128xi32> to vector<1x128xf32>
    %449 = arith.addf %436, %448 : vector<1x128xf32>
    %cst_132 = arith.constant 0.36787945 : f32
    %450 = vector.broadcast %cst_132 : f32 to vector<1x128xf32>
    %451 = arith.mulf %450, %449 : vector<1x128xf32>
    %452 = arith.addf %440, %436 : vector<1x128xf32>
    %453 = arith.addf %452, %448 : vector<1x128xf32>
    %cst_133 = arith.constant 0.36787945 : f32
    %454 = vector.broadcast %cst_133 : f32 to vector<1x128xf32>
    %455 = arith.mulf %454, %453 : vector<1x128xf32>
    %456 = vector.extract_strided_slice %243 {offsets = [14, 0], sizes = [1, 128], strides = [1, 1]} : vector<16x128xf32> to vector<1x128xf32>
    %cst_134 = arith.constant -54.3656349 : f32
    %457 = vector.broadcast %cst_134 : f32 to vector<1x128xf32>
    %458 = arith.mulf %457, %455 : vector<1x128xf32>
    %459 = arith.addf %456, %458 : vector<1x128xf32>
    %cst_135 = arith.constant 1.000000e+01 : f32
    %460 = vector.broadcast %cst_135 : f32 to vector<1x128xf32>
    %461 = arith.cmpf oge, %459, %460 : vector<1x128xf32>
    %462 = arith.extui %461 : vector<1x128xi1> to vector<1x128xi32>
    %463 = arith.sitofp %462 : vector<1x128xi32> to vector<1x128xf32>
    %464 = arith.addf %455, %451 : vector<1x128xf32>
    %465 = arith.addf %464, %463 : vector<1x128xf32>
    %cst_136 = arith.constant 0.36787945 : f32
    %466 = vector.broadcast %cst_136 : f32 to vector<1x128xf32>
    %467 = arith.mulf %466, %465 : vector<1x128xf32>
    %468 = vector.extract_strided_slice %243 {offsets = [15, 0], sizes = [1, 128], strides = [1, 1]} : vector<16x128xf32> to vector<1x128xf32>
    %cst_137 = arith.constant -54.3656349 : f32
    %469 = vector.broadcast %cst_137 : f32 to vector<1x128xf32>
    %470 = arith.mulf %469, %467 : vector<1x128xf32>
    %471 = arith.addf %468, %470 : vector<1x128xf32>
    %cst_138 = arith.constant 1.000000e+01 : f32
    %472 = vector.broadcast %cst_138 : f32 to vector<1x128xf32>
    %473 = arith.cmpf oge, %471, %472 : vector<1x128xf32>
    %474 = arith.extui %473 : vector<1x128xi1> to vector<1x128xi32>
    %475 = arith.sitofp %474 : vector<1x128xi32> to vector<1x128xf32>
    %476 = tpu.concatenate %253, %268, %283, %298, %313, %328, %343, %358, %373, %388, %403, %418, %433, %448, %463, %475 in 0 : vector<1x128xf32>, vector<1x128xf32>, vector<1x128xf32>, vector<1x128xf32>, vector<1x128xf32>, vector<1x128xf32>, vector<1x128xf32>, vector<1x128xf32>, vector<1x128xf32>, vector<1x128xf32>, vector<1x128xf32>, vector<1x128xf32>, vector<1x128xf32>, vector<1x128xf32>, vector<1x128xf32>, vector<1x128xf32> -> vector<16x128xf32>
    %cst_139 = arith.constant 1.000000e+00 : f32
    %477 = vector.broadcast %cst_139 : f32 to vector<16x128xf32>
    %478 = arith.mulf %476, %477 : vector<16x128xf32>
    %c0_140 = arith.constant 0 : index
    %c0_141 = arith.constant 0 : index
    %c0_142 = arith.constant 0 : index
    %479 = vector.load %arg5[%c0_140, %c0_141, %c0_142] : memref<1x16x128xf32, #tpu.memory_space<vmem>>, vector<1x16x128xf32>
    %480 = vector.shape_cast %479 : vector<1x16x128xf32> to vector<16x128xf32>
    %481 = vector.shape_cast %478 : vector<16x128xf32> to vector<1x16x128xf32>
    tpu.vector_store %arg5[%c0_140, %c0_141, %c0_142], %481 {strides = array<i32>} : memref<1x16x128xf32, #tpu.memory_space<vmem>>, vector<1x16x128xf32>,
    return
  }
  func.func @transform_0(%arg0: i32) -> (i32, i32, i32) {
    %c0_i32 = arith.constant 0 : i32
    %c0_i32_0 = arith.constant 0 : i32
    %c0_i32_1 = arith.constant 0 : i32
    return %arg0, %c0_i32, %c0_i32_0 : i32, i32, i32
  }
  func.func @transform_1(%arg0: i32) -> (i32, i32) {
    %c0_i32 = arith.constant 0 : i32
    %c0_i32_0 = arith.constant 0 : i32
    %c0_i32_1 = arith.constant 0 : i32
    return %c0_i32, %c0_i32_0 : i32, i32
  }
  func.func @transform_2(%arg0: i32) -> (i32, i32) {
    %c0_i32 = arith.constant 0 : i32
    %c0_i32_0 = arith.constant 0 : i32
    %c0_i32_1 = arith.constant 0 : i32
    return %c0_i32, %c0_i32_0 : i32, i32
  }
  func.func @transform_3(%arg0: i32) -> (i32, i32) {
    %c0_i32 = arith.constant 0 : i32
    %c0_i32_0 = arith.constant 0 : i32
    %c0_i32_1 = arith.constant 0 : i32
    return %c0_i32, %c0_i32_0 : i32, i32
  }
  func.func @transform_4(%arg0: i32) -> (i32, i32, i32) {
    %c0_i32 = arith.constant 0 : i32
    %c0_i32_0 = arith.constant 0 : i32
    %c0_i32_1 = arith.constant 0 : i32
    return %arg0, %c0_i32, %c0_i32_0 : i32, i32, i32
  }
}

</mosaic_0001>

<bundles_post_ra>
// kernel: yqt_net_forward.1
= control target key start
LH: loop header
LB: loop body
LE: loop exit
PB: predicated region body
PF: predicated region fallthrough
CT: control target
= control target key end

     0   :  { %s10189_s15 = smov 0   ;;  %s14753_s0 = inlined_call_operand.vmem [shape: bf16[2,16,2432], index: 0, kind: input, shape index: {}]   ;;  %s14754_s1 = inlined_call_operand.vmem [shape: bf16[2432,512], index: 1, kind: input, shape index: {}]   ;;  %s14755_s2 = inlined_call_operand.vmem [shape: bf16[512,128], index: 2, kind: input, shape index: {}]   ;;  %s14756_s3 = inlined_call_operand.vmem [shape: f32[16,16], index: 3, kind: input, shape index: {}]   ;;  %s14757_s4 = inlined_call_operand.vmem [shape: f32[2,16,128], index: 4, kind: output, shape index: {}]  }
   0x1 LB: > { %s6745_s16 = sadd.s32 4294967295, %s10161_s15   ;;  %p6749_p0 = scmp.ge.s32.totalorder %s10161_s15, 1  ;;  %s10161_s15 = sphi %s10189_s15, %s14_s15  }
   0x2   : > { %p162_p1 = scmp.lt.s32.totalorder %s10161_s15, 3 }
   0x4   : > { %p163_p2 = pnand %p6749_p0, %p162_p1 }
   0x6   : > { %166 = sbr.rel (%p163_p2) target bundleno = 1589 (0x635), region = 36 }
   0xb   : > { %v6943_v0 = vld [vmem:[%s14754_s1 + $0xe0] sm:$0xf]  ;;  %v9531_v1 = vld [vmem:[%s14754_s1 + $0xec] sm:$0xf0]  ;;  %p188_p3 = scmp.lt.s32.totalorder %s6745_s16, 1  ;;  %vm5028_vm0 = vcmask 130048  }
   0xc   : > { %v7071_v2 = vld [vmem:[%s14754_s1 + $0x1e0] sm:$0xf]  ;;  %v6944_v3 = vor.u32 %v9531_v1, %v6943_v0  ;;  %v9563_v4 = vld [vmem:[%s14754_s1 + $0x1ec] sm:$0xf0]  ;;  %vm6043_vm9 = vcmask 1040384   ;;  %vm6048_vm10 = vcmask 1041408  }
   0xd   : > { %v7199_v5 = vld [vmem:[%s14754_s1 + $0x2e0] sm:$0xf]  ;;  %v9595_v6 = vld [vmem:[%s14754_s1 + $0x2ec] sm:$0xf0]  ;;  %v7072_v7 = vor.u32 %v9563_v4, %v7071_v2  ;;  %s14801_s16 = smov (!%p188_p3, %s6745_s16), 1 }
   0xe   : > { %v7200_v8 = vor.u32 %v9595_v6, %v7199_v5  ;;  %v7327_v9 = vld [vmem:[%s14754_s1 + $0x3e0] sm:$0xf]  ;;  %v9627_v10 = vld [vmem:[%s14754_s1 + $0x3ec] sm:$0xf0]  ;;  %3962 = vmatpush.bf16.msra.mxu0 %v6944_v3  ;;  %s10143_s29 = smul.u32 152, %s14801_s16  ;;  %s9481_s25 = sshll.u32 %s14801_s16, 4 }
   0xf   : > { %v6927_v11 = vld [vmem:[%s14754_s1 + $0xc0] sm:$0xf]  ;;  %v7328_v12 = vor.u32 %v9627_v10, %v7327_v9  ;;  %v9527_v13 = vld [vmem:[%s14754_s1 + $0xcc] sm:$0xf0]  ;;  %3976 = vmatpush.bf16.msra.mxu1 %v7072_v7  ;;  %s14717_s28 = scalar_lea.vmem %s14757_s4, %s9481_s25 }
  0x10   : > { %v7055_v14 = vld [vmem:[%s14754_s1 + $0x1c0] sm:$0xf]  ;;  %v9559_v15 = vld [vmem:[%s14754_s1 + $0x1cc] sm:$0xf0]  ;;  %3990 = vmatpush.bf16.msra.mxu2 %v7200_v8  ;;  %v6928_v16 = vor.u32 %v9527_v13, %v6927_v11  ;;  %s10495_s20 = scalar_lea.vmem %s14753_s0, %s10143_s29 }
  0x11   : > { %v7056_v17 = vor.u32 %v9559_v15, %v7055_v14  ;;  %v7183_v18 = vld [vmem:[%s14754_s1 + $0x2c0] sm:$0xf]  ;;  %v9591_v19 = vld [vmem:[%s14754_s1 + $0x2cc] sm:$0xf0]  ;;  %4004 = vmatpush.bf16.msra.mxu3 %v7328_v12 }
  0x12   : > { %v7311_v20 = vld [vmem:[%s14754_s1 + $0x3c0] sm:$0xf]  ;;  %v7184_v21 = vor.u32 %v9591_v19, %v7183_v18  ;;  %v9623_v22 = vld [vmem:[%s14754_s1 + $0x3cc] sm:$0xf0]  ;;  %3963 = vmatpush.bf16.msra.mxu0 %v6928_v16 }
  0x13   : > { %v6911_v23 = vld [vmem:[%s14754_s1 + $0xa0] sm:$0xf]  ;;  %v9523_v24 = vld [vmem:[%s14754_s1 + $0xac] sm:$0xf0]  ;;  %v7312_v25 = vor.u32 %v9623_v22, %v7311_v20  ;;  %3977 = vmatpush.bf16.msra.mxu1 %v7056_v17 }
  0x14   : > { %v7039_v26 = vld [vmem:[%s14754_s1 + $0x1a0] sm:$0xf]  ;;  %v9555_v27 = vld [vmem:[%s14754_s1 + $0x1ac] sm:$0xf0]  ;;  %v6912_v29 = vor.u32 %v9523_v24, %v6911_v23  ;;  %3991 = vmatpush.bf16.msra.mxu2 %v7184_v21 }
  0x15   : > { %v7167_v28 = vld [vmem:[%s14754_s1 + $0x2a0] sm:$0xf]  ;;  %v9587_v30 = vld [vmem:[%s14754_s1 + $0x2ac] sm:$0xf0]  ;;  %v7040_v33 = vor.u32 %v9555_v27, %v7039_v26  ;;  %4005 = vmatpush.bf16.msra.mxu3 %v7312_v25 }
  0x16   : > { %v7295_v31 = vld [vmem:[%s14754_s1 + $0x3a0] sm:$0xf]  ;;  %v9619_v32 = vld [vmem:[%s14754_s1 + $0x3ac] sm:$0xf0]  ;;  %v7168_v34 = vor.u32 %v9587_v30, %v7167_v28  ;;  %3964 = vmatpush.bf16.msra.mxu0 %v6912_v29 }
  0x17   : > { %v6895_v35 = vld [vmem:[%s14754_s1 + $0x80] sm:$0xf]  ;;  %v9519_v36 = vld [vmem:[%s14754_s1 + $0x8c] sm:$0xf0]  ;;  %v7296_v38 = vor.u32 %v9619_v32, %v7295_v31  ;;  %3978 = vmatpush.bf16.msra.mxu1 %v7040_v33 }
  0x18   : > { %v7023_v37 = vld [vmem:[%s14754_s1 + $0x180] sm:$0xf]  ;;  %v9551_v39 = vld [vmem:[%s14754_s1 + $0x18c] sm:$0xf0]  ;;  %v6896_v44 = vor.u32 %v9519_v36, %v6895_v35  ;;  %3992 = vmatpush.bf16.msra.mxu2 %v7168_v34 }
  0x19   : > { %v7151_v40 = vld [vmem:[%s14754_s1 + $0x280] sm:$0xf]  ;;  %v9583_v41 = vld [vmem:[%s14754_s1 + $0x28c] sm:$0xf0]  ;;  %v7024_v45 = vor.u32 %v9551_v39, %v7023_v37  ;;  %4006 = vmatpush.bf16.msra.mxu3 %v7296_v38 }
  0x1a   : > { %v7279_v42 = vld [vmem:[%s14754_s1 + $0x380] sm:$0xf]  ;;  %v9615_v43 = vld [vmem:[%s14754_s1 + $0x38c] sm:$0xf0]  ;;  %v7152_v46 = vor.u32 %v9583_v41, %v7151_v40  ;;  %3965 = vmatpush.bf16.msra.mxu0 %v6896_v44 }
  0x1b   : > { %v6879_v47 = vld [vmem:[%s14754_s1 + $0x60] sm:$0xf]  ;;  %v9515_v48 = vld [vmem:[%s14754_s1 + $0x6c] sm:$0xf0]  ;;  %v7280_v50 = vor.u32 %v9615_v43, %v7279_v42  ;;  %3979 = vmatpush.bf16.msra.mxu1 %v7024_v45 }
  0x1c   : > { %v7007_v49 = vld [vmem:[%s14754_s1 + $0x160] sm:$0xf]  ;;  %v9547_v51 = vld [vmem:[%s14754_s1 + $0x16c] sm:$0xf0]  ;;  %v6880_v56 = vor.u32 %v9515_v48, %v6879_v47  ;;  %3993 = vmatpush.bf16.msra.mxu2 %v7152_v46 }
  0x1d   : > { %v7135_v52 = vld [vmem:[%s14754_s1 + $0x260] sm:$0xf]  ;;  %v9579_v53 = vld [vmem:[%s14754_s1 + $0x26c] sm:$0xf0]  ;;  %v7008_v57 = vor.u32 %v9547_v51, %v7007_v49  ;;  %4007 = vmatpush.bf16.msra.mxu3 %v7280_v50 }
  0x1e   : > { %v7263_v54 = vld [vmem:[%s14754_s1 + $0x360] sm:$0xf]  ;;  %v9611_v55 = vld [vmem:[%s14754_s1 + $0x36c] sm:$0xf0]  ;;  %v7136_v58 = vor.u32 %v9579_v53, %v7135_v52  ;;  %3966 = vmatpush.bf16.msra.mxu0 %v6880_v56 }
  0x1f   : > { %v6863_v59 = vld [vmem:[%s14754_s1 + $0x40] sm:$0xf]  ;;  %v9511_v60 = vld [vmem:[%s14754_s1 + $0x4c] sm:$0xf0]  ;;  %v7264_v62 = vor.u32 %v9611_v55, %v7263_v54  ;;  %3980 = vmatpush.bf16.msra.mxu1 %v7008_v57 }
  0x20   : > { %v6991_v61 = vld [vmem:[%s14754_s1 + $0x140] sm:$0xf]  ;;  %v9543_v63 = vld [vmem:[%s14754_s1 + $0x14c] sm:$0xf0]  ;;  %v6864_v4 = vor.u32 %v9511_v60, %v6863_v59  ;;  %3994 = vmatpush.bf16.msra.mxu2 %v7136_v58 }
  0x21   : > { %v7119_v0 = vld [vmem:[%s14754_s1 + $0x240] sm:$0xf]  ;;  %v9575_v1 = vld [vmem:[%s14754_s1 + $0x24c] sm:$0xf0]  ;;  %v6992_v5 = vor.u32 %v9543_v63, %v6991_v61  ;;  %4008 = vmatpush.bf16.msra.mxu3 %v7264_v62 }
  0x22   : > { %v7247_v2 = vld [vmem:[%s14754_s1 + $0x340] sm:$0xf]  ;;  %v9607_v3 = vld [vmem:[%s14754_s1 + $0x34c] sm:$0xf0]  ;;  %v7120_v6 = vor.u32 %v9575_v1, %v7119_v0  ;;  %3967 = vmatpush.bf16.msra.mxu0 %v6864_v4 }
  0x23   : > { %v6847_v7 = vld [vmem:[%s14754_s1 + $0x20] sm:$0xf]  ;;  %v9507_v8 = vld [vmem:[%s14754_s1 + $0x2c] sm:$0xf0]  ;;  %v7248_v10 = vor.u32 %v9607_v3, %v7247_v2  ;;  %3981 = vmatpush.bf16.msra.mxu1 %v6992_v5 }
  0x24   : > { %v6975_v9 = vld [vmem:[%s14754_s1 + $0x120] sm:$0xf]  ;;  %v9539_v11 = vld [vmem:[%s14754_s1 + $0x12c] sm:$0xf0]  ;;  %v6848_v16 = vor.u32 %v9507_v8, %v6847_v7  ;;  %3995 = vmatpush.bf16.msra.mxu2 %v7120_v6 }
  0x25   : > { %v7103_v12 = vld [vmem:[%s14754_s1 + $0x220] sm:$0xf]  ;;  %v9571_v13 = vld [vmem:[%s14754_s1 + $0x22c] sm:$0xf0]  ;;  %v6976_v19 = vor.u32 %v9539_v11, %v6975_v9  ;;  %4009 = vmatpush.bf16.msra.mxu3 %v7248_v10 }
  0x26   : > { %v7231_v14 = vld [vmem:[%s14754_s1 + $0x320] sm:$0xf]  ;;  %v9603_v15 = vld [vmem:[%s14754_s1 + $0x32c] sm:$0xf0]  ;;  %v7104_v20 = vor.u32 %v9571_v13, %v7103_v12  ;;  %3968 = vmatpush.bf16.msra.mxu0 %v6848_v16  ;;  %v9491_v13 = vld [vmem:[%s10495_s20 + $0x48] sm:$0xf0] }
  0x27   : > { %v6831_v17 = vld [vmem:[%s14754_s1] sm:$0xf]  ;;  %v9503_v18 = vld [vmem:[%s14754_s1 + $0xc] sm:$0xf0]  ;;  %v7232_v24 = vor.u32 %v9603_v15, %v7231_v14  ;;  %3982 = vmatpush.bf16.msra.mxu1 %v6976_v19  ;;  %v6763_v14 = vld [vmem:[%s10495_s20 + $0x8] sm:$0xf] }
  0x28   : > { %v6959_v21 = vld [vmem:[%s14754_s1 + $0x100] sm:$0xf]  ;;  %v9535_v22 = vld [vmem:[%s14754_s1 + $0x10c] sm:$0xf0]  ;;  %v6832_v31 = vor.u32 %v9503_v18, %v6831_v17  ;;  %3996 = vmatpush.bf16.msra.mxu2 %v7104_v20  ;;  %v9492_v16 = vld [vmem:[%s10495_s20 + $0x50] sm:$0xf0] }
  0x29   : > { %v7087_v23 = vld [vmem:[%s14754_s1 + $0x200] sm:$0xf]  ;;  %v9567_v25 = vld [vmem:[%s14754_s1 + $0x20c] sm:$0xf0]  ;;  %v6960_v35 = vor.u32 %v9535_v22, %v6959_v21  ;;  %4010 = vmatpush.bf16.msra.mxu3 %v7232_v24  ;;  %v9482_v17 = vld [vmem:[%s10495_s20 + $0x4] sm:$0xf]  ;;  %v10505_v20 = vor.u32 %v9492_v16, %v6763_v14 }
  0x2a   : > { %v7215_v26 = vld [vmem:[%s14754_s1 + $0x300] sm:$0xf]  ;;  %v9599_v27 = vld [vmem:[%s14754_s1 + $0x30c] sm:$0xf0]  ;;  %v7088_v36 = vor.u32 %v9567_v25, %v7087_v23  ;;  %3969 = vmatpush.bf16.msra.mxu0 %v6832_v31  ;;  %v9483_v22 = vld [vmem:[%s10495_s20 + $0xc] sm:$0xf] }
  0x2b   : > { %v7455_v28 = vld [vmem:[%s14754_s1 + $0x4e0] sm:$0xf]  ;;  %v9659_v29 = vld [vmem:[%s14754_s1 + $0x4ec] sm:$0xf0]  ;;  %v7216_v39 = vor.u32 %v9599_v27, %v7215_v26  ;;  %3983 = vmatpush.bf16.msra.mxu1 %v6960_v35  ;;  %v6765_v23 = vld [vmem:[%s10495_s20 + $0x54] sm:$0xf0] }
  0x2c   : > { %v7583_v30 = vld [vmem:[%s14754_s1 + $0x5e0] sm:$0xf]  ;;  %v9691_v32 = vld [vmem:[%s14754_s1 + $0x5ec] sm:$0xf0]  ;;  %v7456_v40 = vor.u32 %v9659_v29, %v7455_v28  ;;  %3997 = vmatpush.bf16.msra.mxu2 %v7088_v36  ;;  %v10520_v29 = vor.u32 %v9483_v22, %v6765_v23 }
  0x2d   : > { %v7711_v33 = vld [vmem:[%s14754_s1 + $0x6e0] sm:$0xf]  ;;  %v9723_v34 = vld [vmem:[%s14754_s1 + $0x6ec] sm:$0xf0]  ;;  %v7584_v41 = vor.u32 %v9691_v32, %v7583_v30  ;;  %4011 = vmatpush.bf16.msra.mxu3 %v7216_v39 }
  0x2e   : > { %v7839_v37 = vld [vmem:[%s14754_s1 + $0x7e0] sm:$0xf]  ;;  %v9755_v38 = vld [vmem:[%s14754_s1 + $0x7ec] sm:$0xf0]  ;;  %v7712_v42 = vor.u32 %v9723_v34, %v7711_v33  ;;  %4018 = vmatpush.bf16.msrb.mxu0 %v7456_v40 }
  0x2f   : > { %v7439_v43 = vld [vmem:[%s14754_s1 + $0x4c0] sm:$0xf]  ;;  %v9655_v44 = vld [vmem:[%s14754_s1 + $0x4cc] sm:$0xf0]  ;;  %v7840_v46 = vor.u32 %v9755_v38, %v7839_v37  ;;  %4032 = vmatpush.bf16.msrb.mxu1 %v7584_v41  ;;  %3998 = vmatmul.bf16.vlgmr.msra.gmra.mxu2 %v10505_v20 }
  0x30   : > { %v7567_v45 = vld [vmem:[%s14754_s1 + $0x5c0] sm:$0xf]  ;;  %v9687_v47 = vld [vmem:[%s14754_s1 + $0x5cc] sm:$0xf0]  ;;  %v7440_v52 = vor.u32 %v9655_v44, %v7439_v43  ;;  %4046 = vmatpush.bf16.msrb.mxu2 %v7712_v42  ;;  %4012 = vmatmul.bf16.vlgmr.msra.gmra.mxu3 %v10520_v29 }
  0x31   : > { %v7695_v48 = vld [vmem:[%s14754_s1 + $0x6c0] sm:$0xf]  ;;  %v9719_v49 = vld [vmem:[%s14754_s1 + $0x6cc] sm:$0xf0]  ;;  %v7568_v56 = vor.u32 %v9687_v47, %v7567_v45  ;;  %4060 = vmatpush.bf16.msrb.mxu3 %v7840_v46 }
  0x32   : > { %v7823_v50 = vld [vmem:[%s14754_s1 + $0x7c0] sm:$0xf]  ;;  %v9751_v51 = vld [vmem:[%s14754_s1 + $0x7cc] sm:$0xf0]  ;;  %v7696_v57 = vor.u32 %v9719_v49, %v7695_v48  ;;  %4019 = vmatpush.bf16.msrb.mxu0 %v7440_v52 }
  0x33   : > { %v7423_v53 = vld [vmem:[%s14754_s1 + $0x4a0] sm:$0xf]  ;;  %v9651_v54 = vld [vmem:[%s14754_s1 + $0x4ac] sm:$0xf0]  ;;  %v7824_v60 = vor.u32 %v9751_v51, %v7823_v50  ;;  %4033 = vmatpush.bf16.msrb.mxu1 %v7568_v56 }
  0x34   : > { %v7551_v55 = vld [vmem:[%s14754_s1 + $0x5a0] sm:$0xf]  ;;  %v9683_v58 = vld [vmem:[%s14754_s1 + $0x5ac] sm:$0xf0]  ;;  %v7424_v2 = vor.u32 %v9651_v54, %v7423_v53  ;;  %4047 = vmatpush.bf16.msrb.mxu2 %v7696_v57 }
  0x35   : > { %v7679_v59 = vld [vmem:[%s14754_s1 + $0x6a0] sm:$0xf]  ;;  %v9715_v61 = vld [vmem:[%s14754_s1 + $0x6ac] sm:$0xf0]  ;;  %v7552_v6 = vor.u32 %v9683_v58, %v7551_v55  ;;  %4061 = vmatpush.bf16.msrb.mxu3 %v7824_v60 }
  0x36   : > { %v7807_v62 = vld [vmem:[%s14754_s1 + $0x7a0] sm:$0xf]  ;;  %v9747_v63 = vld [vmem:[%s14754_s1 + $0x7ac] sm:$0xf0]  ;;  %v7680_v7 = vor.u32 %v9715_v61, %v7679_v59  ;;  %4020 = vmatpush.bf16.msrb.mxu0 %v7424_v2 }
  0x37   : > { %v7407_v0 = vld [vmem:[%s14754_s1 + $0x480] sm:$0xf]  ;;  %v9647_v1 = vld [vmem:[%s14754_s1 + $0x48c] sm:$0xf0]  ;;  %v7808_v11 = vor.u32 %v9747_v63, %v7807_v62  ;;  %4034 = vmatpush.bf16.msrb.mxu1 %v7552_v6 }
  0x38   : > { %v7535_v3 = vld [vmem:[%s14754_s1 + $0x580] sm:$0xf]  ;;  %v9679_v4 = vld [vmem:[%s14754_s1 + $0x58c] sm:$0xf0]  ;;  %v7408_v19 = vor.u32 %v9647_v1, %v7407_v0  ;;  %4048 = vmatpush.bf16.msrb.mxu2 %v7680_v7 }
  0x39   : > { %v7663_v5 = vld [vmem:[%s14754_s1 + $0x680] sm:$0xf]  ;;  %v9711_v8 = vld [vmem:[%s14754_s1 + $0x68c] sm:$0xf0]  ;;  %v7536_v24 = vor.u32 %v9679_v4, %v7535_v3  ;;  %4062 = vmatpush.bf16.msrb.mxu3 %v7808_v11 }
  0x3a   : > { %v7791_v9 = vld [vmem:[%s14754_s1 + $0x780] sm:$0xf]  ;;  %v9743_v10 = vld [vmem:[%s14754_s1 + $0x78c] sm:$0xf0]  ;;  %v7664_v25 = vor.u32 %v9711_v8, %v7663_v5  ;;  %4021 = vmatpush.bf16.msrb.mxu0 %v7408_v19  ;;  %v9493_v19 = vld [vmem:[%s10495_s20 + $0x58] sm:$0xf0] }
  0x3b   : > { %v6755_v12 = vld [vmem:[%s10495_s20] sm:$0xf]  ;;  %v6757_v18 = vld [vmem:[%s10495_s20 + $0x4c] sm:$0xf0]  ;;  %v7792_v30 = vor.u32 %v9743_v10, %v7791_v9  ;;  %4035 = vmatpush.bf16.msrb.mxu1 %v7536_v24  ;;  %v6779_v24 = vld [vmem:[%s10495_s20 + $0x18] sm:$0xf] }
  0x3c   : > { %v10500_v15 = vor.u32 %v9491_v13, %v6755_v12  ;;  %v10507_v21 = vor.u32 %v9482_v17, %v6757_v18  ;;  %v7391_v26 = vld [vmem:[%s14754_s1 + $0x460] sm:$0xf]  ;;  %v9643_v27 = vld [vmem:[%s14754_s1 + $0x46c] sm:$0xf0]  ;;  %4049 = vmatpush.bf16.msrb.mxu2 %v7664_v25  ;;  %v9494_v25 = vld [vmem:[%s10495_s20 + $0x60] sm:$0xf0] }
  0x3d   : > { %v7519_v28 = vld [vmem:[%s14754_s1 + $0x560] sm:$0xf]  ;;  %v9675_v31 = vld [vmem:[%s14754_s1 + $0x56c] sm:$0xf0]  ;;  %v7392_v36 = vor.u32 %v9643_v27, %v7391_v26  ;;  %4063 = vmatpush.bf16.msrb.mxu3 %v7792_v30  ;;  %v9484_v26 = vld [vmem:[%s10495_s20 + $0x14] sm:$0xf] }
  0x3e   : > { %3970 = vmatmul.bf16.vlgmr.msra.gmra.mxu0 %v10500_v15  ;;  %v7647_v32 = vld [vmem:[%s14754_s1 + $0x660] sm:$0xf]  ;;  %v9707_v33 = vld [vmem:[%s14754_s1 + $0x66c] sm:$0xf0]  ;;  %3984 = vmatmul.bf16.vlgmr.msra.gmra.mxu1 %v10507_v21  ;;  %v7520_v37 = vor.u32 %v9675_v31, %v7519_v28  ;;  %v9485_v31 = vld [vmem:[%s10495_s20 + $0x1c] sm:$0xf] }
  0x3f   : > { %v7775_v34 = vld [vmem:[%s14754_s1 + $0x760] sm:$0xf]  ;;  %v9739_v35 = vld [vmem:[%s14754_s1 + $0x76c] sm:$0xf0]  ;;  %v7648_v38 = vor.u32 %v9707_v33, %v7647_v32  ;;  %4022 = vmatpush.bf16.msrb.mxu0 %v7392_v36  ;;  %v6781_v32 = vld [vmem:[%s10495_s20 + $0x64] sm:$0xf0] }
  0x40   : > { %v7375_v39 = vld [vmem:[%s14754_s1 + $0x440] sm:$0xf]  ;;  %v9639_v40 = vld [vmem:[%s14754_s1 + $0x44c] sm:$0xf0]  ;;  %v7776_v42 = vor.u32 %v9739_v35, %v7775_v34  ;;  %4036 = vmatpush.bf16.msrb.mxu1 %v7520_v37 }
  0x41   : > { %v7503_v41 = vld [vmem:[%s14754_s1 + $0x540] sm:$0xf]  ;;  %v9671_v43 = vld [vmem:[%s14754_s1 + $0x54c] sm:$0xf0]  ;;  %v7376_v48 = vor.u32 %v9639_v40, %v7375_v39  ;;  %4050 = vmatpush.bf16.msrb.mxu2 %v7648_v38 }
  0x42   : > { %v7631_v44 = vld [vmem:[%s14754_s1 + $0x640] sm:$0xf]  ;;  %v9703_v45 = vld [vmem:[%s14754_s1 + $0x64c] sm:$0xf0]  ;;  %v7504_v50 = vor.u32 %v9671_v43, %v7503_v41  ;;  %4064 = vmatpush.bf16.msrb.mxu3 %v7776_v42  ;;  %v10665_v43 = vor.u32 %v9494_v25, %v6779_v24 }
  0x43   : > { %v7759_v46 = vld [vmem:[%s14754_s1 + $0x740] sm:$0xf]  ;;  %v9735_v47 = vld [vmem:[%s14754_s1 + $0x74c] sm:$0xf0]  ;;  %v7632_v51 = vor.u32 %v9703_v45, %v7631_v44  ;;  %4023 = vmatpush.bf16.msrb.mxu0 %v7376_v48 }
  0x44   : > { %v7359_v49 = vld [vmem:[%s14754_s1 + $0x420] sm:$0xf]  ;;  %v9635_v52 = vld [vmem:[%s14754_s1 + $0x42c] sm:$0xf0]  ;;  %v7760_v55 = vor.u32 %v9735_v47, %v7759_v46  ;;  %4037 = vmatpush.bf16.msrb.mxu1 %v7504_v50  ;;  %v10675_v47 = vor.u32 %v9485_v31, %v6781_v32 }
  0x45   : > { %v7487_v53 = vld [vmem:[%s14754_s1 + $0x520] sm:$0xf]  ;;  %v9667_v54 = vld [vmem:[%s14754_s1 + $0x52c] sm:$0xf0]  ;;  %v7360_v62 = vor.u32 %v9635_v52, %v7359_v49  ;;  %4051 = vmatpush.bf16.msrb.mxu2 %v7632_v51 }
  0x46   : > { %v7615_v56 = vld [vmem:[%s14754_s1 + $0x620] sm:$0xf]  ;;  %v9699_v57 = vld [vmem:[%s14754_s1 + $0x62c] sm:$0xf0]  ;;  %v7488_v3 = vor.u32 %v9667_v54, %v7487_v53  ;;  %4065 = vmatpush.bf16.msrb.mxu3 %v7760_v55 }
  0x47   : > { %v7743_v58 = vld [vmem:[%s14754_s1 + $0x720] sm:$0xf]  ;;  %v9731_v59 = vld [vmem:[%s14754_s1 + $0x72c] sm:$0xf0]  ;;  %v7616_v4 = vor.u32 %v9699_v57, %v7615_v56  ;;  %4024 = vmatpush.bf16.msrb.mxu0 %v7360_v62 }
  0x48   : > { %v7343_v60 = vld [vmem:[%s14754_s1 + $0x400] sm:$0xf]  ;;  %v9631_v61 = vld [vmem:[%s14754_s1 + $0x40c] sm:$0xf0]  ;;  %v7744_v8 = vor.u32 %v9731_v59, %v7743_v58  ;;  %4038 = vmatpush.bf16.msrb.mxu1 %v7488_v3 }
  0x49   : > { %v7471_v63 = vld [vmem:[%s14754_s1 + $0x500] sm:$0xf]  ;;  %v9663_v0 = vld [vmem:[%s14754_s1 + $0x50c] sm:$0xf0]  ;;  %v7344_v16 = vor.u32 %v9631_v61, %v7343_v60  ;;  %4052 = vmatpush.bf16.msrb.mxu2 %v7616_v4 }
  0x4a   : > { %v7599_v1 = vld [vmem:[%s14754_s1 + $0x600] sm:$0xf]  ;;  %v9695_v2 = vld [vmem:[%s14754_s1 + $0x60c] sm:$0xf0]  ;;  %v7472_v22 = vor.u32 %v9663_v0, %v7471_v63  ;;  %4066 = vmatpush.bf16.msrb.mxu3 %v7744_v8 }
  0x4b   : > { %v7727_v5 = vld [vmem:[%s14754_s1 + $0x700] sm:$0xf]  ;;  %v9727_v6 = vld [vmem:[%s14754_s1 + $0x70c] sm:$0xf0]  ;;  %v7600_v23 = vor.u32 %v9695_v2, %v7599_v1  ;;  %4025 = vmatpush.bf16.msrb.mxu0 %v7344_v16 }
  0x4c   : > { %v7967_v7 = vld [vmem:[%s14754_s1 + $0x8e0] sm:$0xf]  ;;  %v9787_v9 = vld [vmem:[%s14754_s1 + $0x8ec] sm:$0xf0]  ;;  %v7728_v27 = vor.u32 %v9727_v6, %v7727_v5  ;;  %4039 = vmatpush.bf16.msrb.mxu1 %v7472_v22 }
  0x4d   : > { %v8095_v10 = vld [vmem:[%s14754_s1 + $0x9e0] sm:$0xf]  ;;  %v9819_v11 = vld [vmem:[%s14754_s1 + $0x9ec] sm:$0xf0]  ;;  %v7968_v28 = vor.u32 %v9787_v9, %v7967_v7  ;;  %4053 = vmatpush.bf16.msrb.mxu2 %v7600_v23 }
  0x4e   : > { %v8223_v12 = vld [vmem:[%s14754_s1 + $0xae0] sm:$0xf]  ;;  %v9851_v13 = vld [vmem:[%s14754_s1 + $0xaec] sm:$0xf0]  ;;  %v8096_v33 = vor.u32 %v9819_v11, %v8095_v10  ;;  %4067 = vmatpush.bf16.msrb.mxu3 %v7728_v27 }
  0x4f   : > { %v8351_v14 = vld [vmem:[%s14754_s1 + $0xbe0] sm:$0xf]  ;;  %v9883_v17 = vld [vmem:[%s14754_s1 + $0xbec] sm:$0xf0]  ;;  %v8224_v34 = vor.u32 %v9851_v13, %v8223_v12  ;;  %4074 = vmatpush.bf16.msra.mxu0 %v7968_v28 }
  0x50   : > { %v6771_v18 = vld [vmem:[%s10495_s20 + $0x10] sm:$0xf]  ;;  %v6773_v30 = vld [vmem:[%s10495_s20 + $0x5c] sm:$0xf0]  ;;  %v8352_v38 = vor.u32 %v9883_v17, %v8351_v14  ;;  %4088 = vmatpush.bf16.msra.mxu1 %v8096_v33  ;;  %4054 = vmatmul.bf16.vlgmr.msrb.gmra.mxu2 %v10665_v43 }
  0x51   : > { %v7951_v35 = vld [vmem:[%s14754_s1 + $0x8c0] sm:$0xf]  ;;  %v9783_v36 = vld [vmem:[%s14754_s1 + $0x8cc] sm:$0xf0]  ;;  %v10654_v39 = vor.u32 %v9493_v19, %v6771_v18  ;;  %v10667_v44 = vor.u32 %v9484_v26, %v6773_v30  ;;  %4102 = vmatpush.bf16.msra.mxu2 %v8224_v34  ;;  %4068 = vmatmul.bf16.vlgmr.msrb.gmra.mxu3 %v10675_v47 }
  0x52   : > { %v8079_v37 = vld [vmem:[%s14754_s1 + $0x9c0] sm:$0xf]  ;;  %v9815_v40 = vld [vmem:[%s14754_s1 + $0x9cc] sm:$0xf0]  ;;  %v7952_v48 = vor.u32 %v9783_v36, %v7951_v35  ;;  %4116 = vmatpush.bf16.msra.mxu3 %v8352_v38 }
  0x53   : > { %v8207_v41 = vld [vmem:[%s14754_s1 + $0xac0] sm:$0xf]  ;;  %v9847_v42 = vld [vmem:[%s14754_s1 + $0xacc] sm:$0xf0]  ;;  %v8080_v49 = vor.u32 %v9815_v40, %v8079_v37  ;;  %4026 = vmatmul.bf16.vlgmr.msrb.gmra.mxu0 %v10654_v39  ;;  %4040 = vmatmul.bf16.vlgmr.msrb.gmra.mxu1 %v10667_v44 }
  0x54   : > { %v8335_v45 = vld [vmem:[%s14754_s1 + $0xbc0] sm:$0xf]  ;;  %v9879_v46 = vld [vmem:[%s14754_s1 + $0xbcc] sm:$0xf0]  ;;  %v8208_v50 = vor.u32 %v9847_v42, %v8207_v41  ;;  %4075 = vmatpush.bf16.msra.mxu0 %v7952_v48 }
  0x55   : > { %v7935_v51 = vld [vmem:[%s14754_s1 + $0x8a0] sm:$0xf]  ;;  %v9779_v52 = vld [vmem:[%s14754_s1 + $0x8ac] sm:$0xf0]  ;;  %v8336_v54 = vor.u32 %v9879_v46, %v8335_v45  ;;  %4089 = vmatpush.bf16.msra.mxu1 %v8080_v49 }
  0x56   : > { %v8063_v53 = vld [vmem:[%s14754_s1 + $0x9a0] sm:$0xf]  ;;  %v9811_v55 = vld [vmem:[%s14754_s1 + $0x9ac] sm:$0xf0]  ;;  %v7936_v60 = vor.u32 %v9779_v52, %v7935_v51  ;;  %4103 = vmatpush.bf16.msra.mxu2 %v8208_v50 }
  0x57   : > { %v8191_v56 = vld [vmem:[%s14754_s1 + $0xaa0] sm:$0xf]  ;;  %v9843_v57 = vld [vmem:[%s14754_s1 + $0xaac] sm:$0xf0]  ;;  %v8064_v61 = vor.u32 %v9811_v55, %v8063_v53  ;;  %4117 = vmatpush.bf16.msra.mxu3 %v8336_v54 }
  0x58   : > { %v8319_v58 = vld [vmem:[%s14754_s1 + $0xba0] sm:$0xf]  ;;  %v9875_v59 = vld [vmem:[%s14754_s1 + $0xbac] sm:$0xf0]  ;;  %v8192_v62 = vor.u32 %v9843_v57, %v8191_v56  ;;  %4076 = vmatpush.bf16.msra.mxu0 %v7936_v60 }
  0x59   : > { %v7919_v63 = vld [vmem:[%s14754_s1 + $0x880] sm:$0xf]  ;;  %v9775_v0 = vld [vmem:[%s14754_s1 + $0x88c] sm:$0xf0]  ;;  %v8320_v2 = vor.u32 %v9875_v59, %v8319_v58  ;;  %4090 = vmatpush.bf16.msra.mxu1 %v8064_v61 }
  0x5a   : > { %v8047_v1 = vld [vmem:[%s14754_s1 + $0x980] sm:$0xf]  ;;  %v9807_v3 = vld [vmem:[%s14754_s1 + $0x98c] sm:$0xf0]  ;;  %v7920_v8 = vor.u32 %v9775_v0, %v7919_v63  ;;  %4104 = vmatpush.bf16.msra.mxu2 %v8192_v62 }
  0x5b   : > { %v8175_v4 = vld [vmem:[%s14754_s1 + $0xa80] sm:$0xf]  ;;  %v9839_v5 = vld [vmem:[%s14754_s1 + $0xa8c] sm:$0xf0]  ;;  %v8048_v9 = vor.u32 %v9807_v3, %v8047_v1  ;;  %4118 = vmatpush.bf16.msra.mxu3 %v8320_v2 }
  0x5c   : > { %v8303_v6 = vld [vmem:[%s14754_s1 + $0xb80] sm:$0xf]  ;;  %v9871_v7 = vld [vmem:[%s14754_s1 + $0xb8c] sm:$0xf0]  ;;  %v8176_v10 = vor.u32 %v9839_v5, %v8175_v4  ;;  %4077 = vmatpush.bf16.msra.mxu0 %v7920_v8 }
  0x5d   : > { %v7903_v11 = vld [vmem:[%s14754_s1 + $0x860] sm:$0xf]  ;;  %v9771_v12 = vld [vmem:[%s14754_s1 + $0x86c] sm:$0xf0]  ;;  %v8304_v14 = vor.u32 %v9871_v7, %v8303_v6  ;;  %4091 = vmatpush.bf16.msra.mxu1 %v8048_v9 }
  0x5e   : > { %v8031_v13 = vld [vmem:[%s14754_s1 + $0x960] sm:$0xf]  ;;  %v9803_v16 = vld [vmem:[%s14754_s1 + $0x96c] sm:$0xf0]  ;;  %v7904_v23 = vor.u32 %v9771_v12, %v7903_v11  ;;  %4105 = vmatpush.bf16.msra.mxu2 %v8176_v10  ;;  %v9495_v10 = vld [vmem:[%s10495_s20 + $0x68] sm:$0xf0] }
  0x5f   : > { %v8159_v17 = vld [vmem:[%s14754_s1 + $0xa60] sm:$0xf]  ;;  %v9835_v18 = vld [vmem:[%s14754_s1 + $0xa6c] sm:$0xf0]  ;;  %v8032_v24 = vor.u32 %v9803_v16, %v8031_v13  ;;  %4119 = vmatpush.bf16.msra.mxu3 %v8304_v14  ;;  %v6795_v13 = vld [vmem:[%s10495_s20 + $0x28] sm:$0xf] }
  0x60   : > { %v8287_v19 = vld [vmem:[%s14754_s1 + $0xb60] sm:$0xf]  ;;  %v9867_v22 = vld [vmem:[%s14754_s1 + $0xb6c] sm:$0xf0]  ;;  %v8160_v25 = vor.u32 %v9835_v18, %v8159_v17  ;;  %4078 = vmatpush.bf16.msra.mxu0 %v7904_v23  ;;  %v9496_v14 = vld [vmem:[%s10495_s20 + $0x70] sm:$0xf0] }
  0x61   : > { %v7887_v26 = vld [vmem:[%s14754_s1 + $0x840] sm:$0xf]  ;;  %v9767_v27 = vld [vmem:[%s14754_s1 + $0x84c] sm:$0xf0]  ;;  %v8288_v30 = vor.u32 %v9867_v22, %v8287_v19  ;;  %4092 = vmatpush.bf16.msra.mxu1 %v8032_v24  ;;  %v9486_v16 = vld [vmem:[%s10495_s20 + $0x24] sm:$0xf] }
  0x62   : > { %v8015_v28 = vld [vmem:[%s14754_s1 + $0x940] sm:$0xf]  ;;  %v9799_v31 = vld [vmem:[%s14754_s1 + $0x94c] sm:$0xf0]  ;;  %v7888_v36 = vor.u32 %v9767_v27, %v7887_v26  ;;  %4106 = vmatpush.bf16.msra.mxu2 %v8160_v25  ;;  %v9487_v22 = vld [vmem:[%s10495_s20 + $0x2c] sm:$0xf] }
  0x63   : > { %v8143_v32 = vld [vmem:[%s14754_s1 + $0xa40] sm:$0xf]  ;;  %v9831_v33 = vld [vmem:[%s14754_s1 + $0xa4c] sm:$0xf0]  ;;  %v8016_v38 = vor.u32 %v9799_v31, %v8015_v28  ;;  %4120 = vmatpush.bf16.msra.mxu3 %v8288_v30  ;;  %v6797_v23 = vld [vmem:[%s10495_s20 + $0x74] sm:$0xf0] }
  0x64   : > { %v8271_v34 = vld [vmem:[%s14754_s1 + $0xb40] sm:$0xf]  ;;  %v9863_v35 = vld [vmem:[%s14754_s1 + $0xb4c] sm:$0xf0]  ;;  %v8144_v40 = vor.u32 %v9831_v33, %v8143_v32  ;;  %4079 = vmatpush.bf16.msra.mxu0 %v7888_v36 }
  0x65   : > { %v7871_v37 = vld [vmem:[%s14754_s1 + $0x820] sm:$0xf]  ;;  %v9763_v41 = vld [vmem:[%s14754_s1 + $0x82c] sm:$0xf0]  ;;  %v8272_v46 = vor.u32 %v9863_v35, %v8271_v34  ;;  %4093 = vmatpush.bf16.msra.mxu1 %v8016_v38  ;;  %v10877_v35 = vor.u32 %v9496_v14, %v6795_v13 }
  0x66   : > { %v7999_v42 = vld [vmem:[%s14754_s1 + $0x920] sm:$0xf]  ;;  %v9795_v45 = vld [vmem:[%s14754_s1 + $0x92c] sm:$0xf0]  ;;  %v7872_v54 = vor.u32 %v9763_v41, %v7871_v37  ;;  %4107 = vmatpush.bf16.msra.mxu2 %v8144_v40  ;;  %v10887_v40 = vor.u32 %v9487_v22, %v6797_v23 }
  0x67   : > { %v8127_v48 = vld [vmem:[%s14754_s1 + $0xa20] sm:$0xf]  ;;  %v9827_v49 = vld [vmem:[%s14754_s1 + $0xa2c] sm:$0xf0]  ;;  %v8000_v59 = vor.u32 %v9795_v45, %v7999_v42  ;;  %4121 = vmatpush.bf16.msra.mxu3 %v8272_v46 }
  0x68   : > { %v8255_v50 = vld [vmem:[%s14754_s1 + $0xb20] sm:$0xf]  ;;  %v9859_v51 = vld [vmem:[%s14754_s1 + $0xb2c] sm:$0xf0]  ;;  %v8128_v60 = vor.u32 %v9827_v49, %v8127_v48  ;;  %4080 = vmatpush.bf16.msra.mxu0 %v7872_v54 }
  0x69   : > { %v7855_v52 = vld [vmem:[%s14754_s1 + $0x800] sm:$0xf]  ;;  %v9759_v53 = vld [vmem:[%s14754_s1 + $0x80c] sm:$0xf0]  ;;  %v8256_v0 = vor.u32 %v9859_v51, %v8255_v50  ;;  %4094 = vmatpush.bf16.msra.mxu1 %v8000_v59 }
  0x6a   : > { %v7983_v55 = vld [vmem:[%s14754_s1 + $0x900] sm:$0xf]  ;;  %v9791_v56 = vld [vmem:[%s14754_s1 + $0x90c] sm:$0xf0]  ;;  %v7856_v7 = vor.u32 %v9759_v53, %v7855_v52  ;;  %4108 = vmatpush.bf16.msra.mxu2 %v8128_v60 }
  0x6b   : > { %v8111_v57 = vld [vmem:[%s14754_s1 + $0xa00] sm:$0xf]  ;;  %v9823_v58 = vld [vmem:[%s14754_s1 + $0xa0c] sm:$0xf0]  ;;  %v7984_v11 = vor.u32 %v9791_v56, %v7983_v55  ;;  %4122 = vmatpush.bf16.msra.mxu3 %v8256_v0 }
  0x6c   : > { %v8239_v61 = vld [vmem:[%s14754_s1 + $0xb00] sm:$0xf]  ;;  %v9855_v62 = vld [vmem:[%s14754_s1 + $0xb0c] sm:$0xf0]  ;;  %v8112_v12 = vor.u32 %v9823_v58, %v8111_v57  ;;  %4081 = vmatpush.bf16.msra.mxu0 %v7856_v7 }
  0x6d   : > { %v8479_v63 = vld [vmem:[%s14754_s1 + $0xce0] sm:$0xf]  ;;  %v9915_v1 = vld [vmem:[%s14754_s1 + $0xcec] sm:$0xf0]  ;;  %v8240_v17 = vor.u32 %v9855_v62, %v8239_v61  ;;  %4095 = vmatpush.bf16.msra.mxu1 %v7984_v11 }
  0x6e   : > { %v8607_v2 = vld [vmem:[%s14754_s1 + $0xde0] sm:$0xf]  ;;  %v9947_v3 = vld [vmem:[%s14754_s1 + $0xdec] sm:$0xf0]  ;;  %v8480_v18 = vor.u32 %v9915_v1, %v8479_v63  ;;  %4109 = vmatpush.bf16.msra.mxu2 %v8112_v12 }
  0x6f   : > { %v8735_v4 = vld [vmem:[%s14754_s1 + $0xee0] sm:$0xf]  ;;  %v9979_v5 = vld [vmem:[%s14754_s1 + $0xeec] sm:$0xf0]  ;;  %v8608_v24 = vor.u32 %v9947_v3, %v8607_v2  ;;  %4123 = vmatpush.bf16.msra.mxu3 %v8240_v17 }
  0x70   : > { %v8863_v6 = vld [vmem:[%s14754_s1 + $0xfe0] sm:$0xf]  ;;  %v10011_v8 = vld [vmem:[%s14754_s1 + $0xfec] sm:$0xf0]  ;;  %v8736_v25 = vor.u32 %v9979_v5, %v8735_v4  ;;  %4130 = vmatpush.bf16.msrb.mxu0 %v8480_v18 }
  0x71   : > { %v6787_v9 = vld [vmem:[%s10495_s20 + $0x20] sm:$0xf]  ;;  %v6789_v19 = vld [vmem:[%s10495_s20 + $0x6c] sm:$0xf0]  ;;  %v8864_v30 = vor.u32 %v10011_v8, %v8863_v6  ;;  %4144 = vmatpush.bf16.msrb.mxu1 %v8608_v24  ;;  %4110 = vmatmul.bf16.vlgmr.msra.gmra.mxu2 %v10877_v35 }
  0x72   : > { %v8463_v26 = vld [vmem:[%s14754_s1 + $0xcc0] sm:$0xf]  ;;  %v9911_v27 = vld [vmem:[%s14754_s1 + $0xccc] sm:$0xf0]  ;;  %v10866_v31 = vor.u32 %v9495_v10, %v6787_v9  ;;  %v10879_v36 = vor.u32 %v9486_v16, %v6789_v19  ;;  %4158 = vmatpush.bf16.msrb.mxu2 %v8736_v25  ;;  %4124 = vmatmul.bf16.vlgmr.msra.gmra.mxu3 %v10887_v40 }
  0x73   : > { %v8591_v28 = vld [vmem:[%s14754_s1 + $0xdc0] sm:$0xf]  ;;  %v9943_v32 = vld [vmem:[%s14754_s1 + $0xdcc] sm:$0xf0]  ;;  %v8464_v41 = vor.u32 %v9911_v27, %v8463_v26  ;;  %4172 = vmatpush.bf16.msrb.mxu3 %v8864_v30 }
  0x74   : > { %v8719_v33 = vld [vmem:[%s14754_s1 + $0xec0] sm:$0xf]  ;;  %v9975_v34 = vld [vmem:[%s14754_s1 + $0xecc] sm:$0xf0]  ;;  %v8592_v42 = vor.u32 %v9943_v32, %v8591_v28  ;;  %4082 = vmatmul.bf16.vlgmr.msra.gmra.mxu0 %v10866_v31  ;;  %4096 = vmatmul.bf16.vlgmr.msra.gmra.mxu1 %v10879_v36 }
  0x75   : > { %v8847_v37 = vld [vmem:[%s14754_s1 + $0xfc0] sm:$0xf]  ;;  %v10007_v38 = vld [vmem:[%s14754_s1 + $0xfcc] sm:$0xf0]  ;;  %v8720_v45 = vor.u32 %v9975_v34, %v8719_v33  ;;  %4131 = vmatpush.bf16.msrb.mxu0 %v8464_v41 }
  0x76   : > { %v8447_v46 = vld [vmem:[%s14754_s1 + $0xca0] sm:$0xf]  ;;  %v9907_v48 = vld [vmem:[%s14754_s1 + $0xcac] sm:$0xf0]  ;;  %v8848_v50 = vor.u32 %v10007_v38, %v8847_v37  ;;  %4145 = vmatpush.bf16.msrb.mxu1 %v8592_v42 }
  0x77   : > { %v8575_v49 = vld [vmem:[%s14754_s1 + $0xda0] sm:$0xf]  ;;  %v9939_v51 = vld [vmem:[%s14754_s1 + $0xdac] sm:$0xf0]  ;;  %v8448_v56 = vor.u32 %v9907_v48, %v8447_v46  ;;  %4159 = vmatpush.bf16.msrb.mxu2 %v8720_v45 }
  0x78   : > { %v8703_v52 = vld [vmem:[%s14754_s1 + $0xea0] sm:$0xf]  ;;  %v9971_v53 = vld [vmem:[%s14754_s1 + $0xeac] sm:$0xf0]  ;;  %v8576_v57 = vor.u32 %v9939_v51, %v8575_v49  ;;  %4173 = vmatpush.bf16.msrb.mxu3 %v8848_v50 }
  0x79   : > { %v8831_v54 = vld [vmem:[%s14754_s1 + $0xfa0] sm:$0xf]  ;;  %v10003_v55 = vld [vmem:[%s14754_s1 + $0xfac] sm:$0xf0]  ;;  %v8704_v58 = vor.u32 %v9971_v53, %v8703_v52  ;;  %4132 = vmatpush.bf16.msrb.mxu0 %v8448_v56 }
  0x7a   : > { %v8431_v59 = vld [vmem:[%s14754_s1 + $0xc80] sm:$0xf]  ;;  %v9903_v60 = vld [vmem:[%s14754_s1 + $0xc8c] sm:$0xf0]  ;;  %v8832_v62 = vor.u32 %v10003_v55, %v8831_v54  ;;  %4146 = vmatpush.bf16.msrb.mxu1 %v8576_v57 }
  0x7b   : > { %v8559_v61 = vld [vmem:[%s14754_s1 + $0xd80] sm:$0xf]  ;;  %v9935_v63 = vld [vmem:[%s14754_s1 + $0xd8c] sm:$0xf0]  ;;  %v8432_v4 = vor.u32 %v9903_v60, %v8431_v59  ;;  %4160 = vmatpush.bf16.msrb.mxu2 %v8704_v58 }
  0x7c   : > { %v8687_v0 = vld [vmem:[%s14754_s1 + $0xe80] sm:$0xf]  ;;  %v9967_v1 = vld [vmem:[%s14754_s1 + $0xe8c] sm:$0xf0]  ;;  %v8560_v5 = vor.u32 %v9935_v63, %v8559_v61  ;;  %4174 = vmatpush.bf16.msrb.mxu3 %v8832_v62 }
  0x7d   : > { %v8815_v2 = vld [vmem:[%s14754_s1 + $0xf80] sm:$0xf]  ;;  %v9999_v3 = vld [vmem:[%s14754_s1 + $0xf8c] sm:$0xf0]  ;;  %v8688_v6 = vor.u32 %v9967_v1, %v8687_v0  ;;  %4133 = vmatpush.bf16.msrb.mxu0 %v8432_v4 }
  0x7e   : > { %v8415_v7 = vld [vmem:[%s14754_s1 + $0xc60] sm:$0xf]  ;;  %v9899_v8 = vld [vmem:[%s14754_s1 + $0xc6c] sm:$0xf0]  ;;  %v8816_v10 = vor.u32 %v9999_v3, %v8815_v2  ;;  %4147 = vmatpush.bf16.msrb.mxu1 %v8560_v5 }
  0x7f   : > { %v8543_v9 = vld [vmem:[%s14754_s1 + $0xd60] sm:$0xf]  ;;  %v9931_v11 = vld [vmem:[%s14754_s1 + $0xd6c] sm:$0xf0]  ;;  %v8416_v17 = vor.u32 %v9899_v8, %v8415_v7  ;;  %4161 = vmatpush.bf16.msrb.mxu2 %v8688_v6  ;;  %v9529_v6 = vld [vmem:[%s14754_s1 + $0xe4] sm:$0xf] }
  0x80   : > { %v8671_v12 = vld [vmem:[%s14754_s1 + $0xe60] sm:$0xf]  ;;  %v9963_v13 = vld [vmem:[%s14754_s1 + $0xe6c] sm:$0xf0]  ;;  %v8544_v18 = vor.u32 %v9931_v11, %v8543_v9  ;;  %4175 = vmatpush.bf16.msrb.mxu3 %v8816_v10  ;;  %v6945_v8 = vld [vmem:[%s14754_s1 + $0xf0] sm:$0xf0] }
  0x81   : > { %v8799_v14 = vld [vmem:[%s14754_s1 + $0xf60] sm:$0xf]  ;;  %v9995_v16 = vld [vmem:[%s14754_s1 + $0xf6c] sm:$0xf0]  ;;  %v8672_v19 = vor.u32 %v9963_v13, %v8671_v12  ;;  %4134 = vmatpush.bf16.msrb.mxu0 %v8416_v17  ;;  %v9497_v10 = vld [vmem:[%s10495_s20 + $0x78] sm:$0xf0] }
  0x82   : > { %v8399_v22 = vld [vmem:[%s14754_s1 + $0xc40] sm:$0xf]  ;;  %v9895_v23 = vld [vmem:[%s14754_s1 + $0xc4c] sm:$0xf0]  ;;  %v8800_v25 = vor.u32 %v9995_v16, %v8799_v14  ;;  %4148 = vmatpush.bf16.msrb.mxu1 %v8544_v18  ;;  %v6811_v13 = vld [vmem:[%s10495_s20 + $0x38] sm:$0xf] }
  0x83   : > { %v8527_v24 = vld [vmem:[%s14754_s1 + $0xd40] sm:$0xf]  ;;  %v9927_v26 = vld [vmem:[%s14754_s1 + $0xd4c] sm:$0xf0]  ;;  %v8400_v33 = vor.u32 %v9895_v23, %v8399_v22  ;;  %4162 = vmatpush.bf16.msrb.mxu2 %v8672_v19  ;;  %v9498_v14 = vld [vmem:[%s10495_s20 + $0x80] sm:$0xf0] }
  0x84   : > { %v8655_v27 = vld [vmem:[%s14754_s1 + $0xe40] sm:$0xf]  ;;  %v9959_v28 = vld [vmem:[%s14754_s1 + $0xe4c] sm:$0xf0]  ;;  %v8528_v37 = vor.u32 %v9927_v26, %v8527_v24  ;;  %4176 = vmatpush.bf16.msrb.mxu3 %v8800_v25  ;;  %v9488_v16 = vld [vmem:[%s10495_s20 + $0x34] sm:$0xf] }
  0x85   : > { %v8783_v30 = vld [vmem:[%s14754_s1 + $0xf40] sm:$0xf]  ;;  %v9991_v32 = vld [vmem:[%s14754_s1 + $0xf4c] sm:$0xf0]  ;;  %v8656_v38 = vor.u32 %v9959_v28, %v8655_v27  ;;  %4135 = vmatpush.bf16.msrb.mxu0 %v8400_v33  ;;  %v9489_v22 = vld [vmem:[%s10495_s20 + $0x3c] sm:$0xf] }
  0x86   : > { %v8383_v34 = vld [vmem:[%s14754_s1 + $0xc20] sm:$0xf]  ;;  %v9891_v41 = vld [vmem:[%s14754_s1 + $0xc2c] sm:$0xf0]  ;;  %v8784_v46 = vor.u32 %v9991_v32, %v8783_v30  ;;  %4149 = vmatpush.bf16.msrb.mxu1 %v8528_v37  ;;  %v6813_v23 = vld [vmem:[%s10495_s20 + $0x84] sm:$0xf0]  ;;  %v6948_v30 = vor.u32 %v9529_v6, %v6945_v8 }
  0x87   : > { %v8511_v42 = vld [vmem:[%s14754_s1 + $0xd20] sm:$0xf]  ;;  %v9923_v45 = vld [vmem:[%s14754_s1 + $0xd2c] sm:$0xf0]  ;;  %v8384_v54 = vor.u32 %v9891_v41, %v8383_v34  ;;  %4163 = vmatpush.bf16.msrb.mxu2 %v8656_v38  ;;  %v11089_v38 = vor.u32 %v9498_v14, %v6811_v13  ;;  %v9517_v6 = vld [vmem:[%s14754_s1 + $0x84] sm:$0xf] }
  0x88   : > { %v8639_v48 = vld [vmem:[%s14754_s1 + $0xe20] sm:$0xf]  ;;  %v9955_v49 = vld [vmem:[%s14754_s1 + $0xe2c] sm:$0xf0]  ;;  %v8512_v59 = vor.u32 %v9923_v45, %v8511_v42  ;;  %4177 = vmatpush.bf16.msrb.mxu3 %v8784_v46  ;;  %v9525_v42 = vld [vmem:[%s14754_s1 + $0xc4] sm:$0xf]  ;;  %v11099_v46 = vor.u32 %v9489_v22, %v6813_v23 }
  0x89   : > { %v8767_v50 = vld [vmem:[%s14754_s1 + $0xf20] sm:$0xf]  ;;  %v9987_v51 = vld [vmem:[%s14754_s1 + $0xf2c] sm:$0xf0]  ;;  %v8640_v60 = vor.u32 %v9955_v49, %v8639_v48  ;;  %4136 = vmatpush.bf16.msrb.mxu0 %v8384_v54  ;;  %v6929_v45 = vld [vmem:[%s14754_s1 + $0xd0] sm:$0xf0] }
  0x8a   : > { %v8367_v52 = vld [vmem:[%s14754_s1 + $0xc00] sm:$0xf]  ;;  %v9887_v53 = vld [vmem:[%s14754_s1 + $0xc0c] sm:$0xf0]  ;;  %v8768_v0 = vor.u32 %v9987_v51, %v8767_v50  ;;  %4150 = vmatpush.bf16.msrb.mxu1 %v8512_v59  ;;  %14762 = vst [vmem:[#allocation2_spill] sm:$0xff] %v11099_v46  ;;  %v6932_v54 = vor.u32 %v9525_v42, %v6929_v45 }
  0x8b   : > { %v8495_v55 = vld [vmem:[%s14754_s1 + $0xd00] sm:$0xf]  ;;  %v9919_v56 = vld [vmem:[%s14754_s1 + $0xd0c] sm:$0xf0]  ;;  %v8368_v7 = vor.u32 %v9887_v53, %v8367_v52  ;;  %4164 = vmatpush.bf16.msrb.mxu2 %v8640_v60  ;;  %v6913_v59 = vld [vmem:[%s14754_s1 + $0xb0] sm:$0xf0] }
  0x8c   : > { %v8623_v57 = vld [vmem:[%s14754_s1 + $0xe00] sm:$0xf]  ;;  %v9951_v58 = vld [vmem:[%s14754_s1 + $0xe0c] sm:$0xf0]  ;;  %v8496_v11 = vor.u32 %v9919_v56, %v8495_v55  ;;  %4178 = vmatpush.bf16.msrb.mxu3 %v8768_v0  ;;  %v6881_v22 = vld [vmem:[%s14754_s1 + $0x70] sm:$0xf0] }
  0x8d   : > { %v8751_v61 = vld [vmem:[%s14754_s1 + $0xf00] sm:$0xf]  ;;  %v9983_v62 = vld [vmem:[%s14754_s1 + $0xf0c] sm:$0xf0]  ;;  %v8624_v12 = vor.u32 %v9951_v58, %v8623_v57  ;;  %4137 = vmatpush.bf16.msrb.mxu0 %v8368_v7  ;;  %v9521_v58 = vld [vmem:[%s14754_s1 + $0xa4] sm:$0xf] }
  0x8e   : > { %v8991_v63 = vld [vmem:[%s14754_s1 + $0x10e0] sm:$0xf]  ;;  %v10043_v1 = vld [vmem:[%s14754_s1 + $0x10ec] sm:$0xf0]  ;;  %v8752_v17 = vor.u32 %v9983_v62, %v8751_v61  ;;  %4151 = vmatpush.bf16.msrb.mxu1 %v8496_v11  ;;  %v6897_v7 = vld [vmem:[%s14754_s1 + $0x90] sm:$0xf0] }
  0x8f   : > { %v9119_v2 = vld [vmem:[%s14754_s1 + $0x11e0] sm:$0xf]  ;;  %v10075_v3 = vld [vmem:[%s14754_s1 + $0x11ec] sm:$0xf0]  ;;  %v8992_v18 = vor.u32 %v10043_v1, %v8991_v63  ;;  %4165 = vmatpush.bf16.msrb.mxu2 %v8624_v12  ;;  %v6900_v14 = vor.u32 %v9517_v6, %v6897_v7  ;;  %v9509_v42 = vld [vmem:[%s14754_s1 + $0x44] sm:$0xf] }
  0x90   : > { %v9247_v4 = vld [vmem:[%s14754_s1 + $0x12e0] sm:$0xf]  ;;  %v10107_v5 = vld [vmem:[%s14754_s1 + $0x12ec] sm:$0xf0]  ;;  %v9120_v24 = vor.u32 %v10075_v3, %v9119_v2  ;;  %4179 = vmatpush.bf16.msrb.mxu3 %v8752_v17  ;;  %v6916_v2 = vor.u32 %v9521_v58, %v6913_v59  ;;  %v6865_v45 = vld [vmem:[%s14754_s1 + $0x50] sm:$0xf0] }
  0x91   : > { %v6803_v9 = vld [vmem:[%s10495_s20 + $0x30] sm:$0xf]  ;;  %v6805_v19 = vld [vmem:[%s10495_s20 + $0x7c] sm:$0xf0]  ;;  %v9248_v25 = vor.u32 %v10107_v5, %v9247_v4  ;;  %4186 = vmatpush.bf16.msra.mxu0 %v8992_v18  ;;  %v9505_v58 = vld [vmem:[%s14754_s1 + $0x24] sm:$0xf] }
  0x92   : > { %v8975_v26 = vld [vmem:[%s14754_s1 + $0x10c0] sm:$0xf]  ;;  %v10039_v27 = vld [vmem:[%s14754_s1 + $0x10cc] sm:$0xf0]  ;;  %v11078_v32 = vor.u32 %v9497_v10, %v6803_v9  ;;  %v11091_v41 = vor.u32 %v9488_v16, %v6805_v19  ;;  %4200 = vmatpush.bf16.msra.mxu1 %v9120_v24  ;;  %4166 = vmatmul.bf16.vlgmr.msrb.gmra.mxu2 %v11089_v38  ;;  %v9513_v19 = vld [vmem:[%s14754_s1 + $0x64] sm:$0xf] }
  0x93   : > { %v9103_v28 = vld [vmem:[%s14754_s1 + $0x11c0] sm:$0xf]  ;;  %v10071_v33 = vld [vmem:[%s14754_s1 + $0x11cc] sm:$0xf0]  ;;  %v8976_v48 = vor.u32 %v10039_v27, %v8975_v26  ;;  %4214 = vmatpush.bf16.msra.mxu2 %v9248_v25  ;;  %4180 = vmatmul.bf16.vlgmr.msrb.gmra.mxu3 %v11099_v46  ;;  %v6849_v59 = vld [vmem:[%s14754_s1 + $0x30] sm:$0xf0] }
  0x94   : > { %v9231_v34 = vld [vmem:[%s14754_s1 + $0x12c0] sm:$0xf]  ;;  %v10103_v37 = vld [vmem:[%s14754_s1 + $0x12cc] sm:$0xf0]  ;;  %v9104_v49 = vor.u32 %v10071_v33, %v9103_v28  ;;  %4228 = vmatpush.bf16.msra.mxu3 %v6948_v30  ;;  %4138 = vmatmul.bf16.vlgmr.msrb.gmra.mxu0 %v11078_v32  ;;  %v6884_v30 = vor.u32 %v9513_v19, %v6881_v22  ;;  %v6852_v6 = vor.u32 %v9505_v58, %v6849_v59  ;;  %v6833_v7 = vld [vmem:[%s14754_s1 + $0x10] sm:$0xf0] }
  0x95   : > { %v9232_v50 = vor.u32 %v10103_v37, %v9231_v34  ;;  %v8959_v51 = vld [vmem:[%s14754_s1 + $0x10a0] sm:$0xf]  ;;  %v10035_v52 = vld [vmem:[%s14754_s1 + $0x10ac] sm:$0xf0]  ;;  %4152 = vmatmul.bf16.vlgmr.msrb.gmra.mxu1 %v11091_v41  ;;  %4187 = vmatpush.bf16.msra.mxu0 %v8976_v48 }
  0x96   : > { %v9087_v53 = vld [vmem:[%s14754_s1 + $0x11a0] sm:$0xf]  ;;  %v10067_v55 = vld [vmem:[%s14754_s1 + $0x11ac] sm:$0xf0]  ;;  %v8960_v60 = vor.u32 %v10035_v52, %v8959_v51  ;;  %4201 = vmatpush.bf16.msra.mxu1 %v9104_v49 }
  0x97   : > { %v9215_v56 = vld [vmem:[%s14754_s1 + $0x12a0] sm:$0xf]  ;;  %v10099_v57 = vld [vmem:[%s14754_s1 + $0x12ac] sm:$0xf0]  ;;  %4215 = vmatpush.bf16.msra.mxu2 %v9232_v50  ;;  %v9088_v61 = vor.u32 %v10067_v55, %v9087_v53 }
  0x98   : > { %v9216_v62 = vor.u32 %v10099_v57, %v9215_v56  ;;  %v8943_v63 = vld [vmem:[%s14754_s1 + $0x1080] sm:$0xf]  ;;  %v10031_v0 = vld [vmem:[%s14754_s1 + $0x108c] sm:$0xf0]  ;;  %4229 = vmatpush.bf16.msra.mxu3 %v6932_v54  ;;  %v6868_v54 = vor.u32 %v9509_v42, %v6865_v45  ;;  %v7057_v42 = vld [vmem:[%s14754_s1 + $0x1d0] sm:$0xf0] }
  0x99   : > { %v9071_v1 = vld [vmem:[%s14754_s1 + $0x1180] sm:$0xf]  ;;  %v10063_v3 = vld [vmem:[%s14754_s1 + $0x118c] sm:$0xf0]  ;;  %4188 = vmatpush.bf16.msra.mxu0 %v8960_v60  ;;  %v8944_v8 = vor.u32 %v10031_v0, %v8943_v63  ;;  %v9589_v45 = vld [vmem:[%s14754_s1 + $0x2c4] sm:$0xf] }
  0x9a   : > { %v9199_v4 = vld [vmem:[%s14754_s1 + $0x1280] sm:$0xf]  ;;  %v10095_v5 = vld [vmem:[%s14754_s1 + $0x128c] sm:$0xf0]  ;;  %4202 = vmatpush.bf16.msra.mxu1 %v9088_v61  ;;  %v9072_v9 = vor.u32 %v10063_v3, %v9071_v1 }
  0x9b   : > { %4216 = vmatpush.bf16.msra.mxu2 %v9216_v62  ;;  %v9200_v10 = vor.u32 %v10095_v5, %v9199_v4  ;;  %v8927_v11 = vld [vmem:[%s14754_s1 + $0x1060] sm:$0xf]  ;;  %v10027_v12 = vld [vmem:[%s14754_s1 + $0x106c] sm:$0xf0]  ;;  %v9501_v5 = vld [vmem:[%s14754_s1 + $0x4] sm:$0xf] }
  0x9c   : > { %v9055_v13 = vld [vmem:[%s14754_s1 + $0x1160] sm:$0xf]  ;;  %4230 = vmatpush.bf16.msra.mxu3 %v6916_v2  ;;  %v10059_v16 = vld [vmem:[%s14754_s1 + $0x116c] sm:$0xf0]  ;;  %v8928_v23 = vor.u32 %v10027_v12, %v8927_v11  ;;  %v7201_v11 = vld [vmem:[%s14754_s1 + $0x2f0] sm:$0xf0] }
  0x9d   : > { %v9183_v17 = vld [vmem:[%s14754_s1 + $0x1260] sm:$0xf]  ;;  %v10091_v18 = vld [vmem:[%s14754_s1 + $0x126c] sm:$0xf0]  ;;  %4189 = vmatpush.bf16.msra.mxu0 %v8944_v8  ;;  %v9056_v24 = vor.u32 %v10059_v16, %v9055_v13  ;;  %v9561_v8 = vld [vmem:[%s14754_s1 + $0x1e4] sm:$0xf] }
  0x9e   : > { %4203 = vmatpush.bf16.msra.mxu1 %v9072_v9  ;;  %v9184_v25 = vor.u32 %v10091_v18, %v9183_v17  ;;  %v8911_v26 = vld [vmem:[%s14754_s1 + $0x1040] sm:$0xf]  ;;  %v10023_v27 = vld [vmem:[%s14754_s1 + $0x104c] sm:$0xf0]  ;;  %v7073_v9 = vld [vmem:[%s14754_s1 + $0x1f0] sm:$0xf0] }
  0x9f   : > { %4217 = vmatpush.bf16.msra.mxu2 %v9200_v10  ;;  %v9039_v28 = vld [vmem:[%s14754_s1 + $0x1140] sm:$0xf]  ;;  %v10055_v33 = vld [vmem:[%s14754_s1 + $0x114c] sm:$0xf0]  ;;  %v8912_v48 = vor.u32 %v10023_v27, %v8911_v26  ;;  %v9593_v10 = vld [vmem:[%s14754_s1 + $0x2e4] sm:$0xf]  ;;  %v7076_v26 = vor.u32 %v9561_v8, %v7073_v9 }
  0xa0   : > { %4231 = vmatpush.bf16.msra.mxu3 %v6900_v14  ;;  %v9167_v34 = vld [vmem:[%s14754_s1 + $0x1240] sm:$0xf]  ;;  %v10087_v37 = vld [vmem:[%s14754_s1 + $0x124c] sm:$0xf0]  ;;  %v9040_v49 = vor.u32 %v10055_v33, %v9039_v28  ;;  %v9625_v12 = vld [vmem:[%s14754_s1 + $0x3e4] sm:$0xf]  ;;  %v7204_v33 = vor.u32 %v9593_v10, %v7201_v11 }
  0xa1   : > { %4190 = vmatpush.bf16.msra.mxu0 %v8928_v23  ;;  %v9168_v50 = vor.u32 %v10087_v37, %v9167_v34  ;;  %v8895_v51 = vld [vmem:[%s14754_s1 + $0x1020] sm:$0xf]  ;;  %v10019_v52 = vld [vmem:[%s14754_s1 + $0x102c] sm:$0xf0]  ;;  %v7329_v14 = vld [vmem:[%s14754_s1 + $0x3f0] sm:$0xf0] }
  0xa2   : > { %4204 = vmatpush.bf16.msra.mxu1 %v9056_v24  ;;  %v9023_v53 = vld [vmem:[%s14754_s1 + $0x1120] sm:$0xf]  ;;  %v10051_v55 = vld [vmem:[%s14754_s1 + $0x112c] sm:$0xf0]  ;;  %v8896_v61 = vor.u32 %v10019_v52, %v8895_v51  ;;  %v9657_v16 = vld [vmem:[%s14754_s1 + $0x4e4] sm:$0xf]  ;;  %v7332_v34 = vor.u32 %v9625_v12, %v7329_v14 }
  0xa3   : > { %4218 = vmatpush.bf16.msra.mxu2 %v9184_v25  ;;  %v9151_v56 = vld [vmem:[%s14754_s1 + $0x1220] sm:$0xf]  ;;  %v10083_v57 = vld [vmem:[%s14754_s1 + $0x122c] sm:$0xf0]  ;;  %v9024_v1 = vor.u32 %v10051_v55, %v9023_v53  ;;  %v7457_v17 = vld [vmem:[%s14754_s1 + $0x4f0] sm:$0xf0]  ;;  %v6836_v25 = vor.u32 %v9501_v5, %v6833_v7 }
  0xa4   : > { %4232 = vmatpush.bf16.msra.mxu3 %v6884_v30  ;;  %v8879_v60 = vld [vmem:[%s14754_s1 + $0x1000] sm:$0xf]  ;;  %v10015_v62 = vld [vmem:[%s14754_s1 + $0x100c] sm:$0xf0]  ;;  %v9152_v2 = vor.u32 %v10083_v57, %v9151_v56  ;;  %v9499_v23 = vld [vmem:[%s10495_s20 + $0x88] sm:$0xf0] }
  0xa5   : > { %4191 = vmatpush.bf16.msra.mxu0 %v8912_v48  ;;  %v9007_v63 = vld [vmem:[%s14754_s1 + $0x1100] sm:$0xf]  ;;  %v10047_v0 = vld [vmem:[%s14754_s1 + $0x110c] sm:$0xf0]  ;;  %v8880_v13 = vor.u32 %v10015_v62, %v8879_v60  ;;  %v6827_v24 = vld [vmem:[%s10495_s20 + $0x48] sm:$0xf]  ;;  %v7460_v48 = vor.u32 %v9657_v16, %v7457_v17 }
  0xa6   : > { %4205 = vmatpush.bf16.msra.mxu1 %v9040_v49  ;;  %v9135_v3 = vld [vmem:[%s14754_s1 + $0x1200] sm:$0xf]  ;;  %v10079_v4 = vld [vmem:[%s14754_s1 + $0x120c] sm:$0xf0]  ;;  %v9008_v18 = vor.u32 %v10047_v0, %v9007_v63  ;;  %v9500_v27 = vld [vmem:[%s10495_s20 + $0x90] sm:$0xf0] }
  0xa7   : > { %4219 = vmatpush.bf16.msra.mxu2 %v9168_v50  ;;  %v9136_v19 = vor.u32 %v10079_v4, %v9135_v3  ;;  %v6819_v22 = vld [vmem:[%s10495_s20 + $0x40] sm:$0xf]  ;;  %v9490_v28 = vld [vmem:[%s10495_s20 + $0x44] sm:$0xf]  ;;  %v6821_v30 = vld [vmem:[%s10495_s20 + $0x8c] sm:$0xf0]  ;;  %v11299_v53 = vor.u32 %v9500_v27, %v6827_v24 }
  0xa8   : > { %4233 = vmatpush.bf16.msra.mxu3 %v6868_v54  ;;  %v9557_v37 = vld [vmem:[%s14754_s1 + $0x1c4] sm:$0xf]  ;;  %v11288_v49 = vor.u32 %v9499_v23, %v6819_v22  ;;  %v7185_v50 = vld [vmem:[%s14754_s1 + $0x2d0] sm:$0xf0]  ;;  %v11301_v54 = vor.u32 %v9490_v28, %v6821_v30 }
  0xa9   : > { %4192 = vmatpush.bf16.msra.mxu0 %v8896_v61  ;;  %v9621_v51 = vld [vmem:[%s14754_s1 + $0x3c4] sm:$0xf]  ;;  %v7313_v52 = vld [vmem:[%s14754_s1 + $0x3d0] sm:$0xf0]  ;;  %14764 = vst [vmem:[#allocation4_spill] sm:$0xff] %v11299_v53  ;;  %v7060_v57 = vor.u32 %v9557_v37, %v7057_v42  ;;  %v7188_v58 = vor.u32 %v9589_v45, %v7185_v50 }
  0xaa   : > { %4206 = vmatpush.bf16.msra.mxu1 %v9024_v1  ;;  %14763 = vst [vmem:[#allocation3_spill] sm:$0xff] %v11288_v49  ;;  %v9653_v55 = vld [vmem:[%s14754_s1 + $0x4c4] sm:$0xf]  ;;  %v7441_v56 = vld [vmem:[%s14754_s1 + $0x4d0] sm:$0xf0]  ;;  %v7316_v59 = vor.u32 %v9621_v51, %v7313_v52 }
  0xab   : > { %4220 = vmatpush.bf16.msra.mxu2 %v9152_v2  ;;  %14765 = vst [vmem:[#allocation5_spill] sm:$0xff] %v11301_v54  ;;  %v9553_v60 = vld [vmem:[%s14754_s1 + $0x1a4] sm:$0xf]  ;;  %v7041_v61 = vld [vmem:[%s14754_s1 + $0x1b0] sm:$0xf0]  ;;  %v7444_v63 = vor.u32 %v9653_v55, %v7441_v56 }
  0xac   : > { %4234 = vmatpush.bf16.msra.mxu3 %v6852_v6  ;;  %v9585_v62 = vld [vmem:[%s14754_s1 + $0x2a4] sm:$0xf]  ;;  %v7169_v0 = vld [vmem:[%s14754_s1 + $0x2b0] sm:$0xf0]  ;;  %v7044_v5 = vor.u32 %v9553_v60, %v7041_v61 }
  0xad   : > { %4193 = vmatpush.bf16.msra.mxu0 %v8880_v13  ;;  %v9617_v1 = vld [vmem:[%s14754_s1 + $0x3a4] sm:$0xf]  ;;  %v7297_v2 = vld [vmem:[%s14754_s1 + $0x3b0] sm:$0xf0]  ;;  %v7172_v6 = vor.u32 %v9585_v62, %v7169_v0 }
  0xae   : > { %4207 = vmatpush.bf16.msra.mxu1 %v9008_v18  ;;  %v9649_v3 = vld [vmem:[%s14754_s1 + $0x4a4] sm:$0xf]  ;;  %v7425_v4 = vld [vmem:[%s14754_s1 + $0x4b0] sm:$0xf0]  ;;  %v7300_v7 = vor.u32 %v9617_v1, %v7297_v2 }
  0xaf   : > { %4221 = vmatpush.bf16.msra.mxu2 %v9136_v19  ;;  %v9549_v8 = vld [vmem:[%s14754_s1 + $0x184] sm:$0xf]  ;;  %v7025_v9 = vld [vmem:[%s14754_s1 + $0x190] sm:$0xf0]  ;;  %v7428_v11 = vor.u32 %v9649_v3, %v7425_v4 }
  0xb0   : > { %4235 = vmatpush.bf16.msra.mxu3 %v6836_v25  ;;  %4194 = vmatmul.bf16.vlgmr.msra.gmra.mxu0 %v11288_v49  ;;  %v9581_v10 = vld [vmem:[%s14754_s1 + $0x284] sm:$0xf]  ;;  %v7153_v12 = vld [vmem:[%s14754_s1 + $0x290] sm:$0xf0]  ;;  %v7028_v18 = vor.u32 %v9549_v8, %v7025_v9 }
  0xb1   : > { %4242 = vmatpush.bf16.msrb.mxu0 %v7076_v26  ;;  %4208 = vmatmul.bf16.vlgmr.msra.gmra.mxu1 %v11301_v54  ;;  %v9613_v13 = vld [vmem:[%s14754_s1 + $0x384] sm:$0xf]  ;;  %v7281_v14 = vld [vmem:[%s14754_s1 + $0x390] sm:$0xf0]  ;;  %v7156_v19 = vor.u32 %v9581_v10, %v7153_v12 }
  0xb2   : > { %4256 = vmatpush.bf16.msrb.mxu1 %v7204_v33  ;;  %4222 = vmatmul.bf16.vlgmr.msra.gmra.mxu2 %v11299_v53  ;;  %v9645_v16 = vld [vmem:[%s14754_s1 + $0x484] sm:$0xf]  ;;  %v7409_v17 = vld [vmem:[%s14754_s1 + $0x490] sm:$0xf0]  ;;  %v7284_v22 = vor.u32 %v9613_v13, %v7281_v14 }
  0xb3   : > { %4270 = vmatpush.bf16.msrb.mxu2 %v7332_v34  ;;  %4236 = vmatmul.bf16.vlgmr.msra.gmra.mxu3 %v10500_v15  ;;  %v9545_v23 = vld [vmem:[%s14754_s1 + $0x164] sm:$0xf]  ;;  %v7009_v24 = vld [vmem:[%s14754_s1 + $0x170] sm:$0xf0]  ;;  %v7412_v26 = vor.u32 %v9645_v16, %v7409_v17 }
  0xb4   : > { %4284 = vmatpush.bf16.msrb.mxu3 %v7460_v48  ;;  %v9577_v25 = vld [vmem:[%s14754_s1 + $0x264] sm:$0xf]  ;;  %v7137_v27 = vld [vmem:[%s14754_s1 + $0x270] sm:$0xf0]  ;;  %v7012_v37 = vor.u32 %v9545_v23, %v7009_v24 }
  0xb5   : > { %4243 = vmatpush.bf16.msrb.mxu0 %v7060_v57  ;;  %v9609_v28 = vld [vmem:[%s14754_s1 + $0x364] sm:$0xf]  ;;  %v7265_v30 = vld [vmem:[%s14754_s1 + $0x370] sm:$0xf0]  ;;  %v7140_v42 = vor.u32 %v9577_v25, %v7137_v27 }
  0xb6   : > { %4257 = vmatpush.bf16.msrb.mxu1 %v7188_v58  ;;  %v9641_v33 = vld [vmem:[%s14754_s1 + $0x464] sm:$0xf]  ;;  %v7393_v34 = vld [vmem:[%s14754_s1 + $0x470] sm:$0xf0]  ;;  %v7268_v45 = vor.u32 %v9609_v28, %v7265_v30 }
  0xb7   : > { %4271 = vmatpush.bf16.msrb.mxu2 %v7316_v59  ;;  %v9541_v48 = vld [vmem:[%s14754_s1 + $0x144] sm:$0xf]  ;;  %v6993_v50 = vld [vmem:[%s14754_s1 + $0x150] sm:$0xf0]  ;;  %v7396_v52 = vor.u32 %v9641_v33, %v7393_v34 }
  0xb8   : > { %4285 = vmatpush.bf16.msrb.mxu3 %v7444_v63  ;;  %v9573_v51 = vld [vmem:[%s14754_s1 + $0x244] sm:$0xf]  ;;  %v7121_v55 = vld [vmem:[%s14754_s1 + $0x250] sm:$0xf0]  ;;  %v6996_v60 = vor.u32 %v9541_v48, %v6993_v50  ;;  %v4013_v48 = vpop.f32.mrf.mxu3 }
  0xb9   : > { %4244 = vmatpush.bf16.msrb.mxu0 %v7044_v5  ;;  %v9605_v56 = vld [vmem:[%s14754_s1 + $0x344] sm:$0xf]  ;;  %v7249_v57 = vld [vmem:[%s14754_s1 + $0x350] sm:$0xf0]  ;;  %v7124_v63 = vor.u32 %v9573_v51, %v7121_v55 }
  0xba   : > { %4258 = vmatpush.bf16.msrb.mxu1 %v7172_v6  ;;  %v9637_v58 = vld [vmem:[%s14754_s1 + $0x444] sm:$0xf]  ;;  %v7377_v59 = vld [vmem:[%s14754_s1 + $0x450] sm:$0xf0]  ;;  %v7252_v0 = vor.u32 %v9605_v56, %v7249_v57 }
  0xbb   : > { %4272 = vmatpush.bf16.msrb.mxu2 %v7300_v7  ;;  %v3971_v61 = vpop.f32.mrf.mxu0  ;;  %v3985_v62 = vpop.f32.mrf.mxu1  ;;  %v9537_v1 = vld [vmem:[%s14754_s1 + $0x124] sm:$0xf]  ;;  %v6977_v2 = vld [vmem:[%s14754_s1 + $0x130] sm:$0xf0]  ;;  %v7380_v5 = vor.u32 %v9637_v58, %v7377_v59 }
  0xbc   : > { %4286 = vmatpush.bf16.msrb.mxu3 %v7428_v11  ;;  %v9569_v3 = vld [vmem:[%s14754_s1 + $0x224] sm:$0xf]  ;;  %v3986_v4 = vadd.f32 %v3985_v62, %v3971_v61  ;;  %v7105_v6 = vld [vmem:[%s14754_s1 + $0x230] sm:$0xf0]  ;;  %v6980_v11 = vor.u32 %v9537_v1, %v6977_v2 }
  0xbd   : > { %4245 = vmatpush.bf16.msrb.mxu0 %v7028_v18  ;;  %v9601_v7 = vld [vmem:[%s14754_s1 + $0x324] sm:$0xf]  ;;  %v7233_v8 = vld [vmem:[%s14754_s1 + $0x330] sm:$0xf0]  ;;  %v7108_v14 = vor.u32 %v9569_v3, %v7105_v6 }
  0xbe   : > { %4259 = vmatpush.bf16.msrb.mxu1 %v7156_v19  ;;  %v9633_v9 = vld [vmem:[%s14754_s1 + $0x424] sm:$0xf]  ;;  %v7361_v10 = vld [vmem:[%s14754_s1 + $0x430] sm:$0xf0]  ;;  %v7236_v16 = vor.u32 %v9601_v7, %v7233_v8 }
  0xbf   : > { %4273 = vmatpush.bf16.msrb.mxu2 %v7284_v22  ;;  %v9533_v12 = vld [vmem:[%s14754_s1 + $0x104] sm:$0xf]  ;;  %v6961_v13 = vld [vmem:[%s14754_s1 + $0x110] sm:$0xf0]  ;;  %v7364_v22 = vor.u32 %v9633_v9, %v7361_v10 }
  0xc0   : > { %4287 = vmatpush.bf16.msrb.mxu3 %v7412_v26  ;;  %v9565_v17 = vld [vmem:[%s14754_s1 + $0x204] sm:$0xf]  ;;  %v7089_v18 = vld [vmem:[%s14754_s1 + $0x210] sm:$0xf0]  ;;  %v3999_v26 = vpop.f32.mrf.mxu2  ;;  %v6964_v34 = vor.u32 %v9533_v12, %v6961_v13 }
  0xc1   : > { %4246 = vmatpush.bf16.msrb.mxu0 %v7012_v37  ;;  %v9597_v19 = vld [vmem:[%s14754_s1 + $0x304] sm:$0xf]  ;;  %v7217_v23 = vld [vmem:[%s14754_s1 + $0x310] sm:$0xf0]  ;;  %v4000_v33 = vadd.f32 %v3999_v26, %v3986_v4  ;;  %v7092_v50 = vor.u32 %v9565_v17, %v7089_v18 }
  0xc2   : > { %4260 = vmatpush.bf16.msrb.mxu1 %v7140_v42  ;;  %v9629_v24 = vld [vmem:[%s14754_s1 + $0x404] sm:$0xf]  ;;  %v7345_v25 = vld [vmem:[%s14754_s1 + $0x410] sm:$0xf0]  ;;  %v7220_v51 = vor.u32 %v9597_v19, %v7217_v23 }
  0xc3   : > { %4274 = vmatpush.bf16.msrb.mxu2 %v7268_v45  ;;  %v9689_v27 = vld [vmem:[%s14754_s1 + $0x5e4] sm:$0xf]  ;;  %v7585_v28 = vld [vmem:[%s14754_s1 + $0x5f0] sm:$0xf0]  ;;  %v4014_v56 = vadd.f32 %v4013_v48, %v4000_v33  ;;  %v7348_v57 = vor.u32 %v9629_v24, %v7345_v25  ;;  %v11481_v61 = vpop.f32.mrf.mxu0  ;;  %v11507_v7 = vpop.f32.mrf.mxu1 }
  0xc4   : > { %4288 = vmatpush.bf16.msrb.mxu3 %v7396_v52  ;;  %v9721_v30 = vld [vmem:[%s14754_s1 + $0x6e4] sm:$0xf]  ;;  %v7713_v37 = vld [vmem:[%s14754_s1 + $0x6f0] sm:$0xf0]  ;;  %v7588_v58 = vor.u32 %v9689_v27, %v7585_v28 }
  0xc5   : > { %4247 = vmatpush.bf16.msrb.mxu0 %v6996_v60  ;;  %v9753_v42 = vld [vmem:[%s14754_s1 + $0x7e4] sm:$0xf]  ;;  %v7841_v45 = vld [vmem:[%s14754_s1 + $0x7f0] sm:$0xf0]  ;;  %v7716_v59 = vor.u32 %v9721_v30, %v7713_v37 }
  0xc6   : > { %4261 = vmatpush.bf16.msrb.mxu1 %v7124_v63  ;;  %v9785_v52 = vld [vmem:[%s14754_s1 + $0x8e4] sm:$0xf]  ;;  %v7969_v55 = vld [vmem:[%s14754_s1 + $0x8f0] sm:$0xf0]  ;;  %v7844_v60 = vor.u32 %v9753_v42, %v7841_v45 }
  0xc7   : > { %4275 = vmatpush.bf16.msrb.mxu2 %v7252_v0  ;;  %v9685_v62 = vld [vmem:[%s14754_s1 + $0x5c4] sm:$0xf]  ;;  %v7569_v63 = vld [vmem:[%s14754_s1 + $0x5d0] sm:$0xf0]  ;;  %v7972_v1 = vor.u32 %v9785_v52, %v7969_v55 }
  0xc8   : > { %4289 = vmatpush.bf16.msrb.mxu3 %v7380_v5  ;;  %v9717_v0 = vld [vmem:[%s14754_s1 + $0x6c4] sm:$0xf]  ;;  %v7697_v2 = vld [vmem:[%s14754_s1 + $0x6d0] sm:$0xf0]  ;;  %v7572_v8 = vor.u32 %v9685_v62, %v7569_v63  ;;  %v11537_v24 = vpop.f32.mrf.mxu2 }
  0xc9   : > { %4248 = vmatpush.bf16.msrb.mxu0 %v6980_v11  ;;  %v9749_v3 = vld [vmem:[%s14754_s1 + $0x7c4] sm:$0xf]  ;;  %v7825_v4 = vld [vmem:[%s14754_s1 + $0x7d0] sm:$0xf0]  ;;  %v7700_v9 = vor.u32 %v9717_v0, %v7697_v2 }
  0xca   : > { %4262 = vmatpush.bf16.msrb.mxu1 %v7108_v14  ;;  %v9781_v5 = vld [vmem:[%s14754_s1 + $0x8c4] sm:$0xf]  ;;  %v7953_v6 = vld [vmem:[%s14754_s1 + $0x8d0] sm:$0xf0]  ;;  %v7828_v10 = vor.u32 %v9749_v3, %v7825_v4 }
  0xcb   : > { %4276 = vmatpush.bf16.msrb.mxu2 %v7236_v16  ;;  %v9681_v11 = vld [vmem:[%s14754_s1 + $0x5a4] sm:$0xf]  ;;  %v7553_v12 = vld [vmem:[%s14754_s1 + $0x5b0] sm:$0xf0]  ;;  %v7956_v14 = vor.u32 %v9781_v5, %v7953_v6 }
  0xcc   : > { %4290 = vmatpush.bf16.msrb.mxu3 %v7364_v22  ;;  %v9713_v13 = vld [vmem:[%s14754_s1 + $0x6a4] sm:$0xf]  ;;  %v7681_v16 = vld [vmem:[%s14754_s1 + $0x6b0] sm:$0xf0]  ;;  %v7556_v23 = vor.u32 %v9681_v11, %v7553_v12 }
  0xcd   : > { %4249 = vmatpush.bf16.msrb.mxu0 %v6964_v34  ;;  %v9745_v17 = vld [vmem:[%s14754_s1 + $0x7a4] sm:$0xf]  ;;  %v7809_v18 = vld [vmem:[%s14754_s1 + $0x7b0] sm:$0xf0]  ;;  %v7684_v25 = vor.u32 %v9713_v13, %v7681_v16  ;;  %v11548_v34 = vpop.f32.mrf.mxu3 }
  0xce   : > { %4263 = vmatpush.bf16.msrb.mxu1 %v7092_v50  ;;  %v9777_v19 = vld [vmem:[%s14754_s1 + $0x8a4] sm:$0xf]  ;;  %v7937_v22 = vld [vmem:[%s14754_s1 + $0x8b0] sm:$0xf0]  ;;  %v7812_v26 = vor.u32 %v9745_v17, %v7809_v18 }
  0xcf   : > { %4277 = vmatpush.bf16.msrb.mxu2 %v7220_v51  ;;  %v9677_v27 = vld [vmem:[%s14754_s1 + $0x584] sm:$0xf]  ;;  %v7537_v28 = vld [vmem:[%s14754_s1 + $0x590] sm:$0xf0]  ;;  %v7940_v33 = vor.u32 %v9777_v19, %v7937_v22 }
  0xd0   : > { %4291 = vmatpush.bf16.msrb.mxu3 %v7348_v57  ;;  %4250 = vmatmul.bf16.vlgmr.msrb.gmra.mxu0 %v10507_v21  ;;  %v9709_v30 = vld [vmem:[%s14754_s1 + $0x684] sm:$0xf]  ;;  %v7665_v37 = vld [vmem:[%s14754_s1 + $0x690] sm:$0xf0]  ;;  %v4027_v48 = vpop.f32.mrf.mxu0  ;;  %v7540_v55 = vor.u32 %v9677_v27, %v7537_v28 }
  0xd1   : > { %4298 = vmatpush.bf16.msra.mxu0 %v7588_v58  ;;  %4264 = vmatmul.bf16.vlgmr.msrb.gmra.mxu1 %v10505_v20  ;;  %v9741_v42 = vld [vmem:[%s14754_s1 + $0x784] sm:$0xf]  ;;  %v7793_v45 = vld [vmem:[%s14754_s1 + $0x790] sm:$0xf0]  ;;  %v4028_v52 = vadd.f32 %v4027_v48, %v4014_v56  ;;  %v7668_v57 = vor.u32 %v9709_v30, %v7665_v37 }
  0xd2   : > { %4312 = vmatpush.bf16.msra.mxu1 %v7716_v59  ;;  %4278 = vmatmul.bf16.vlgmr.msrb.gmra.mxu2 %v10520_v29  ;;  %v9773_v50 = vld [vmem:[%s14754_s1 + $0x884] sm:$0xf]  ;;  %v7921_v51 = vld [vmem:[%s14754_s1 + $0x890] sm:$0xf0]  ;;  %v7796_v58 = vor.u32 %v9741_v42, %v7793_v45  ;;  %v4041_v59 = vpop.f32.mrf.mxu1 }
  0xd3   : > { %4326 = vmatpush.bf16.msra.mxu2 %v7844_v60  ;;  %4292 = vmatmul.bf16.vlgmr.msrb.gmra.mxu3 %v10654_v39  ;;  %v9673_v60 = vld [vmem:[%s14754_s1 + $0x564] sm:$0xf]  ;;  %v7521_v62 = vld [vmem:[%s14754_s1 + $0x570] sm:$0xf0]  ;;  %v7924_v56 = vor.u32 %v9773_v50, %v7921_v51  ;;  %v4042_v0 = vadd.f32 %v4041_v59, %v4028_v52 }
  0xd4   : > { %4340 = vmatpush.bf16.msra.mxu3 %v7972_v1  ;;  %v9705_v63 = vld [vmem:[%s14754_s1 + $0x664] sm:$0xf]  ;;  %v7649_v1 = vld [vmem:[%s14754_s1 + $0x670] sm:$0xf0]  ;;  %v7524_v6 = vor.u32 %v9673_v60, %v7521_v62 }
  0xd5   : > { %4299 = vmatpush.bf16.msra.mxu0 %v7572_v8  ;;  %v9737_v2 = vld [vmem:[%s14754_s1 + $0x764] sm:$0xf]  ;;  %v7777_v3 = vld [vmem:[%s14754_s1 + $0x770] sm:$0xf0]  ;;  %v7652_v8 = vor.u32 %v9705_v63, %v7649_v1 }
  0xd6   : > { %4313 = vmatpush.bf16.msra.mxu1 %v7700_v9  ;;  %v9769_v4 = vld [vmem:[%s14754_s1 + $0x864] sm:$0xf]  ;;  %v7905_v5 = vld [vmem:[%s14754_s1 + $0x870] sm:$0xf0]  ;;  %v7780_v9 = vor.u32 %v9737_v2, %v7777_v3 }
  0xd7   : > { %4327 = vmatpush.bf16.msra.mxu2 %v7828_v10  ;;  %v9669_v10 = vld [vmem:[%s14754_s1 + $0x544] sm:$0xf]  ;;  %v7505_v11 = vld [vmem:[%s14754_s1 + $0x550] sm:$0xf0]  ;;  %v7908_v13 = vor.u32 %v9769_v4, %v7905_v5 }
  0xd8   : > { %4341 = vmatpush.bf16.msra.mxu3 %v7956_v14  ;;  %v9701_v12 = vld [vmem:[%s14754_s1 + $0x644] sm:$0xf]  ;;  %v4055_v14 = vpop.f32.mrf.mxu2  ;;  %v7633_v16 = vld [vmem:[%s14754_s1 + $0x650] sm:$0xf0] }
  0xd9   : > { %4300 = vmatpush.bf16.msra.mxu0 %v7556_v23  ;;  %v9733_v17 = vld [vmem:[%s14754_s1 + $0x744] sm:$0xf]  ;;  %v7761_v18 = vld [vmem:[%s14754_s1 + $0x750] sm:$0xf0]  ;;  %v4056_v19 = vadd.f32 %v4055_v14, %v4042_v0  ;;  %v7636_v28 = vor.u32 %v9701_v12, %v7633_v16 }
  0xda   : > { %4314 = vmatpush.bf16.msra.mxu1 %v7684_v25  ;;  %v9765_v22 = vld [vmem:[%s14754_s1 + $0x844] sm:$0xf]  ;;  %v7889_v23 = vld [vmem:[%s14754_s1 + $0x850] sm:$0xf0]  ;;  %v4069_v25 = vpop.f32.mrf.mxu3  ;;  %v7764_v30 = vor.u32 %v9733_v17, %v7761_v18 }
  0xdb   : > { %4328 = vmatpush.bf16.msra.mxu2 %v7812_v26  ;;  %v7508_v26 = vor.u32 %v9669_v10, %v7505_v11  ;;  %v11613_v27 = vadd.f32 %v4069_v25, %v4056_v19  ;;  %v7489_v37 = vld [vmem:[%s14754_s1 + $0x530] sm:$0xf0]  ;;  %v9697_v42 = vld [vmem:[%s14754_s1 + $0x624] sm:$0xf]  ;;  %v7892_v45 = vor.u32 %v9765_v22, %v7889_v23 }
  0xdc   : > { %4342 = vmatpush.bf16.msra.mxu3 %v7940_v33  ;;  %v9665_v33 = vld [vmem:[%s14754_s1 + $0x524] sm:$0xf]  ;;  %v7617_v48 = vld [vmem:[%s14754_s1 + $0x630] sm:$0xf0] }
  0xdd   : > { %4301 = vmatpush.bf16.msra.mxu0 %v7540_v55  ;;  %v9729_v50 = vld [vmem:[%s14754_s1 + $0x724] sm:$0xf]  ;;  %v7745_v51 = vld [vmem:[%s14754_s1 + $0x730] sm:$0xf0]  ;;  %v7620_v60 = vor.u32 %v9697_v42, %v7617_v48 }
  0xde   : > { %4315 = vmatpush.bf16.msra.mxu1 %v7668_v57  ;;  %v9761_v52 = vld [vmem:[%s14754_s1 + $0x824] sm:$0xf]  ;;  %v7873_v55 = vld [vmem:[%s14754_s1 + $0x830] sm:$0xf0]  ;;  %v7492_v57 = vor.u32 %v9665_v33, %v7489_v37  ;;  %v7748_v62 = vor.u32 %v9729_v50, %v7745_v51  ;;  %v11713_v51 = vpop.f32.mrf.mxu1 }
  0xdf   : > { %4329 = vmatpush.bf16.msra.mxu2 %v7796_v58  ;;  %v9661_v58 = vld [vmem:[%s14754_s1 + $0x504] sm:$0xf]  ;;  %v7473_v59 = vld [vmem:[%s14754_s1 + $0x510] sm:$0xf0]  ;;  %v7876_v1 = vor.u32 %v9761_v52, %v7873_v55 }
  0xe0   : > { %4343 = vmatpush.bf16.msra.mxu3 %v7924_v56  ;;  %v9693_v63 = vld [vmem:[%s14754_s1 + $0x604] sm:$0xf]  ;;  %v7601_v56 = vld [vmem:[%s14754_s1 + $0x610] sm:$0xf0] }
  0xe1   : > { %4302 = vmatpush.bf16.msra.mxu0 %v7524_v6  ;;  %v9725_v0 = vld [vmem:[%s14754_s1 + $0x704] sm:$0xf]  ;;  %v7729_v2 = vld [vmem:[%s14754_s1 + $0x710] sm:$0xf0] }
  0xe2   : > { %4316 = vmatpush.bf16.msra.mxu1 %v7652_v8  ;;  %v9757_v3 = vld [vmem:[%s14754_s1 + $0x804] sm:$0xf]  ;;  %v7857_v4 = vld [vmem:[%s14754_s1 + $0x810] sm:$0xf0]  ;;  %v7732_v14 = vor.u32 %v9725_v0, %v7729_v2 }
  0xe3   : > { %4330 = vmatpush.bf16.msra.mxu2 %v7780_v9  ;;  %v9817_v5 = vld [vmem:[%s14754_s1 + $0x9e4] sm:$0xf]  ;;  %v8097_v6 = vld [vmem:[%s14754_s1 + $0x9f0] sm:$0xf0]  ;;  %v7476_v9 = vor.u32 %v9661_v58, %v7473_v59  ;;  %v7860_v18 = vor.u32 %v9757_v3, %v7857_v4 }
  0xe4   : > { %4344 = vmatpush.bf16.msra.mxu3 %v7908_v13  ;;  %v9849_v8 = vld [vmem:[%s14754_s1 + $0xae4] sm:$0xf]  ;;  %v8225_v10 = vld [vmem:[%s14754_s1 + $0xaf0] sm:$0xf0]  ;;  %v7604_v13 = vor.u32 %v9693_v63, %v7601_v56  ;;  %v8100_v19 = vor.u32 %v9817_v5, %v8097_v6 }
  0xe5   : > { %4303 = vmatpush.bf16.msra.mxu0 %v7508_v26  ;;  %v9881_v11 = vld [vmem:[%s14754_s1 + $0xbe4] sm:$0xf]  ;;  %v8353_v12 = vld [vmem:[%s14754_s1 + $0xbf0] sm:$0xf0]  ;;  %v8228_v22 = vor.u32 %v9849_v8, %v8225_v10  ;;  %v11752_v10 = vpop.f32.mrf.mxu2 }
  0xe6   : > { %4317 = vmatpush.bf16.msra.mxu1 %v7636_v28  ;;  %v9913_v16 = vld [vmem:[%s14754_s1 + $0xce4] sm:$0xf]  ;;  %v8481_v17 = vld [vmem:[%s14754_s1 + $0xcf0] sm:$0xf0]  ;;  %v8356_v23 = vor.u32 %v9881_v11, %v8353_v12 }
  0xe7   : > { %4331 = vmatpush.bf16.msra.mxu2 %v7764_v30  ;;  %v9813_v25 = vld [vmem:[%s14754_s1 + $0x9c4] sm:$0xf]  ;;  %v8081_v26 = vld [vmem:[%s14754_s1 + $0x9d0] sm:$0xf0]  ;;  %v8484_v30 = vor.u32 %v9913_v16, %v8481_v17  ;;  %v11763_v16 = vpop.f32.mrf.mxu3 }
  0xe8   : > { %4345 = vmatpush.bf16.msra.mxu3 %v7892_v45  ;;  %v9845_v28 = vld [vmem:[%s14754_s1 + $0xac4] sm:$0xf]  ;;  %v8209_v33 = vld [vmem:[%s14754_s1 + $0xad0] sm:$0xf0]  ;;  %v11705_v45 = vpop.f32.mrf.mxu0  ;;  %v8084_v52 = vor.u32 %v9813_v25, %v8081_v26 }
  0xe9   : > { %4304 = vmatpush.bf16.msra.mxu0 %v7492_v57  ;;  %v9877_v37 = vld [vmem:[%s14754_s1 + $0xbc4] sm:$0xf]  ;;  %v8337_v42 = vld [vmem:[%s14754_s1 + $0xbd0] sm:$0xf0]  ;;  %v8212_v55 = vor.u32 %v9845_v28, %v8209_v33 }
  0xea   : > { %4318 = vmatpush.bf16.msra.mxu1 %v7620_v60  ;;  %v9909_v48 = vld [vmem:[%s14754_s1 + $0xcc4] sm:$0xf]  ;;  %v8465_v50 = vld [vmem:[%s14754_s1 + $0xcd0] sm:$0xf0]  ;;  %v8340_v57 = vor.u32 %v9877_v37, %v8337_v42 }
  0xeb   : > { %4332 = vmatpush.bf16.msra.mxu2 %v7748_v62  ;;  %v9809_v58 = vld [vmem:[%s14754_s1 + $0x9a4] sm:$0xf]  ;;  %v8065_v59 = vld [vmem:[%s14754_s1 + $0x9b0] sm:$0xf0]  ;;  %v8468_v62 = vor.u32 %v9909_v48, %v8465_v50 }
  0xec   : > { %4346 = vmatpush.bf16.msra.mxu3 %v7876_v1  ;;  %v9841_v60 = vld [vmem:[%s14754_s1 + $0xaa4] sm:$0xf]  ;;  %v8193_v63 = vld [vmem:[%s14754_s1 + $0xab0] sm:$0xf0]  ;;  %v8068_v3 = vor.u32 %v9809_v58, %v8065_v59 }
  0xed   : > { %4305 = vmatpush.bf16.msra.mxu0 %v7476_v9  ;;  %v9873_v56 = vld [vmem:[%s14754_s1 + $0xba4] sm:$0xf]  ;;  %v8321_v0 = vld [vmem:[%s14754_s1 + $0xbb0] sm:$0xf0]  ;;  %v8196_v4 = vor.u32 %v9841_v60, %v8193_v63 }
  0xee   : > { %4319 = vmatpush.bf16.msra.mxu1 %v7604_v13  ;;  %v9905_v1 = vld [vmem:[%s14754_s1 + $0xca4] sm:$0xf]  ;;  %v8449_v2 = vld [vmem:[%s14754_s1 + $0xcb0] sm:$0xf0]  ;;  %v8324_v5 = vor.u32 %v9873_v56, %v8321_v0 }
  0xef   : > { %4333 = vmatpush.bf16.msra.mxu2 %v7732_v14  ;;  %v9805_v6 = vld [vmem:[%s14754_s1 + $0x984] sm:$0xf]  ;;  %v8049_v8 = vld [vmem:[%s14754_s1 + $0x990] sm:$0xf0]  ;;  %v8452_v11 = vor.u32 %v9905_v1, %v8449_v2 }
  0xf0   : > { %4347 = vmatpush.bf16.msra.mxu3 %v7860_v18  ;;  %4306 = vmatmul.bf16.vlgmr.msra.gmra.mxu0 %v10667_v44  ;;  %v9837_v9 = vld [vmem:[%s14754_s1 + $0xa84] sm:$0xf]  ;;  %v8177_v12 = vld [vmem:[%s14754_s1 + $0xa90] sm:$0xf0] }
  0xf1   : > { %4354 = vmatpush.bf16.msrb.mxu0 %v8100_v19  ;;  %4320 = vmatmul.bf16.vlgmr.msra.gmra.mxu1 %v10665_v43  ;;  %v9869_v13 = vld [vmem:[%s14754_s1 + $0xb84] sm:$0xf]  ;;  %v8305_v14 = vld [vmem:[%s14754_s1 + $0xb90] sm:$0xf0]  ;;  %v4083_v17 = vpop.f32.mrf.mxu0  ;;  %v4097_v25 = vpop.f32.mrf.mxu1  ;;  %v8180_v26 = vor.u32 %v9837_v9, %v8177_v12 }
  0xf2   : > { %4368 = vmatpush.bf16.msrb.mxu1 %v8228_v22  ;;  %4334 = vmatmul.bf16.vlgmr.msra.gmra.mxu2 %v10675_v47  ;;  %v9901_v18 = vld [vmem:[%s14754_s1 + $0xc84] sm:$0xf]  ;;  %v8433_v19 = vld [vmem:[%s14754_s1 + $0xc90] sm:$0xf0]  ;;  %v4084_v22 = vadd.f32 %v4083_v17, %v11613_v27  ;;  %v8308_v28 = vor.u32 %v9869_v13, %v8305_v14 }
  0xf3   : > { %4382 = vmatpush.bf16.msrb.mxu2 %v8356_v23  ;;  %4348 = vmatmul.bf16.vlgmr.msra.gmra.mxu3 %v10866_v31  ;;  %v8052_v23 = vor.u32 %v9805_v6, %v8049_v8  ;;  %v8033_v33 = vld [vmem:[%s14754_s1 + $0x970] sm:$0xf0]  ;;  %v9833_v37 = vld [vmem:[%s14754_s1 + $0xa64] sm:$0xf]  ;;  %v8436_v27 = vor.u32 %v9901_v18, %v8433_v19 }
  0xf4   : > { %4396 = vmatpush.bf16.msrb.mxu3 %v8484_v30  ;;  %v9801_v30 = vld [vmem:[%s14754_s1 + $0x964] sm:$0xf]  ;;  %v4098_v42 = vadd.f32 %v4097_v25, %v4084_v22  ;;  %v8161_v48 = vld [vmem:[%s14754_s1 + $0xa70] sm:$0xf0]  ;;  %v4111_v1 = vpop.f32.mrf.mxu2 }
  0xf5   : > { %4355 = vmatpush.bf16.msrb.mxu0 %v8084_v52  ;;  %v9865_v50 = vld [vmem:[%s14754_s1 + $0xb64] sm:$0xf]  ;;  %v8289_v52 = vld [vmem:[%s14754_s1 + $0xb70] sm:$0xf0]  ;;  %v8036_v58 = vor.u32 %v9801_v30, %v8033_v33  ;;  %v8164_v59 = vor.u32 %v9833_v37, %v8161_v48  ;;  %v4125_v6 = vpop.f32.mrf.mxu3 }
  0xf6   : > { %4369 = vmatpush.bf16.msrb.mxu1 %v8212_v55  ;;  %v9897_v55 = vld [vmem:[%s14754_s1 + $0xc64] sm:$0xf]  ;;  %v8292_v60 = vor.u32 %v9865_v50, %v8289_v52  ;;  %v8017_v63 = vld [vmem:[%s14754_s1 + $0x950] sm:$0xf0] }
  0xf7   : > { %4383 = vmatpush.bf16.msrb.mxu2 %v8340_v57  ;;  %v8417_v57 = vld [vmem:[%s14754_s1 + $0xc70] sm:$0xf0]  ;;  %v9829_v56 = vld [vmem:[%s14754_s1 + $0xa44] sm:$0xf] }
  0xf8   : > { %4397 = vmatpush.bf16.msrb.mxu3 %v8468_v62  ;;  %v9797_v62 = vld [vmem:[%s14754_s1 + $0x944] sm:$0xf]  ;;  %v8420_v0 = vor.u32 %v9897_v55, %v8417_v57  ;;  %v8145_v2 = vld [vmem:[%s14754_s1 + $0xa50] sm:$0xf0] }
  0xf9   : > { %4356 = vmatpush.bf16.msrb.mxu0 %v8068_v3  ;;  %v9861_v3 = vld [vmem:[%s14754_s1 + $0xb44] sm:$0xf]  ;;  %v8401_v9 = vld [vmem:[%s14754_s1 + $0xc50] sm:$0xf0]  ;;  %v8148_v13 = vor.u32 %v9829_v56, %v8145_v2 }
  0xfa   : > { %4370 = vmatpush.bf16.msrb.mxu1 %v8196_v4  ;;  %v8273_v4 = vld [vmem:[%s14754_s1 + $0xb50] sm:$0xf0]  ;;  %v9893_v8 = vld [vmem:[%s14754_s1 + $0xc44] sm:$0xf] }
  0xfb   : > { %4384 = vmatpush.bf16.msrb.mxu2 %v8324_v5  ;;  %v4112_v5 = vadd.f32 %v4111_v1, %v4098_v42  ;;  %v8276_v14 = vor.u32 %v9861_v3, %v8273_v4  ;;  %v9793_v17 = vld [vmem:[%s14754_s1 + $0x924] sm:$0xf]  ;;  %v8001_v18 = vld [vmem:[%s14754_s1 + $0x930] sm:$0xf0]  ;;  %v8404_v22 = vor.u32 %v9893_v8, %v8401_v9 }
  0xfc   : > { %4398 = vmatpush.bf16.msrb.mxu3 %v8452_v11  ;;  %v8020_v11 = vor.u32 %v9797_v62, %v8017_v63  ;;  %v9825_v19 = vld [vmem:[%s14754_s1 + $0xa24] sm:$0xf]  ;;  %v8385_v30 = vld [vmem:[%s14754_s1 + $0xc30] sm:$0xf0]  ;;  %v8004_v33 = vor.u32 %v9793_v17, %v8001_v18 }
  0xfd   : > { %4357 = vmatpush.bf16.msrb.mxu0 %v8052_v23  ;;  %v11820_v12 = vadd.f32 %v4125_v6, %v4112_v5  ;;  %v8129_v23 = vld [vmem:[%s14754_s1 + $0xa30] sm:$0xf0]  ;;  %v9857_v25 = vld [vmem:[%s14754_s1 + $0xb24] sm:$0xf] }
  0xfe   : > { %4371 = vmatpush.bf16.msrb.mxu1 %v8180_v26  ;;  %v8257_v26 = vld [vmem:[%s14754_s1 + $0xb30] sm:$0xf0]  ;;  %v9789_v37 = vld [vmem:[%s14754_s1 + $0x904] sm:$0xf]  ;;  %v8132_v42 = vor.u32 %v9825_v19, %v8129_v23 }
  0xff   : > { %4385 = vmatpush.bf16.msrb.mxu2 %v8308_v28  ;;  %v9889_v28 = vld [vmem:[%s14754_s1 + $0xc24] sm:$0xf]  ;;  %v8260_v48 = vor.u32 %v9857_v25, %v8257_v26  ;;  %v8113_v52 = vld [vmem:[%s14754_s1 + $0xa10] sm:$0xf0] }
 0x100   : > { %4399 = vmatpush.bf16.msrb.mxu3 %v8436_v27  ;;  %v7985_v27 = vld [vmem:[%s14754_s1 + $0x910] sm:$0xf0]  ;;  %v9821_v50 = vld [vmem:[%s14754_s1 + $0xa04] sm:$0xf]  ;;  %v8388_v57 = vor.u32 %v9889_v28, %v8385_v30  ;;  %v11912_v28 = vpop.f32.mrf.mxu0 }
 0x101   : > { %4358 = vmatpush.bf16.msrb.mxu0 %v8036_v58  ;;  %v9853_v55 = vld [vmem:[%s14754_s1 + $0xb04] sm:$0xf]  ;;  %v8241_v58 = vld [vmem:[%s14754_s1 + $0xb10] sm:$0xf0]  ;;  %v8116_v4 = vor.u32 %v9821_v50, %v8113_v52  ;;  %14766 = vst [vmem:[#allocation6_spill] sm:$0xff] %v11912_v28 }
 0x102   : > { %4372 = vmatpush.bf16.msrb.mxu1 %v8164_v59  ;;  %v9885_v59 = vld [vmem:[%s14754_s1 + $0xc04] sm:$0xf]  ;;  %v8609_v63 = vld [vmem:[%s14754_s1 + $0xdf0] sm:$0xf0]  ;;  %v8244_v5 = vor.u32 %v9853_v55, %v8241_v58 }
 0x103   : > { %4386 = vmatpush.bf16.msrb.mxu2 %v8292_v60  ;;  %v8369_v60 = vld [vmem:[%s14754_s1 + $0xc10] sm:$0xf0]  ;;  %v9945_v62 = vld [vmem:[%s14754_s1 + $0xde4] sm:$0xf] }
 0x104   : > { %4400 = vmatpush.bf16.msrb.mxu3 %v8420_v0  ;;  %v9977_v56 = vld [vmem:[%s14754_s1 + $0xee4] sm:$0xf]  ;;  %v7988_v0 = vor.u32 %v9789_v37, %v7985_v27  ;;  %v8737_v1 = vld [vmem:[%s14754_s1 + $0xef0] sm:$0xf0]  ;;  %v8372_v9 = vor.u32 %v9885_v59, %v8369_v60  ;;  %v11920_v37 = vpop.f32.mrf.mxu1 }
 0x105   : > { %4359 = vmatpush.bf16.msrb.mxu0 %v8020_v11  ;;  %v10009_v2 = vld [vmem:[%s14754_s1 + $0xfe4] sm:$0xf]  ;;  %v8865_v3 = vld [vmem:[%s14754_s1 + $0xff0] sm:$0xf0]  ;;  %v8612_v11 = vor.u32 %v9945_v62, %v8609_v63  ;;  %14767 = vst [vmem:[#allocation7_spill] sm:$0xff] %v11920_v37 }
 0x106   : > { %4373 = vmatpush.bf16.msrb.mxu1 %v8148_v13  ;;  %v10041_v6 = vld [vmem:[%s14754_s1 + $0x10e4] sm:$0xf]  ;;  %v8993_v8 = vld [vmem:[%s14754_s1 + $0x10f0] sm:$0xf0]  ;;  %v8740_v13 = vor.u32 %v9977_v56, %v8737_v1 }
 0x107   : > { %4387 = vmatpush.bf16.msrb.mxu2 %v8276_v14  ;;  %v8868_v14 = vor.u32 %v10009_v2, %v8865_v3  ;;  %v9941_v17 = vld [vmem:[%s14754_s1 + $0xdc4] sm:$0xf]  ;;  %v8593_v18 = vld [vmem:[%s14754_s1 + $0xdd0] sm:$0xf0] }
 0x108   : > { %4401 = vmatpush.bf16.msrb.mxu3 %v8404_v22  ;;  %v9973_v19 = vld [vmem:[%s14754_s1 + $0xec4] sm:$0xf]  ;;  %v8996_v22 = vor.u32 %v10041_v6, %v8993_v8  ;;  %v8721_v23 = vld [vmem:[%s14754_s1 + $0xed0] sm:$0xf0]  ;;  %v8596_v27 = vor.u32 %v9941_v17, %v8593_v18 }
 0x109   : > { %4360 = vmatpush.bf16.msrb.mxu0 %v8004_v33  ;;  %v10005_v25 = vld [vmem:[%s14754_s1 + $0xfc4] sm:$0xf]  ;;  %v8849_v26 = vld [vmem:[%s14754_s1 + $0xfd0] sm:$0xf0] }
 0x10a   : > { %4374 = vmatpush.bf16.msrb.mxu1 %v8132_v42  ;;  %v10037_v30 = vld [vmem:[%s14754_s1 + $0x10c4] sm:$0xf]  ;;  %v8977_v33 = vld [vmem:[%s14754_s1 + $0x10d0] sm:$0xf0]  ;;  %v8724_v42 = vor.u32 %v9973_v19, %v8721_v23 }
 0x10b   : > { %4388 = vmatpush.bf16.msrb.mxu2 %v8260_v48  ;;  %v8852_v48 = vor.u32 %v10005_v25, %v8849_v26  ;;  %v9937_v50 = vld [vmem:[%s14754_s1 + $0xda4] sm:$0xf]  ;;  %v8577_v52 = vld [vmem:[%s14754_s1 + $0xdb0] sm:$0xf0] }
 0x10c   : > { %4402 = vmatpush.bf16.msrb.mxu3 %v8388_v57  ;;  %v9969_v55 = vld [vmem:[%s14754_s1 + $0xea4] sm:$0xf]  ;;  %v8980_v57 = vor.u32 %v10037_v30, %v8977_v33  ;;  %v8705_v58 = vld [vmem:[%s14754_s1 + $0xeb0] sm:$0xf0]  ;;  %v8580_v56 = vor.u32 %v9937_v50, %v8577_v52 }
 0x10d   : > { %4361 = vmatpush.bf16.msrb.mxu0 %v7988_v0  ;;  %v10001_v59 = vld [vmem:[%s14754_s1 + $0xfa4] sm:$0xf]  ;;  %v8833_v60 = vld [vmem:[%s14754_s1 + $0xfb0] sm:$0xf0]  ;;  %v8708_v0 = vor.u32 %v9969_v55, %v8705_v58 }
 0x10e   : > { %4375 = vmatpush.bf16.msrb.mxu1 %v8116_v4  ;;  %v10033_v62 = vld [vmem:[%s14754_s1 + $0x10a4] sm:$0xf]  ;;  %v8961_v63 = vld [vmem:[%s14754_s1 + $0x10b0] sm:$0xf0]  ;;  %v8836_v1 = vor.u32 %v10001_v59, %v8833_v60 }
 0x10f   : > { %4389 = vmatpush.bf16.msrb.mxu2 %v8244_v5  ;;  %v9933_v2 = vld [vmem:[%s14754_s1 + $0xd84] sm:$0xf]  ;;  %v8561_v3 = vld [vmem:[%s14754_s1 + $0xd90] sm:$0xf0]  ;;  %v11959_v5 = vpop.f32.mrf.mxu2  ;;  %v8964_v6 = vor.u32 %v10033_v62, %v8961_v63 }
 0x110   : > { %4403 = vmatpush.bf16.msrb.mxu3 %v8372_v9  ;;  %4362 = vmatmul.bf16.vlgmr.msrb.gmra.mxu0 %v10879_v36  ;;  %v9965_v4 = vld [vmem:[%s14754_s1 + $0xe84] sm:$0xf]  ;;  %14768 = vst [vmem:[#allocation8_spill] sm:$0xff] %v11959_v5  ;;  %v8689_v8 = vld [vmem:[%s14754_s1 + $0xe90] sm:$0xf0] }
 0x111   : > { %4410 = vmatpush.bf16.msra.mxu0 %v8612_v11  ;;  %4376 = vmatmul.bf16.vlgmr.msrb.gmra.mxu1 %v10877_v35  ;;  %v9997_v9 = vld [vmem:[%s14754_s1 + $0xf84] sm:$0xf]  ;;  %v8817_v11 = vld [vmem:[%s14754_s1 + $0xf90] sm:$0xf0]  ;;  %v8692_v25 = vor.u32 %v9965_v4, %v8689_v8 }
 0x112   : > { %4424 = vmatpush.bf16.msra.mxu1 %v8740_v13  ;;  %4390 = vmatmul.bf16.vlgmr.msrb.gmra.mxu2 %v10887_v40  ;;  %v11970_v13 = vpop.f32.mrf.mxu3  ;;  %v10029_v17 = vld [vmem:[%s14754_s1 + $0x1084] sm:$0xf]  ;;  %v8945_v18 = vld [vmem:[%s14754_s1 + $0x1090] sm:$0xf0]  ;;  %v4153_v23 = vpop.f32.mrf.mxu1  ;;  %v8820_v26 = vor.u32 %v9997_v9, %v8817_v11 }
 0x113   : > { %4438 = vmatpush.bf16.msra.mxu2 %v8868_v14  ;;  %4404 = vmatmul.bf16.vlgmr.msrb.gmra.mxu3 %v11078_v32  ;;  %14769 = vst [vmem:[#allocation9_spill] sm:$0xff] %v11970_v13  ;;  %v4139_v14 = vpop.f32.mrf.mxu0  ;;  %v9929_v30 = vld [vmem:[%s14754_s1 + $0xd64] sm:$0xf]  ;;  %v8545_v33 = vld [vmem:[%s14754_s1 + $0xd70] sm:$0xf0] }
 0x114   : > { %4452 = vmatpush.bf16.msra.mxu3 %v8996_v22  ;;  %v4140_v19 = vadd.f32 %v4139_v14, %v11820_v12  ;;  %v8564_v22 = vor.u32 %v9933_v2, %v8561_v3  ;;  %v8948_v12 = vor.u32 %v10029_v17, %v8945_v18  ;;  %v9993_v50 = vld [vmem:[%s14754_s1 + $0xf64] sm:$0xf]  ;;  %v8801_v52 = vld [vmem:[%s14754_s1 + $0xf70] sm:$0xf0]  ;;  %v8548_v58 = vor.u32 %v9929_v30, %v8545_v33 }
 0x115   : > { %4411 = vmatpush.bf16.msra.mxu0 %v8596_v27  ;;  %v9961_v27 = vld [vmem:[%s14754_s1 + $0xe64] sm:$0xf]  ;;  %v8804_v60 = vor.u32 %v9993_v50, %v8801_v52  ;;  %v8529_v63 = vld [vmem:[%s14754_s1 + $0xd50] sm:$0xf0] }
 0x116   : > { %4425 = vmatpush.bf16.msra.mxu1 %v8724_v42  ;;  %v4154_v42 = vadd.f32 %v4153_v23, %v4140_v19  ;;  %v10025_v55 = vld [vmem:[%s14754_s1 + $0x1064] sm:$0xf]  ;;  %v8657_v2 = vld [vmem:[%s14754_s1 + $0xe50] sm:$0xf0] }
 0x117   : > { %4439 = vmatpush.bf16.msra.mxu2 %v8852_v48  ;;  %v8673_v48 = vld [vmem:[%s14754_s1 + $0xe70] sm:$0xf0]  ;;  %v9925_v62 = vld [vmem:[%s14754_s1 + $0xd44] sm:$0xf] }
 0x118   : > { %4453 = vmatpush.bf16.msra.mxu3 %v8980_v57  ;;  %v8929_v57 = vld [vmem:[%s14754_s1 + $0x1070] sm:$0xf0]  ;;  %v8676_v59 = vor.u32 %v9961_v27, %v8673_v48  ;;  %v9989_v3 = vld [vmem:[%s14754_s1 + $0xf44] sm:$0xf]  ;;  %v8532_v14 = vor.u32 %v9925_v62, %v8529_v63 }
 0x119   : > { %4412 = vmatpush.bf16.msra.mxu0 %v8580_v56  ;;  %v9957_v56 = vld [vmem:[%s14754_s1 + $0xe44] sm:$0xf]  ;;  %v8785_v4 = vld [vmem:[%s14754_s1 + $0xf50] sm:$0xf0] }
 0x11a   : > { %4426 = vmatpush.bf16.msra.mxu1 %v8708_v0  ;;  %v8932_v0 = vor.u32 %v10025_v55, %v8929_v57  ;;  %v4181_v8 = vpop.f32.mrf.mxu3  ;;  %v10021_v9 = vld [vmem:[%s14754_s1 + $0x1044] sm:$0xf]  ;;  %v8913_v11 = vld [vmem:[%s14754_s1 + $0x1050] sm:$0xf0]  ;;  %v8660_v18 = vor.u32 %v9957_v56, %v8657_v2  ;;  %v8788_v19 = vor.u32 %v9989_v3, %v8785_v4 }
 0x11b   : > { %4440 = vmatpush.bf16.msra.mxu2 %v8836_v1  ;;  %v4167_v1 = vpop.f32.mrf.mxu2  ;;  %v8513_v23 = vld [vmem:[%s14754_s1 + $0xd30] sm:$0xf0]  ;;  %v9985_v33 = vld [vmem:[%s14754_s1 + $0xf24] sm:$0xf] }
 0x11c   : > { %4454 = vmatpush.bf16.msra.mxu3 %v8964_v6  ;;  %v4168_v6 = vadd.f32 %v4167_v1, %v4154_v42  ;;  %v8641_v30 = vld [vmem:[%s14754_s1 + $0xe30] sm:$0xf0]  ;;  %v9917_v50 = vld [vmem:[%s14754_s1 + $0xd04] sm:$0xf] }
 0x11d   : > { %4413 = vmatpush.bf16.msra.mxu0 %v8564_v22  ;;  %v9921_v22 = vld [vmem:[%s14754_s1 + $0xd24] sm:$0xf]  ;;  %v8769_v27 = vld [vmem:[%s14754_s1 + $0xf30] sm:$0xf0] }
 0x11e   : > { %4427 = vmatpush.bf16.msra.mxu1 %v8692_v25  ;;  %v12027_v17 = vadd.f32 %v4181_v8, %v4168_v6  ;;  %v9953_v25 = vld [vmem:[%s14754_s1 + $0xe24] sm:$0xf]  ;;  %v8897_v42 = vld [vmem:[%s14754_s1 + $0x1030] sm:$0xf0]  ;;  %v8516_v48 = vor.u32 %v9921_v22, %v8513_v23  ;;  %v8772_v57 = vor.u32 %v9985_v33, %v8769_v27  ;;  %v6951_v8 = vld [vmem:[%s14754_s1 + $0xe8] sm:$0xf] }
 0x11f   : > { %4441 = vmatpush.bf16.msra.mxu2 %v8820_v26  ;;  %v8916_v26 = vor.u32 %v10021_v9, %v8913_v11  ;;  %v8497_v52 = vld [vmem:[%s14754_s1 + $0xd10] sm:$0xf0]  ;;  %v8644_v55 = vor.u32 %v9953_v25, %v8641_v30  ;;  %v10013_v56 = vld [vmem:[%s14754_s1 + $0x1004] sm:$0xf]  ;;  %v9532_v9 = vld [vmem:[%s14754_s1 + $0xf4] sm:$0xf0] }
 0x120   : > { %4455 = vmatpush.bf16.msra.mxu3 %v8948_v12  ;;  %v10017_v12 = vld [vmem:[%s14754_s1 + $0x1024] sm:$0xf]  ;;  %v8753_v63 = vld [vmem:[%s14754_s1 + $0xf10] sm:$0xf0]  ;;  %v8500_v4 = vor.u32 %v9917_v50, %v8497_v52  ;;  %v9528_v50 = vld [vmem:[%s14754_s1 + $0xd4] sm:$0xf0]  ;;  %v12119_v52 = vpop.f32.mrf.mxu0 }
 0x121   : > { %4414 = vmatpush.bf16.msra.mxu0 %v8548_v58  ;;  %v9949_v58 = vld [vmem:[%s14754_s1 + $0xe04] sm:$0xf]  ;;  %v8900_v62 = vor.u32 %v10017_v12, %v8897_v42  ;;  %v9121_v2 = vld [vmem:[%s14754_s1 + $0x11f0] sm:$0xf0]  ;;  %14770 = vst [vmem:[#allocation10_spill] sm:$0xff] %v12119_v52 }
 0x122   : > { %4428 = vmatpush.bf16.msra.mxu1 %v8676_v59  ;;  %v8625_v59 = vld [vmem:[%s14754_s1 + $0xe10] sm:$0xf0]  ;;  %v10073_v1 = vld [vmem:[%s14754_s1 + $0x11e4] sm:$0xf] }
 0x123   : > { %4442 = vmatpush.bf16.msra.mxu2 %v8804_v60  ;;  %v9981_v60 = vld [vmem:[%s14754_s1 + $0xf04] sm:$0xf]  ;;  %v9249_v6 = vld [vmem:[%s14754_s1 + $0x12f0] sm:$0xf0]  ;;  %v8628_v11 = vor.u32 %v9949_v58, %v8625_v59  ;;  %v9124_v23 = vor.u32 %v10073_v1, %v9121_v2  ;;  %v12127_v58 = vpop.f32.mrf.mxu1 }
 0x124   : > { %4456 = vmatpush.bf16.msra.mxu3 %v8932_v0  ;;  %v8881_v0 = vld [vmem:[%s14754_s1 + $0x1010] sm:$0xf0]  ;;  %v10105_v3 = vld [vmem:[%s14754_s1 + $0x12e4] sm:$0xf]  ;;  %14771 = vst [vmem:[#allocation11_spill] sm:$0xff] %v12127_v58 }
 0x125   : > { %4415 = vmatpush.bf16.msra.mxu0 %v8532_v14  ;;  %v8756_v14 = vor.u32 %v9981_v60, %v8753_v63  ;;  %v8884_v22 = vor.u32 %v10013_v56, %v8881_v0  ;;  %v9252_v25 = vor.u32 %v10105_v3, %v9249_v6  ;;  %v10069_v30 = vld [vmem:[%s14754_s1 + $0x11c4] sm:$0xf]  ;;  %v9105_v33 = vld [vmem:[%s14754_s1 + $0x11d0] sm:$0xf0]  ;;  %v6919_v3 = vld [vmem:[%s14754_s1 + $0xa8] sm:$0xf] }
 0x126   : > { %4429 = vmatpush.bf16.msra.mxu1 %v8660_v18  ;;  %v7079_v18 = vld [vmem:[%s14754_s1 + $0x1e8] sm:$0xf]  ;;  %v10101_v27 = vld [vmem:[%s14754_s1 + $0x12c4] sm:$0xf]  ;;  %v9233_v42 = vld [vmem:[%s14754_s1 + $0x12d0] sm:$0xf0]  ;;  %v9108_v59 = vor.u32 %v10069_v30, %v9105_v33 }
 0x127   : > { %4443 = vmatpush.bf16.msra.mxu2 %v8788_v19  ;;  %v9564_v19 = vld [vmem:[%s14754_s1 + $0x1f4] sm:$0xf0]  ;;  %v9236_v60 = vor.u32 %v10101_v27, %v9233_v42  ;;  %v10065_v63 = vld [vmem:[%s14754_s1 + $0x11a4] sm:$0xf]  ;;  %v9089_v56 = vld [vmem:[%s14754_s1 + $0x11b0] sm:$0xf0] }
 0x128   : > { %4457 = vmatpush.bf16.msra.mxu3 %v8916_v26  ;;  %v6952_v26 = vor.u32 %v9532_v9, %v6951_v8  ;;  %v7080_v12 = vor.u32 %v9564_v19, %v7079_v18  ;;  %v10097_v0 = vld [vmem:[%s14754_s1 + $0x12a4] sm:$0xf]  ;;  %v9217_v2 = vld [vmem:[%s14754_s1 + $0x12b0] sm:$0xf0]  ;;  %v7047_v6 = vld [vmem:[%s14754_s1 + $0x1a8] sm:$0xf]  ;;  %v9092_v9 = vor.u32 %v10065_v63, %v9089_v56 }
 0x129   : > { %4416 = vmatpush.bf16.msra.mxu0 %v8516_v48  ;;  %v6935_v48 = vld [vmem:[%s14754_s1 + $0xc8] sm:$0xf]  ;;  %v9556_v8 = vld [vmem:[%s14754_s1 + $0x1b4] sm:$0xf0]  ;;  %v10061_v18 = vld [vmem:[%s14754_s1 + $0x1184] sm:$0xf] }
 0x12a   : > { %4430 = vmatpush.bf16.msra.mxu1 %v8644_v55  ;;  %v7063_v55 = vld [vmem:[%s14754_s1 + $0x1c8] sm:$0xf]  ;;  %v9073_v19 = vld [vmem:[%s14754_s1 + $0x1190] sm:$0xf0]  ;;  %v9520_v33 = vld [vmem:[%s14754_s1 + $0x94] sm:$0xf0] }
 0x12b   : > { %4444 = vmatpush.bf16.msra.mxu2 %v8772_v57  ;;  %v9560_v57 = vld [vmem:[%s14754_s1 + $0x1d4] sm:$0xf0]  ;;  %v6903_v30 = vld [vmem:[%s14754_s1 + $0x88] sm:$0xf]  ;;  %v10089_v63 = vld [vmem:[%s14754_s1 + $0x1264] sm:$0xf] }
 0x12c   : > { %4458 = vmatpush.bf16.msra.mxu3 %v8900_v62  ;;  %v6936_v62 = vor.u32 %v9528_v50, %v6935_v48  ;;  %v7064_v1 = vor.u32 %v9560_v57, %v7063_v55  ;;  %v9552_v42 = vld [vmem:[%s14754_s1 + $0x194] sm:$0xf0]  ;;  %v9076_v50 = vor.u32 %v10061_v18, %v9073_v19  ;;  %v10085_v18 = vld [vmem:[%s14754_s1 + $0x1244] sm:$0xf] }
 0x12d   : > { %4417 = vmatpush.bf16.msra.mxu0 %v8500_v4  ;;  %v9524_v4 = vld [vmem:[%s14754_s1 + $0xb4] sm:$0xf0]  ;;  %v4195_v27 = vpop.f32.mrf.mxu0 }
 0x12e   : > { %4431 = vmatpush.bf16.msra.mxu1 %v8628_v11  ;;  %v9220_v11 = vor.u32 %v10097_v0, %v9217_v2  ;;  %v4196_v48 = vadd.f32 %v4195_v27, %v12027_v17  ;;  %v4209_v55 = vpop.f32.mrf.mxu1  ;;  %v9185_v0 = vld [vmem:[%s14754_s1 + $0x1270] sm:$0xf0]  ;;  %v9516_v2 = vld [vmem:[%s14754_s1 + $0x74] sm:$0xf0]  ;;  %v6999_v27 = vld [vmem:[%s14754_s1 + $0x148] sm:$0xf] }
 0x12f   : > { %4445 = vmatpush.bf16.msra.mxu2 %v8756_v14  ;;  %v6920_v14 = vor.u32 %v9524_v4, %v6919_v3  ;;  %v7015_v3 = vld [vmem:[%s14754_s1 + $0x168] sm:$0xf]  ;;  %v9548_v4 = vld [vmem:[%s14754_s1 + $0x174] sm:$0xf0] }
 0x130   : > { %4459 = vmatpush.bf16.msra.mxu3 %v8884_v22  ;;  %4418 = vmatmul.bf16.vlgmr.msra.gmra.mxu0 %v11091_v41  ;;  %v10093_v22 = vld [vmem:[%s14754_s1 + $0x1284] sm:$0xf]  ;;  %v4210_v56 = vadd.f32 %v4209_v55, %v4196_v48  ;;  %v7016_v19 = vor.u32 %v9548_v4, %v7015_v3  ;;  %v9009_v4 = vld [vmem:[%s14754_s1 + $0x1110] sm:$0xf0] }
 0x131   : > { %4466 = vmatpush.bf16.msrb.mxu0 %v9124_v23  ;;  %4432 = vmatmul.bf16.vlgmr.msra.gmra.mxu1 %v11089_v38  ;;  %v12166_v23 = vpop.f32.mrf.mxu2  ;;  %v10049_v55 = vld [vmem:[%s14754_s1 + $0x1124] sm:$0xf] }
 0x132   : > { %4480 = vmatpush.bf16.msrb.mxu1 %v9252_v25  ;;  %4446 = vmatmul.bf16.vlgmr.msra.gmra.mxu2 %v11099_v46  ;;  %14772 = vst [vmem:[#allocation12_spill] sm:$0xff] %v12166_v23  ;;  %v7048_v25 = vor.u32 %v9556_v8, %v7047_v6  ;;  %v9188_v8 = vor.u32 %v10089_v63, %v9185_v0  ;;  %v9153_v63 = vld [vmem:[%s14754_s1 + $0x1230] sm:$0xf0]  ;;  %v6983_v0 = vld [vmem:[%s14754_s1 + $0x128] sm:$0xf] }
 0x133   : > { %4494 = vmatpush.bf16.msrb.mxu2 %v6952_v26  ;;  %4460 = vmatmul.bf16.vlgmr.msra.gmra.mxu3 %v11288_v49  ;;  %v9201_v26 = vld [vmem:[%s14754_s1 + $0x1290] sm:$0xf0]  ;;  %v10045_v3 = vld [vmem:[%s14754_s1 + $0x1104] sm:$0xf]  ;;  %v10044_v23 = vld [vmem:[%s14754_s1 + $0x10f4] sm:$0xf0] }
 0x134   : > { %4508 = vmatpush.bf16.msrb.mxu3 %v7080_v12  ;;  %v7031_v12 = vld [vmem:[%s14754_s1 + $0x188] sm:$0xf]  ;;  %v9204_v57 = vor.u32 %v10093_v22, %v9201_v26 }
 0x135   : > { %4467 = vmatpush.bf16.msrb.mxu0 %v9108_v59  ;;  %v6904_v59 = vor.u32 %v9520_v33, %v6903_v30  ;;  %v7032_v17 = vor.u32 %v9552_v42, %v7031_v12  ;;  %v6871_v26 = vld [vmem:[%s14754_s1 + $0x48] sm:$0xf]  ;;  %v9512_v30 = vld [vmem:[%s14754_s1 + $0x54] sm:$0xf0] }
 0x136   : > { %4481 = vmatpush.bf16.msrb.mxu1 %v9236_v60  ;;  %v10057_v60 = vld [vmem:[%s14754_s1 + $0x1164] sm:$0xf]  ;;  %v9544_v12 = vld [vmem:[%s14754_s1 + $0x154] sm:$0xf0] }
 0x137   : > { %4495 = vmatpush.bf16.msrb.mxu2 %v6936_v62  ;;  %v9057_v62 = vld [vmem:[%s14754_s1 + $0x1170] sm:$0xf0] }
 0x138   : > { %4509 = vmatpush.bf16.msrb.mxu3 %v7064_v1  ;;  %v6887_v1 = vld [vmem:[%s14754_s1 + $0x68] sm:$0xf]  ;;  %v9060_v6 = vor.u32 %v10057_v60, %v9057_v62  ;;  %v12243_v60 = vpop.f32.mrf.mxu3  ;;  %v7000_v62 = vor.u32 %v9544_v12, %v6999_v27  ;;  %v9012_v12 = vor.u32 %v10045_v3, %v9009_v4  ;;  %v9592_v3 = vld [vmem:[%s14754_s1 + $0x2d4] sm:$0xf0] }
 0x139   : > { %4468 = vmatpush.bf16.msrb.mxu0 %v9092_v9  ;;  %v6888_v9 = vor.u32 %v9516_v2, %v6887_v1  ;;  %v4223_v22 = vpop.f32.mrf.mxu2  ;;  %14774 = vst [vmem:[#allocation14_spill] sm:$0xff] %v12243_v60  ;;  %v9540_v1 = vld [vmem:[%s14754_s1 + $0x134] sm:$0xf0]  ;;  %v7335_v27 = vld [vmem:[%s14754_s1 + $0x3e8] sm:$0xf] }
 0x13a   : > { %4482 = vmatpush.bf16.msrb.mxu1 %v9220_v11  ;;  %v10053_v11 = vld [vmem:[%s14754_s1 + $0x1144] sm:$0xf]  ;;  %v12226_v33 = vadd.f32 %v4223_v22, %v4210_v56  ;;  %v9508_v56 = vld [vmem:[%s14754_s1 + $0x34] sm:$0xf0]  ;;  %v6967_v22 = vld [vmem:[%s14754_s1 + $0x108] sm:$0xf] }
 0x13b   : > { %4496 = vmatpush.bf16.msrb.mxu2 %v6920_v14  ;;  %v9041_v14 = vld [vmem:[%s14754_s1 + $0x1150] sm:$0xf0]  ;;  %v7319_v4 = vld [vmem:[%s14754_s1 + $0x3c8] sm:$0xf] }
 0x13c   : > { %4510 = vmatpush.bf16.msrb.mxu3 %v7048_v25  ;;  %v9169_v25 = vld [vmem:[%s14754_s1 + $0x1250] sm:$0xf0]  ;;  %14773 = vst [vmem:[#allocation13_spill] sm:$0xff] %v12226_v33  ;;  %v9044_v42 = vor.u32 %v10053_v11, %v9041_v14  ;;  %v6839_v14 = vld [vmem:[%s14754_s1 + $0x8] sm:$0xf] }
 0x13d   : > { %4469 = vmatpush.bf16.msrb.mxu0 %v9076_v50  ;;  %v9172_v48 = vor.u32 %v10085_v18, %v9169_v25  ;;  %v6872_v50 = vor.u32 %v9512_v30, %v6871_v26  ;;  %v9137_v11 = vld [vmem:[%s14754_s1 + $0x1210] sm:$0xf0]  ;;  %v6984_v18 = vor.u32 %v9540_v1, %v6983_v0  ;;  %v9536_v25 = vld [vmem:[%s14754_s1 + $0x114] sm:$0xf0]  ;;  %v7207_v26 = vld [vmem:[%s14754_s1 + $0x2e8] sm:$0xf] }
 0x13e   : > { %4483 = vmatpush.bf16.msrb.mxu1 %v9204_v57  ;;  %v9025_v57 = vld [vmem:[%s14754_s1 + $0x1130] sm:$0xf0]  ;;  %v9596_v30 = vld [vmem:[%s14754_s1 + $0x2f4] sm:$0xf0] }
 0x13f   : > { %4497 = vmatpush.bf16.msrb.mxu2 %v6904_v59  ;;  %v10081_v59 = vld [vmem:[%s14754_s1 + $0x1224] sm:$0xf]  ;;  %v9028_v2 = vor.u32 %v10049_v55, %v9025_v57 }
 0x140   : > { %4511 = vmatpush.bf16.msrb.mxu3 %v7032_v17  ;;  %v6855_v17 = vld [vmem:[%s14754_s1 + $0x28] sm:$0xf] }
 0x141   : > { %4470 = vmatpush.bf16.msrb.mxu0 %v9060_v6  ;;  %v9156_v6 = vor.u32 %v10081_v59, %v9153_v63  ;;  %v7591_v59 = vld [vmem:[%s14754_s1 + $0x5e8] sm:$0xf]  ;;  %v6968_v63 = vor.u32 %v9536_v25, %v6967_v22  ;;  %v12334_v25 = vpop.f32.mrf.mxu1 }
 0x142   : > { %4484 = vmatpush.bf16.msrb.mxu1 %v9188_v8  ;;  %v6856_v8 = vor.u32 %v9508_v56, %v6855_v17  ;;  %v7208_v17 = vor.u32 %v9596_v30, %v7207_v26  ;;  %v4237_v56 = vpop.f32.mrf.mxu3  ;;  %14776 = vst [vmem:[#allocation16_spill] sm:$0xff] %v12334_v25 }
 0x143   : > { %4498 = vmatpush.bf16.msrb.mxu2 %v6888_v9  ;;  %v10077_v9 = vld [vmem:[%s14754_s1 + $0x1204] sm:$0xf] }
 0x144   : > { %4512 = vmatpush.bf16.msrb.mxu3 %v7016_v19  ;;  %v9504_v19 = vld [vmem:[%s14754_s1 + $0x14] sm:$0xf0]  ;;  %v9140_v55 = vor.u32 %v10077_v9, %v9137_v11  ;;  %v7447_v9 = vld [vmem:[%s14754_s1 + $0x4c8] sm:$0xf] }
 0x145   : > { %4471 = vmatpush.bf16.msrb.mxu0 %v9044_v42  ;;  %v9628_v42 = vld [vmem:[%s14754_s1 + $0x3f4] sm:$0xf0]  ;;  %v6840_v57 = vor.u32 %v9504_v19, %v6839_v14  ;;  %v12326_v14 = vpop.f32.mrf.mxu0 }
 0x146   : > { %4485 = vmatpush.bf16.msrb.mxu1 %v9172_v48  ;;  %v7463_v48 = vld [vmem:[%s14754_s1 + $0x4e8] sm:$0xf]  ;;  %v7336_v0 = vor.u32 %v9628_v42, %v7335_v27  ;;  %v9656_v11 = vld [vmem:[%s14754_s1 + $0x4d4] sm:$0xf0]  ;;  %14775 = vst [vmem:[#allocation15_spill] sm:$0xff] %v12326_v14 }
 0x147   : > { %4499 = vmatpush.bf16.msrb.mxu2 %v6872_v50  ;;  %v9660_v50 = vld [vmem:[%s14754_s1 + $0x4f4] sm:$0xf0]  ;;  %v7448_v30 = vor.u32 %v9656_v11, %v7447_v9  ;;  %v7175_v27 = vld [vmem:[%s14754_s1 + $0x2a8] sm:$0xf] }
 0x148   : > { %4513 = vmatpush.bf16.msrb.mxu3 %v7000_v62  ;;  %v9692_v62 = vld [vmem:[%s14754_s1 + $0x5f4] sm:$0xf0]  ;;  %v7464_v1 = vor.u32 %v9660_v50, %v7463_v48  ;;  %v7303_v42 = vld [vmem:[%s14754_s1 + $0x3a8] sm:$0xf] }
 0x149   : > { %4472 = vmatpush.bf16.msrb.mxu0 %v9028_v2  ;;  %v7191_v2 = vld [vmem:[%s14754_s1 + $0x2c8] sm:$0xf]  ;;  %v9688_v19 = vld [vmem:[%s14754_s1 + $0x5d4] sm:$0xf0] }
 0x14a   : > { %4486 = vmatpush.bf16.msrb.mxu1 %v9156_v6  ;;  %v7592_v6 = vor.u32 %v9692_v62, %v7591_v59  ;;  %v7192_v22 = vor.u32 %v9592_v3, %v7191_v2  ;;  %v9620_v50 = vld [vmem:[%s14754_s1 + $0x3b4] sm:$0xf0]  ;;  %v7559_v59 = vld [vmem:[%s14754_s1 + $0x5a8] sm:$0xf] }
 0x14b   : > { %4500 = vmatpush.bf16.msrb.mxu2 %v6856_v8  ;;  %v9624_v8 = vld [vmem:[%s14754_s1 + $0x3d4] sm:$0xf0]  ;;  %v7287_v3 = vld [vmem:[%s14754_s1 + $0x388] sm:$0xf] }
 0x14c   : > { %4514 = vmatpush.bf16.msrb.mxu3 %v6984_v18  ;;  %v7575_v18 = vld [vmem:[%s14754_s1 + $0x5c8] sm:$0xf]  ;;  %v7320_v26 = vor.u32 %v9624_v8, %v7319_v4  ;;  %v9684_v62 = vld [vmem:[%s14754_s1 + $0x5b4] sm:$0xf0]  ;;  %v12373_v4 = vpop.f32.mrf.mxu2  ;;  %v12375_v8 = vpop.f32.mrf.mxu3 }
 0x14d   : > { %4473 = vmatpush.bf16.msrb.mxu0 %v9012_v12  ;;  %v9588_v12 = vld [vmem:[%s14754_s1 + $0x2b4] sm:$0xf0]  ;;  %v7576_v48 = vor.u32 %v9688_v19, %v7575_v18  ;;  %14777 = vst [vmem:[#allocation17_spill] sm:$0xff] %v12373_v4  ;;  %v7415_v11 = vld [vmem:[%s14754_s1 + $0x488] sm:$0xf]  ;;  %v4251_v19 = vpop.f32.mrf.mxu0 }
 0x14e   : > { %4487 = vmatpush.bf16.msrb.mxu1 %v9140_v55  ;;  %v7431_v55 = vld [vmem:[%s14754_s1 + $0x4a8] sm:$0xf]  ;;  %v9584_v2 = vld [vmem:[%s14754_s1 + $0x294] sm:$0xf0] }
 0x14f   : > { %4501 = vmatpush.bf16.msrb.mxu2 %v6840_v57  ;;  %v9652_v57 = vld [vmem:[%s14754_s1 + $0x4b4] sm:$0xf0] }
 0x150   : > { %4515 = vmatpush.bf16.msrb.mxu3 %v6968_v63  ;;  %4474 = vmatmul.bf16.vlgmr.msrb.gmra.mxu0 %v11301_v54  ;;  %v7176_v63 = vor.u32 %v9588_v12, %v7175_v27  ;;  %v9616_v9 = vld [vmem:[%s14754_s1 + $0x394] sm:$0xf0] }
 0x151   : > { %4522 = vmatpush.bf16.msra.mxu0 %v7208_v17  ;;  %4488 = vmatmul.bf16.vlgmr.msrb.gmra.mxu1 %v11299_v53  ;;  %v7304_v17 = vor.u32 %v9620_v50, %v7303_v42  ;;  %v9648_v18 = vld [vmem:[%s14754_s1 + $0x494] sm:$0xf0]  ;;  %v7288_v12 = vor.u32 %v9616_v9, %v7287_v3  ;;  %v7143_v50 = vld [vmem:[%s14754_s1 + $0x268] sm:$0xf] }
 0x152   : > { %4536 = vmatpush.bf16.msra.mxu1 %v7336_v0  ;;  %4502 = vmatmul.bf16.vlgmr.msrb.gmra.mxu2 %v10500_v15  ;;  %v7432_v0 = vor.u32 %v9652_v57, %v7431_v55  ;;  %v7416_v42 = vor.u32 %v9648_v18, %v7415_v11  ;;  %v9580_v55 = vld [vmem:[%s14754_s1 + $0x274] sm:$0xf0]  ;;  %v7271_v57 = vld [vmem:[%s14754_s1 + $0x368] sm:$0xf] }
 0x153   : > { %4550 = vmatpush.bf16.msra.mxu2 %v7464_v1  ;;  %4516 = vmatmul.bf16.vlgmr.msrb.gmra.mxu3 %v10507_v21  ;;  %v7159_v1 = vld [vmem:[%s14754_s1 + $0x288] sm:$0xf]  ;;  %v9576_v11 = vld [vmem:[%s14754_s1 + $0x254] sm:$0xf0] }
 0x154   : > { %4564 = vmatpush.bf16.msra.mxu3 %v7592_v6  ;;  %v7560_v6 = vor.u32 %v9684_v62, %v7559_v59  ;;  %v7160_v27 = vor.u32 %v9584_v2, %v7159_v1  ;;  %v9612_v62 = vld [vmem:[%s14754_s1 + $0x374] sm:$0xf0]  ;;  %v7144_v2 = vor.u32 %v9580_v55, %v7143_v50  ;;  %v7127_v9 = vld [vmem:[%s14754_s1 + $0x248] sm:$0xf] }
 0x155   : > { %4523 = vmatpush.bf16.msra.mxu0 %v7192_v22  ;;  %v7543_v22 = vld [vmem:[%s14754_s1 + $0x588] sm:$0xf]  ;;  %v9676_v1 = vld [vmem:[%s14754_s1 + $0x574] sm:$0xf0]  ;;  %v7272_v3 = vor.u32 %v9612_v62, %v7271_v57  ;;  %v7128_v55 = vor.u32 %v9576_v11, %v7127_v9 }
 0x156   : > { %4537 = vmatpush.bf16.msra.mxu1 %v7320_v26  ;;  %v9680_v26 = vld [vmem:[%s14754_s1 + $0x594] sm:$0xf0]  ;;  %v7255_v18 = vld [vmem:[%s14754_s1 + $0x348] sm:$0xf]  ;;  %v4293_v50 = vpop.f32.mrf.mxu3 }
 0x157   : > { %4551 = vmatpush.bf16.msra.mxu2 %v7448_v30  ;;  %v4252_v30 = vadd.f32 %v4251_v19, %v4237_v56  ;;  %v7544_v56 = vor.u32 %v9680_v26, %v7543_v22  ;;  %v4279_v22 = vpop.f32.mrf.mxu2  ;;  %v9608_v26 = vld [vmem:[%s14754_s1 + $0x354] sm:$0xf0] }
 0x158   : > { %4565 = vmatpush.bf16.msra.mxu3 %v7576_v48  ;;  %v4265_v48 = vpop.f32.mrf.mxu1  ;;  %v9668_v9 = vld [vmem:[%s14754_s1 + $0x534] sm:$0xf0] }
 0x159   : > { %4524 = vmatpush.bf16.msra.mxu0 %v7176_v63  ;;  %v4266_v59 = vadd.f32 %v4265_v48, %v4252_v30  ;;  %v7399_v63 = vld [vmem:[%s14754_s1 + $0x468] sm:$0xf]  ;;  %v9672_v48 = vld [vmem:[%s14754_s1 + $0x554] sm:$0xf0] }
 0x15a   : > { %4538 = vmatpush.bf16.msra.mxu1 %v7304_v17  ;;  %v9644_v17 = vld [vmem:[%s14754_s1 + $0x474] sm:$0xf0]  ;;  %v7383_v30 = vld [vmem:[%s14754_s1 + $0x448] sm:$0xf] }
 0x15b   : > { %4552 = vmatpush.bf16.msra.mxu2 %v7432_v0  ;;  %v7527_v0 = vld [vmem:[%s14754_s1 + $0x568] sm:$0xf] }
 0x15c   : > { %4566 = vmatpush.bf16.msra.mxu3 %v7560_v6  ;;  %v7400_v6 = vor.u32 %v9644_v17, %v7399_v63  ;;  %v7528_v19 = vor.u32 %v9676_v1, %v7527_v0  ;;  %v9572_v63 = vld [vmem:[%s14754_s1 + $0x234] sm:$0xf0]  ;;  %v7239_v17 = vld [vmem:[%s14754_s1 + $0x328] sm:$0xf] }
 0x15d   : > { %4525 = vmatpush.bf16.msra.mxu0 %v7160_v27  ;;  %v9640_v27 = vld [vmem:[%s14754_s1 + $0x454] sm:$0xf0] }
 0x15e   : > { %4539 = vmatpush.bf16.msra.mxu1 %v7288_v12  ;;  %v4280_v12 = vadd.f32 %v4279_v22, %v4266_v59  ;;  %v7384_v62 = vor.u32 %v9640_v27, %v7383_v30  ;;  %v7111_v59 = vld [vmem:[%s14754_s1 + $0x228] sm:$0xf]  ;;  %v9604_v1 = vld [vmem:[%s14754_s1 + $0x334] sm:$0xf0] }
 0x15f   : > { %4553 = vmatpush.bf16.msra.mxu2 %v7416_v42  ;;  %v7511_v42 = vld [vmem:[%s14754_s1 + $0x548] sm:$0xf]  ;;  %v7112_v11 = vor.u32 %v9572_v63, %v7111_v59  ;;  %v7240_v22 = vor.u32 %v9604_v1, %v7239_v17  ;;  %v9600_v27 = vld [vmem:[%s14754_s1 + $0x314] sm:$0xf0] }
 0x160   : > { %4567 = vmatpush.bf16.msra.mxu3 %v7544_v56  ;;  %v12440_v57 = vadd.f32 %v4293_v50, %v4280_v12  ;;  %v7256_v56 = vor.u32 %v9608_v26, %v7255_v18  ;;  %v7512_v0 = vor.u32 %v9672_v48, %v7511_v42  ;;  %v7095_v18 = vld [vmem:[%s14754_s1 + $0x208] sm:$0xf]  ;;  %v9632_v48 = vld [vmem:[%s14754_s1 + $0x414] sm:$0xf0] }
 0x161   : > { %4526 = vmatpush.bf16.msra.mxu0 %v7144_v2  ;;  %v7367_v2 = vld [vmem:[%s14754_s1 + $0x428] sm:$0xf]  ;;  %v9756_v17 = vld [vmem:[%s14754_s1 + $0x7f4] sm:$0xf0] }
 0x162   : > { %4540 = vmatpush.bf16.msra.mxu1 %v7272_v3  ;;  %v9636_v3 = vld [vmem:[%s14754_s1 + $0x434] sm:$0xf0]  ;;  %v7223_v30 = vld [vmem:[%s14754_s1 + $0x308] sm:$0xf] }
 0x163   : > { %4554 = vmatpush.bf16.msra.mxu2 %v7400_v6  ;;  %v7495_v6 = vld [vmem:[%s14754_s1 + $0x528] sm:$0xf]  ;;  %v7368_v26 = vor.u32 %v9636_v3, %v7367_v2  ;;  %v9788_v1 = vld [vmem:[%s14754_s1 + $0x8f4] sm:$0xf0]  ;;  %v7224_v2 = vor.u32 %v9600_v27, %v7223_v30 }
 0x164   : > { %4568 = vmatpush.bf16.msra.mxu3 %v7528_v19  ;;  %v9568_v19 = vld [vmem:[%s14754_s1 + $0x214] sm:$0xf0]  ;;  %v7351_v12 = vld [vmem:[%s14754_s1 + $0x408] sm:$0xf]  ;;  %v7496_v42 = vor.u32 %v9668_v9, %v7495_v6 }
 0x165   : > { %4527 = vmatpush.bf16.msra.mxu0 %v7128_v55  ;;  %v7479_v50 = vld [vmem:[%s14754_s1 + $0x508] sm:$0xf]  ;;  %v9664_v55 = vld [vmem:[%s14754_s1 + $0x514] sm:$0xf0]  ;;  %v7096_v63 = vor.u32 %v9568_v19, %v7095_v18  ;;  %v7352_v3 = vor.u32 %v9632_v48, %v7351_v12 }
 0x166   : > { %4541 = vmatpush.bf16.msra.mxu1 %v7256_v56  ;;  %v7719_v56 = vld [vmem:[%s14754_s1 + $0x6e8] sm:$0xf]  ;;  %v9820_v9 = vld [vmem:[%s14754_s1 + $0x9f4] sm:$0xf0] }
 0x167   : > { %4555 = vmatpush.bf16.msra.mxu2 %v7384_v62  ;;  %v9724_v62 = vld [vmem:[%s14754_s1 + $0x6f4] sm:$0xf0]  ;;  %v7847_v59 = vld [vmem:[%s14754_s1 + $0x7e8] sm:$0xf] }
 0x168   : > { %4569 = vmatpush.bf16.msra.mxu3 %v7512_v0  ;;  %v7975_v0 = vld [vmem:[%s14754_s1 + $0x8e8] sm:$0xf]  ;;  %v7720_v18 = vor.u32 %v9724_v62, %v7719_v56  ;;  %v7848_v19 = vor.u32 %v9756_v17, %v7847_v59  ;;  %v9752_v12 = vld [vmem:[%s14754_s1 + $0x7d4] sm:$0xf0]  ;;  %v12540_v62 = vpop.f32.mrf.mxu1 }
 0x169   : > { %4528 = vmatpush.bf16.msra.mxu0 %v7112_v11  ;;  %v8103_v6 = vld [vmem:[%s14754_s1 + $0x9e8] sm:$0xf]  ;;  %v7480_v11 = vor.u32 %v9664_v55, %v7479_v50  ;;  %v7976_v33 = vor.u32 %v9788_v1, %v7975_v0  ;;  %v9784_v48 = vld [vmem:[%s14754_s1 + $0x8d4] sm:$0xf0]  ;;  %v12532_v50 = vpop.f32.mrf.mxu0 }
 0x16a   : > { %4542 = vmatpush.bf16.msra.mxu1 %v7240_v22  ;;  %v7703_v22 = vld [vmem:[%s14754_s1 + $0x6c8] sm:$0xf]  ;;  %v8104_v27 = vor.u32 %v9820_v9, %v8103_v6  ;;  %v9816_v56 = vld [vmem:[%s14754_s1 + $0x9d4] sm:$0xf0] }
 0x16b   : > { %4556 = vmatpush.bf16.msra.mxu2 %v7368_v26  ;;  %v9720_v26 = vld [vmem:[%s14754_s1 + $0x6d4] sm:$0xf0]  ;;  %v7831_v30 = vld [vmem:[%s14754_s1 + $0x7c8] sm:$0xf] }
 0x16c   : > { %4570 = vmatpush.bf16.msra.mxu3 %v7496_v42  ;;  %v7959_v42 = vld [vmem:[%s14754_s1 + $0x8c8] sm:$0xf]  ;;  %v7704_v59 = vor.u32 %v9720_v26, %v7703_v22  ;;  %v9716_v1 = vld [vmem:[%s14754_s1 + $0x6b4] sm:$0xf0] }
 0x16d   : > { %4529 = vmatpush.bf16.msra.mxu0 %v7096_v63  ;;  %v8087_v55 = vld [vmem:[%s14754_s1 + $0x9c8] sm:$0xf]  ;;  %v7832_v63 = vor.u32 %v9752_v12, %v7831_v30  ;;  %v7960_v17 = vor.u32 %v9784_v48, %v7959_v42  ;;  %v9780_v9 = vld [vmem:[%s14754_s1 + $0x8b4] sm:$0xf0]  ;;  %v12579_v42 = vpop.f32.mrf.mxu2 }
 0x16e   : > { %4543 = vmatpush.bf16.msra.mxu1 %v7224_v2  ;;  %v7687_v0 = vld [vmem:[%s14754_s1 + $0x6a8] sm:$0xf] }
 0x16f   : > { %4557 = vmatpush.bf16.msra.mxu2 %v7352_v3  ;;  %v7815_v2 = vld [vmem:[%s14754_s1 + $0x7a8] sm:$0xf]  ;;  %v8088_v3 = vor.u32 %v9816_v56, %v8087_v55  ;;  %v9744_v55 = vld [vmem:[%s14754_s1 + $0x794] sm:$0xf0] }
 0x170   : > { %4571 = vmatpush.bf16.msra.mxu3 %v7480_v11  ;;  %4530 = vmatmul.bf16.vlgmr.msra.gmra.mxu0 %v10505_v20  ;;  %v7943_v6 = vld [vmem:[%s14754_s1 + $0x8a8] sm:$0xf] }
 0x171   : > { %4578 = vmatpush.bf16.msrb.mxu0 %v7720_v18  ;;  %4544 = vmatmul.bf16.vlgmr.msra.gmra.mxu1 %v10520_v29  ;;  %v8071_v11 = vld [vmem:[%s14754_s1 + $0x9a8] sm:$0xf]  ;;  %v9812_v18 = vld [vmem:[%s14754_s1 + $0x9b4] sm:$0xf0]  ;;  %v7944_v26 = vor.u32 %v9780_v9, %v7943_v6 }
 0x172   : > { %4592 = vmatpush.bf16.msrb.mxu1 %v7848_v19  ;;  %4558 = vmatmul.bf16.vlgmr.msra.gmra.mxu2 %v10654_v39  ;;  %v7688_v19 = vor.u32 %v9716_v1, %v7687_v0  ;;  %v7671_v30 = vld [vmem:[%s14754_s1 + $0x688] sm:$0xf]  ;;  %v8072_v48 = vor.u32 %v9812_v18, %v8071_v11  ;;  %v9808_v1 = vld [vmem:[%s14754_s1 + $0x994] sm:$0xf0] }
 0x173   : > { %4606 = vmatpush.bf16.msrb.mxu2 %v7976_v33  ;;  %v9748_v33 = vld [vmem:[%s14754_s1 + $0x7b4] sm:$0xf0]  ;;  %4572 = vmatmul.bf16.vlgmr.msra.gmra.mxu3 %v10667_v44  ;;  %v7799_v12 = vld [vmem:[%s14754_s1 + $0x788] sm:$0xf] }
 0x174   : > { %4620 = vmatpush.bf16.msrb.mxu3 %v8104_v27  ;;  %v7816_v22 = vor.u32 %v9748_v33, %v7815_v2  ;;  %v9712_v27 = vld [vmem:[%s14754_s1 + $0x694] sm:$0xf0]  ;;  %v7927_v56 = vld [vmem:[%s14754_s1 + $0x888] sm:$0xf]  ;;  %v4321_v33 = vpop.f32.mrf.mxu1  ;;  %v7800_v6 = vor.u32 %v9744_v55, %v7799_v12 }
 0x175   : > { %4579 = vmatpush.bf16.msrb.mxu0 %v7704_v59  ;;  %v9776_v59 = vld [vmem:[%s14754_s1 + $0x894] sm:$0xf0]  ;;  %v8055_v0 = vld [vmem:[%s14754_s1 + $0x988] sm:$0xf] }
 0x176   : > { %4593 = vmatpush.bf16.msrb.mxu1 %v7832_v63  ;;  %v12590_v63 = vpop.f32.mrf.mxu3  ;;  %v7928_v9 = vor.u32 %v9776_v59, %v7927_v56  ;;  %v7655_v11 = vld [vmem:[%s14754_s1 + $0x668] sm:$0xf]  ;;  %v9708_v18 = vld [vmem:[%s14754_s1 + $0x674] sm:$0xf0] }
 0x177   : > { %4607 = vmatpush.bf16.msrb.mxu2 %v7960_v17  ;;  %v4307_v17 = vpop.f32.mrf.mxu0  ;;  %v8039_v12 = vld [vmem:[%s14754_s1 + $0x968] sm:$0xf]  ;;  %v7656_v55 = vor.u32 %v9708_v18, %v7655_v11 }
 0x178   : > { %4621 = vmatpush.bf16.msrb.mxu3 %v8088_v3  ;;  %v4308_v2 = vadd.f32 %v4307_v17, %v12440_v57  ;;  %v7672_v3 = vor.u32 %v9712_v27, %v7671_v30  ;;  %v8056_v57 = vor.u32 %v9808_v1, %v8055_v0  ;;  %v9772_v27 = vld [vmem:[%s14754_s1 + $0x874] sm:$0xf0]  ;;  %v7639_v17 = vld [vmem:[%s14754_s1 + $0x648] sm:$0xf] }
 0x179   : > { %4580 = vmatpush.bf16.msrb.mxu0 %v7688_v19  ;;  %v7783_v19 = vld [vmem:[%s14754_s1 + $0x768] sm:$0xf]  ;;  %v9704_v0 = vld [vmem:[%s14754_s1 + $0x654] sm:$0xf0] }
 0x17a   : > { %4594 = vmatpush.bf16.msrb.mxu1 %v7816_v22  ;;  %v4322_v30 = vadd.f32 %v4321_v33, %v4308_v2  ;;  %v9740_v22 = vld [vmem:[%s14754_s1 + $0x774] sm:$0xf0]  ;;  %v7767_v1 = vld [vmem:[%s14754_s1 + $0x748] sm:$0xf] }
 0x17b   : > { %4608 = vmatpush.bf16.msrb.mxu2 %v7944_v26  ;;  %v7911_v26 = vld [vmem:[%s14754_s1 + $0x868] sm:$0xf]  ;;  %v7784_v56 = vor.u32 %v9740_v22, %v7783_v19  ;;  %v9736_v33 = vld [vmem:[%s14754_s1 + $0x754] sm:$0xf0]  ;;  %v7640_v22 = vor.u32 %v9704_v0, %v7639_v17 }
 0x17c   : > { %4622 = vmatpush.bf16.msrb.mxu3 %v8072_v48  ;;  %v9804_v48 = vld [vmem:[%s14754_s1 + $0x974] sm:$0xf0]  ;;  %v7912_v59 = vor.u32 %v9772_v27, %v7911_v26  ;;  %v8023_v19 = vld [vmem:[%s14754_s1 + $0x948] sm:$0xf]  ;;  %v7768_v27 = vor.u32 %v9736_v33, %v7767_v1 }
 0x17d   : > { %4581 = vmatpush.bf16.msrb.mxu0 %v7672_v3  ;;  %v8040_v2 = vor.u32 %v9804_v48, %v8039_v12  ;;  %v4335_v3 = vpop.f32.mrf.mxu2  ;;  %v9700_v48 = vld [vmem:[%s14754_s1 + $0x634] sm:$0xf0]  ;;  %v8007_v0 = vld [vmem:[%s14754_s1 + $0x928] sm:$0xf] }
 0x17e   : > { %4595 = vmatpush.bf16.msrb.mxu1 %v7800_v6  ;;  %v7895_v6 = vld [vmem:[%s14754_s1 + $0x848] sm:$0xf]  ;;  %v4336_v11 = vadd.f32 %v4335_v3, %v4322_v30  ;;  %v4349_v18 = vpop.f32.mrf.mxu3  ;;  %v9764_v17 = vld [vmem:[%s14754_s1 + $0x834] sm:$0xf0] }
 0x17f   : > { %4609 = vmatpush.bf16.msrb.mxu2 %v7928_v9  ;;  %v9768_v9 = vld [vmem:[%s14754_s1 + $0x854] sm:$0xf0]  ;;  %v7623_v30 = vld [vmem:[%s14754_s1 + $0x628] sm:$0xf] }
 0x180   : > { %4623 = vmatpush.bf16.msrb.mxu3 %v8056_v57  ;;  %v9800_v57 = vld [vmem:[%s14754_s1 + $0x954] sm:$0xf0]  ;;  %v12647_v26 = vadd.f32 %v4349_v18, %v4336_v11  ;;  %v7896_v12 = vor.u32 %v9768_v9, %v7895_v6  ;;  %v7751_v3 = vld [vmem:[%s14754_s1 + $0x728] sm:$0xf] }
 0x181   : > { %4582 = vmatpush.bf16.msrb.mxu0 %v7656_v55  ;;  %v8024_v55 = vor.u32 %v9800_v57, %v8023_v19  ;;  %v9796_v1 = vld [vmem:[%s14754_s1 + $0x934] sm:$0xf0]  ;;  %v7607_v33 = vld [vmem:[%s14754_s1 + $0x608] sm:$0xf] }
 0x182   : > { %4596 = vmatpush.bf16.msrb.mxu1 %v7784_v56  ;;  %v9732_v56 = vld [vmem:[%s14754_s1 + $0x734] sm:$0xf0]  ;;  %v7735_v18 = vld [vmem:[%s14754_s1 + $0x708] sm:$0xf] }
 0x183   : > { %4610 = vmatpush.bf16.msrb.mxu2 %v7912_v59  ;;  %v7879_v59 = vld [vmem:[%s14754_s1 + $0x828] sm:$0xf]  ;;  %v9696_v6 = vld [vmem:[%s14754_s1 + $0x614] sm:$0xf0]  ;;  %v7752_v9 = vor.u32 %v9732_v56, %v7751_v3 }
 0x184   : > { %4624 = vmatpush.bf16.msrb.mxu3 %v8040_v2  ;;  %v7624_v2 = vor.u32 %v9700_v48, %v7623_v30  ;;  %v7880_v11 = vor.u32 %v9764_v17, %v7879_v59  ;;  %v9728_v19 = vld [vmem:[%s14754_s1 + $0x714] sm:$0xf0]  ;;  %v7863_v57 = vld [vmem:[%s14754_s1 + $0x808] sm:$0xf]  ;;  %v7608_v56 = vor.u32 %v9696_v6, %v7607_v33 }
 0x185   : > { %4583 = vmatpush.bf16.msrb.mxu0 %v7640_v22  ;;  %v8008_v22 = vor.u32 %v9796_v1, %v8007_v0  ;;  %v9792_v30 = vld [vmem:[%s14754_s1 + $0x914] sm:$0xf0]  ;;  %v8231_v48 = vld [vmem:[%s14754_s1 + $0xae8] sm:$0xf]  ;;  %v7736_v1 = vor.u32 %v9728_v19, %v7735_v18 }
 0x186   : > { %4597 = vmatpush.bf16.msrb.mxu1 %v7768_v27  ;;  %v9760_v27 = vld [vmem:[%s14754_s1 + $0x814] sm:$0xf0]  ;;  %v8487_v17 = vld [vmem:[%s14754_s1 + $0xce8] sm:$0xf] }
 0x187   : > { %4611 = vmatpush.bf16.msrb.mxu2 %v7896_v12  ;;  %v7991_v12 = vld [vmem:[%s14754_s1 + $0x908] sm:$0xf]  ;;  %v9852_v3 = vld [vmem:[%s14754_s1 + $0xaf4] sm:$0xf0]  ;;  %v7864_v4 = vor.u32 %v9760_v27, %v7863_v57 }
 0x188   : > { %4625 = vmatpush.bf16.msrb.mxu3 %v8024_v55  ;;  %v8359_v55 = vld [vmem:[%s14754_s1 + $0xbe8] sm:$0xf]  ;;  %v9884_v59 = vld [vmem:[%s14754_s1 + $0xbf4] sm:$0xf0]  ;;  %v7992_v6 = vor.u32 %v9792_v30, %v7991_v12  ;;  %v8232_v25 = vor.u32 %v9852_v3, %v8231_v48 }
 0x189   : > { %4584 = vmatpush.bf16.msrb.mxu0 %v7624_v2  ;;  %v9916_v0 = vld [vmem:[%s14754_s1 + $0xcf4] sm:$0xf0]  ;;  %v8615_v2 = vld [vmem:[%s14754_s1 + $0xde8] sm:$0xf]  ;;  %v8360_v14 = vor.u32 %v9884_v59, %v8359_v55 }
 0x18a   : > { %4598 = vmatpush.bf16.msrb.mxu1 %v7752_v9  ;;  %v9948_v33 = vld [vmem:[%s14754_s1 + $0xdf4] sm:$0xf0]  ;;  %v8488_v60 = vor.u32 %v9916_v0, %v8487_v17  ;;  %v8215_v9 = vld [vmem:[%s14754_s1 + $0xac8] sm:$0xf] }
 0x18b   : > { %4612 = vmatpush.bf16.msrb.mxu2 %v7880_v11  ;;  %v9848_v11 = vld [vmem:[%s14754_s1 + $0xad4] sm:$0xf0]  ;;  %v8343_v18 = vld [vmem:[%s14754_s1 + $0xbc8] sm:$0xf]  ;;  %v8616_v19 = vor.u32 %v9948_v33, %v8615_v2 }
 0x18c   : > { %4626 = vmatpush.bf16.msrb.mxu3 %v8008_v22  ;;  %v9880_v57 = vld [vmem:[%s14754_s1 + $0xbd4] sm:$0xf0]  ;;  %v8471_v22 = vld [vmem:[%s14754_s1 + $0xcc8] sm:$0xf]  ;;  %v8216_v48 = vor.u32 %v9848_v11, %v8215_v9 }
 0x18d   : > { %4585 = vmatpush.bf16.msrb.mxu0 %v7608_v56  ;;  %v9912_v27 = vld [vmem:[%s14754_s1 + $0xcd4] sm:$0xf0]  ;;  %v8599_v12 = vld [vmem:[%s14754_s1 + $0xdc8] sm:$0xf]  ;;  %v8344_v3 = vor.u32 %v9880_v57, %v8343_v18 }
 0x18e   : > { %4599 = vmatpush.bf16.msrb.mxu1 %v7736_v1  ;;  %v9944_v30 = vld [vmem:[%s14754_s1 + $0xdd4] sm:$0xf0]  ;;  %v8472_v55 = vor.u32 %v9912_v27, %v8471_v22  ;;  %v8199_v56 = vld [vmem:[%s14754_s1 + $0xaa8] sm:$0xf] }
 0x18f   : > { %4613 = vmatpush.bf16.msrb.mxu2 %v7864_v4  ;;  %v9844_v4 = vld [vmem:[%s14754_s1 + $0xab4] sm:$0xf0]  ;;  %v8327_v59 = vld [vmem:[%s14754_s1 + $0xba8] sm:$0xf] }
 0x190   : > { %4627 = vmatpush.bf16.msrb.mxu3 %v7992_v6  ;;  %4586 = vmatmul.bf16.vlgmr.msrb.gmra.mxu0 %v10665_v43  ;;  %v9908_v17 = vld [vmem:[%s14754_s1 + $0xcb4] sm:$0xf0]  ;;  %v8583_v0 = vld [vmem:[%s14754_s1 + $0xda8] sm:$0xf]  ;;  %v8200_v2 = vor.u32 %v9844_v4, %v8199_v56 }
 0x191   : > { %4634 = vmatpush.bf16.msra.mxu0 %v8232_v25  ;;  %v8600_v25 = vor.u32 %v9944_v30, %v8599_v12  ;;  %4600 = vmatmul.bf16.vlgmr.msrb.gmra.mxu1 %v10675_v47  ;;  %v9940_v1 = vld [vmem:[%s14754_s1 + $0xdb4] sm:$0xf0]  ;;  %v8183_v9 = vld [vmem:[%s14754_s1 + $0xa88] sm:$0xf] }
 0x192   : > { %4648 = vmatpush.bf16.msra.mxu1 %v8360_v14  ;;  %v8455_v14 = vld [vmem:[%s14754_s1 + $0xca8] sm:$0xf]  ;;  %4614 = vmatmul.bf16.vlgmr.msrb.gmra.mxu2 %v10866_v31  ;;  %v9840_v11 = vld [vmem:[%s14754_s1 + $0xa94] sm:$0xf0] }
 0x193   : > { %4662 = vmatpush.bf16.msra.mxu2 %v8488_v60  ;;  %v9876_v60 = vld [vmem:[%s14754_s1 + $0xbb4] sm:$0xf0]  ;;  %4628 = vmatmul.bf16.vlgmr.msrb.gmra.mxu3 %v10879_v36  ;;  %v8456_v6 = vor.u32 %v9908_v17, %v8455_v14  ;;  %v8311_v18 = vld [vmem:[%s14754_s1 + $0xb88] sm:$0xf] }
 0x194   : > { %4676 = vmatpush.bf16.msra.mxu3 %v8616_v19  ;;  %v8328_v33 = vor.u32 %v9876_v60, %v8327_v59  ;;  %v8584_v19 = vor.u32 %v9940_v1, %v8583_v0  ;;  %v9872_v57 = vld [vmem:[%s14754_s1 + $0xb94] sm:$0xf0]  ;;  %v8439_v22 = vld [vmem:[%s14754_s1 + $0xc88] sm:$0xf]  ;;  %v12815_v0 = vpop.f32.mrf.mxu0 }
 0x195   : > { %4635 = vmatpush.bf16.msra.mxu0 %v8216_v48  ;;  %v9904_v27 = vld [vmem:[%s14754_s1 + $0xc94] sm:$0xf0]  ;;  %v8567_v12 = vld [vmem:[%s14754_s1 + $0xd88] sm:$0xf]  ;;  %v8184_v48 = vor.u32 %v9840_v11, %v8183_v9 }
 0x196   : > { %4649 = vmatpush.bf16.msra.mxu1 %v8344_v3  ;;  %v9936_v30 = vld [vmem:[%s14754_s1 + $0xd94] sm:$0xf0]  ;;  %v8312_v3 = vor.u32 %v9872_v57, %v8311_v18  ;;  %v8167_v56 = vld [vmem:[%s14754_s1 + $0xa68] sm:$0xf] }
 0x197   : > { %4663 = vmatpush.bf16.msra.mxu2 %v8472_v55  ;;  %v8440_v55 = vor.u32 %v9904_v27, %v8439_v22  ;;  %v9836_v4 = vld [vmem:[%s14754_s1 + $0xa74] sm:$0xf0]  ;;  %v8295_v59 = vld [vmem:[%s14754_s1 + $0xb68] sm:$0xf] }
 0x198   : > { %4677 = vmatpush.bf16.msra.mxu3 %v8600_v25  ;;  %v8568_v25 = vor.u32 %v9936_v30, %v8567_v12  ;;  %v9868_v60 = vld [vmem:[%s14754_s1 + $0xb74] sm:$0xf0]  ;;  %v8423_v14 = vld [vmem:[%s14754_s1 + $0xc68] sm:$0xf] }
 0x199   : > { %4636 = vmatpush.bf16.msra.mxu0 %v8200_v2  ;;  %v9900_v17 = vld [vmem:[%s14754_s1 + $0xc74] sm:$0xf0]  ;;  %v8551_v1 = vld [vmem:[%s14754_s1 + $0xd68] sm:$0xf]  ;;  %v8296_v9 = vor.u32 %v9868_v60, %v8295_v59 }
 0x19a   : > { %4650 = vmatpush.bf16.msra.mxu1 %v8328_v33  ;;  %v9932_v2 = vld [vmem:[%s14754_s1 + $0xd74] sm:$0xf0]  ;;  %v12823_v33 = vpop.f32.mrf.mxu1  ;;  %v8424_v11 = vor.u32 %v9900_v17, %v8423_v14  ;;  %v8151_v18 = vld [vmem:[%s14754_s1 + $0xa48] sm:$0xf]  ;;  %v12858_v14 = vpop.f32.mrf.mxu2 }
 0x19b   : > { %4664 = vmatpush.bf16.msra.mxu2 %v8456_v6  ;;  %v8168_v6 = vor.u32 %v9836_v4, %v8167_v56  ;;  %v8279_v57 = vld [vmem:[%s14754_s1 + $0xb48] sm:$0xf]  ;;  %v8552_v22 = vor.u32 %v9932_v2, %v8551_v1  ;;  %v9864_v27 = vld [vmem:[%s14754_s1 + $0xb54] sm:$0xf0] }
 0x19c   : > { %4678 = vmatpush.bf16.msra.mxu3 %v8584_v19  ;;  %v9832_v19 = vld [vmem:[%s14754_s1 + $0xa54] sm:$0xf0]  ;;  %v8407_v12 = vld [vmem:[%s14754_s1 + $0xc48] sm:$0xf]  ;;  %v8280_v56 = vor.u32 %v9864_v27, %v8279_v57 }
 0x19d   : > { %4637 = vmatpush.bf16.msra.mxu0 %v8184_v48  ;;  %v9896_v30 = vld [vmem:[%s14754_s1 + $0xc54] sm:$0xf0]  ;;  %v8535_v48 = vld [vmem:[%s14754_s1 + $0xd48] sm:$0xf] }
 0x19e   : > { %4651 = vmatpush.bf16.msra.mxu1 %v8312_v3  ;;  %v9928_v3 = vld [vmem:[%s14754_s1 + $0xd54] sm:$0xf0]  ;;  %v8408_v4 = vor.u32 %v9896_v30, %v8407_v12  ;;  %v8135_v59 = vld [vmem:[%s14754_s1 + $0xa28] sm:$0xf] }
 0x19f   : > { %4665 = vmatpush.bf16.msra.mxu2 %v8440_v55  ;;  %v8152_v55 = vor.u32 %v9832_v19, %v8151_v18  ;;  %v8263_v60 = vld [vmem:[%s14754_s1 + $0xb28] sm:$0xf]  ;;  %v8536_v17 = vor.u32 %v9928_v3, %v8535_v48  ;;  %v9860_v1 = vld [vmem:[%s14754_s1 + $0xb34] sm:$0xf0] }
 0x1a0   : > { %4679 = vmatpush.bf16.msra.mxu3 %v8568_v25  ;;  %v9828_v25 = vld [vmem:[%s14754_s1 + $0xa34] sm:$0xf0]  ;;  %v8391_v2 = vld [vmem:[%s14754_s1 + $0xc28] sm:$0xf]  ;;  %v8264_v30 = vor.u32 %v9860_v1, %v8263_v60 }
 0x1a1   : > { %4638 = vmatpush.bf16.msra.mxu0 %v8168_v6  ;;  %v9892_v6 = vld [vmem:[%s14754_s1 + $0xc34] sm:$0xf0]  ;;  %v8519_v18 = vld [vmem:[%s14754_s1 + $0xd28] sm:$0xf] }
 0x1a2   : > { %4652 = vmatpush.bf16.msra.mxu1 %v8296_v9  ;;  %v12869_v9 = vpop.f32.mrf.mxu3  ;;  %v9924_v19 = vld [vmem:[%s14754_s1 + $0xd34] sm:$0xf0]  ;;  %v4377_v57 = vpop.f32.mrf.mxu1  ;;  %v8119_v27 = vld [vmem:[%s14754_s1 + $0xa08] sm:$0xf]  ;;  %v8392_v48 = vor.u32 %v9892_v6, %v8391_v2 }
 0x1a3   : > { %4666 = vmatpush.bf16.msra.mxu2 %v8424_v11  ;;  %14778 = vst [vmem:[#allocation18_spill] sm:$0xff] %v12869_v9  ;;  %v4363_v11 = vpop.f32.mrf.mxu0  ;;  %v9824_v12 = vld [vmem:[%s14754_s1 + $0xa14] sm:$0xf0]  ;;  %v8247_v3 = vld [vmem:[%s14754_s1 + $0xb08] sm:$0xf]  ;;  %v4391_v13 = vpop.f32.mrf.mxu2 }
 0x1a4   : > { %4680 = vmatpush.bf16.msra.mxu3 %v8552_v22  ;;  %v8136_v22 = vor.u32 %v9828_v25, %v8135_v59  ;;  %v8375_v59 = vld [vmem:[%s14754_s1 + $0xc08] sm:$0xf]  ;;  %v8520_v25 = vor.u32 %v9924_v19, %v8519_v18  ;;  %v9920_v60 = vld [vmem:[%s14754_s1 + $0xd14] sm:$0xf0]  ;;  %v8120_v6 = vor.u32 %v9824_v12, %v8119_v27  ;;  %v4364_v12 = vadd.f32 %v4363_v11, %v12647_v26 }
 0x1a5   : > { %4639 = vmatpush.bf16.msra.mxu0 %v8152_v55  ;;  %v9856_v55 = vld [vmem:[%s14754_s1 + $0xb14] sm:$0xf0]  ;;  %v8743_v1 = vld [vmem:[%s14754_s1 + $0xee8] sm:$0xf] }
 0x1a6   : > { %4653 = vmatpush.bf16.msra.mxu1 %v8280_v56  ;;  %v9888_v56 = vld [vmem:[%s14754_s1 + $0xc14] sm:$0xf0]  ;;  %v8871_v2 = vld [vmem:[%s14754_s1 + $0xfe8] sm:$0xf]  ;;  %v8248_v58 = vor.u32 %v9856_v55, %v8247_v3 }
 0x1a7   : > { %4667 = vmatpush.bf16.msra.mxu2 %v8408_v4  ;;  %v8503_v4 = vld [vmem:[%s14754_s1 + $0xd08] sm:$0xf]  ;;  %v10012_v18 = vld [vmem:[%s14754_s1 + $0xff4] sm:$0xf0]  ;;  %v8376_v52 = vor.u32 %v9888_v56, %v8375_v59 }
 0x1a8   : > { %4681 = vmatpush.bf16.msra.mxu3 %v8536_v17  ;;  %v9980_v17 = vld [vmem:[%s14754_s1 + $0xef4] sm:$0xf0]  ;;  %v8999_v19 = vld [vmem:[%s14754_s1 + $0x10e8] sm:$0xf]  ;;  %v8504_v5 = vor.u32 %v9920_v60, %v8503_v4  ;;  %v8872_v28 = vor.u32 %v10012_v18, %v8871_v2  ;;  %v4378_v60 = vadd.f32 %v4377_v57, %v4364_v12 }
 0x1a9   : > { %4640 = vmatpush.bf16.msra.mxu0 %v8136_v22  ;;  %v9127_v22 = vld [vmem:[%s14754_s1 + $0x11e8] sm:$0xf]  ;;  %v10076_v27 = vld [vmem:[%s14754_s1 + $0x11f4] sm:$0xf0]  ;;  %v8744_v37 = vor.u32 %v9980_v17, %v8743_v1 }
 0x1aa   : > { %4654 = vmatpush.bf16.msra.mxu1 %v8264_v30  ;;  %v4405_v9 = vpop.f32.mrf.mxu3  ;;  %v9000_v30 = vor.u32 %v10044_v23, %v8999_v19  ;;  %v9976_v3 = vld [vmem:[%s14754_s1 + $0xed4] sm:$0xf0]  ;;  %v8855_v55 = vld [vmem:[%s14754_s1 + $0xfc8] sm:$0xf]  ;;  %v9128_v26 = vor.u32 %v10076_v27, %v9127_v22  ;;  %v12952_v1 = vpop.f32.mrf.mxu1  ;;  %v4392_v18 = vadd.f32 %v4391_v13, %v4378_v60 }
 0x1ab   : > { %4668 = vmatpush.bf16.msra.mxu2 %v8392_v48  ;;  %v8727_v48 = vld [vmem:[%s14754_s1 + $0xec8] sm:$0xf]  ;;  %v10008_v11 = vld [vmem:[%s14754_s1 + $0xfd4] sm:$0xf0] }
 0x1ac   : > { %4682 = vmatpush.bf16.msra.mxu3 %v8520_v25  ;;  %v8983_v23 = vld [vmem:[%s14754_s1 + $0x10c8] sm:$0xf]  ;;  %v10040_v59 = vld [vmem:[%s14754_s1 + $0x10d4] sm:$0xf0]  ;;  %v12944_v25 = vpop.f32.mrf.mxu0  ;;  %v8728_v17 = vor.u32 %v9976_v3, %v8727_v48  ;;  %v8856_v2 = vor.u32 %v10008_v11, %v8855_v55  ;;  %v12991_v11 = vpop.f32.mrf.mxu2 }
 0x1ad   : > { %4641 = vmatpush.bf16.msra.mxu0 %v8120_v6  ;;  %v9111_v56 = vld [vmem:[%s14754_s1 + $0x11c8] sm:$0xf]  ;;  %v10072_v4 = vld [vmem:[%s14754_s1 + $0x11d4] sm:$0xf0]  ;;  %v8984_v6 = vor.u32 %v10040_v59, %v8983_v23 }
 0x1ae   : > { %4655 = vmatpush.bf16.msra.mxu1 %v8248_v58  ;;  %v9972_v58 = vld [vmem:[%s14754_s1 + $0xeb4] sm:$0xf0]  ;;  %v8839_v57 = vld [vmem:[%s14754_s1 + $0xfa8] sm:$0xf] }
 0x1af   : > { %4669 = vmatpush.bf16.msra.mxu2 %v8376_v52  ;;  %v8711_v52 = vld [vmem:[%s14754_s1 + $0xea8] sm:$0xf]  ;;  %v10036_v19 = vld [vmem:[%s14754_s1 + $0x10b4] sm:$0xf0] }
 0x1b0   : > { %4683 = vmatpush.bf16.msra.mxu3 %v8504_v5  ;;  %4642 = vmatmul.bf16.vlgmr.msra.gmra.mxu0 %v10877_v35  ;;  %v8967_v5 = vld [vmem:[%s14754_s1 + $0x10a8] sm:$0xf]  ;;  %v10068_v22 = vld [vmem:[%s14754_s1 + $0x11b4] sm:$0xf0]  ;;  %v8712_v27 = vor.u32 %v9972_v58, %v8711_v52 }
 0x1b1   : > { %4690 = vmatpush.bf16.msrb.mxu0 %v8744_v37  ;;  %v10004_v37 = vld [vmem:[%s14754_s1 + $0xfb4] sm:$0xf0]  ;;  %4656 = vmatmul.bf16.vlgmr.msra.gmra.mxu1 %v10887_v40  ;;  %v9095_v13 = vld [vmem:[%s14754_s1 + $0x11a8] sm:$0xf] }
 0x1b2   : > { %4704 = vmatpush.bf16.msrb.mxu1 %v8872_v28  ;;  %v9112_v28 = vor.u32 %v10072_v4, %v9111_v56  ;;  %4670 = vmatmul.bf16.vlgmr.msra.gmra.mxu2 %v11078_v32  ;;  %v8840_v12 = vor.u32 %v10004_v37, %v8839_v57  ;;  %v8695_v48 = vld [vmem:[%s14754_s1 + $0xe88] sm:$0xf]  ;;  %v9968_v3 = vld [vmem:[%s14754_s1 + $0xe94] sm:$0xf0]  ;;  %v9096_v23 = vor.u32 %v10068_v22, %v9095_v13  ;;  %v13002_v60 = vpop.f32.mrf.mxu3  ;;  %v4433_v58 = vpop.f32.mrf.mxu1 }
 0x1b3   : > { %4718 = vmatpush.bf16.msrb.mxu2 %v9000_v30  ;;  %4684 = vmatmul.bf16.vlgmr.msra.gmra.mxu3 %v11091_v41  ;;  %v8968_v30 = vor.u32 %v10036_v19, %v8967_v5  ;;  %v8823_v55 = vld [vmem:[%s14754_s1 + $0xf88] sm:$0xf]  ;;  %v10000_v59 = vld [vmem:[%s14754_s1 + $0xf94] sm:$0xf0]  ;;  %v8696_v52 = vor.u32 %v9968_v3, %v8695_v48 }
 0x1b4   : > { %4732 = vmatpush.bf16.msrb.mxu3 %v9128_v26  ;;  %v4406_v26 = vadd.f32 %v4405_v9, %v4392_v18  ;;  %v8951_v56 = vld [vmem:[%s14754_s1 + $0x1088] sm:$0xf]  ;;  %v10032_v4 = vld [vmem:[%s14754_s1 + $0x1094] sm:$0xf0]  ;;  %v8824_v57 = vor.u32 %v10000_v59, %v8823_v55 }
 0x1b5   : > { %4691 = vmatpush.bf16.msrb.mxu0 %v8728_v17  ;;  %v4419_v17 = vpop.f32.mrf.mxu0  ;;  %v9079_v9 = vld [vmem:[%s14754_s1 + $0x1188] sm:$0xf]  ;;  %v8952_v18 = vor.u32 %v10032_v4, %v8951_v56  ;;  %v9964_v37 = vld [vmem:[%s14754_s1 + $0xe74] sm:$0xf0] }
 0x1b6   : > { %4705 = vmatpush.bf16.msrb.mxu1 %v8856_v2  ;;  %v10064_v2 = vld [vmem:[%s14754_s1 + $0x1194] sm:$0xf0]  ;;  %v8807_v5 = vld [vmem:[%s14754_s1 + $0xf68] sm:$0xf] }
 0x1b7   : > { %4719 = vmatpush.bf16.msrb.mxu2 %v8984_v6  ;;  %v4420_v6 = vadd.f32 %v4419_v17, %v4406_v26  ;;  %v9080_v19 = vor.u32 %v10064_v2, %v9079_v9  ;;  %v9996_v22 = vld [vmem:[%s14754_s1 + $0xf74] sm:$0xf0]  ;;  %v8791_v56 = vld [vmem:[%s14754_s1 + $0xf48] sm:$0xf]  ;;  %v4447_v17 = vpop.f32.mrf.mxu2 }
 0x1b8   : > { %4733 = vmatpush.bf16.msrb.mxu3 %v9112_v28  ;;  %v8679_v28 = vld [vmem:[%s14754_s1 + $0xe68] sm:$0xf]  ;;  %v10060_v48 = vld [vmem:[%s14754_s1 + $0x1174] sm:$0xf0]  ;;  %v8808_v55 = vor.u32 %v9996_v22, %v8807_v5 }
 0x1b9   : > { %4692 = vmatpush.bf16.msrb.mxu0 %v8712_v27  ;;  %v4434_v13 = vadd.f32 %v4433_v58, %v4420_v6  ;;  %v8935_v27 = vld [vmem:[%s14754_s1 + $0x1068] sm:$0xf]  ;;  %v8680_v3 = vor.u32 %v9964_v37, %v8679_v28  ;;  %v9960_v59 = vld [vmem:[%s14754_s1 + $0xe54] sm:$0xf0] }
 0x1ba   : > { %4706 = vmatpush.bf16.msrb.mxu1 %v8840_v12  ;;  %v10028_v12 = vld [vmem:[%s14754_s1 + $0x1074] sm:$0xf0]  ;;  %v8919_v2 = vld [vmem:[%s14754_s1 + $0x1048] sm:$0xf]  ;;  %v4461_v58 = vpop.f32.mrf.mxu3 }
 0x1bb   : > { %4720 = vmatpush.bf16.msrb.mxu2 %v8968_v30  ;;  %v9063_v30 = vld [vmem:[%s14754_s1 + $0x1168] sm:$0xf]  ;;  %v8936_v26 = vor.u32 %v10028_v12, %v8935_v27  ;;  %v9992_v9 = vld [vmem:[%s14754_s1 + $0xf54] sm:$0xf0] }
 0x1bc   : > { %4734 = vmatpush.bf16.msrb.mxu3 %v9096_v23  ;;  %v8663_v23 = vld [vmem:[%s14754_s1 + $0xe48] sm:$0xf]  ;;  %v9064_v4 = vor.u32 %v10060_v48, %v9063_v30  ;;  %v10024_v6 = vld [vmem:[%s14754_s1 + $0x1054] sm:$0xf0]  ;;  %v8792_v5 = vor.u32 %v9992_v9, %v8791_v56 }
 0x1bd   : > { %4693 = vmatpush.bf16.msrb.mxu0 %v8696_v52  ;;  %v4448_v52 = vadd.f32 %v4447_v17, %v4434_v13  ;;  %v8664_v28 = vor.u32 %v9960_v59, %v8663_v23  ;;  %v8647_v13 = vld [vmem:[%s14754_s1 + $0xe28] sm:$0xf]  ;;  %v9956_v22 = vld [vmem:[%s14754_s1 + $0xe34] sm:$0xf0] }
 0x1be   : > { %4707 = vmatpush.bf16.msrb.mxu1 %v8824_v57  ;;  %v9047_v57 = vld [vmem:[%s14754_s1 + $0x1148] sm:$0xf]  ;;  %v9988_v30 = vld [vmem:[%s14754_s1 + $0xf34] sm:$0xf0]  ;;  %v8648_v23 = vor.u32 %v9956_v22, %v8647_v13  ;;  %v6953_v22 = vld [vmem:[%s14754_s1 + $0xf8] sm:$0xf0] }
 0x1bf   : > { %4721 = vmatpush.bf16.msrb.mxu2 %v8952_v18  ;;  %v10056_v18 = vld [vmem:[%s14754_s1 + $0x1154] sm:$0xf0]  ;;  %v13058_v37 = vadd.f32 %v4461_v58, %v4448_v52  ;;  %v8775_v27 = vld [vmem:[%s14754_s1 + $0xf28] sm:$0xf] }
 0x1c0   : > { %4735 = vmatpush.bf16.msrb.mxu3 %v9080_v19  ;;  %v8920_v19 = vor.u32 %v10024_v6, %v8919_v2  ;;  %v9048_v12 = vor.u32 %v10056_v18, %v9047_v57  ;;  %v8903_v48 = vld [vmem:[%s14754_s1 + $0x1028] sm:$0xf]  ;;  %v9952_v56 = vld [vmem:[%s14754_s1 + $0xe14] sm:$0xf0] }
 0x1c1   : > { %4694 = vmatpush.bf16.msrb.mxu0 %v8680_v3  ;;  %v10020_v3 = vld [vmem:[%s14754_s1 + $0x1034] sm:$0xf0]  ;;  %v8631_v59 = vld [vmem:[%s14754_s1 + $0xe08] sm:$0xf] }
 0x1c2   : > { %4708 = vmatpush.bf16.msrb.mxu1 %v8808_v55  ;;  %v9031_v55 = vld [vmem:[%s14754_s1 + $0x1128] sm:$0xf]  ;;  %v8904_v17 = vor.u32 %v10020_v3, %v8903_v48  ;;  %v9984_v2 = vld [vmem:[%s14754_s1 + $0xf14] sm:$0xf0]  ;;  %v8632_v13 = vor.u32 %v9952_v56, %v8631_v59  ;;  %v9594_v3 = vld [vmem:[%s14754_s1 + $0x2ec] sm:$0xf] }
 0x1c3   : > { %4722 = vmatpush.bf16.msrb.mxu2 %v8936_v26  ;;  %v10052_v26 = vld [vmem:[%s14754_s1 + $0x1134] sm:$0xf0]  ;;  %v8759_v9 = vld [vmem:[%s14754_s1 + $0xf08] sm:$0xf] }
 0x1c4   : > { %4736 = vmatpush.bf16.msrb.mxu3 %v9064_v4  ;;  %v8776_v4 = vor.u32 %v9988_v30, %v8775_v27  ;;  %v8887_v6 = vld [vmem:[%s14754_s1 + $0x1008] sm:$0xf]  ;;  %v9032_v52 = vor.u32 %v10052_v26, %v9031_v55  ;;  %v10016_v58 = vld [vmem:[%s14754_s1 + $0x1014] sm:$0xf0]  ;;  %v9562_v27 = vld [vmem:[%s14754_s1 + $0x1ec] sm:$0xf]  ;;  %v8760_v30 = vor.u32 %v9984_v2, %v8759_v9 }
 0x1c5   : > { %4695 = vmatpush.bf16.msrb.mxu0 %v8664_v28  ;;  %v9015_v57 = vld [vmem:[%s14754_s1 + $0x1108] sm:$0xf]  ;;  %v10048_v18 = vld [vmem:[%s14754_s1 + $0x1114] sm:$0xf0]  ;;  %v8888_v48 = vor.u32 %v10016_v58, %v8887_v6  ;;  %v7209_v55 = vld [vmem:[%s14754_s1 + $0x2f8] sm:$0xf0] }
 0x1c6   : > { %4709 = vmatpush.bf16.msrb.mxu1 %v8792_v5  ;;  %v9255_v28 = vld [vmem:[%s14754_s1 + $0x12e8] sm:$0xf]  ;;  %v10108_v5 = vld [vmem:[%s14754_s1 + $0x12f4] sm:$0xf0]  ;;  %v9016_v26 = vor.u32 %v10048_v18, %v9015_v57  ;;  %v9526_v9 = vld [vmem:[%s14754_s1 + $0xcc] sm:$0xf]  ;;  %v7212_v2 = vor.u32 %v9594_v3, %v7209_v55 }
 0x1c7   : > { %4723 = vmatpush.bf16.msrb.mxu2 %v8920_v19  ;;  %v9530_v19 = vld [vmem:[%s14754_s1 + $0xec] sm:$0xf]  ;;  %v6937_v6 = vld [vmem:[%s14754_s1 + $0xd8] sm:$0xf0] }
 0x1c8   : > { %4737 = vmatpush.bf16.msrb.mxu3 %v9048_v12  ;;  %v7081_v12 = vld [vmem:[%s14754_s1 + $0x1f8] sm:$0xf0]  ;;  %v6956_v59 = vor.u32 %v9530_v19, %v6953_v22  ;;  %v9590_v57 = vld [vmem:[%s14754_s1 + $0x2cc] sm:$0xf]  ;;  %v10100_v22 = vld [vmem:[%s14754_s1 + $0x12b4] sm:$0xf0] }
 0x1c9   : > { %4696 = vmatpush.bf16.msrb.mxu0 %v8648_v23  ;;  %v9256_v23 = vor.u32 %v10108_v5, %v9255_v28  ;;  %v7084_v56 = vor.u32 %v9562_v27, %v7081_v12  ;;  %v7065_v58 = vld [vmem:[%s14754_s1 + $0x1d8] sm:$0xf0]  ;;  %v6940_v5 = vor.u32 %v9526_v9, %v6937_v6  ;;  %v9522_v27 = vld [vmem:[%s14754_s1 + $0xac] sm:$0xf] }
 0x1ca   : > { %4710 = vmatpush.bf16.msrb.mxu1 %v8776_v4  ;;  %v9239_v4 = vld [vmem:[%s14754_s1 + $0x12c8] sm:$0xf]  ;;  %v7193_v18 = vld [vmem:[%s14754_s1 + $0x2d8] sm:$0xf0]  ;;  %v9586_v55 = vld [vmem:[%s14754_s1 + $0x2ac] sm:$0xf] }
 0x1cb   : > { %4724 = vmatpush.bf16.msrb.mxu2 %v8904_v17  ;;  %v10104_v17 = vld [vmem:[%s14754_s1 + $0x12d4] sm:$0xf0]  ;;  %v7196_v12 = vor.u32 %v9590_v57, %v7193_v18  ;;  %v7049_v3 = vld [vmem:[%s14754_s1 + $0x1b8] sm:$0xf0]  ;;  %v9518_v9 = vld [vmem:[%s14754_s1 + $0x8c] sm:$0xf] }
 0x1cc   : > { %4738 = vmatpush.bf16.msrb.mxu3 %v9032_v52  ;;  %v9558_v52 = vld [vmem:[%s14754_s1 + $0x1cc] sm:$0xf]  ;;  %v9240_v28 = vor.u32 %v10104_v17, %v9239_v4  ;;  %v9207_v4 = vld [vmem:[%s14754_s1 + $0x1288] sm:$0xf]  ;;  %v10096_v17 = vld [vmem:[%s14754_s1 + $0x1294] sm:$0xf0] }
 0x1cd   : > { %4697 = vmatpush.bf16.msrb.mxu0 %v8632_v13  ;;  %v7068_v19 = vor.u32 %v9558_v52, %v7065_v58  ;;  %v9223_v13 = vld [vmem:[%s14754_s1 + $0x12a8] sm:$0xf]  ;;  %v6905_v6 = vld [vmem:[%s14754_s1 + $0x98] sm:$0xf0]  ;;  %v9550_v52 = vld [vmem:[%s14754_s1 + $0x18c] sm:$0xf] }
 0x1ce   : > { %4711 = vmatpush.bf16.msrb.mxu1 %v8760_v30  ;;  %v6921_v30 = vld [vmem:[%s14754_s1 + $0xb8] sm:$0xf0]  ;;  %v9582_v57 = vld [vmem:[%s14754_s1 + $0x28c] sm:$0xf] }
 0x1cf   : > { %4725 = vmatpush.bf16.msrb.mxu2 %v8888_v48  ;;  %v9554_v48 = vld [vmem:[%s14754_s1 + $0x1ac] sm:$0xf]  ;;  %v7033_v58 = vld [vmem:[%s14754_s1 + $0x198] sm:$0xf0] }
 0x1d0   : > { %4739 = vmatpush.bf16.msrb.mxu3 %v9016_v26  ;;  %4698 = vmatmul.bf16.vlgmr.msrb.gmra.mxu0 %v11089_v38  ;;  %v7177_v26 = vld [vmem:[%s14754_s1 + $0x2b8] sm:$0xf0] }
 0x1d1   : > { %4746 = vmatpush.bf16.msra.mxu0 %v9256_v23  ;;  %4712 = vmatmul.bf16.vlgmr.msrb.gmra.mxu1 %v11099_v46  ;;  %v9224_v23 = vor.u32 %v10100_v22, %v9223_v13  ;;  %v7161_v18 = vld [vmem:[%s14754_s1 + $0x298] sm:$0xf0]  ;;  %v9191_v13 = vld [vmem:[%s14754_s1 + $0x1268] sm:$0xf]  ;;  %v10092_v22 = vld [vmem:[%s14754_s1 + $0x1274] sm:$0xf0] }
 0x1d2   : > { %4760 = vmatpush.bf16.msra.mxu1 %v6956_v59  ;;  %4726 = vmatmul.bf16.vlgmr.msrb.gmra.mxu2 %v11288_v49  ;;  %v6924_v59 = vor.u32 %v9522_v27, %v6921_v30  ;;  %v9514_v27 = vld [vmem:[%s14754_s1 + $0x6c] sm:$0xf]  ;;  %v6889_v30 = vld [vmem:[%s14754_s1 + $0x78] sm:$0xf0] }
 0x1d3   : > { %4774 = vmatpush.bf16.msra.mxu2 %v7084_v56  ;;  %4740 = vmatmul.bf16.vlgmr.msrb.gmra.mxu3 %v11301_v54  ;;  %v7052_v56 = vor.u32 %v9554_v48, %v7049_v3  ;;  %v9546_v48 = vld [vmem:[%s14754_s1 + $0x16c] sm:$0xf]  ;;  %v7017_v3 = vld [vmem:[%s14754_s1 + $0x178] sm:$0xf0] }
 0x1d4   : > { %4788 = vmatpush.bf16.msra.mxu3 %v7212_v2  ;;  %v7180_v2 = vor.u32 %v9586_v55, %v7177_v26  ;;  %v9578_v55 = vld [vmem:[%s14754_s1 + $0x26c] sm:$0xf]  ;;  %v7145_v26 = vld [vmem:[%s14754_s1 + $0x278] sm:$0xf0] }
 0x1d5   : > { %4747 = vmatpush.bf16.msra.mxu0 %v9240_v28  ;;  %v9208_v28 = vor.u32 %v10096_v17, %v9207_v4  ;;  %v9175_v4 = vld [vmem:[%s14754_s1 + $0x1248] sm:$0xf]  ;;  %v10088_v17 = vld [vmem:[%s14754_s1 + $0x1254] sm:$0xf0] }
 0x1d6   : > { %4761 = vmatpush.bf16.msra.mxu1 %v6940_v5  ;;  %v6908_v5 = vor.u32 %v9518_v9, %v6905_v6  ;;  %v9510_v9 = vld [vmem:[%s14754_s1 + $0x4c] sm:$0xf]  ;;  %v6873_v6 = vld [vmem:[%s14754_s1 + $0x58] sm:$0xf0] }
 0x1d7   : > { %4775 = vmatpush.bf16.msra.mxu2 %v7068_v19  ;;  %v7036_v19 = vor.u32 %v9550_v52, %v7033_v58  ;;  %v9542_v52 = vld [vmem:[%s14754_s1 + $0x14c] sm:$0xf]  ;;  %v7001_v58 = vld [vmem:[%s14754_s1 + $0x158] sm:$0xf0] }
 0x1d8   : > { %4789 = vmatpush.bf16.msra.mxu3 %v7196_v12  ;;  %v7164_v12 = vor.u32 %v9582_v57, %v7161_v18  ;;  %v9574_v57 = vld [vmem:[%s14754_s1 + $0x24c] sm:$0xf]  ;;  %v7129_v18 = vld [vmem:[%s14754_s1 + $0x258] sm:$0xf0] }
 0x1d9   : > { %4748 = vmatpush.bf16.msra.mxu0 %v9224_v23  ;;  %v9192_v23 = vor.u32 %v10092_v22, %v9191_v13  ;;  %v9159_v13 = vld [vmem:[%s14754_s1 + $0x1228] sm:$0xf]  ;;  %v10084_v22 = vld [vmem:[%s14754_s1 + $0x1234] sm:$0xf0] }
 0x1da   : > { %4762 = vmatpush.bf16.msra.mxu1 %v6924_v59  ;;  %v6892_v59 = vor.u32 %v9514_v27, %v6889_v30  ;;  %v9506_v27 = vld [vmem:[%s14754_s1 + $0x2c] sm:$0xf]  ;;  %v6857_v30 = vld [vmem:[%s14754_s1 + $0x38] sm:$0xf0] }
 0x1db   : > { %4776 = vmatpush.bf16.msra.mxu2 %v7052_v56  ;;  %v7020_v56 = vor.u32 %v9546_v48, %v7017_v3  ;;  %v9538_v48 = vld [vmem:[%s14754_s1 + $0x12c] sm:$0xf]  ;;  %v6985_v3 = vld [vmem:[%s14754_s1 + $0x138] sm:$0xf0] }
 0x1dc   : > { %4790 = vmatpush.bf16.msra.mxu3 %v7180_v2  ;;  %v7148_v2 = vor.u32 %v9578_v55, %v7145_v26  ;;  %v9570_v55 = vld [vmem:[%s14754_s1 + $0x22c] sm:$0xf]  ;;  %v7113_v26 = vld [vmem:[%s14754_s1 + $0x238] sm:$0xf0] }
 0x1dd   : > { %4749 = vmatpush.bf16.msra.mxu0 %v9208_v28  ;;  %v9176_v28 = vor.u32 %v10088_v17, %v9175_v4  ;;  %v6860_v4 = vor.u32 %v9506_v27, %v6857_v30  ;;  %v6988_v17 = vor.u32 %v9538_v48, %v6985_v3  ;;  %v9690_v27 = vld [vmem:[%s14754_s1 + $0x5ec] sm:$0xf] }
 0x1de   : > { %4763 = vmatpush.bf16.msra.mxu1 %v6908_v5  ;;  %v6876_v5 = vor.u32 %v9510_v9, %v6873_v6  ;;  %v9502_v9 = vld [vmem:[%s14754_s1 + $0xc] sm:$0xf] }
 0x1df   : > { %4777 = vmatpush.bf16.msra.mxu2 %v7036_v19  ;;  %v7004_v19 = vor.u32 %v9542_v52, %v7001_v58  ;;  %v9534_v6 = vld [vmem:[%s14754_s1 + $0x10c] sm:$0xf]  ;;  %v7116_v52 = vor.u32 %v9570_v55, %v7113_v26  ;;  %v6969_v58 = vld [vmem:[%s14754_s1 + $0x118] sm:$0xf0] }
 0x1e0   : > { %4791 = vmatpush.bf16.msra.mxu3 %v7164_v12  ;;  %v7132_v12 = vor.u32 %v9574_v57, %v7129_v18  ;;  %v9566_v57 = vld [vmem:[%s14754_s1 + $0x20c] sm:$0xf]  ;;  %v7097_v18 = vld [vmem:[%s14754_s1 + $0x218] sm:$0xf0]  ;;  %v6972_v48 = vor.u32 %v9534_v6, %v6969_v58 }
 0x1e1   : > { %4750 = vmatpush.bf16.msra.mxu0 %v9192_v23  ;;  %v9160_v23 = vor.u32 %v10084_v22, %v9159_v13  ;;  %v7465_v22 = vld [vmem:[%s14754_s1 + $0x4f8] sm:$0xf0]  ;;  %v9722_v3 = vld [vmem:[%s14754_s1 + $0x6ec] sm:$0xf]  ;;  %v7100_v26 = vor.u32 %v9566_v57, %v7097_v18 }
 0x1e2   : > { %4764 = vmatpush.bf16.msra.mxu1 %v6892_v59  ;;  %v9143_v59 = vld [vmem:[%s14754_s1 + $0x1208] sm:$0xf]  ;;  %v7721_v55 = vld [vmem:[%s14754_s1 + $0x6f8] sm:$0xf0]  ;;  %v9718_v57 = vld [vmem:[%s14754_s1 + $0x6cc] sm:$0xf] }
 0x1e3   : > { %4778 = vmatpush.bf16.msra.mxu2 %v7020_v56  ;;  %v10080_v56 = vld [vmem:[%s14754_s1 + $0x1214] sm:$0xf0]  ;;  %v7449_v6 = vld [vmem:[%s14754_s1 + $0x4d8] sm:$0xf0] }
 0x1e4   : > { %4792 = vmatpush.bf16.msra.mxu3 %v7148_v2  ;;  %v6841_v2 = vld [vmem:[%s14754_s1 + $0x18] sm:$0xf0]  ;;  %v9144_v13 = vor.u32 %v10080_v56, %v9143_v59 }
 0x1e5   : > { %4751 = vmatpush.bf16.msra.mxu0 %v9176_v28  ;;  %v9626_v28 = vld [vmem:[%s14754_s1 + $0x3ec] sm:$0xf]  ;;  %v6844_v30 = vor.u32 %v9502_v9, %v6841_v2  ;;  %v7724_v2 = vor.u32 %v9722_v3, %v7721_v55  ;;  %v7577_v58 = vld [vmem:[%s14754_s1 + $0x5d8] sm:$0xf0] }
 0x1e6   : > { %4765 = vmatpush.bf16.msra.mxu1 %v6876_v5  ;;  %v7337_v5 = vld [vmem:[%s14754_s1 + $0x3f8] sm:$0xf0]  ;;  %v9654_v9 = vld [vmem:[%s14754_s1 + $0x4cc] sm:$0xf] }
 0x1e7   : > { %4779 = vmatpush.bf16.msra.mxu2 %v7004_v19  ;;  %v9658_v19 = vld [vmem:[%s14754_s1 + $0x4ec] sm:$0xf]  ;;  %v7705_v18 = vld [vmem:[%s14754_s1 + $0x6d8] sm:$0xf0] }
 0x1e8   : > { %4793 = vmatpush.bf16.msra.mxu3 %v7132_v12  ;;  %v7593_v12 = vld [vmem:[%s14754_s1 + $0x5f8] sm:$0xf0]  ;;  %v7468_v59 = vor.u32 %v9658_v19, %v7465_v22  ;;  %v9714_v55 = vld [vmem:[%s14754_s1 + $0x6ac] sm:$0xf] }
 0x1e9   : > { %4752 = vmatpush.bf16.msra.mxu0 %v9160_v23  ;;  %v7340_v23 = vor.u32 %v9626_v28, %v7337_v5  ;;  %v7596_v56 = vor.u32 %v9690_v27, %v7593_v12  ;;  %v7452_v5 = vor.u32 %v9654_v9, %v7449_v6  ;;  %v7305_v22 = vld [vmem:[%s14754_s1 + $0x3b8] sm:$0xf0]  ;;  %v9650_v27 = vld [vmem:[%s14754_s1 + $0x4ac] sm:$0xf]  ;;  %v7708_v12 = vor.u32 %v9718_v57, %v7705_v18 }
 0x1ea   : > { %4766 = vmatpush.bf16.msra.mxu1 %v6860_v4  ;;  %v9622_v4 = vld [vmem:[%s14754_s1 + $0x3cc] sm:$0xf]  ;;  %v7561_v3 = vld [vmem:[%s14754_s1 + $0x5b8] sm:$0xf0] }
 0x1eb   : > { %4780 = vmatpush.bf16.msra.mxu2 %v6988_v17  ;;  %v7321_v17 = vld [vmem:[%s14754_s1 + $0x3d8] sm:$0xf0]  ;;  %v9678_v9 = vld [vmem:[%s14754_s1 + $0x58c] sm:$0xf] }
 0x1ec   : > { %4794 = vmatpush.bf16.msra.mxu3 %v7116_v52  ;;  %v9686_v52 = vld [vmem:[%s14754_s1 + $0x5cc] sm:$0xf]  ;;  %v7324_v28 = vor.u32 %v9622_v4, %v7321_v17  ;;  %v7289_v17 = vld [vmem:[%s14754_s1 + $0x398] sm:$0xf0] }
 0x1ed   : > { %4753 = vmatpush.bf16.msra.mxu0 %v9144_v13  ;;  %v7580_v19 = vor.u32 %v9686_v52, %v7577_v58  ;;  %v9618_v13 = vld [vmem:[%s14754_s1 + $0x3ac] sm:$0xf]  ;;  %v7673_v52 = vld [vmem:[%s14754_s1 + $0x698] sm:$0xf0] }
 0x1ee   : > { %4767 = vmatpush.bf16.msra.mxu1 %v6844_v30  ;;  %v7433_v30 = vld [vmem:[%s14754_s1 + $0x4b8] sm:$0xf0]  ;;  %v9614_v4 = vld [vmem:[%s14754_s1 + $0x38c] sm:$0xf] }
 0x1ef   : > { %4781 = vmatpush.bf16.msra.mxu2 %v6972_v48  ;;  %v9682_v48 = vld [vmem:[%s14754_s1 + $0x5ac] sm:$0xf]  ;;  %v7292_v58 = vor.u32 %v9614_v4, %v7289_v17  ;;  %v7385_v17 = vld [vmem:[%s14754_s1 + $0x458] sm:$0xf0] }
 0x1f0   : > { %4795 = vmatpush.bf16.msra.mxu3 %v7100_v26  ;;  %4754 = vmatmul.bf16.vlgmr.msra.gmra.mxu0 %v11299_v53  ;;  %v7689_v26 = vld [vmem:[%s14754_s1 + $0x6b8] sm:$0xf0]  ;;  %v9710_v6 = vld [vmem:[%s14754_s1 + $0x68c] sm:$0xf] }
 0x1f1   : > { %4802 = vmatpush.bf16.msrb.mxu0 %v7340_v23  ;;  %4768 = vmatmul.bf16.vlgmr.msra.gmra.mxu1 %v10500_v15  ;;  %v7308_v23 = vor.u32 %v9618_v13, %v7305_v22  ;;  %v9646_v15 = vld [vmem:[%s14754_s1 + $0x48c] sm:$0xf]  ;;  %v7676_v13 = vor.u32 %v9710_v6, %v7673_v52  ;;  %v7401_v22 = vld [vmem:[%s14754_s1 + $0x478] sm:$0xf0] }
 0x1f2   : > { %4816 = vmatpush.bf16.msrb.mxu1 %v7468_v59  ;;  %4782 = vmatmul.bf16.vlgmr.msra.gmra.mxu2 %v10507_v21  ;;  %v7436_v59 = vor.u32 %v9650_v27, %v7433_v30  ;;  %v7692_v21 = vor.u32 %v9714_v55, %v7689_v26  ;;  %v9674_v27 = vld [vmem:[%s14754_s1 + $0x56c] sm:$0xf] }
 0x1f3   : > { %4830 = vmatpush.bf16.msrb.mxu2 %v7596_v56  ;;  %4796 = vmatmul.bf16.vlgmr.msra.gmra.mxu3 %v10505_v20  ;;  %v7564_v56 = vor.u32 %v9682_v48, %v7561_v3  ;;  %v7417_v20 = vld [vmem:[%s14754_s1 + $0x498] sm:$0xf0]  ;;  %v9706_v30 = vld [vmem:[%s14754_s1 + $0x66c] sm:$0xf] }
 0x1f4   : > { %4844 = vmatpush.bf16.msrb.mxu3 %v7724_v2  ;;  %v7545_v2 = vld [vmem:[%s14754_s1 + $0x598] sm:$0xf0]  ;;  %v7420_v57 = vor.u32 %v9646_v15, %v7417_v20  ;;  %v9670_v15 = vld [vmem:[%s14754_s1 + $0x54c] sm:$0xf] }
 0x1f5   : > { %4803 = vmatpush.bf16.msrb.mxu0 %v7324_v28  ;;  %v7548_v18 = vor.u32 %v9678_v9, %v7545_v2  ;;  %v9610_v28 = vld [vmem:[%s14754_s1 + $0x36c] sm:$0xf]  ;;  %v7657_v48 = vld [vmem:[%s14754_s1 + $0x678] sm:$0xf0] }
 0x1f6   : > { %4817 = vmatpush.bf16.msrb.mxu1 %v7452_v5  ;;  %v7273_v5 = vld [vmem:[%s14754_s1 + $0x378] sm:$0xf0]  ;;  %v7660_v4 = vor.u32 %v9706_v30, %v7657_v48  ;;  %v9702_v20 = vld [vmem:[%s14754_s1 + $0x64c] sm:$0xf] }
 0x1f7   : > { %4831 = vmatpush.bf16.msrb.mxu2 %v7580_v19  ;;  %v9642_v19 = vld [vmem:[%s14754_s1 + $0x46c] sm:$0xf]  ;;  %v7276_v3 = vor.u32 %v9610_v28, %v7273_v5  ;;  %v7641_v9 = vld [vmem:[%s14754_s1 + $0x658] sm:$0xf0] }
 0x1f8   : > { %4845 = vmatpush.bf16.msrb.mxu3 %v7708_v12  ;;  %v7529_v12 = vld [vmem:[%s14754_s1 + $0x578] sm:$0xf0]  ;;  %v7404_v55 = vor.u32 %v9642_v19, %v7401_v22  ;;  %v7644_v28 = vor.u32 %v9702_v20, %v7641_v9  ;;  %v9666_v19 = vld [vmem:[%s14754_s1 + $0x52c] sm:$0xf] }
 0x1f9   : > { %4804 = vmatpush.bf16.msrb.mxu0 %v7308_v23  ;;  %v7532_v26 = vor.u32 %v9674_v27, %v7529_v12  ;;  %v9606_v23 = vld [vmem:[%s14754_s1 + $0x34c] sm:$0xf]  ;;  %v7369_v5 = vld [vmem:[%s14754_s1 + $0x438] sm:$0xf0] }
 0x1fa   : > { %4818 = vmatpush.bf16.msrb.mxu1 %v7436_v59  ;;  %v7257_v59 = vld [vmem:[%s14754_s1 + $0x358] sm:$0xf0]  ;;  %v9698_v22 = vld [vmem:[%s14754_s1 + $0x62c] sm:$0xf] }
 0x1fb   : > { %4832 = vmatpush.bf16.msrb.mxu2 %v7564_v56  ;;  %v9638_v56 = vld [vmem:[%s14754_s1 + $0x44c] sm:$0xf]  ;;  %v7260_v2 = vor.u32 %v9606_v23, %v7257_v59  ;;  %v7625_v27 = vld [vmem:[%s14754_s1 + $0x638] sm:$0xf0] }
 0x1fc   : > { %4846 = vmatpush.bf16.msrb.mxu3 %v7692_v21  ;;  %v7513_v21 = vld [vmem:[%s14754_s1 + $0x558] sm:$0xf0]  ;;  %v7388_v6 = vor.u32 %v9638_v56, %v7385_v17  ;;  %v9598_v30 = vld [vmem:[%s14754_s1 + $0x30c] sm:$0xf]  ;;  %v7628_v56 = vor.u32 %v9698_v22, %v7625_v27 }
 0x1fd   : > { %4805 = vmatpush.bf16.msrb.mxu0 %v7292_v58  ;;  %v7516_v52 = vor.u32 %v9670_v15, %v7513_v21  ;;  %v9602_v58 = vld [vmem:[%s14754_s1 + $0x32c] sm:$0xf]  ;;  %v7225_v48 = vld [vmem:[%s14754_s1 + $0x318] sm:$0xf0] }
 0x1fe   : > { %4819 = vmatpush.bf16.msrb.mxu1 %v7420_v57  ;;  %v7241_v57 = vld [vmem:[%s14754_s1 + $0x338] sm:$0xf0]  ;;  %v9662_v59 = vld [vmem:[%s14754_s1 + $0x50c] sm:$0xf] }
 0x1ff   : > { %4833 = vmatpush.bf16.msrb.mxu2 %v7548_v18  ;;  %v9634_v18 = vld [vmem:[%s14754_s1 + $0x42c] sm:$0xf]  ;;  %v7244_v12 = vor.u32 %v9602_v58, %v7241_v57  ;;  %v7353_v23 = vld [vmem:[%s14754_s1 + $0x418] sm:$0xf0] }
 0x200   : > { %4847 = vmatpush.bf16.msrb.mxu3 %v7676_v13  ;;  %v7497_v13 = vld [vmem:[%s14754_s1 + $0x538] sm:$0xf0]  ;;  %v9694_v17 = vld [vmem:[%s14754_s1 + $0x60c] sm:$0xf] }
 0x201   : > { %4806 = vmatpush.bf16.msrb.mxu0 %v7276_v3  ;;  %v7372_v3 = vor.u32 %v9634_v18, %v7369_v5  ;;  %v7609_v15 = vld [vmem:[%s14754_s1 + $0x618] sm:$0xf0]  ;;  %v9754_v21 = vld [vmem:[%s14754_s1 + $0x7ec] sm:$0xf] }
 0x202   : > { %4820 = vmatpush.bf16.msrb.mxu1 %v7404_v55  ;;  %v7500_v55 = vor.u32 %v9666_v19, %v7497_v13  ;;  %v7849_v20 = vld [vmem:[%s14754_s1 + $0x7f8] sm:$0xf0]  ;;  %v9786_v9 = vld [vmem:[%s14754_s1 + $0x8ec] sm:$0xf]  ;;  %v7612_v19 = vor.u32 %v9694_v17, %v7609_v15 }
 0x203   : > { %4834 = vmatpush.bf16.msrb.mxu2 %v7532_v26  ;;  %v9630_v26 = vld [vmem:[%s14754_s1 + $0x40c] sm:$0xf]  ;;  %v8105_v58 = vld [vmem:[%s14754_s1 + $0x9f8] sm:$0xf0]  ;;  %v7852_v13 = vor.u32 %v9754_v21, %v7849_v20 }
 0x204   : > { %4848 = vmatpush.bf16.msrb.mxu3 %v7660_v4  ;;  %v7481_v4 = vld [vmem:[%s14754_s1 + $0x518] sm:$0xf0]  ;;  %v7356_v57 = vor.u32 %v9630_v26, %v7353_v23  ;;  %v9814_v26 = vld [vmem:[%s14754_s1 + $0x9cc] sm:$0xf] }
 0x205   : > { %4807 = vmatpush.bf16.msrb.mxu0 %v7260_v2  ;;  %v7228_v2 = vor.u32 %v9598_v30, %v7225_v48  ;;  %v7484_v18 = vor.u32 %v9662_v59, %v7481_v4  ;;  %v8233_v5 = vld [vmem:[%s14754_s1 + $0xaf8] sm:$0xf0]  ;;  %v9782_v48 = vld [vmem:[%s14754_s1 + $0x8cc] sm:$0xf]  ;;  %v13542_v59 = vpop.f32.mrf.mxu0 }
 0x206   : > { %4821 = vmatpush.bf16.msrb.mxu1 %v7388_v6  ;;  %v7977_v6 = vld [vmem:[%s14754_s1 + $0x8f8] sm:$0xf0]  ;;  %v9746_v20 = vld [vmem:[%s14754_s1 + $0x7ac] sm:$0xf] }
 0x207   : > { %4835 = vmatpush.bf16.msrb.mxu2 %v7516_v52  ;;  %v9818_v52 = vld [vmem:[%s14754_s1 + $0x9ec] sm:$0xf]  ;;  %v7980_v22 = vor.u32 %v9786_v9, %v7977_v6  ;;  %v7833_v30 = vld [vmem:[%s14754_s1 + $0x7d8] sm:$0xf0] }
 0x208   : > { %4849 = vmatpush.bf16.msrb.mxu3 %v7644_v28  ;;  %v9850_v28 = vld [vmem:[%s14754_s1 + $0xaec] sm:$0xf]  ;;  %v8108_v27 = vor.u32 %v9818_v52, %v8105_v58  ;;  %v8089_v23 = vld [vmem:[%s14754_s1 + $0x9d8] sm:$0xf0] }
 0x209   : > { %4808 = vmatpush.bf16.msrb.mxu0 %v7244_v12  ;;  %v9750_v12 = vld [vmem:[%s14754_s1 + $0x7cc] sm:$0xf]  ;;  %v8217_v4 = vld [vmem:[%s14754_s1 + $0xad8] sm:$0xf0]  ;;  %v8092_v21 = vor.u32 %v9814_v26, %v8089_v23 }
 0x20a   : > { %4822 = vmatpush.bf16.msrb.mxu1 %v7372_v3  ;;  %v8236_v3 = vor.u32 %v9850_v28, %v8233_v5  ;;  %v7836_v17 = vor.u32 %v9750_v12, %v7833_v30  ;;  %v7817_v9 = vld [vmem:[%s14754_s1 + $0x7b8] sm:$0xf0]  ;;  %v9810_v58 = vld [vmem:[%s14754_s1 + $0x9ac] sm:$0xf]  ;;  %v13578_v5 = vpop.f32.mrf.mxu1 }
 0x20b   : > { %4836 = vmatpush.bf16.msrb.mxu2 %v7500_v55  ;;  %v7961_v55 = vld [vmem:[%s14754_s1 + $0x8d8] sm:$0xf0]  ;;  %v7820_v28 = vor.u32 %v9746_v20, %v7817_v9  ;;  %v9806_v30 = vld [vmem:[%s14754_s1 + $0x98c] sm:$0xf] }
 0x20c   : > { %4850 = vmatpush.bf16.msrb.mxu3 %v7628_v56  ;;  %v9846_v56 = vld [vmem:[%s14754_s1 + $0xacc] sm:$0xf]  ;;  %v7964_v15 = vor.u32 %v9782_v48, %v7961_v55  ;;  %v7945_v52 = vld [vmem:[%s14754_s1 + $0x8b8] sm:$0xf0] }
 0x20d   : > { %4809 = vmatpush.bf16.msrb.mxu0 %v7228_v2  ;;  %v9778_v2 = vld [vmem:[%s14754_s1 + $0x8ac] sm:$0xf]  ;;  %v8220_v6 = vor.u32 %v9846_v56, %v8217_v4  ;;  %v7929_v12 = vld [vmem:[%s14754_s1 + $0x898] sm:$0xf0]  ;;  %v13608_v56 = vpop.f32.mrf.mxu3 }
 0x20e   : > { %4823 = vmatpush.bf16.msrb.mxu1 %v7356_v57  ;;  %v8073_v57 = vld [vmem:[%s14754_s1 + $0x9b8] sm:$0xf0]  ;;  %v9838_v55 = vld [vmem:[%s14754_s1 + $0xa8c] sm:$0xf] }
 0x20f   : > { %4837 = vmatpush.bf16.msrb.mxu2 %v7484_v18  ;;  %v8201_v18 = vld [vmem:[%s14754_s1 + $0xab8] sm:$0xf0]  ;;  %v9770_v20 = vld [vmem:[%s14754_s1 + $0x86c] sm:$0xf] }
 0x210   : > { %4851 = vmatpush.bf16.msrb.mxu3 %v7612_v19  ;;  %4810 = vmatmul.bf16.vlgmr.msrb.gmra.mxu0 %v10520_v29  ;;  %v9842_v29 = vld [vmem:[%s14754_s1 + $0xaac] sm:$0xf]  ;;  %v13580_v19 = vpop.f32.mrf.mxu2  ;;  %v8057_v48 = vld [vmem:[%s14754_s1 + $0x998] sm:$0xf0] }
 0x211   : > { %4858 = vmatpush.bf16.msra.mxu0 %v7852_v13  ;;  %4824 = vmatmul.bf16.vlgmr.msrb.gmra.mxu1 %v10654_v39  ;;  %v8076_v39 = vor.u32 %v9810_v58, %v8073_v57  ;;  %v9742_v13 = vld [vmem:[%s14754_s1 + $0x78c] sm:$0xf]  ;;  %v8185_v26 = vld [vmem:[%s14754_s1 + $0xa98] sm:$0xf0] }
 0x212   : > { %4872 = vmatpush.bf16.msra.mxu1 %v7980_v22  ;;  %4838 = vmatmul.bf16.vlgmr.msrb.gmra.mxu2 %v10667_v44  ;;  %v7948_v44 = vor.u32 %v9778_v2, %v7945_v52  ;;  %v7801_v22 = vld [vmem:[%s14754_s1 + $0x798] sm:$0xf0]  ;;  %v8188_v9 = vor.u32 %v9838_v55, %v8185_v26  ;;  %v9834_v58 = vld [vmem:[%s14754_s1 + $0xa6c] sm:$0xf] }
 0x213   : > { %4886 = vmatpush.bf16.msra.mxu2 %v8108_v27  ;;  %4852 = vmatmul.bf16.vlgmr.msrb.gmra.mxu3 %v10665_v43  ;;  %v9774_v43 = vld [vmem:[%s14754_s1 + $0x88c] sm:$0xf]  ;;  %v8204_v27 = vor.u32 %v9842_v29, %v8201_v18  ;;  %v7804_v23 = vor.u32 %v9742_v13, %v7801_v22  ;;  %v7913_v2 = vld [vmem:[%s14754_s1 + $0x878] sm:$0xf0]  ;;  %v13634_v18 = vpop.f32.mrf.mxu1 }
 0x214   : > { %4900 = vmatpush.bf16.msra.mxu3 %v8236_v3  ;;  %v13600_v3 = vpop.f32.mrf.mxu0  ;;  %v7932_v4 = vor.u32 %v9774_v43, %v7929_v12  ;;  %v8041_v52 = vld [vmem:[%s14754_s1 + $0x978] sm:$0xf0]  ;;  %14779 = vst [vmem:[#allocation19_spill] sm:$0xff] %v13634_v18  ;;  %v9734_v13 = vld [vmem:[%s14754_s1 + $0x74c] sm:$0xf] }
 0x215   : > { %4859 = vmatpush.bf16.msra.mxu0 %v7836_v17  ;;  %v8060_v17 = vor.u32 %v9806_v30, %v8057_v48  ;;  %v8169_v57 = vld [vmem:[%s14754_s1 + $0xa78] sm:$0xf0]  ;;  %v9766_v43 = vld [vmem:[%s14754_s1 + $0x84c] sm:$0xf] }
 0x216   : > { %4873 = vmatpush.bf16.msra.mxu1 %v7964_v15  ;;  %v9738_v15 = vld [vmem:[%s14754_s1 + $0x76c] sm:$0xf]  ;;  %v7769_v22 = vld [vmem:[%s14754_s1 + $0x758] sm:$0xf0] }
 0x217   : > { %4887 = vmatpush.bf16.msra.mxu2 %v8092_v21  ;;  %v7785_v21 = vld [vmem:[%s14754_s1 + $0x778] sm:$0xf0]  ;;  %v9798_v30 = vld [vmem:[%s14754_s1 + $0x94c] sm:$0xf] }
 0x218   : > { %4901 = vmatpush.bf16.msra.mxu3 %v8220_v6  ;;  %v9802_v6 = vld [vmem:[%s14754_s1 + $0x96c] sm:$0xf]  ;;  %v7788_v29 = vor.u32 %v9738_v15, %v7785_v21  ;;  %v7897_v12 = vld [vmem:[%s14754_s1 + $0x858] sm:$0xf0] }
 0x219   : > { %4860 = vmatpush.bf16.msra.mxu0 %v7820_v28  ;;  %v13636_v28 = vpop.f32.mrf.mxu2  ;;  %v8025_v48 = vld [vmem:[%s14754_s1 + $0x958] sm:$0xf0]  ;;  %v9830_v55 = vld [vmem:[%s14754_s1 + $0xa4c] sm:$0xf]  ;;  %v7900_v15 = vor.u32 %v9766_v43, %v7897_v12 }
 0x21a   : > { %4874 = vmatpush.bf16.msra.mxu1 %v7948_v44  ;;  %v7916_v44 = vor.u32 %v9770_v20, %v7913_v2  ;;  %v8153_v26 = vld [vmem:[%s14754_s1 + $0xa58] sm:$0xf0]  ;;  %v8028_v21 = vor.u32 %v9798_v30, %v8025_v48  ;;  %v9730_v20 = vld [vmem:[%s14754_s1 + $0x72c] sm:$0xf] }
 0x21b   : > { %4888 = vmatpush.bf16.msra.mxu2 %v8076_v39  ;;  %v8044_v39 = vor.u32 %v9802_v6, %v8041_v52  ;;  %v9762_v2 = vld [vmem:[%s14754_s1 + $0x82c] sm:$0xf]  ;;  %v8156_v6 = vor.u32 %v9830_v55, %v8153_v26  ;;  %v7881_v52 = vld [vmem:[%s14754_s1 + $0x838] sm:$0xf0] }
 0x21c   : > { %4902 = vmatpush.bf16.msra.mxu3 %v8204_v27  ;;  %v8172_v27 = vor.u32 %v9834_v58, %v8169_v57  ;;  %v9794_v58 = vld [vmem:[%s14754_s1 + $0x92c] sm:$0xf]  ;;  %v8009_v57 = vld [vmem:[%s14754_s1 + $0x938] sm:$0xf0]  ;;  %v7884_v43 = vor.u32 %v9762_v2, %v7881_v52 }
 0x21d   : > { %4861 = vmatpush.bf16.msra.mxu0 %v7804_v23  ;;  %v7772_v23 = vor.u32 %v9734_v13, %v7769_v22  ;;  %v9726_v13 = vld [vmem:[%s14754_s1 + $0x70c] sm:$0xf]  ;;  %v7737_v22 = vld [vmem:[%s14754_s1 + $0x718] sm:$0xf0] }
 0x21e   : > { %4875 = vmatpush.bf16.msra.mxu1 %v7932_v4  ;;  %v13662_v4 = vpop.f32.mrf.mxu0  ;;  %v9758_v12 = vld [vmem:[%s14754_s1 + $0x80c] sm:$0xf]  ;;  %v7865_v30 = vld [vmem:[%s14754_s1 + $0x818] sm:$0xf0]  ;;  %v7740_v52 = vor.u32 %v9726_v13, %v7737_v22 }
 0x21f   : > { %4889 = vmatpush.bf16.msra.mxu2 %v8060_v17  ;;  %v13664_v17 = vpop.f32.mrf.mxu3  ;;  %v9790_v48 = vld [vmem:[%s14754_s1 + $0x90c] sm:$0xf]  ;;  %v7993_v26 = vld [vmem:[%s14754_s1 + $0x918] sm:$0xf0]  ;;  %v7868_v53 = vor.u32 %v9758_v12, %v7865_v30 }
 0x220   : > { %4903 = vmatpush.bf16.msra.mxu3 %v8188_v9  ;;  %v7753_v9 = vld [vmem:[%s14754_s1 + $0x738] sm:$0xf0]  ;;  %v7996_v54 = vor.u32 %v9790_v48, %v7993_v26  ;;  %v9910_v12 = vld [vmem:[%s14754_s1 + $0xccc] sm:$0xf] }
 0x221   : > { %4862 = vmatpush.bf16.msra.mxu0 %v7788_v29  ;;  %v9826_v29 = vld [vmem:[%s14754_s1 + $0xa2c] sm:$0xf]  ;;  %v8361_v2 = vld [vmem:[%s14754_s1 + $0xbf8] sm:$0xf0] }
 0x222   : > { %4876 = vmatpush.bf16.msra.mxu1 %v7916_v44  ;;  %v8137_v44 = vld [vmem:[%s14754_s1 + $0xa38] sm:$0xf0] }
 0x223   : > { %4890 = vmatpush.bf16.msra.mxu2 %v8044_v39  ;;  %v7756_v39 = vor.u32 %v9730_v20, %v7753_v9  ;;  %v8140_v55 = vor.u32 %v9826_v29, %v8137_v44  ;;  %v13716_v20 = vpop.f32.mrf.mxu2  ;;  %v9882_v9 = vld [vmem:[%s14754_s1 + $0xbec] sm:$0xf]  ;;  %v8617_v29 = vld [vmem:[%s14754_s1 + $0xdf8] sm:$0xf0] }
 0x224   : > { %4904 = vmatpush.bf16.msra.mxu3 %v8172_v27  ;;  %v8012_v27 = vor.u32 %v9794_v58, %v8009_v57  ;;  %v8489_v58 = vld [vmem:[%s14754_s1 + $0xcf8] sm:$0xf0]  ;;  %v9946_v57 = vld [vmem:[%s14754_s1 + $0xdec] sm:$0xf]  ;;  %v8364_v49 = vor.u32 %v9882_v9, %v8361_v2 }
 0x225   : > { %4863 = vmatpush.bf16.msra.mxu0 %v7772_v23  ;;  %v9822_v23 = vld [vmem:[%s14754_s1 + $0xa0c] sm:$0xf]  ;;  %v8745_v13 = vld [vmem:[%s14754_s1 + $0xef8] sm:$0xf0] }
 0x226   : > { %4877 = vmatpush.bf16.msra.mxu1 %v7900_v15  ;;  %v8121_v15 = vld [vmem:[%s14754_s1 + $0xa18] sm:$0xf0]  ;;  %v13736_v44 = vpop.f32.mrf.mxu0 }
 0x227   : > { %4891 = vmatpush.bf16.msra.mxu2 %v8028_v21  ;;  %v13714_v21 = vpop.f32.mrf.mxu1  ;;  %v8124_v22 = vor.u32 %v9822_v23, %v8121_v15  ;;  %v13744_v18 = vpop.f32.mrf.mxu3  ;;  %v8473_v48 = vld [vmem:[%s14754_s1 + $0xcd8] sm:$0xf0]  ;;  %v9974_v23 = vld [vmem:[%s14754_s1 + $0xecc] sm:$0xf] }
 0x228   : > { %4905 = vmatpush.bf16.msra.mxu3 %v8156_v6  ;;  %14780 = vst [vmem:[#allocation20_spill] sm:$0xff] %v13714_v21  ;;  %v9914_v6 = vld [vmem:[%s14754_s1 + $0xcec] sm:$0xf]  ;;  %v8620_v21 = vor.u32 %v9946_v57, %v8617_v29  ;;  %v8601_v26 = vld [vmem:[%s14754_s1 + $0xdd8] sm:$0xf0] }
 0x229   : > { %4864 = vmatpush.bf16.msra.mxu0 %v7756_v39  ;;  %v9978_v39 = vld [vmem:[%s14754_s1 + $0xeec] sm:$0xf]  ;;  %v8492_v46 = vor.u32 %v9914_v6, %v8489_v58  ;;  %v8729_v15 = vld [vmem:[%s14754_s1 + $0xed8] sm:$0xf0]  ;;  %v8476_v6 = vor.u32 %v9910_v12, %v8473_v48 }
 0x22a   : > { %4878 = vmatpush.bf16.msra.mxu1 %v7884_v43  ;;  %v9878_v43 = vld [vmem:[%s14754_s1 + $0xbcc] sm:$0xf]  ;;  %v8748_v30 = vor.u32 %v9978_v39, %v8745_v13  ;;  %v8585_v57 = vld [vmem:[%s14754_s1 + $0xdb8] sm:$0xf0]  ;;  %v3988_v13 = vadd.f32 %v11507_v7, %v11481_v61 }
 0x22b   : > { %4892 = vmatpush.bf16.msra.mxu2 %v8012_v27  ;;  %v8345_v27 = vld [vmem:[%s14754_s1 + $0xbd8] sm:$0xf0]  ;;  %v9906_v58 = vld [vmem:[%s14754_s1 + $0xcac] sm:$0xf]  ;;  %v13791_v29 = vpop.f32.mrf.mxu2 }
 0x22c   : > { %4906 = vmatpush.bf16.msra.mxu3 %v8140_v55  ;;  %v9942_v55 = vld [vmem:[%s14754_s1 + $0xdcc] sm:$0xf]  ;;  %v8348_v9 = vor.u32 %v9878_v43, %v8345_v27  ;;  %v8713_v39 = vld [vmem:[%s14754_s1 + $0xeb8] sm:$0xf0] }
 0x22d   : > { %4865 = vmatpush.bf16.msra.mxu0 %v7740_v52  ;;  %v8604_v52 = vor.u32 %v9942_v55, %v8601_v26  ;;  %v9870_v27 = vld [vmem:[%s14754_s1 + $0xb8c] sm:$0xf]  ;;  %v8313_v12 = vld [vmem:[%s14754_s1 + $0xb98] sm:$0xf0]  ;;  %v4254_v55 = vadd.f32 %v12532_v50, %v12375_v8 }
 0x22e   : > { %4879 = vmatpush.bf16.msra.mxu1 %v7868_v53  ;;  %v9874_v53 = vld [vmem:[%s14754_s1 + $0xbac] sm:$0xf]  ;;  %v13804_v43 = vpop.f32.mrf.mxu0  ;;  %v8441_v7 = vld [vmem:[%s14754_s1 + $0xc98] sm:$0xf0] }
 0x22f   : > { %4893 = vmatpush.bf16.msra.mxu2 %v7996_v54  ;;  %v13770_v2 = vpop.f32.mrf.mxu1  ;;  %v8329_v54 = vld [vmem:[%s14754_s1 + $0xbb8] sm:$0xf0]  ;;  %v13826_v26 = vpop.f32.mrf.mxu3  ;;  %v9866_v8 = vld [vmem:[%s14754_s1 + $0xb6c] sm:$0xf] }
 0x230   : > { %4907 = vmatpush.bf16.msra.mxu3 %v8124_v22  ;;  %4866 = vmatmul.bf16.vlgmr.msra.gmra.mxu0 %v10675_v47  ;;  %v9970_v47 = vld [vmem:[%s14754_s1 + $0xeac] sm:$0xf]  ;;  %v8332_v22 = vor.u32 %v9874_v53, %v8329_v54  ;;  %v8569_v48 = vld [vmem:[%s14754_s1 + $0xd98] sm:$0xf0] }
 0x231   : > { %4914 = vmatpush.bf16.msrb.mxu0 %v8364_v49  ;;  %v8732_v49 = vor.u32 %v9974_v23, %v8729_v15  ;;  %4880 = vmatmul.bf16.vlgmr.msra.gmra.mxu1 %v10866_v31  ;;  %v8716_v61 = vor.u32 %v9970_v47, %v8713_v39  ;;  %v9966_v23 = vld [vmem:[%s14754_s1 + $0xe8c] sm:$0xf]  ;;  %v8697_v15 = vld [vmem:[%s14754_s1 + $0xe98] sm:$0xf0] }
 0x232   : > { %4928 = vmatpush.bf16.msrb.mxu1 %v8492_v46  ;;  %v8457_v46 = vld [vmem:[%s14754_s1 + $0xcb8] sm:$0xf0]  ;;  %4894 = vmatmul.bf16.vlgmr.msra.gmra.mxu2 %v10879_v36  ;;  %v9898_v54 = vld [vmem:[%s14754_s1 + $0xc6c] sm:$0xf] }
 0x233   : > { %4942 = vmatpush.bf16.msrb.mxu2 %v8620_v21  ;;  %v9938_v21 = vld [vmem:[%s14754_s1 + $0xdac] sm:$0xf]  ;;  %4908 = vmatmul.bf16.vlgmr.msra.gmra.mxu3 %v10877_v35  ;;  %v8460_v31 = vor.u32 %v9906_v58, %v8457_v46  ;;  %v8297_v50 = vld [vmem:[%s14754_s1 + $0xb78] sm:$0xf0] }
 0x234   : > { %4956 = vmatpush.bf16.msrb.mxu3 %v8748_v30  ;;  %v8588_v36 = vor.u32 %v9938_v21, %v8585_v57  ;;  %v9902_v35 = vld [vmem:[%s14754_s1 + $0xc8c] sm:$0xf]  ;;  %v8425_v58 = vld [vmem:[%s14754_s1 + $0xc78] sm:$0xf0]  ;;  %v4268_v21 = vadd.f32 %v12540_v62, %v4254_v55 }
 0x235   : > { %4915 = vmatpush.bf16.msrb.mxu0 %v8348_v9  ;;  %v9934_v30 = vld [vmem:[%s14754_s1 + $0xd8c] sm:$0xf]  ;;  %v4002_v9 = vadd.f32 %v11537_v24, %v3988_v13  ;;  %v8700_v24 = vor.u32 %v9966_v23, %v8697_v15  ;;  %v8553_v46 = vld [vmem:[%s14754_s1 + $0xd78] sm:$0xf0]  ;;  %v8428_v62 = vor.u32 %v9898_v54, %v8425_v58 }
 0x236   : > { %4929 = vmatpush.bf16.msrb.mxu1 %v8476_v6  ;;  %v8316_v6 = vor.u32 %v9870_v27, %v8313_v12  ;;  %v8572_v53 = vor.u32 %v9934_v30, %v8569_v48  ;;  %v9962_v47 = vld [vmem:[%s14754_s1 + $0xe6c] sm:$0xf]  ;;  %v8681_v39 = vld [vmem:[%s14754_s1 + $0xe78] sm:$0xf0]  ;;  %v13866_v27 = vpop.f32.mrf.mxu0 }
 0x237   : > { %4943 = vmatpush.bf16.msrb.mxu2 %v8604_v52  ;;  %v8444_v52 = vor.u32 %v9902_v35, %v8441_v7  ;;  %v13854_v57 = vpop.f32.mrf.mxu1  ;;  %v4016_v13 = vadd.f32 %v11548_v34, %v4002_v9  ;;  %v9862_v35 = vld [vmem:[%s14754_s1 + $0xb4c] sm:$0xf]  ;;  %v8281_v34 = vld [vmem:[%s14754_s1 + $0xb58] sm:$0xf0]  ;;  %v8684_v7 = vor.u32 %v9962_v47, %v8681_v39 }
 0x238   : > { %4957 = vmatpush.bf16.msrb.mxu3 %v8732_v49  ;;  %v9930_v49 = vld [vmem:[%s14754_s1 + $0xd6c] sm:$0xf]  ;;  %v8409_v30 = vld [vmem:[%s14754_s1 + $0xc58] sm:$0xf0]  ;;  %v8284_v15 = vor.u32 %v9862_v35, %v8281_v34 }
 0x239   : > { %4916 = vmatpush.bf16.msrb.mxu0 %v8332_v22  ;;  %v8300_v22 = vor.u32 %v9866_v8, %v8297_v50  ;;  %v8556_v12 = vor.u32 %v9930_v49, %v8553_v46  ;;  %v9926_v48 = vld [vmem:[%s14754_s1 + $0xd4c] sm:$0xf]  ;;  %v8537_v55 = vld [vmem:[%s14754_s1 + $0xd58] sm:$0xf0] }
 0x23a   : > { %4930 = vmatpush.bf16.msrb.mxu1 %v8460_v31  ;;  %v4282_v31 = vadd.f32 %v12579_v42, %v4268_v21  ;;  %v9894_v42 = vld [vmem:[%s14754_s1 + $0xc4c] sm:$0xf]  ;;  %v8265_v50 = vld [vmem:[%s14754_s1 + $0xb38] sm:$0xf0] }
 0x23b   : > { %4944 = vmatpush.bf16.msrb.mxu2 %v8588_v36  ;;  %v13864_v36 = vpop.f32.mrf.mxu2  ;;  %v9958_v23 = vld [vmem:[%s14754_s1 + $0xe4c] sm:$0xf]  ;;  %v8393_v58 = vld [vmem:[%s14754_s1 + $0xc38] sm:$0xf0] }
 0x23c   : > { %4958 = vmatpush.bf16.msrb.mxu3 %v8716_v61  ;;  %v4030_v61 = vadd.f32 %v11705_v45, %v4016_v13  ;;  %v8665_v45 = vld [vmem:[%s14754_s1 + $0xe58] sm:$0xf0]  ;;  %v4296_v9 = vadd.f32 %v12590_v63, %v4282_v31  ;;  %v9858_v8 = vld [vmem:[%s14754_s1 + $0xb2c] sm:$0xf] }
 0x23d   : > { %4917 = vmatpush.bf16.msrb.mxu0 %v8316_v6  ;;  %v13894_v6 = vpop.f32.mrf.mxu3  ;;  %v9890_v54 = vld [vmem:[%s14754_s1 + $0xc2c] sm:$0xf]  ;;  %v8521_v46 = vld [vmem:[%s14754_s1 + $0xd38] sm:$0xf0] }
 0x23e   : > { %4931 = vmatpush.bf16.msrb.mxu1 %v8444_v52  ;;  %v8412_v52 = vor.u32 %v9894_v42, %v8409_v30  ;;  %v4044_v63 = vadd.f32 %v11713_v51, %v4030_v61  ;;  %v9922_v49 = vld [vmem:[%s14754_s1 + $0xd2c] sm:$0xf]  ;;  %v4310_v21 = vadd.f32 %v12815_v0, %v4296_v9  ;;  %v8649_v39 = vld [vmem:[%s14754_s1 + $0xe38] sm:$0xf0] }
 0x23f   : > { %4945 = vmatpush.bf16.msrb.mxu2 %v8572_v53  ;;  %v8540_v53 = vor.u32 %v9926_v48, %v8537_v55  ;;  %v13916_v47 = vpop.f32.mrf.mxu1  ;;  %v9954_v51 = vld [vmem:[%s14754_s1 + $0xe2c] sm:$0xf]  ;;  %v8249_v0 = vld [vmem:[%s14754_s1 + $0xb18] sm:$0xf0]  ;;  %v8524_v35 = vor.u32 %v9922_v49, %v8521_v46  ;;  %v14781_v49 = vld [vmem:[#allocation6_spill] sm:$0xff] }
 0x240   : > { %4959 = vmatpush.bf16.msrb.mxu3 %v8700_v24  ;;  %v8668_v24 = vor.u32 %v9958_v23, %v8665_v45  ;;  %v4058_v13 = vadd.f32 %v11752_v10, %v4044_v63  ;;  %v9854_v31 = vld [vmem:[%s14754_s1 + $0xb0c] sm:$0xf]  ;;  %v8377_v34 = vld [vmem:[%s14754_s1 + $0xc18] sm:$0xf0]  ;;  %v8652_v61 = vor.u32 %v9954_v51, %v8649_v39  ;;  %v4324_v55 = vadd.f32 %v12823_v33, %v4310_v21  ;;  %v13952_v23 = vpop.f32.mrf.mxu0 }
 0x241   : > { %4918 = vmatpush.bf16.msrb.mxu0 %v8300_v22  ;;  %v8268_v22 = vor.u32 %v9858_v8, %v8265_v50  ;;  %v9886_v10 = vld [vmem:[%s14754_s1 + $0xc0c] sm:$0xf]  ;;  %v8633_v48 = vld [vmem:[%s14754_s1 + $0xe18] sm:$0xf0]  ;;  %v8252_v33 = vor.u32 %v9854_v31, %v8249_v0  ;;  %v4520_v21 = vadd.f32 %v13744_v18, %v13716_v20 }
 0x242   : > { %4932 = vmatpush.bf16.msrb.mxu1 %v8428_v62  ;;  %v9918_v42 = vld [vmem:[%s14754_s1 + $0xd0c] sm:$0xf]  ;;  %v9001_v8 = vld [vmem:[%s14754_s1 + $0x10f8] sm:$0xf0]  ;;  %v4338_v63 = vadd.f32 %v12858_v14, %v4324_v55 }
 0x243   : > { %4946 = vmatpush.bf16.msrb.mxu2 %v8556_v12  ;;  %v13931_v62 = vpop.f32.mrf.mxu2  ;;  %v8396_v12 = vor.u32 %v9890_v54, %v8393_v58  ;;  %v9950_v30 = vld [vmem:[%s14754_s1 + $0xe0c] sm:$0xf]  ;;  %v9129_v54 = vld [vmem:[%s14754_s1 + $0x11f8] sm:$0xf0]  ;;  %v4534_v18 = vadd.f32 %v13804_v43, %v4520_v21 }
 0x244   : > { %4960 = vmatpush.bf16.msrb.mxu3 %v8684_v7  ;;  %v8505_v7 = vld [vmem:[%s14754_s1 + $0xd18] sm:$0xf0]  ;;  %v10010_v45 = vld [vmem:[%s14754_s1 + $0xfec] sm:$0xf]  ;;  %v8636_v14 = vor.u32 %v9950_v30, %v8633_v48 }
 0x245   : > { %4919 = vmatpush.bf16.msrb.mxu0 %v8284_v15  ;;  %v8873_v15 = vld [vmem:[%s14754_s1 + $0xff8] sm:$0xf0]  ;;  %v10042_v9 = vld [vmem:[%s14754_s1 + $0x10ec] sm:$0xf] }
 0x246   : > { %4933 = vmatpush.bf16.msrb.mxu1 %v8412_v52  ;;  %v4072_v52 = vadd.f32 %v11763_v16, %v4058_v13  ;;  %v10074_v50 = vld [vmem:[%s14754_s1 + $0x11ec] sm:$0xf]  ;;  %v13976_v16 = vpop.f32.mrf.mxu3  ;;  %v9257_v58 = vld [vmem:[%s14754_s1 + $0x12f8] sm:$0xf0]  ;;  %v8876_v51 = vor.u32 %v10010_v45, %v8873_v15  ;;  %v9004_v39 = vor.u32 %v10042_v9, %v9001_v8 }
 0x247   : > { %4947 = vmatpush.bf16.msrb.mxu2 %v8540_v53  ;;  %v4518_v53 = vadd.f32 %v13664_v17, %v13636_v28  ;;  %v8380_v28 = vor.u32 %v9886_v10, %v8377_v34  ;;  %v8508_v17 = vor.u32 %v9918_v42, %v8505_v7  ;;  %v9132_v13 = vor.u32 %v10074_v50, %v9129_v54  ;;  %v8857_v31 = vld [vmem:[%s14754_s1 + $0xfd8] sm:$0xf0]  ;;  %v10038_v0 = vld [vmem:[%s14754_s1 + $0x10cc] sm:$0xf]  ;;  %v14782_v42 = vld [vmem:[#allocation18_spill] sm:$0xff]  ;;  %v14008_v7 = vpop.f32.mrf.mxu1 }
 0x248   : > { %4961 = vmatpush.bf16.msrb.mxu3 %v8668_v24  ;;  %v10106_v24 = vld [vmem:[%s14754_s1 + $0x12ec] sm:$0xf]  ;;  %v4086_v46 = vadd.f32 %v14781_v49, %v4072_v52  ;;  %v9113_v34 = vld [vmem:[%s14754_s1 + $0x11d8] sm:$0xf0]  ;;  %v14020_v9 = vpop.f32.mrf.mxu0  ;;  %v4548_v54 = vadd.f32 %v13854_v57, %v4534_v18  ;;  %v14784_v57 = vld [vmem:[#allocation8_spill] sm:$0xff] }
 0x249   : > { %4920 = vmatpush.bf16.msrb.mxu0 %v8268_v22  ;;  %v10006_v22 = vld [vmem:[%s14754_s1 + $0xfcc] sm:$0xf]  ;;  %v9260_v20 = vor.u32 %v10106_v24, %v9257_v58  ;;  %v9241_v43 = vld [vmem:[%s14754_s1 + $0x12d8] sm:$0xf0] }
 0x24a   : > { %4934 = vmatpush.bf16.msrb.mxu1 %v8396_v12  ;;  %v4532_v12 = vadd.f32 %v13736_v44, %v4518_v53  ;;  %v10070_v10 = vld [vmem:[%s14754_s1 + $0x11cc] sm:$0xf]  ;;  %v8860_v55 = vor.u32 %v10006_v22, %v8857_v31  ;;  %v8841_v8 = vld [vmem:[%s14754_s1 + $0xfb8] sm:$0xf0]  ;;  %v4562_v49 = vadd.f32 %v13864_v36, %v4548_v54 }
 0x24b   : > { %4948 = vmatpush.bf16.msrb.mxu2 %v8524_v35  ;;  %v8985_v35 = vld [vmem:[%s14754_s1 + $0x10d8] sm:$0xf0]  ;;  %v10102_v44 = vld [vmem:[%s14754_s1 + $0x12cc] sm:$0xf]  ;;  %v14018_v15 = vpop.f32.mrf.mxu2  ;;  %v9116_v53 = vor.u32 %v10070_v10, %v9113_v34 }
 0x24c   : > { %4962 = vmatpush.bf16.msrb.mxu3 %v8652_v61  ;;  %v4352_v61 = vadd.f32 %v14782_v42, %v4338_v63  ;;  %v14783_v30 = vld [vmem:[#allocation7_spill] sm:$0xff]  ;;  %v8988_v52 = vor.u32 %v10038_v0, %v8985_v35  ;;  %v4546_v50 = vadd.f32 %v13770_v2, %v4532_v12  ;;  %v9244_v63 = vor.u32 %v10102_v44, %v9241_v43  ;;  %v9097_v24 = vld [vmem:[%s14754_s1 + $0x11b8] sm:$0xf0] }
 0x24d   : > { %4921 = vmatpush.bf16.msrb.mxu0 %v8252_v33  ;;  %v4100_v48 = vadd.f32 %v14783_v30, %v4086_v46  ;;  %v10002_v33 = vld [vmem:[%s14754_s1 + $0xfac] sm:$0xf]  ;;  %v9225_v2 = vld [vmem:[%s14754_s1 + $0x12b8] sm:$0xf0]  ;;  %v4576_v10 = vadd.f32 %v13894_v6, %v4562_v49  ;;  %v14786_v30 = vld [vmem:[#allocation10_spill] sm:$0xff] }
 0x24e   : > { %4935 = vmatpush.bf16.msrb.mxu1 %v8380_v28  ;;  %v4366_v45 = vadd.f32 %v12944_v25, %v4352_v61  ;;  %v10034_v25 = vld [vmem:[%s14754_s1 + $0x10ac] sm:$0xf]  ;;  %v8969_v28 = vld [vmem:[%s14754_s1 + $0x10b8] sm:$0xf0]  ;;  %v8844_v46 = vor.u32 %v10002_v33, %v8841_v8  ;;  %v14055_v21 = vpop.f32.mrf.mxu3 }
 0x24f   : > { %4949 = vmatpush.bf16.msrb.mxu2 %v8508_v17  ;;  %v10066_v17 = vld [vmem:[%s14754_s1 + $0x11ac] sm:$0xf]  ;;  %v4114_v58 = vadd.f32 %v14784_v57, %v4100_v48  ;;  %v8825_v36 = vld [vmem:[%s14754_s1 + $0xf98] sm:$0xf0]  ;;  %v14077_v12 = vpop.f32.mrf.mxu1 }
 0x250   : > { %4963 = vmatpush.bf16.msrb.mxu3 %v8636_v14  ;;  %4922 = vmatmul.bf16.vlgmr.msrb.gmra.mxu0 %v10887_v40  ;;  %v10098_v40 = vld [vmem:[%s14754_s1 + $0x12ac] sm:$0xf]  ;;  %v9100_v14 = vor.u32 %v10066_v17, %v9097_v24  ;;  %v9081_v31 = vld [vmem:[%s14754_s1 + $0x1198] sm:$0xf0] }
 0x251   : > { %4970 = vmatpush.bf16.msra.mxu0 %v8876_v51  ;;  %4936 = vmatmul.bf16.vlgmr.msrb.gmra.mxu1 %v11078_v32  ;;  %v8972_v32 = vor.u32 %v10034_v25, %v8969_v28  ;;  %v9998_v51 = vld [vmem:[%s14754_s1 + $0xf8c] sm:$0xf]  ;;  %v9209_v18 = vld [vmem:[%s14754_s1 + $0x1298] sm:$0xf0] }
 0x252   : > { %4984 = vmatpush.bf16.msra.mxu1 %v9004_v39  ;;  %4950 = vmatmul.bf16.vlgmr.msrb.gmra.mxu2 %v11091_v41  ;;  %v4380_v41 = vadd.f32 %v12952_v1, %v4366_v45  ;;  %v4560_v1 = vadd.f32 %v13791_v29, %v4546_v50  ;;  %v9228_v39 = vor.u32 %v10098_v40, %v9225_v2  ;;  %v10062_v22 = vld [vmem:[%s14754_s1 + $0x118c] sm:$0xf]  ;;  %v8809_v43 = vld [vmem:[%s14754_s1 + $0xf78] sm:$0xf0]  ;;  %v4645_v50 = vpop.f32.mrf.mxu0 }
 0x253   : > { %4998 = vmatpush.bf16.msra.mxu2 %v9132_v13  ;;  %4964 = vmatmul.bf16.vlgmr.msrb.gmra.mxu3 %v11089_v38  ;;  %v10030_v38 = vld [vmem:[%s14754_s1 + $0x108c] sm:$0xf]  ;;  %v8953_v13 = vld [vmem:[%s14754_s1 + $0x1098] sm:$0xf0]  ;;  %v8828_v34 = vor.u32 %v9998_v51, %v8825_v36  ;;  %v14087_v42 = vpop.f32.mrf.mxu2  ;;  %v9084_v61 = vor.u32 %v10062_v22, %v9081_v31  ;;  %v4590_v45 = vadd.f32 %v13952_v23, %v4576_v10  ;;  %v14788_v51 = vld [vmem:[#allocation12_spill] sm:$0xff] }
 0x254   : > { %5012 = vmatpush.bf16.msra.mxu3 %v9260_v20  ;;  %v4394_v0 = vadd.f32 %v12991_v11, %v4380_v41  ;;  %v10094_v29 = vld [vmem:[%s14754_s1 + $0x128c] sm:$0xf]  ;;  %v14785_v20 = vld [vmem:[#allocation9_spill] sm:$0xff]  ;;  %v8956_v11 = vor.u32 %v10030_v38, %v8953_v13 }
 0x255   : > { %4971 = vmatpush.bf16.msra.mxu0 %v8860_v55  ;;  %v4128_v35 = vadd.f32 %v14785_v20, %v4114_v58  ;;  %v9994_v44 = vld [vmem:[%s14754_s1 + $0xf6c] sm:$0xf]  ;;  %v4574_v55 = vadd.f32 %v13826_v26, %v4560_v1  ;;  %v9065_v8 = vld [vmem:[%s14754_s1 + $0x1178] sm:$0xf0]  ;;  %v4604_v58 = vadd.f32 %v14008_v7, %v4590_v45 }
 0x256   : > { %4985 = vmatpush.bf16.msra.mxu1 %v8988_v52  ;;  %v10026_v6 = vld [vmem:[%s14754_s1 + $0x106c] sm:$0xf]  ;;  %v9212_v52 = vor.u32 %v10094_v29, %v9209_v18  ;;  %v4408_v25 = vadd.f32 %v13002_v60, %v4394_v0  ;;  %v9193_v23 = vld [vmem:[%s14754_s1 + $0x1278] sm:$0xf0]  ;;  %v14119_v17 = vpop.f32.mrf.mxu3 }
 0x257   : > { %4999 = vmatpush.bf16.msra.mxu2 %v9116_v53  ;;  %v4142_v48 = vadd.f32 %v14786_v30, %v4128_v35  ;;  %v8937_v53 = vld [vmem:[%s14754_s1 + $0x1078] sm:$0xf0]  ;;  %v10058_v33 = vld [vmem:[%s14754_s1 + $0x116c] sm:$0xf]  ;;  %v4588_v54 = vadd.f32 %v13866_v27, %v4574_v55  ;;  %v4618_v1 = vadd.f32 %v14018_v15, %v4604_v58  ;;  %v4659_v22 = vpop.f32.mrf.mxu1 }
 0x258   : > { %5013 = vmatpush.bf16.msra.mxu3 %v9244_v63  ;;  %v10090_v26 = vld [vmem:[%s14754_s1 + $0x126c] sm:$0xf]  ;;  %v8812_v63 = vor.u32 %v9994_v44, %v8809_v43  ;;  %v4422_v28 = vadd.f32 %v13542_v59, %v4408_v25  ;;  %v8940_v60 = vor.u32 %v10026_v6, %v8937_v53  ;;  %v9068_v24 = vor.u32 %v10058_v33, %v9065_v8  ;;  %v8793_v2 = vld [vmem:[%s14754_s1 + $0xf58] sm:$0xf0]  ;;  %v14789_v43 = vld [vmem:[#allocation14_spill] sm:$0xff] }
 0x259   : > { %4972 = vmatpush.bf16.msra.mxu0 %v8844_v46  ;;  %v9990_v40 = vld [vmem:[%s14754_s1 + $0xf4c] sm:$0xf]  ;;  %v9196_v49 = vor.u32 %v10090_v26, %v9193_v23  ;;  %v8921_v46 = vld [vmem:[%s14754_s1 + $0x1058] sm:$0xf0]  ;;  %v4602_v38 = vadd.f32 %v13916_v47, %v4588_v54  ;;  %v4632_v30 = vadd.f32 %v14055_v21, %v4618_v1 }
 0x25a   : > { %4986 = vmatpush.bf16.msra.mxu1 %v8972_v32  ;;  %v10022_v27 = vld [vmem:[%s14754_s1 + $0x104c] sm:$0xf]  ;;  %v9049_v32 = vld [vmem:[%s14754_s1 + $0x1158] sm:$0xf0]  ;;  %v4436_v13 = vadd.f32 %v13578_v5, %v4422_v28 }
 0x25b   : > { %5000 = vmatpush.bf16.msra.mxu2 %v9100_v14  ;;  %v14787_v57 = vld [vmem:[#allocation11_spill] sm:$0xff]  ;;  %v9177_v7 = vld [vmem:[%s14754_s1 + $0x1258] sm:$0xf0]  ;;  %v8924_v31 = vor.u32 %v10022_v27, %v8921_v46  ;;  %v4616_v15 = vadd.f32 %v13931_v62, %v4602_v38  ;;  %v4646_v25 = vadd.f32 %v4645_v50, %v4632_v30 }
 0x25c   : > { %5014 = vmatpush.bf16.msra.mxu3 %v9228_v39  ;;  %v4156_v59 = vadd.f32 %v14787_v57, %v4142_v48  ;;  %v10054_v41 = vld [vmem:[%s14754_s1 + $0x114c] sm:$0xf]  ;;  %v8796_v39 = vor.u32 %v9990_v40, %v8793_v2  ;;  %v8777_v18 = vld [vmem:[%s14754_s1 + $0xf38] sm:$0xf0] }
 0x25d   : > { %4973 = vmatpush.bf16.msra.mxu0 %v8828_v34  ;;  %v10086_v14 = vld [vmem:[%s14754_s1 + $0x124c] sm:$0xf]  ;;  %v9052_v0 = vor.u32 %v10054_v41, %v9049_v32  ;;  %v8905_v20 = vld [vmem:[%s14754_s1 + $0x1038] sm:$0xf0]  ;;  %v4450_v34 = vadd.f32 %v13580_v19, %v4436_v13  ;;  %v4630_v8 = vadd.f32 %v13976_v16, %v4616_v15  ;;  %v14794_v13 = vld [vmem:[#allocation2_spill] sm:$0xff] }
 0x25e   : > { %4987 = vmatpush.bf16.msra.mxu1 %v8956_v11  ;;  %v4170_v36 = vadd.f32 %v14788_v51, %v4156_v59  ;;  %v9986_v29 = vld [vmem:[%s14754_s1 + $0xf2c] sm:$0xf]  ;;  %v9180_v5 = vor.u32 %v10086_v14, %v9177_v7  ;;  %v9033_v10 = vld [vmem:[%s14754_s1 + $0x1138] sm:$0xf0]  ;;  %v4673_v11 = vpop.f32.mrf.mxu2  ;;  %v14791_v59 = vld [vmem:[#allocation16_spill] sm:$0xff] }
 0x25f   : > { %5001 = vmatpush.bf16.msra.mxu2 %v9084_v61  ;;  %v10018_v47 = vld [vmem:[%s14754_s1 + $0x102c] sm:$0xf]  ;;  %v14171_v61 = vpop.f32.mrf.mxu0  ;;  %v9161_v44 = vld [vmem:[%s14754_s1 + $0x1238] sm:$0xf0]  ;;  %v8780_v48 = vor.u32 %v9986_v29, %v8777_v18  ;;  %v4464_v28 = vadd.f32 %v13608_v56, %v4450_v34  ;;  %v4713_v27 = vpop.f32.mrf.mxu1 }
 0x260   : > { %5015 = vmatpush.bf16.msra.mxu3 %v9212_v52  ;;  %v10050_v35 = vld [vmem:[%s14754_s1 + $0x112c] sm:$0xf]  ;;  %v4184_v6 = vadd.f32 %v14789_v43, %v4170_v36  ;;  %v8908_v19 = vor.u32 %v10018_v47, %v8905_v20  ;;  %v8761_v52 = vld [vmem:[%s14754_s1 + $0xf18] sm:$0xf0]  ;;  %v14228_v43 = vld [vmem:[%s14756_s3] sm:$0xff] }
 0x261   : > { %4974 = vmatpush.bf16.msra.mxu0 %v8812_v63  ;;  %v10082_v62 = vld [vmem:[%s14754_s1 + $0x122c] sm:$0xf]  ;;  %v9036_v55 = vor.u32 %v10050_v35, %v9033_v10  ;;  %v8889_v23 = vld [vmem:[%s14754_s1 + $0x1018] sm:$0xf0]  ;;  %v4478_v2 = vadd.f32 %v13662_v4, %v4464_v28  ;;  %v14793_v4 = vld [vmem:[#allocation20_spill] sm:$0xff] }
 0x262   : > { %4988 = vmatpush.bf16.msra.mxu1 %v8940_v60  ;;  %v9982_v45 = vld [vmem:[%s14754_s1 + $0xf0c] sm:$0xf]  ;;  %v9164_v26 = vor.u32 %v10082_v62, %v9161_v44  ;;  %v9017_v63 = vld [vmem:[%s14754_s1 + $0x1118] sm:$0xf0]  ;;  %v4687_v60 = vpop.f32.mrf.mxu3 }
 0x263   : > { %5002 = vmatpush.bf16.msra.mxu2 %v9068_v24  ;;  %v10014_v53 = vld [vmem:[%s14754_s1 + $0x100c] sm:$0xf]  ;;  %v9145_v50 = vld [vmem:[%s14754_s1 + $0x1218] sm:$0xf0]  ;;  %v4644_v24 = vadd.f32 %v14020_v9, %v4630_v8  ;;  %v8764_v40 = vor.u32 %v9982_v45, %v8761_v52  ;;  %v4476_v9 = vadd.f32 %v13600_v3, %v13058_v37  ;;  %v4492_v36 = vadd.f32 %v14793_v4, %v4478_v2 }
 0x264   : > { %5016 = vmatpush.bf16.msra.mxu3 %v9196_v49  ;;  %v14790_v33 = vld [vmem:[#allocation15_spill] sm:$0xff]  ;;  %v8892_v57 = vor.u32 %v10014_v53, %v8889_v23  ;;  %v4660_v49 = vadd.f32 %v4659_v22, %v4646_v25  ;;  %v14792_v32 = vld [vmem:[#allocation17_spill] sm:$0xff] }
 0x265   : > { %4975 = vmatpush.bf16.msra.mxu0 %v8796_v39  ;;  %v4198_v21 = vadd.f32 %v14790_v33, %v4184_v6  ;;  %v10046_v54 = vld [vmem:[%s14754_s1 + $0x110c] sm:$0xf]  ;;  %v4658_v7 = vadd.f32 %v14077_v12, %v4644_v24  ;;  %v14797_v12 = vld [vmem:[#allocation5_spill] sm:$0xff] }
 0x266   : > { %4989 = vmatpush.bf16.msra.mxu1 %v8924_v31  ;;  %v10078_v16 = vld [vmem:[%s14754_s1 + $0x120c] sm:$0xf]  ;;  %v9020_v56 = vor.u32 %v10046_v54, %v9017_v63  ;;  %v4727_v41 = vpop.f32.mrf.mxu2  ;;  %v4674_v51 = vadd.f32 %v4673_v11, %v4660_v49  ;;  %v14799_v29 = vld [vmem:[#allocation13_spill] sm:$0xff] }
 0x267   : > { %5003 = vmatpush.bf16.msra.mxu2 %v9052_v0  ;;  %v4212_v58 = vadd.f32 %v14791_v59, %v4198_v21  ;;  %v9148_v46 = vor.u32 %v10078_v16, %v9145_v50  ;;  %v4701_v38 = vpop.f32.mrf.mxu0  ;;  %v4672_v1 = vadd.f32 %v14087_v42, %v4658_v7  ;;  %v14795_v22 = vld [vmem:[#allocation19_spill] sm:$0xff]  ;;  %v14798_v0 = vld [vmem:[#allocation4_spill] sm:$0xff]  ;;  %v4715_v47 = vpop.f32.mrf.mxu1 }
 0x268   : > { %5017 = vmatpush.bf16.msra.mxu3 %v9180_v5  ;;  %v4490_v31 = vadd.f32 %v14795_v22, %v4476_v9  ;;  %v4688_v37 = vadd.f32 %v4687_v60, %v4674_v51  ;;  %v14796_v3 = vld [vmem:[#allocation3_spill] sm:$0xff] }
 0x269   : > { %4976 = vmatpush.bf16.msra.mxu0 %v8780_v48  ;;  %v4226_v14 = vadd.f32 %v14792_v32, %v4212_v58  ;;  %v4686_v18 = vadd.f32 %v14119_v17, %v4672_v1  ;;  %v14239_v54 = vld [vmem:[%s14756_s3 + $0x8] sm:$0xff] }
 0x26a   : > { %4990 = vmatpush.bf16.msra.mxu1 %v8908_v19  ;;  %v4741_v39 = vpop.f32.mrf.mxu3  ;;  %v4702_v42 = vadd.f32 %v4701_v38, %v4688_v37 }
 0x26b   : > { %5004 = vmatpush.bf16.msra.mxu2 %v9036_v55  ;;  %v4700_v15 = vadd.f32 %v14171_v61, %v4686_v18 }
 0x26c   : > { %5018 = vmatpush.bf16.msra.mxu3 %v9164_v26  ;;  %v4716_v35 = vadd.f32 %v4715_v47, %v4702_v42 }
 0x26d   : > { %4977 = vmatpush.bf16.msra.mxu0 %v8764_v40  ;;  %v4714_v10 = vadd.f32 %v4713_v27, %v4700_v15 }
 0x26e   : > { %4991 = vmatpush.bf16.msra.mxu1 %v8892_v57  ;;  %v4729_v5 = vpop.f32.mrf.mxu2 }
 0x26f   : > { %5005 = vmatpush.bf16.msra.mxu2 %v9020_v56  ;;  %v4755_v20 = vpop.f32.mrf.mxu0  ;;  %v4730_v34 = vadd.f32 %v4729_v5, %v4716_v35  ;;  %v4728_v62 = vadd.f32 %v4727_v41, %v4714_v10  ;;  %v4769_v48 = vpop.f32.mrf.mxu1 }
 0x270   : > { %5019 = vmatpush.bf16.msra.mxu3 %v9148_v46  ;;  %4978 = vmatmul.bf16.vlgmr.msra.gmra.mxu0 %v14794_v13 }
 0x271   : > { %5049 = vmatpush.msrb.mxu0 %v4226_v14  ;;  %4992 = vmatmul.bf16.vlgmr.msra.gmra.mxu1 %v14796_v3  ;;  %v4742_v6 = vadd.f32 %v4741_v39, %v4728_v62 }
 0x272   : > { %5072 = vmatpush.msrb.mxu1 %v4492_v36  ;;  %5006 = vmatmul.bf16.vlgmr.msra.gmra.mxu2 %v14797_v12  ;;  %v4743_v11 = vpop.f32.mrf.mxu3 }
 0x273   : > { %5020 = vmatmul.bf16.vlgmr.msra.gmra.mxu3 %v14798_v0  ;;  %5050 = vmatpush.msrb.mxu0 %v14799_v29  ;;  %v4744_v44 = vadd.f32 %v4743_v11, %v4730_v34  ;;  %v4756_v61 = vadd.f32 %v4755_v20, %v4742_v6 }
 0x274   : > { %5073 = vmatpush.msrb.mxu1 %v4490_v31 }
 0x276   : > { %v4783_v19 = vpop.f32.mrf.mxu2 }
 0x277   : > { %v4757_v17 = vpop.f32.mrf.mxu0  ;;  %v4771_v45 = vpop.f32.mrf.mxu1  ;;  %v4784_v28 = vadd.f32 %v4783_v19, %v4769_v48 }
 0x278   : > { %v4758_v30 = vadd.f32 %v4757_v17, %v4744_v44 }
 0x27a   : > { %5095 = vmatpush.msrb.mxu2 %v4758_v30  ;;  %v4797_v55 = vpop.f32.mrf.mxu3 }
 0x27b   : > { %v4798_v24 = vadd.f32 %v4797_v55, %v4784_v28  ;;  %v10163_v28 = vmov 0.0  }
 0x27c   : > { %5096 = vmatpush.msrb.mxu2 %v4756_v61 }
 0x27e   : > { %v4785_v52 = vpop.f32.mrf.mxu2 }
 0x27f   : > { %v4786_v40 = vadd.f32 %v4785_v52, %v4771_v45 }
 0x280   : > { %9261 = vmatmul.msk.f32.vlgmr.msrb.gmra.mxu0 %vm5028_vm0, %v14228_v43 }
 0x281   : > { %9263 = vmatmul.msk.f32.vlgmr.msrb.gmra.mxu1 %vm5028_vm0, %v14228_v43 }
 0x282   : > { %9265 = vmatmul.msk.f32.vlgmr.msrb.gmra.mxu2 %vm5028_vm0, %v14228_v43  ;;  %v4799_v53 = vpop.f32.mrf.mxu3 }
 0x283   : > { %v4800_v27 = vadd.f32 %v4799_v53, %v4786_v40 }
 0x288   : > { %9262 = vmatmul.msk.f32.gmra.mxu0 %vm5028_vm0, %v14239_v54 }
 0x289   : > { %9264 = vmatmul.msk.f32.gmra.mxu1 %vm5028_vm0, %v14239_v54 }
 0x28a   : > { %9266 = vmatmul.msk.f32.gmra.mxu2 %vm5028_vm0, %v14239_v54 }
 0x28d   : > { %v4811_v33 = vpop.f32.mrf.mxu0 }
 0x28e   : > { %v4825_v21 = vpop.f32.mrf.mxu1  ;;  %v4812_v57 = vadd.f32 %v4811_v33, %v4798_v24 }
 0x290   : > { %v4826_v46 = vadd.f32 %v4825_v21, %v4812_v57 }
 0x295   : > { %v4839_v8 = vpop.f32.mrf.mxu2  ;;  %v4813_v26 = vpop.f32.mrf.mxu0 }
 0x296   : > { %v4853_v25 = vpop.f32.mrf.mxu3  ;;  %v4827_v23 = vpop.f32.mrf.mxu1  ;;  %v4814_v59 = vadd.f32 %v4813_v26, %v4800_v27  ;;  %v4840_v32 = vadd.f32 %v4839_v8, %v4826_v46 }
 0x298   : > { %v4828_v41 = vadd.f32 %v4827_v23, %v4814_v59  ;;  %v4854_v36 = vadd.f32 %v4853_v25, %v4840_v32 }
 0x29d   : > { %v4841_v63 = vpop.f32.mrf.mxu2 }
 0x29e   : > { %v4855_v60 = vpop.f32.mrf.mxu3  ;;  %v4842_v14 = vadd.f32 %v4841_v63, %v4828_v41 }
 0x2a0   : > { %v4856_v38 = vadd.f32 %v4855_v60, %v4842_v14 }
 0x2ad   : > { %v4867_v16 = vpop.f32.mrf.mxu0 }
 0x2ae   : > { %v4881_v50 = vpop.f32.mrf.mxu1  ;;  %v4868_v1 = vadd.f32 %v4867_v16, %v4854_v36 }
 0x2b0   : > { %v4882_v22 = vadd.f32 %v4881_v50, %v4868_v1 }
 0x2b5   : > { %v4895_v2 = vpop.f32.mrf.mxu2  ;;  %v4869_v58 = vpop.f32.mrf.mxu0 }
 0x2b6   : > { %v4909_v56 = vpop.f32.mrf.mxu3  ;;  %v4883_v49 = vpop.f32.mrf.mxu1  ;;  %v4870_v39 = vadd.f32 %v4869_v58, %v4856_v38  ;;  %v4896_v3 = vadd.f32 %v4895_v2, %v4882_v22 }
 0x2b8   : > { %v4884_v31 = vadd.f32 %v4883_v49, %v4870_v39  ;;  %v4910_v18 = vadd.f32 %v4909_v56, %v4896_v3 }
 0x2bd   : > { %v4897_v9 = vpop.f32.mrf.mxu2 }
 0x2be   : > { %v4911_v7 = vpop.f32.mrf.mxu3  ;;  %v4898_v12 = vadd.f32 %v4897_v9, %v4884_v31 }
 0x2c0   : > { %v4912_v42 = vadd.f32 %v4911_v7, %v4898_v12 }
 0x2cd   : > { %v4923_v51 = vpop.f32.mrf.mxu0 }
 0x2ce   : > { %v4937_v4 = vpop.f32.mrf.mxu1  ;;  %v4924_v47 = vadd.f32 %v4923_v51, %v4910_v18 }
 0x2d0   : > { %v4938_v34 = vadd.f32 %v4937_v4, %v4924_v47 }
 0x2d5   : > { %v4951_v13 = vpop.f32.mrf.mxu2  ;;  %v4925_v0 = vpop.f32.mrf.mxu0 }
 0x2d6   : > { %v4965_v37 = vpop.f32.mrf.mxu3  ;;  %v4939_v29 = vpop.f32.mrf.mxu1  ;;  %v4926_v15 = vadd.f32 %v4925_v0, %v4912_v42  ;;  %v4952_v62 = vadd.f32 %v4951_v13, %v4938_v34 }
 0x2d8   : > { %v4940_v11 = vadd.f32 %v4939_v29, %v4926_v15  ;;  %v4966_v6 = vadd.f32 %v4965_v37, %v4952_v62 }
 0x2dd   : > { %v4953_v5 = vpop.f32.mrf.mxu2 }
 0x2de   : > { %v4967_v20 = vpop.f32.mrf.mxu3  ;;  %v4954_v44 = vadd.f32 %v4953_v5, %v4940_v11 }
 0x2e0   : > { %v4968_v30 = vadd.f32 %v4967_v20, %v4954_v44 }
 0x2ed   : > { %v4979_v35 = vpop.f32.mrf.mxu0 }
 0x2ee   : > { %v4993_v10 = vpop.f32.mrf.mxu1  ;;  %v4980_v55 = vadd.f32 %v4979_v35, %v4966_v6 }
 0x2f0   : > { %v4994_v52 = vadd.f32 %v4993_v10, %v4980_v55 }
 0x2f5   : > { %v5007_v17 = vpop.f32.mrf.mxu2  ;;  %v4981_v48 = vpop.f32.mrf.mxu0 }
 0x2f6   : > { %v5021_v61 = vpop.f32.mrf.mxu3  ;;  %v4995_v19 = vpop.f32.mrf.mxu1  ;;  %v4982_v45 = vadd.f32 %v4981_v48, %v4968_v30  ;;  %v5008_v21 = vadd.f32 %v5007_v17, %v4994_v52 }
 0x2f8   : > { %v4996_v53 = vadd.f32 %v4995_v19, %v4982_v45  ;;  %v5022_v24 = vadd.f32 %v5021_v61, %v5008_v21 }
 0x2fd   : > { %v5009_v33 = vpop.f32.mrf.mxu2  ;;  %v14247_v25 = vpop.f32.mrf.mxu0 }
 0x2fe   : > { %v5010_v8 = vadd.f32 %v5009_v33, %v4996_v53  ;;  %v5023_v26 = vpop.f32.mrf.mxu3  ;;  %vm5127_vm1 = vcmp.ge.f32.partialorder %v14247_v25, 10.0  ;;  %v14250_v23 = vpop.f32.mrf.mxu1 }
 0x2ff   : > { %v14253_v60 = vsel %vm5127_vm1, 1.0, %v10163_v28  ;;  %vm5128_vm2 = vcmp.ge.f32.partialorder %v14250_v23, 10.0 }
 0x300   : > { %v5024_v63 = vadd.f32 %v5023_v26, %v5010_v8  ;;  %v5143_v16 = vmul.f32 0.36787945, %v14253_v60  ;;  %v14258_v50 = vsel %vm5128_vm2, 1.0, %v10163_v28 }
 0x301   : > { %v5144_v40 = vmul.f32 0.36787945, %v14258_v50 }
 0x302   : > { %5118 = vmatpush.msrb.mxu3 %v5024_v63  ;;  %v5147_v2 = vmul.f32 -54.365635, %v5143_v16  ;;  %v5199_v46 = vadd.f32 %v5143_v16, %v5143_v16 }
 0x303   : > { %v5148_v27 = vmul.f32 -54.365635, %v5144_v40  ;;  %v5200_v32 = vadd.f32 %v5144_v40, %v5144_v40 }
 0x304   : > { %5119 = vmatpush.msrb.mxu3 %v5022_v24  ;;  %v5155_v57 = vrot.slane %v5147_v2, 7 }
 0x305   : > { %9267 = vmatmul.msk.f32.vlgmr.msrb.gmra.mxu3 %vm5028_vm0, %v14228_v43  ;;  %v5156_v56 = vrot.slane %v5148_v27, 7  ;;  %v14265_v49 = vpop.f32.mrf.mxu2 }
 0x306   : > { %v5163_v59 = vadd.f32 %v5155_v57, %v14247_v25  ;;  %vm5129_vm4 = vcmp.ge.f32.partialorder %v14265_v49, 10.0 }
 0x307   : > { %v5164_v58 = vadd.f32 %v5156_v56, %v14250_v23  ;;  %v14270_v14 = vsel %vm5129_vm4, 1.0, %v10163_v28 }
 0x308   : > { %vm5167_vm3 = vcmp.ge.f32.partialorder %v5163_v59, 10.0  ;;  %v5145_v7 = vmul.f32 0.36787945, %v14270_v14 }
 0x309   : > { %v9273_v41 = vsel %vm5167_vm3, 1.0, %v10163_v28  ;;  %vm5168_vm5 = vcmp.ge.f32.partialorder %v5164_v58, 10.0 }
 0x30a   : > { %v5183_v9 = vrot.slane %v9273_v41, 1  ;;  %v9274_v43 = vsel %vm5168_vm5, 1.0, %v10163_v28  ;;  %v5149_v36 = vmul.f32 -54.365635, %v5145_v7  ;;  %v5201_v18 = vadd.f32 %v5145_v7, %v5145_v7 }
 0x30b   : > { %v5184_v51 = vrot.slane %v9274_v43, 1  ;;  %v6044_v27 = vsel %vm6043_vm9, %v14253_v60, %v9273_v41  ;;  %v6045_v56 = vsel %vm6043_vm9, %v14258_v50, %v9274_v43 }
 0x30c   : > { %v5203_v4 = vadd.f32 %v5199_v46, %v5183_v9  ;;  %v5191_v1 = vadd.f32 %v5183_v9, %v5143_v16  ;;  %v5157_v13 = vrot.slane %v5149_v36, 7 }
 0x30d   : > { %9268 = vmatmul.msk.f32.gmra.mxu3 %vm5028_vm0, %v14239_v54  ;;  %v5204_v38 = vadd.f32 %v5200_v32, %v5184_v51  ;;  %v5192_v22 = vadd.f32 %v5184_v51, %v5144_v40 }
 0x30e   : > { %v5207_v39 = vmul.f32 0.36787945, %v5203_v4  ;;  %v5165_v3 = vadd.f32 %v5157_v13, %v14265_v49  ;;  %v5195_v0 = vmul.f32 0.36787945, %v5191_v1 }
 0x30f   : > { %v5208_v31 = vmul.f32 0.36787945, %v5204_v38  ;;  %v5196_v42 = vmul.f32 0.36787945, %v5192_v22 }
 0x310   : > { %v5211_v37 = vmul.f32 -54.365635, %v5207_v39  ;;  %vm5169_vm6 = vcmp.ge.f32.partialorder %v5165_v3, 10.0  ;;  %v5263_v35 = vadd.f32 %v5207_v39, %v5195_v0 }
 0x311   : > { %v5212_v12 = vmul.f32 -54.365635, %v5208_v31  ;;  %v9275_v15 = vsel %vm5169_vm6, 1.0, %v10163_v28  ;;  %v5264_v11 = vadd.f32 %v5208_v31, %v5196_v42 }
 0x312   : > { %v5219_v29 = vrot.slane %v5211_v37, 6  ;;  %v5185_v5 = vrot.slane %v9275_v15, 1 }
 0x313   : > { %v5220_v47 = vrot.slane %v5212_v12, 6 }
 0x314   : > { %v5227_v54 = vadd.f32 %v5219_v29, %v14247_v25  ;;  %v5205_v10 = vadd.f32 %v5201_v18, %v5185_v5  ;;  %v5193_v62 = vadd.f32 %v5185_v5, %v5145_v7 }
 0x315   : > { %v5228_v20 = vadd.f32 %v5220_v47, %v14250_v23 }
 0x316   : > { %vm5231_vm7 = vcmp.ge.f32.partialorder %v5227_v54, 10.0  ;;  %v5209_v6 = vmul.f32 0.36787945, %v5205_v10  ;;  %v5197_v52 = vmul.f32 0.36787945, %v5193_v62 }
 0x317   : > { %v9277_v34 = vsel %vm5231_vm7, 1.0, %v10163_v28  ;;  %vm5232_vm8 = vcmp.ge.f32.partialorder %v5228_v20, 10.0 }
 0x318   : > { %v5247_v44 = vrot.slane %v9277_v34, 2  ;;  %v9278_v17 = vsel %vm5232_vm8, 1.0, %v10163_v28  ;;  %v5213_v48 = vmul.f32 -54.365635, %v5209_v6  ;;  %v5265_v40 = vadd.f32 %v5209_v6, %v5197_v52 }
 0x319   : > { %v5248_v30 = vrot.slane %v9278_v17, 2  ;;  %v14290_v46 = vsel %vm6048_vm10, %v6044_v27, %v9277_v34  ;;  %v14293_v32 = vsel %vm6048_vm10, %v6045_v56, %v9278_v17 }
 0x31a   : > { %v5267_v61 = vadd.f32 %v5263_v35, %v5247_v44  ;;  %v5255_v19 = vadd.f32 %v5247_v44, %v5195_v0  ;;  %v5221_v33 = vrot.slane %v5213_v48, 6  ;;  %v6046_v0 = vsel %vm6043_vm9, %v14270_v14, %v9275_v15 }
 0x31b   : > { %v5256_v55 = vadd.f32 %v5248_v30, %v5196_v42  ;;  %v5268_v45 = vadd.f32 %v5264_v11, %v5248_v30 }
 0x31c   : > { %v5271_v53 = vmul.f32 0.36787945, %v5267_v61  ;;  %v5229_v26 = vadd.f32 %v5221_v33, %v14265_v49  ;;  %v5259_v63 = vmul.f32 0.36787945, %v5255_v19 }
 0x31d   : > { %v5272_v21 = vmul.f32 0.36787945, %v5268_v45  ;;  %v5260_v16 = vmul.f32 0.36787945, %v5256_v55 }
 0x31e   : > { %v5275_v8 = vmul.f32 -54.365635, %v5271_v53  ;;  %vm5233_vm11 = vcmp.ge.f32.partialorder %v5229_v26, 10.0  ;;  %v5327_v51 = vadd.f32 %v5271_v53, %v5259_v63 }
 0x31f   : > { %v5276_v24 = vmul.f32 -54.365635, %v5272_v21  ;;  %v9279_v59 = vsel %vm5233_vm11, 1.0, %v10163_v28  ;;  %v5328_v50 = vadd.f32 %v5272_v21, %v5260_v16 }
 0x320   : > { %v5283_v2 = vrot.slane %v5275_v8, 5  ;;  %v5249_v9 = vrot.slane %v9279_v59, 2  ;;  %v14307_v42 = vsel %vm6048_vm10, %v6046_v0, %v9279_v59 }
 0x321   : > { %v5284_v57 = vrot.slane %v5276_v24, 5 }
 0x322   : > { %v5291_v58 = vadd.f32 %v5283_v2, %v14247_v25  ;;  %v5269_v60 = vadd.f32 %v5265_v40, %v5249_v9  ;;  %v5257_v43 = vadd.f32 %v5249_v9, %v5197_v52 }
 0x323   : > { %v5292_v7 = vadd.f32 %v5284_v57, %v14250_v23 }
 0x324   : > { %vm5295_vm12 = vcmp.ge.f32.partialorder %v5291_v58, 10.0  ;;  %v5273_v38 = vmul.f32 0.36787945, %v5269_v60  ;;  %v5261_v31 = vmul.f32 0.36787945, %v5257_v43 }
 0x325   : > { %v14297_v41 = vsel %vm5295_vm12, 1.0, %v10163_v28  ;;  %vm5296_vm13 = vcmp.ge.f32.partialorder %v5292_v7, 10.0 }
 0x326   : > { %v5311_v4 = vrot.slane %v14297_v41, 3  ;;  %v14301_v36 = vsel %vm5296_vm13, 1.0, %v10163_v28  ;;  %v5277_v13 = vmul.f32 -54.365635, %v5273_v38  ;;  %v5329_v10 = vadd.f32 %v5273_v38, %v5261_v31 }
 0x327   : > { %v5312_v1 = vrot.slane %v14301_v36, 3 }
 0x328   : > { %v5331_v39 = vadd.f32 %v5327_v51, %v5311_v4  ;;  %v5319_v37 = vadd.f32 %v5311_v4, %v5259_v63  ;;  %v5285_v12 = vrot.slane %v5277_v13, 5 }
 0x329   : > { %v5332_v22 = vadd.f32 %v5328_v50, %v5312_v1  ;;  %v5320_v29 = vadd.f32 %v5312_v1, %v5260_v16 }
 0x32a   : > { %v5335_v3 = vmul.f32 0.36787945, %v5331_v39  ;;  %v5293_v54 = vadd.f32 %v5285_v12, %v14265_v49  ;;  %v5323_v20 = vmul.f32 0.36787945, %v5319_v37 }
 0x32b   : > { %v5336_v18 = vmul.f32 0.36787945, %v5332_v22  ;;  %v5324_v34 = vmul.f32 0.36787945, %v5320_v29 }
 0x32c   : > { %v5339_v47 = vmul.f32 -54.365635, %v5335_v3  ;;  %vm5297_vm14 = vcmp.ge.f32.partialorder %v5293_v54, 10.0  ;;  %v5391_v17 = vadd.f32 %v5335_v3, %v5323_v20 }
 0x32d   : > { %v5340_v5 = vmul.f32 -54.365635, %v5336_v18  ;;  %v14311_v62 = vsel %vm5297_vm14, 1.0, %v10163_v28  ;;  %v5392_v61 = vadd.f32 %v5336_v18, %v5324_v34 }
 0x32e   : > { %v5347_v35 = vrot.slane %v5339_v47, 4  ;;  %v5313_v15 = vrot.slane %v14311_v62, 3 }
 0x32f   : > { %v5348_v11 = vrot.slane %v5340_v5, 4 }
 0x330   : > { %v5355_v14 = vadd.f32 %v5347_v35, %v14247_v25  ;;  %v5333_v6 = vadd.f32 %v5329_v10, %v5313_v15  ;;  %v5321_v55 = vadd.f32 %v5313_v15, %v5261_v31 }
 0x331   : > { %v5356_v44 = vadd.f32 %v5348_v11, %v14250_v23 }
 0x332   : > { %vm5359_vm15 = vcmp.ge.f32.partialorder %v5355_v14, 10.0  ;;  %v5337_v45 = vmul.f32 0.36787945, %v5333_v6  ;;  %v5325_v63 = vmul.f32 0.36787945, %v5321_v55 }
 0x333   : > { %v14317_v30 = vsel %vm5359_vm15, 1.0, %v10163_v28  ;;  %vm5360_vm1 = vcmp.ge.f32.partialorder %v5356_v44, 10.0 }
 0x334   : > { %v5375_v48 = vrot.slane %v14317_v30, 4  ;;  %v14321_v19 = vsel %vm5360_vm1, 1.0, %v10163_v28  ;;  %v5341_v33 = vmul.f32 -54.365635, %v5337_v45  ;;  %v5393_v59 = vadd.f32 %v5337_v45, %v5325_v63 }
 0x335   : > { %v5376_v52 = vrot.slane %v14321_v19, 4  ;;  %vm6053_vm1 = vcmask 1042432  }
 0x336   : > { %v5395_v53 = vadd.f32 %v5391_v17, %v5375_v48  ;;  %v5383_v8 = vadd.f32 %v5375_v48, %v5323_v20  ;;  %v5349_v16 = vrot.slane %v5341_v33, 4 }
 0x337   : > { %v5396_v21 = vadd.f32 %v5392_v61, %v5376_v52  ;;  %v5384_v24 = vadd.f32 %v5376_v52, %v5324_v34 }
 0x338   : > { %v5399_v26 = vmul.f32 0.36787945, %v5395_v53  ;;  %v5357_v27 = vadd.f32 %v5349_v16, %v14265_v49  ;;  %v5387_v58 = vmul.f32 0.36787945, %v5383_v8 }
 0x339   : > { %v5400_v40 = vmul.f32 0.36787945, %v5396_v21  ;;  %v5388_v51 = vmul.f32 0.36787945, %v5384_v24 }
 0x33a   : > { %v5403_v2 = vmul.f32 -54.365635, %v5399_v26  ;;  %vm5361_vm2 = vcmp.ge.f32.partialorder %v5357_v27, 10.0  ;;  %v5455_v38 = vadd.f32 %v5399_v26, %v5387_v58 }
 0x33b   : > { %v5404_v57 = vmul.f32 -54.365635, %v5400_v40  ;;  %v14326_v7 = vsel %vm5361_vm2, 1.0, %v10163_v28  ;;  %v5456_v39 = vadd.f32 %v5400_v40, %v5388_v51  ;;  %vm6058_vm2 = vcmask 1043456  }
 0x33c   : > { %v5411_v56 = vrot.slane %v5403_v2, 3  ;;  %v5377_v50 = vrot.slane %v14326_v7, 4 }
 0x33d   : > { %v5412_v9 = vrot.slane %v5404_v57, 3 }
 0x33e   : > { %v5419_v60 = vadd.f32 %v5411_v56, %v14247_v25  ;;  %v5397_v4 = vadd.f32 %v5393_v59, %v5377_v50  ;;  %v5385_v13 = vadd.f32 %v5377_v50, %v5325_v63 }
 0x33f   : > { %v5420_v43 = vadd.f32 %v5412_v9, %v14250_v23 }
 0x340   : > { %vm5423_vm3 = vcmp.ge.f32.partialorder %v5419_v60, 10.0  ;;  %v5401_v22 = vmul.f32 0.36787945, %v5397_v4  ;;  %v5389_v5 = vmul.f32 0.36787945, %v5385_v13 }
 0x341   : > { %vm5424_vm4 = vcmp.ge.f32.partialorder %v5420_v43, 10.0  ;;  %v14332_v1 = vsel %vm5423_vm3, 1.0, %v10163_v28  ;;  %vm6063_vm3 = vcmask 1044480  }
 0x342   : > { %v5439_v31 = vrot.slane %v14332_v1, 5  ;;  %v14336_v37 = vsel %vm5424_vm4, 1.0, %v10163_v28  ;;  %v5405_v12 = vmul.f32 -54.365635, %v5401_v22  ;;  %v5457_v44 = vadd.f32 %v5401_v22, %v5389_v5 }
 0x343   : > { %v5440_v3 = vrot.slane %v14336_v37, 5  ;;  %vm6068_vm4 = vcmask 1045504  }
 0x344   : > { %v5459_v0 = vadd.f32 %v5455_v38, %v5439_v31  ;;  %v5413_v18 = vrot.slane %v5405_v12, 3  ;;  %v5447_v47 = vadd.f32 %v5439_v31, %v5387_v58 }
 0x345   : > { %v5460_v29 = vadd.f32 %v5456_v39, %v5440_v3  ;;  %v5448_v20 = vadd.f32 %v5440_v3, %v5388_v51 }
 0x346   : > { %v5463_v54 = vmul.f32 0.36787945, %v5459_v0  ;;  %v5421_v10 = vadd.f32 %v5413_v18, %v14265_v49  ;;  %v5451_v14 = vmul.f32 0.36787945, %v5447_v47 }
 0x347   : > { %v5464_v35 = vmul.f32 0.36787945, %v5460_v29  ;;  %v5452_v17 = vmul.f32 0.36787945, %v5448_v20 }
 0x348   : > { %v5467_v34 = vmul.f32 -54.365635, %v5463_v54  ;;  %vm5425_vm5 = vcmp.ge.f32.partialorder %v5421_v10, 10.0  ;;  %v5519_v52 = vadd.f32 %v5463_v54, %v5451_v14 }
 0x349   : > { %v5468_v11 = vmul.f32 -54.365635, %v5464_v35  ;;  %v14341_v61 = vsel %vm5425_vm5, 1.0, %v10163_v28  ;;  %v5520_v21 = vadd.f32 %v5464_v35, %v5452_v17  ;;  %vm6073_vm5 = vcmask 1046528  }
 0x34a   : > { %v5475_v15 = vrot.slane %v5467_v34, 2  ;;  %v5441_v55 = vrot.slane %v14341_v61, 5 }
 0x34b   : > { %v5476_v6 = vrot.slane %v5468_v11, 2 }
 0x34c   : > { %v5483_v48 = vadd.f32 %v5475_v15, %v14247_v25  ;;  %v5461_v53 = vadd.f32 %v5457_v44, %v5441_v55  ;;  %v5449_v63 = vadd.f32 %v5441_v55, %v5389_v5 }
 0x34d   : > { %v5484_v45 = vadd.f32 %v5476_v6, %v14250_v23 }
 0x34e   : > { %vm5487_vm6 = vcmp.ge.f32.partialorder %v5483_v48, 10.0  ;;  %v5465_v16 = vmul.f32 0.36787945, %v5461_v53  ;;  %v5453_v59 = vmul.f32 0.36787945, %v5449_v63  ;;  %v14363_v48 = vpop.f32.mrf.mxu0 }
 0x34f   : > { %v14347_v33 = vsel %vm5487_vm6, 1.0, %v10163_v28  ;;  %vm5488_vm7 = vcmp.ge.f32.partialorder %v5484_v45, 10.0 }
 0x350   : > { %v5503_v8 = vrot.slane %v14347_v33, 6  ;;  %v14351_v26 = vsel %vm5488_vm7, 1.0, %v10163_v28  ;;  %v5469_v2 = vmul.f32 -54.365635, %v5465_v16  ;;  %v5521_v39 = vadd.f32 %v5465_v16, %v5453_v59 }
 0x351   : > { %v5504_v24 = vrot.slane %v14351_v26, 6 }
 0x352   : > { %v5523_v40 = vadd.f32 %v5519_v52, %v5503_v8  ;;  %v5511_v57 = vadd.f32 %v5503_v8, %v5451_v14  ;;  %v5477_v58 = vrot.slane %v5469_v2, 2  ;;  %v14365_v52 = vpop.f32.mrf.mxu1 }
 0x353   : > { %v5524_v27 = vadd.f32 %v5520_v21, %v5504_v24  ;;  %v5512_v9 = vadd.f32 %v5504_v24, %v5452_v17 }
 0x354   : > { %v5527_v56 = vmul.f32 0.36787945, %v5523_v40  ;;  %v5485_v50 = vadd.f32 %v5477_v58, %v14265_v49  ;;  %v5515_v4 = vmul.f32 0.36787945, %v5511_v57 }
 0x355   : > { %v5528_v51 = vmul.f32 0.36787945, %v5524_v27  ;;  %v5516_v13 = vmul.f32 0.36787945, %v5512_v9 }
 0x356   : > { %v5531_v60 = vmul.f32 -54.365635, %v5527_v56  ;;  %vm5489_vm8 = vcmp.ge.f32.partialorder %v5485_v50, 10.0  ;;  %v5583_v29 = vadd.f32 %v5527_v56, %v5515_v4  ;;  %v6054_v50 = vsel %vm6053_vm1, %v14290_v46, %v14297_v41 }
 0x357   : > { %v5532_v43 = vmul.f32 -54.365635, %v5528_v51  ;;  %v14356_v31 = vsel %vm5489_vm8, 1.0, %v10163_v28  ;;  %v5584_v54 = vadd.f32 %v5528_v51, %v5516_v13 }
 0x358   : > { %v5539_v38 = vrot.slane %v5531_v60, 1  ;;  %v5505_v12 = vrot.slane %v14356_v31, 6 }
 0x359   : > { %v5540_v22 = vrot.slane %v5532_v43, 1  ;;  %v6055_v43 = vsel %vm6053_vm1, %v14293_v32, %v14301_v36 }
 0x35a   : > { %v5547_v3 = vadd.f32 %v5539_v38, %v14247_v25  ;;  %v5525_v18 = vadd.f32 %v5521_v39, %v5505_v12  ;;  %v5513_v44 = vadd.f32 %v5505_v12, %v5453_v59 }
 0x35b   : > { %v5548_v0 = vadd.f32 %v5540_v22, %v14250_v23 }
 0x35c   : > { %vm5551_vm11 = vcmp.ge.f32.partialorder %v5547_v3, 10.0  ;;  %v5529_v35 = vmul.f32 0.36787945, %v5525_v18  ;;  %v5517_v63 = vmul.f32 0.36787945, %v5513_v44 }
 0x35d   : > { %v9297_v47 = vsel %vm5551_vm11, 1.0, %v10163_v28  ;;  %vm5552_vm12 = vcmp.ge.f32.partialorder %v5548_v0, 10.0 }
 0x35e   : > { %v5567_v5 = vrot.slane %v9297_v47, 7  ;;  %v9298_v20 = vsel %vm5552_vm12, 1.0, %v10163_v28  ;;  %v5533_v14 = vmul.f32 -54.365635, %v5529_v35  ;;  %v5585_v56 = vadd.f32 %v5529_v35, %v5517_v63 }
 0x35f   : > { %v5568_v10 = vrot.slane %v9298_v20, 7 }
 0x360   : > { %v5575_v34 = vadd.f32 %v5567_v5, %v5515_v4  ;;  %v5587_v11 = vadd.f32 %v5583_v29, %v5567_v5  ;;  %v5541_v6 = vrot.slane %v5533_v14, 1  ;;  %v6059_v4 = vsel %vm6058_vm2, %v6054_v50, %v14317_v30 }
 0x361   : > { %v5576_v25 = vadd.f32 %v5568_v10, %v5516_v13  ;;  %v5588_v15 = vadd.f32 %v5584_v54, %v5568_v10  ;;  %v6060_v13 = vsel %vm6058_vm2, %v6055_v43, %v14321_v19  ;;  %v6064_v3 = vsel %vm6063_vm3, %v6059_v4, %v14332_v1  ;;  %v14410_v10 = vpop.f32.mrf.mxu2 }
 0x362   : > { %v5579_v17 = vmul.f32 0.36787945, %v5575_v34  ;;  %v5591_v23 = vmul.f32 0.36787945, %v5587_v11  ;;  %v5549_v21 = vadd.f32 %v5541_v6, %v14265_v49  ;;  %v6065_v46 = vsel %vm6063_vm3, %v6060_v13, %v14336_v37 }
 0x363   : > { %v5580_v55 = vmul.f32 0.36787945, %v5576_v25  ;;  %v5592_v45 = vmul.f32 0.36787945, %v5588_v15  ;;  %v6069_v41 = vsel %vm6068_vm4, %v6064_v3, %v14347_v33  ;;  %v6070_v36 = vsel %vm6068_vm4, %v6065_v46, %v14351_v26 }
 0x364   : > { %v5595_v53 = vmul.f32 -54.365635, %v5591_v23  ;;  %v5623_v24 = vadd.f32 %v5591_v23, %v5579_v17  ;;  %vm5553_vm13 = vcmp.ge.f32.partialorder %v5549_v21, 10.0  ;;  %v14396_v19 = vsel %vm6073_vm5, %v6069_v41, %v9297_v47 }
 0x365   : > { %v5596_v8 = vmul.f32 -54.365635, %v5592_v45  ;;  %v5624_v2 = vadd.f32 %v5592_v45, %v5580_v55  ;;  %v9299_v27 = vsel %vm5553_vm13, 1.0, %v10163_v28  ;;  %v14399_v29 = vsel %vm6073_vm5, %v6070_v36, %v9298_v20 }
 0x366   : > { %v5599_v16 = vadd.f32 %v5595_v53, %v14363_v48  ;;  %v5569_v51 = vrot.slane %v9299_v27, 7  ;;  %v6056_v37 = vsel %vm6053_vm1, %v14307_v42, %v14311_v62 }
 0x367   : > { %v5600_v40 = vadd.f32 %v5596_v8, %v14365_v52  ;;  %v6061_v26 = vsel %vm6058_vm2, %v6056_v37, %v14326_v7 }
 0x368   : > { %vm5603_vm14 = vcmp.ge.f32.partialorder %v5599_v16, 10.0  ;;  %v5577_v30 = vadd.f32 %v5569_v51, %v5517_v63  ;;  %v5589_v54 = vadd.f32 %v5585_v56, %v5569_v51  ;;  %v6066_v20 = vsel %vm6063_vm3, %v6061_v26, %v14341_v61 }
 0x369   : > { %v14372_v57 = vsel %vm5603_vm14, 1.0, %v10163_v28  ;;  %vm5604_vm15 = vcmp.ge.f32.partialorder %v5600_v40, 10.0  ;;  %v6071_v11 = vsel %vm6068_vm4, %v6066_v20, %v14356_v31 }
 0x36a   : > { %v5627_v59 = vadd.f32 %v14372_v57, %v5623_v24  ;;  %v9302_v49 = vsel %vm5604_vm15, 1.0, %v10163_v28  ;;  %v5615_v58 = vadd.f32 %v14372_v57, %v5579_v17  ;;  %v5581_v35 = vmul.f32 0.36787945, %v5577_v30 }
 0x36b   : > { %v5628_v9 = vadd.f32 %v9302_v49, %v5624_v2  ;;  %v5616_v38 = vadd.f32 %v9302_v49, %v5580_v55  ;;  %v5593_v47 = vmul.f32 0.36787945, %v5589_v54  ;;  %v14417_v15 = vsel %vm6073_vm5, %v6071_v11, %v9299_v27 }
 0x36c   : > { %v5631_v60 = vmul.f32 0.36787945, %v5627_v59  ;;  %v5619_v12 = vmul.f32 0.36787945, %v5615_v58 }
 0x36d   : > { %v5632_v39 = vmul.f32 0.36787945, %v5628_v9  ;;  %v5620_v1 = vmul.f32 0.36787945, %v5616_v38  ;;  %v5597_v14 = vmul.f32 -54.365635, %v5593_v47  ;;  %v5625_v17 = vadd.f32 %v5593_v47, %v5581_v35 }
 0x36e   : > { %v5635_v22 = vmul.f32 -54.365635, %v5631_v60  ;;  %v5687_v34 = vadd.f32 %v5631_v60, %v5619_v12 }
 0x36f   : > { %v5636_v32 = vmul.f32 -54.365635, %v5632_v39  ;;  %v5688_v62 = vadd.f32 %v5632_v39, %v5620_v1  ;;  %v5601_v61 = vadd.f32 %v5597_v14, %v14410_v10 }
 0x370   : > { %v5643_v0 = vrot.slane %v5635_v22, 7 }
 0x371   : > { %v5644_v18 = vrot.slane %v5636_v32, 7  ;;  %vm5605_vm8 = vcmp.ge.f32.partialorder %v5601_v61, 10.0 }
 0x372   : > { %v5651_v33 = vadd.f32 %v5643_v0, %v14363_v48  ;;  %v9303_v45 = vsel %vm5605_vm8, 1.0, %v10163_v28 }
 0x373   : > { %v5652_v5 = vadd.f32 %v5644_v18, %v14365_v52  ;;  %v5629_v8 = vadd.f32 %v9303_v45, %v5625_v17  ;;  %v5617_v59 = vadd.f32 %v9303_v45, %v5581_v35 }
 0x374   : > { %vm5655_vm6 = vcmp.ge.f32.partialorder %v5651_v33, 10.0 }
 0x375   : > { %v9305_v42 = vsel %vm5655_vm6, 1.0, %v10163_v28  ;;  %vm5656_vm7 = vcmp.ge.f32.partialorder %v5652_v5, 10.0  ;;  %v5633_v2 = vmul.f32 0.36787945, %v5629_v8  ;;  %v5621_v38 = vmul.f32 0.36787945, %v5617_v59 }
 0x376   : > { %v5671_v7 = vrot.slane %v9305_v42, 1  ;;  %v9306_v25 = vsel %vm5656_vm7, 1.0, %v10163_v28  ;;  %v6078_v16 = vsel %vm6043_vm9, %v14372_v57, %v9305_v42 }
 0x377   : > { %v5672_v44 = vrot.slane %v9306_v25, 1  ;;  %v6079_v24 = vsel %vm6043_vm9, %v9302_v49, %v9306_v25  ;;  %v5637_v51 = vmul.f32 -54.365635, %v5633_v2  ;;  %v5689_v30 = vadd.f32 %v5633_v2, %v5621_v38  ;;  %v10115_v2 = vld [vmem:[%s14755_s2 + $0x30] sm:$0xff] }
 0x378   : > { %v5691_v23 = vadd.f32 %v5687_v34, %v5671_v7  ;;  %v5679_v55 = vadd.f32 %v5671_v7, %v5619_v12 }
 0x379   : > { %v5692_v6 = vadd.f32 %v5688_v62, %v5672_v44  ;;  %v5680_v53 = vadd.f32 %v5672_v44, %v5620_v1  ;;  %v5645_v43 = vrot.slane %v5637_v51, 7 }
 0x37a   : > { %v5695_v31 = vmul.f32 0.36787945, %v5691_v23  ;;  %v5683_v27 = vmul.f32 0.36787945, %v5679_v55  ;;  %v10116_v23 = vld [vmem:[%s14755_s2 + $0x38] sm:$0xff] }
 0x37b   : > { %v5696_v21 = vmul.f32 0.36787945, %v5692_v6  ;;  %v5684_v58 = vmul.f32 0.36787945, %v5680_v53  ;;  %v5653_v39 = vadd.f32 %v5645_v43, %v14410_v10  ;;  %v10124_v6 = vld [vmem:[%s14755_s2 + $0x78] sm:$0xff]  ;;  %6366 = vmatpush.bf16.msra.mxu0 %v10116_v23 }
 0x37c   : > { %v5699_v63 = vmul.f32 -54.365635, %v5695_v31  ;;  %v5751_v4 = vadd.f32 %v5695_v31, %v5683_v27  ;;  %6380 = vmatpush.bf16.msra.mxu1 %v10124_v6  ;;  %v10120_v23 = vld [vmem:[%s14755_s2 + $0x58] sm:$0xff] }
 0x37d   : > { %v5700_v40 = vmul.f32 -54.365635, %v5696_v21  ;;  %v5752_v49 = vadd.f32 %v5696_v21, %v5684_v58  ;;  %vm5657_vm13 = vcmp.ge.f32.partialorder %v5653_v39, 10.0  ;;  %v10122_v39 = vld [vmem:[%s14755_s2 + $0x68] sm:$0xff] }
 0x37e   : > { %v5707_v56 = vrot.slane %v5699_v63, 6  ;;  %v9307_v36 = vsel %vm5657_vm13, 1.0, %v10163_v28 }
 0x37f   : > { %v5708_v9 = vrot.slane %v5700_v40, 6  ;;  %v5673_v18 = vrot.slane %v9307_v36, 1  ;;  %v14439_v54 = vsel %vm6043_vm9, %v9303_v45, %v9307_v36  ;;  %6367 = vmatpush.bf16.msra.mxu0 %v10115_v2 }
 0x380   : > { %v5715_v60 = vadd.f32 %v5707_v56, %v14363_v48 }
 0x381   : > { %v5716_v50 = vadd.f32 %v5708_v9, %v14365_v52  ;;  %v5693_v20 = vadd.f32 %v5689_v30, %v5673_v18  ;;  %v5681_v31 = vadd.f32 %v5673_v18, %v5621_v38 }
 0x382   : > { %vm5719_vm11 = vcmp.ge.f32.partialorder %v5715_v60, 10.0 }
 0x383   : > { %v9309_v57 = vsel %vm5719_vm11, 1.0, %v10163_v28  ;;  %vm5720_vm12 = vcmp.ge.f32.partialorder %v5716_v50, 10.0  ;;  %v5697_v14 = vmul.f32 0.36787945, %v5693_v20  ;;  %v5685_v59 = vmul.f32 0.36787945, %v5681_v31 }
 0x384   : > { %v5735_v13 = vrot.slane %v9309_v57, 2  ;;  %v14429_v22 = vsel %vm6048_vm10, %v6078_v16, %v9309_v57  ;;  %v9310_v3 = vsel %vm5720_vm12, 1.0, %v10163_v28  ;;  %v10131_v31 = vld [vmem:[%s14755_s2 + $0xb0] sm:$0xff] }
 0x385   : > { %v5736_v46 = vrot.slane %v9310_v3, 2  ;;  %v14433_v41 = vsel %vm6048_vm10, %v6079_v24, %v9310_v3  ;;  %v5701_v17 = vmul.f32 -54.365635, %v5697_v14  ;;  %v5753_v36 = vadd.f32 %v5697_v14, %v5685_v59 }
 0x386   : > { %v5755_v32 = vadd.f32 %v5751_v4, %v5735_v13  ;;  %v5743_v0 = vadd.f32 %v5735_v13, %v5683_v27  ;;  %v10123_v27 = vld [vmem:[%s14755_s2 + $0x70] sm:$0xff] }
 0x387   : > { %v5756_v1 = vadd.f32 %v5752_v49, %v5736_v46  ;;  %v5744_v26 = vadd.f32 %v5736_v46, %v5684_v58  ;;  %v5709_v21 = vrot.slane %v5701_v17, 6  ;;  %6381 = vmatpush.bf16.msra.mxu1 %v10123_v27  ;;  %v10114_v49 = vld [vmem:[%s14755_s2 + $0x28] sm:$0xff]  ;;  %v10112_v17 = vld [vmem:[%s14755_s2 + $0x18] sm:$0xff] }
 0x388   : > { %v14436_v12 = vpop.f32.mrf.mxu3  ;;  %v5759_v37 = vmul.f32 0.36787945, %v5755_v32  ;;  %v5747_v34 = vmul.f32 0.36787945, %v5743_v0  ;;  %6368 = vmatpush.bf16.msra.mxu0 %v10114_v49 }
 0x389   : > { %vm5130_vm14 = vcmp.ge.f32.partialorder %v14436_v12, 10.0  ;;  %v5760_v5 = vmul.f32 0.36787945, %v5756_v1  ;;  %v5748_v7 = vmul.f32 0.36787945, %v5744_v26  ;;  %v5717_v58 = vadd.f32 %v5709_v21, %v14410_v10 }
 0x38a   : > { %v9272_v33 = vsel %vm5130_vm14, 1.0, %v10163_v28  ;;  %v5763_v47 = vmul.f32 -54.365635, %v5759_v37  ;;  %v5815_v53 = vadd.f32 %v5759_v37, %v5747_v34 }
 0x38b   : > { %v5146_v35 = vmul.f32 0.36787945, %v9272_v33  ;;  %v5764_v11 = vmul.f32 -54.365635, %v5760_v5  ;;  %v5816_v63 = vadd.f32 %v5760_v5, %v5748_v7  ;;  %vm5721_vm8 = vcmp.ge.f32.partialorder %v5717_v58, 10.0  ;;  %6382 = vmatpush.bf16.msra.mxu1 %v10122_v39  ;;  %v10113_v5 = vld [vmem:[%s14755_s2 + $0x20] sm:$0xff] }
 0x38c   : > { %v5771_v62 = vrot.slane %v5763_v47, 5  ;;  %v9311_v1 = vsel %vm5721_vm8, 1.0, %v10163_v28  ;;  %v10121_v47 = vld [vmem:[%s14755_s2 + $0x60] sm:$0xff]  ;;  %6369 = vmatpush.bf16.msra.mxu0 %v10113_v5 }
 0x38d   : > { %v5150_v42 = vmul.f32 -54.365635, %v5146_v35  ;;  %v5772_v25 = vrot.slane %v5764_v11, 5  ;;  %v5202_v51 = vadd.f32 %v5146_v35, %v5146_v35  ;;  %v5737_v26 = vrot.slane %v9311_v1, 2 }
 0x38e   : > { %v5779_v61 = vadd.f32 %v5771_v62, %v14363_v48 }
 0x38f   : > { %v5158_v44 = vrot.slane %v5150_v42, 7  ;;  %v5780_v55 = vadd.f32 %v5772_v25, %v14365_v52  ;;  %v10132_v42 = vld [vmem:[%s14755_s2 + $0xb8] sm:$0xff]  ;;  %v5757_v14 = vadd.f32 %v5753_v36, %v5737_v26  ;;  %6383 = vmatpush.bf16.msra.mxu1 %v10121_v47  ;;  %v10118_v36 = vld [vmem:[%s14755_s2 + $0x48] sm:$0xff] }
 0x390   : > { %vm5783_vm15 = vcmp.ge.f32.partialorder %v5779_v61, 10.0  ;;  %6394 = vmatpush.bf16.msra.mxu2 %v10132_v42  ;;  %6370 = vmatpush.bf16.msra.mxu0 %v10112_v17  ;;  %v10117_v42 = vld [vmem:[%s14755_s2 + $0x40] sm:$0xff] }
 0x391   : > { %v5166_v45 = vadd.f32 %v5158_v44, %v14436_v12  ;;  %v14453_v8 = vsel %vm5783_vm15, 1.0, %v10163_v28  ;;  %vm5784_vm6 = vcmp.ge.f32.partialorder %v5780_v55, 10.0 }
 0x392   : > { %v5799_v16 = vrot.slane %v14453_v8, 3  ;;  %v14457_v24 = vsel %vm5784_vm6, 1.0, %v10163_v28 }
 0x393   : > { %vm5170_vm7 = vcmp.ge.f32.partialorder %v5166_v45, 10.0  ;;  %v5800_v56 = vrot.slane %v14457_v24, 3  ;;  %6384 = vmatpush.bf16.msra.mxu1 %v10120_v23 }
 0x394   : > { %v9276_v40 = vsel %vm5170_vm7, 1.0, %v10163_v28  ;;  %v5819_v50 = vadd.f32 %v5815_v53, %v5799_v16  ;;  %v5807_v38 = vadd.f32 %v5799_v16, %v5747_v34  ;;  %v5745_v16 = vadd.f32 %v5737_v26, %v5685_v59  ;;  %6395 = vmatpush.bf16.msra.mxu2 %v10131_v31  ;;  %v10130_v59 = vld [vmem:[%s14755_s2 + $0xa8] sm:$0xff] }
 0x395   : > { %v5186_v9 = vrot.slane %v9276_v40, 1  ;;  %v6047_v60 = vsel %vm6043_vm9, %v9272_v33, %v9276_v40  ;;  %v5820_v43 = vadd.f32 %v5816_v63, %v5800_v56  ;;  %v5808_v13 = vadd.f32 %v5800_v56, %v5748_v7 }
 0x396   : > { %v5823_v57 = vmul.f32 0.36787945, %v5819_v50  ;;  %v5811_v37 = vmul.f32 0.36787945, %v5807_v38  ;;  %v5749_v49 = vmul.f32 0.36787945, %v5745_v16 }
 0x397   : > { %v5206_v4 = vadd.f32 %v5202_v51, %v5186_v9  ;;  %v5824_v3 = vmul.f32 0.36787945, %v5820_v43  ;;  %v5194_v30 = vadd.f32 %v5186_v9, %v5146_v35  ;;  %v5812_v20 = vmul.f32 0.36787945, %v5808_v13  ;;  %v10111_v9 = vld [vmem:[%s14755_s2 + $0x10] sm:$0xff] }
 0x398   : > { %v5827_v32 = vmul.f32 -54.365635, %v5823_v57  ;;  %v14484_v35 = vsel %vm6048_vm10, %v14439_v54, %v9311_v1  ;;  %v5879_v61 = vadd.f32 %v5823_v57, %v5811_v37  ;;  %v5761_v54 = vmul.f32 0.36787945, %v5757_v14  ;;  %v10119_v51 = vld [vmem:[%s14755_s2 + $0x50] sm:$0xff]  ;;  %6371 = vmatpush.bf16.msra.mxu0 %v10111_v9  ;;  %6396 = vmatpush.bf16.msra.mxu2 %v10130_v59 }
 0x399   : > { %v5210_v46 = vmul.f32 0.36787945, %v5206_v4  ;;  %v5828_v0 = vmul.f32 -54.365635, %v5824_v3  ;;  %v5198_v7 = vmul.f32 0.36787945, %v5194_v30  ;;  %v5880_v55 = vadd.f32 %v5824_v3, %v5812_v20  ;;  %6385 = vmatpush.bf16.msra.mxu1 %v10119_v51 }
 0x39a   : > { %v5835_v33 = vrot.slane %v5827_v32, 4  ;;  %v5765_v40 = vmul.f32 -54.365635, %v5761_v54  ;;  %v10110_v32 = vld [vmem:[%s14755_s2 + $0x8] sm:$0xff] }
 0x39b   : > { %v5214_v18 = vmul.f32 -54.365635, %v5210_v46  ;;  %v5836_v34 = vrot.slane %v5828_v0, 4  ;;  %v5266_v27 = vadd.f32 %v5210_v46, %v5198_v7 }
 0x39c   : > { %v5843_v62 = vadd.f32 %v5835_v33, %v14363_v48  ;;  %v5773_v43 = vrot.slane %v5765_v40, 5  ;;  %6372 = vmatpush.bf16.msra.mxu0 %v10110_v32 }
 0x39d   : > { %v5222_v11 = vrot.slane %v5214_v18, 6  ;;  %v5844_v25 = vadd.f32 %v5836_v34, %v14365_v52  ;;  %v10129_v18 = vld [vmem:[%s14755_s2 + $0xa0] sm:$0xff]  ;;  %6386 = vmatpush.bf16.msra.mxu1 %v10118_v36 }
 0x39e   : > { %vm5847_vm11 = vcmp.ge.f32.partialorder %v5843_v62, 10.0  ;;  %v5781_v39 = vadd.f32 %v5773_v43, %v14410_v10  ;;  %6397 = vmatpush.bf16.msra.mxu2 %v10129_v18  ;;  %v10128_v62 = vld [vmem:[%s14755_s2 + $0x98] sm:$0xff] }
 0x39f   : > { %v5230_v44 = vadd.f32 %v5222_v11, %v14436_v12  ;;  %v14499_v6 = vsel %vm5847_vm11, 1.0, %v10163_v28  ;;  %vm5848_vm12 = vcmp.ge.f32.partialorder %v5844_v25, 10.0  ;;  %v10109_v11 = vld [vmem:[%s14755_s2] sm:$0xff] }
 0x3a0   : > { %v5863_v45 = vrot.slane %v14499_v6, 4  ;;  %v14506_v53 = vsel %vm5848_vm12, 1.0, %v10163_v28  ;;  %vm5785_vm14 = vcmp.ge.f32.partialorder %v5781_v39, 10.0  ;;  %6373 = vmatpush.bf16.msra.mxu0 %v10109_v11 }
 0x3a1   : > { %vm5234_vm13 = vcmp.ge.f32.partialorder %v5230_v44, 10.0  ;;  %v5864_v63 = vrot.slane %v14506_v53, 4  ;;  %v14533_v33 = vsel %vm5785_vm14, 1.0, %v10163_v28  ;;  %6387 = vmatpush.bf16.msra.mxu1 %v10117_v42 }
 0x3a2   : > { %v9280_v21 = vsel %vm5234_vm13, 1.0, %v10163_v28  ;;  %v5883_v58 = vadd.f32 %v5879_v61, %v5863_v45  ;;  %v5801_v47 = vrot.slane %v14533_v33, 3  ;;  %6398 = vmatpush.bf16.msra.mxu2 %v10128_v62 }
 0x3a3   : > { %v5250_v2 = vrot.slane %v9280_v21, 2  ;;  %v14511_v56 = vsel %vm6048_vm10, %v6047_v60, %v9280_v21  ;;  %v5884_v50 = vadd.f32 %v5880_v55, %v5864_v63  ;;  %v5871_v60 = vadd.f32 %v5863_v45, %v5811_v37 }
 0x3a4   : > { %v5887_v38 = vmul.f32 0.36787945, %v5883_v58  ;;  %v5872_v46 = vadd.f32 %v5864_v63, %v5812_v20  ;;  %v5817_v20 = vadd.f32 %v5761_v54, %v5749_v49  ;;  %v10127_v63 = vld [vmem:[%s14755_s2 + $0x90] sm:$0xff] }
 0x3a5   : > { %v5270_v4 = vadd.f32 %v5266_v27, %v5250_v2  ;;  %v5888_v57 = vmul.f32 0.36787945, %v5884_v50  ;;  %v5258_v0 = vadd.f32 %v5250_v2, %v5198_v7  ;;  %v5875_v26 = vmul.f32 0.36787945, %v5871_v60  ;;  %v10126_v60 = vld [vmem:[%s14755_s2 + $0x88] sm:$0xff] }
 0x3a6   : > { %v5891_v3 = vmul.f32 -54.365635, %v5887_v38  ;;  %v5876_v7 = vmul.f32 0.36787945, %v5872_v46  ;;  %v5821_v44 = vadd.f32 %v5817_v20, %v5801_v47  ;;  %v5809_v2 = vadd.f32 %v5801_v47, %v5749_v49  ;;  %6399 = vmatpush.bf16.msra.mxu2 %v10127_v63 }
 0x3a7   : > { %v5274_v13 = vmul.f32 0.36787945, %v5270_v4  ;;  %v5892_v30 = vmul.f32 -54.365635, %v5888_v57  ;;  %v5262_v61 = vmul.f32 0.36787945, %v5258_v0  ;;  %v5943_v23 = vadd.f32 %v5887_v38, %v5875_v26 }
 0x3a8   : > { %v5899_v37 = vrot.slane %v5891_v3, 3  ;;  %v5825_v55 = vmul.f32 0.36787945, %v5821_v44  ;;  %v5944_v21 = vadd.f32 %v5888_v57, %v5876_v7  ;;  %v5813_v3 = vmul.f32 0.36787945, %v5809_v2 }
 0x3a9   : > { %v5278_v1 = vmul.f32 -54.365635, %v5274_v13  ;;  %v5900_v5 = vrot.slane %v5892_v30, 3  ;;  %v5330_v9 = vadd.f32 %v5274_v13, %v5262_v61 }
 0x3aa   : > { %v5907_v14 = vadd.f32 %v5899_v37, %v14363_v48  ;;  %v5829_v27 = vmul.f32 -54.365635, %v5825_v55  ;;  %6400 = vmatpush.bf16.msra.mxu2 %v10126_v60  ;;  %v5881_v47 = vadd.f32 %v5825_v55, %v5813_v3 }
 0x3ab   : > { %v5286_v34 = vrot.slane %v5278_v1, 5  ;;  %v5908_v25 = vadd.f32 %v5900_v5, %v14365_v52  ;;  %v10125_v1 = vld [vmem:[%s14755_s2 + $0x80] sm:$0xff] }
 0x3ac   : > { %vm5911_vm15 = vcmp.ge.f32.partialorder %v5907_v14, 10.0  ;;  %v5837_v43 = vrot.slane %v5829_v27, 4 }
 0x3ad   : > { %v5294_v54 = vadd.f32 %v5286_v34, %v14436_v12  ;;  %v14549_v17 = vsel %vm5911_vm15, 1.0, %v10163_v28  ;;  %vm5912_vm6 = vcmp.ge.f32.partialorder %v5908_v25, 10.0 }
 0x3ae   : > { %v5927_v31 = vrot.slane %v14549_v17, 5  ;;  %v14553_v45 = vsel %vm5912_vm6, 1.0, %v10163_v28  ;;  %v5845_v49 = vadd.f32 %v5837_v43, %v14410_v10  ;;  %6401 = vmatpush.bf16.msra.mxu2 %v10125_v1 }
 0x3af   : > { %vm5298_vm7 = vcmp.ge.f32.partialorder %v5294_v54, 10.0  ;;  %v5928_v40 = vrot.slane %v14553_v45, 5 }
 0x3b0   : > { %v9284_v16 = vsel %vm5298_vm7, 1.0, %v10163_v28  ;;  %v5947_v51 = vadd.f32 %v5943_v23, %v5927_v31  ;;  %v5935_v57 = vadd.f32 %v5927_v31, %v5875_v26  ;;  %vm5849_vm8 = vcmp.ge.f32.partialorder %v5845_v49, 10.0 }
 0x3b1   : > { %v5314_v58 = vrot.slane %v9284_v16, 3  ;;  %v5948_v50 = vadd.f32 %v5944_v21, %v5928_v40  ;;  %v6057_v4 = vsel %vm6053_vm1, %v14511_v56, %v9284_v16  ;;  %v5936_v32 = vadd.f32 %v5928_v40, %v5876_v7 }
 0x3b2   : > { %v5951_v38 = vmul.f32 0.36787945, %v5947_v51  ;;  %v14570_v18 = vsel %vm5849_vm8, 1.0, %v10163_v28  ;;  %v5939_v37 = vmul.f32 0.36787945, %v5935_v57 }
 0x3b3   : > { %v5334_v59 = vadd.f32 %v5330_v9, %v5314_v58  ;;  %v5952_v39 = vmul.f32 0.36787945, %v5948_v50  ;;  %v5322_v30 = vadd.f32 %v5314_v58, %v5262_v61  ;;  %v5865_v5 = vrot.slane %v14570_v18, 4 }
 0x3b4   : > { %v5955_v13 = vmul.f32 -54.365635, %v5951_v38  ;;  %v5940_v11 = vmul.f32 0.36787945, %v5936_v32  ;;  %v5987_v44 = vadd.f32 %v5951_v38, %v5939_v37  ;;  %v10140_v32 = vld [vmem:[%s14755_s2 + $0xf8] sm:$0xff] }
 0x3b5   : > { %v5338_v46 = vmul.f32 0.36787945, %v5334_v59  ;;  %v5956_v36 = vmul.f32 -54.365635, %v5952_v39  ;;  %v5885_v62 = vadd.f32 %v5881_v47, %v5865_v5  ;;  %v5326_v14 = vmul.f32 0.36787945, %v5322_v30  ;;  %6408 = vmatpush.bf16.msra.mxu3 %v10140_v32 }
 0x3b6   : > { %v5963_v56 = vrot.slane %v5955_v13, 2  ;;  %v5988_v55 = vadd.f32 %v5952_v39, %v5940_v11  ;;  %v5873_v63 = vadd.f32 %v5865_v5, %v5813_v3 }
 0x3b7   : > { %v5342_v0 = vmul.f32 -54.365635, %v5338_v46  ;;  %v5964_v26 = vrot.slane %v5956_v36, 2  ;;  %v5889_v61 = vmul.f32 0.36787945, %v5885_v62  ;;  %v5394_v2 = vadd.f32 %v5338_v46, %v5326_v14  ;;  %v10138_v62 = vld [vmem:[%s14755_s2 + $0xe8] sm:$0xff] }
 0x3b8   : > { %v5971_v34 = vadd.f32 %v5963_v56, %v14363_v48  ;;  %v5877_v38 = vmul.f32 0.36787945, %v5873_v63  ;;  %v6086_v46 = vsel %vm6053_vm1, %v14429_v22, %v14453_v8  ;;  %v6087_v22 = vsel %vm6053_vm1, %v14433_v41, %v14457_v24  ;;  %v10139_v8 = vld [vmem:[%s14755_s2 + $0xf0] sm:$0xff] }
 0x3b9   : > { %v5350_v20 = vrot.slane %v5342_v0, 4  ;;  %v5972_v42 = vadd.f32 %v5964_v26, %v14365_v52  ;;  %v5893_v16 = vmul.f32 -54.365635, %v5889_v61  ;;  %v6090_v26 = vsel %vm6058_vm2, %v6086_v46, %v14499_v6  ;;  %6409 = vmatpush.bf16.msra.mxu3 %v10139_v8 }
 0x3ba   : > { %vm5975_vm11 = vcmp.ge.f32.partialorder %v5971_v34, 10.0  ;;  %v5945_v56 = vadd.f32 %v5889_v61, %v5877_v38  ;;  %v6094_v5 = vsel %vm6063_vm3, %v6090_v26, %v14549_v17 }
 0x3bb   : > { %v5358_v7 = vadd.f32 %v5350_v20, %v14436_v12  ;;  %v9325_v25 = vsel %vm5975_vm11, 1.0, %v10163_v28  ;;  %vm5976_vm12 = vcmp.ge.f32.partialorder %v5972_v42, 10.0  ;;  %v5901_v51 = vrot.slane %v5893_v16, 3 }
 0x3bc   : > { %v5995_v54 = vrot.slane %v9325_v25, 6  ;;  %v9326_v23 = vsel %vm5976_vm12, 1.0, %v10163_v28  ;;  %v6098_v34 = vsel %vm6068_vm4, %v6094_v5, %v9325_v25 }
 0x3bd   : > { %vm5362_vm13 = vcmp.ge.f32.partialorder %v5358_v7, 10.0  ;;  %v5996_v21 = vrot.slane %v9326_v23, 6  ;;  %v5909_v60 = vadd.f32 %v5901_v51, %v14410_v10  ;;  %6410 = vmatpush.bf16.msra.mxu3 %v10138_v62 }
 0x3be   : > { %v9288_v31 = vsel %vm5362_vm13, 1.0, %v10163_v28  ;;  %v6003_v27 = vadd.f32 %v5995_v54, %v5987_v44 }
 0x3bf   : > { %v5378_v40 = vrot.slane %v9288_v31, 4  ;;  %v6062_v58 = vsel %vm6058_vm2, %v6057_v4, %v9288_v31  ;;  %v6004_v9 = vadd.f32 %v5996_v21, %v5988_v55  ;;  %vm5913_vm14 = vcmp.ge.f32.partialorder %v5909_v60, 10.0 }
 0x3c0   : > { %v6007_v43 = vmul.f32 0.36787945, %v6003_v27  ;;  %v14585_v4 = vsel %vm5913_vm14, 1.0, %v10163_v28 }
 0x3c1   : > { %v5398_v50 = vadd.f32 %v5394_v2, %v5378_v40  ;;  %v6008_v59 = vmul.f32 0.36787945, %v6004_v9  ;;  %v5386_v36 = vadd.f32 %v5378_v40, %v5326_v14  ;;  %v5929_v0 = vrot.slane %v14585_v4, 5  ;;  %v10136_v2 = vld [vmem:[%s14755_s2 + $0xd8] sm:$0xff] }
 0x3c2   : > { %v6011_v39 = vmul.f32 -54.365635, %v6007_v43 }
 0x3c3   : > { %v5402_v57 = vmul.f32 0.36787945, %v5398_v50  ;;  %v6012_v49 = vmul.f32 -54.365635, %v6008_v59  ;;  %v5949_v20 = vadd.f32 %v5945_v56, %v5929_v0  ;;  %v5390_v42 = vmul.f32 0.36787945, %v5386_v36 }
 0x3c4   : > { %v6019_v3 = vrot.slane %v6011_v39, 1  ;;  %v5937_v7 = vadd.f32 %v5929_v0, %v5877_v38  ;;  %v6088_v36 = vsel %vm6053_vm1, %v14484_v35, %v14533_v33 }
 0x3c5   : > { %v5406_v13 = vmul.f32 -54.365635, %v5402_v57  ;;  %v6020_v30 = vrot.slane %v6012_v49, 1  ;;  %v5953_v11 = vmul.f32 0.36787945, %v5949_v20  ;;  %v5458_v31 = vadd.f32 %v5402_v57, %v5390_v42 }
 0x3c6   : > { %v6027_v37 = vadd.f32 %v6019_v3, %v14363_v48  ;;  %v6091_v48 = vsel %vm6058_vm2, %v6087_v22, %v14506_v53  ;;  %v5941_v21 = vmul.f32 0.36787945, %v5937_v7  ;;  %v6092_v0 = vsel %vm6058_vm2, %v6088_v36, %v14570_v18 }
 0x3c7   : > { %v5414_v1 = vrot.slane %v5406_v13, 3  ;;  %v6028_v47 = vadd.f32 %v6020_v30, %v14365_v52  ;;  %v6095_v41 = vsel %vm6063_vm3, %v6091_v48, %v14553_v45  ;;  %v5957_v25 = vmul.f32 -54.365635, %v5953_v11 }
 0x3c8   : > { %vm6031_vm15 = vcmp.ge.f32.partialorder %v6027_v37, 10.0  ;;  %v6099_v53 = vsel %vm6068_vm4, %v6095_v41, %v9326_v23  ;;  %v5989_v27 = vadd.f32 %v5953_v11, %v5941_v21  ;;  %v6096_v56 = vsel %vm6063_vm3, %v6092_v0, %v14585_v4 }
 0x3c9   : > { %v5422_v6 = vadd.f32 %v5414_v1, %v14436_v12  ;;  %v9329_v24 = vsel %vm6031_vm15, 1.0, %v10163_v28  ;;  %vm6032_vm6 = vcmp.ge.f32.partialorder %v6028_v47, 10.0  ;;  %v5965_v54 = vrot.slane %v5957_v25, 2 }
 0x3ca   : > { %v6102_v52 = vsel %vm6073_vm5, %v6098_v34, %v9329_v24  ;;  %v9330_v17 = vsel %vm6032_vm6, 1.0, %v10163_v28  ;;  %v14649_v24 = vpop.f32.mrf.mxu3 }
 0x3cb   : > { %vm5426_vm7 = vcmp.ge.f32.partialorder %v5422_v6, 10.0  ;;  %v6106_v14 = vpack.c.bf16 %v6102_v52, %v14396_v19  ;;  %v6103_v45 = vsel %vm6073_vm5, %v6099_v53, %v9330_v17  ;;  %v10137_v19 = vld [vmem:[%s14755_s2 + $0xe0] sm:$0xff]  ;;  %v5973_v63 = vadd.f32 %v5965_v54, %v14410_v10 }
 0x3cc   : > { %v6107_v44 = vpack.c.bf16 %v6103_v45, %v14399_v29  ;;  %v9292_v61 = vsel %vm5426_vm7, 1.0, %v10163_v28  ;;  %6411 = vmatpush.bf16.msra.mxu3 %v10137_v19 }
 0x3cd   : > { %6374 = vmatmul.bf16.vlgmr.msra.gmra.mxu0 %v6106_v14  ;;  %v5442_v55 = vrot.slane %v9292_v61, 5  ;;  %v6067_v23 = vsel %vm6063_vm3, %v6062_v58, %v9292_v61  ;;  %vm5977_vm8 = vcmp.ge.f32.partialorder %v5973_v63, 10.0 }
 0x3ce   : > { %6388 = vmatmul.bf16.vlgmr.msra.gmra.mxu1 %v6107_v44  ;;  %v9327_v40 = vsel %vm5977_vm8, 1.0, %v10163_v28 }
 0x3cf   : > { %v5462_v16 = vadd.f32 %v5458_v31, %v5442_v55  ;;  %v5997_v58 = vrot.slane %v9327_v40, 6  ;;  %v5450_v9 = vadd.f32 %v5442_v55, %v5390_v42  ;;  %v6100_v26 = vsel %vm6068_vm4, %v6096_v56, %v9327_v40 }
 0x3d0   : > { %6412 = vmatpush.bf16.msra.mxu3 %v10136_v2 }
 0x3d1   : > { %v5466_v29 = vmul.f32 0.36787945, %v5462_v16  ;;  %v6005_v50 = vadd.f32 %v5997_v58, %v5989_v27  ;;  %v5454_v38 = vmul.f32 0.36787945, %v5450_v9 }
 0x3d3   : > { %v5470_v51 = vmul.f32 -54.365635, %v5466_v29  ;;  %v6009_v59 = vmul.f32 0.36787945, %v6005_v50  ;;  %v5522_v3 = vadd.f32 %v5466_v29, %v5454_v38 }
 0x3d5   : > { %v5478_v43 = vrot.slane %v5470_v51, 2  ;;  %v6013_v57 = vmul.f32 -54.365635, %v6009_v59 }
 0x3d7   : > { %v5486_v60 = vadd.f32 %v5478_v43, %v14436_v12  ;;  %v6021_v49 = vrot.slane %v6013_v57, 1 }
 0x3d9   : > { %vm5490_vm11 = vcmp.ge.f32.partialorder %v5486_v60, 10.0  ;;  %v6029_v32 = vadd.f32 %v6021_v49, %v14410_v10 }
 0x3da   : > { %v9296_v39 = vsel %vm5490_vm11, 1.0, %v10163_v28 }
 0x3db   : > { %v5506_v13 = vrot.slane %v9296_v39, 6  ;;  %v6072_v46 = vsel %vm6068_vm4, %v6067_v23, %v9296_v39  ;;  %vm6033_vm12 = vcmp.ge.f32.partialorder %v6029_v32, 10.0 }
 0x3dc   : > { %v9331_v37 = vsel %vm6033_vm12, 1.0, %v10163_v28 }
 0x3dd   : > { %v5526_v30 = vadd.f32 %v5522_v3, %v5506_v13  ;;  %v6104_v22 = vsel %vm6073_vm5, %v6100_v26, %v9331_v37  ;;  %v5514_v10 = vadd.f32 %v5506_v13, %v5454_v38  ;;  %v10135_v26 = vld [vmem:[%s14755_s2 + $0xd0] sm:$0xff] }
 0x3de   : > { %v6108_v5 = vpack.c.bf16 %v6104_v22, %v14417_v15  ;;  %6413 = vmatpush.bf16.msra.mxu3 %v10135_v26 }
 0x3df   : > { %v5530_v1 = vmul.f32 0.36787945, %v5526_v30  ;;  %v5518_v33 = vmul.f32 0.36787945, %v5514_v10  ;;  %v10134_v10 = vld [vmem:[%s14755_s2 + $0xc8] sm:$0xff] }
 0x3e0   : > { %6402 = vmatmul.bf16.vlgmr.msra.gmra.mxu2 %v6108_v5 }
 0x3e1   : > { %v5534_v8 = vmul.f32 -54.365635, %v5530_v1  ;;  %v5586_v48 = vadd.f32 %v5530_v1, %v5518_v33 }
 0x3e2   : > { %6414 = vmatpush.bf16.msra.mxu3 %v10134_v10 }
 0x3e3   : > { %v5542_v35 = vrot.slane %v5534_v8, 1 }
 0x3e5   : > { %v5550_v18 = vadd.f32 %v5542_v35, %v14436_v12 }
 0x3e7   : > { %vm5554_vm13 = vcmp.ge.f32.partialorder %v5550_v18, 10.0  ;;  %v10133_v18 = vld [vmem:[%s14755_s2 + $0xc0] sm:$0xff] }
 0x3e8   : > { %v9300_v47 = vsel %vm5554_vm13, 1.0, %v10163_v28  ;;  %6415 = vmatpush.bf16.msra.mxu3 %v10133_v18 }
 0x3e9   : > { %v5570_v4 = vrot.slane %v9300_v47, 7  ;;  %v14647_v20 = vsel %vm6073_vm5, %v6072_v46, %v9300_v47 }
 0x3eb   : > { %v5578_v6 = vadd.f32 %v5570_v4, %v5518_v33  ;;  %v5590_v34 = vadd.f32 %v5586_v48, %v5570_v4 }
 0x3ed   : > { %v5594_v41 = vmul.f32 0.36787945, %v5590_v34  ;;  %v5582_v11 = vmul.f32 0.36787945, %v5578_v6 }
 0x3ef   : > { %v5598_v15 = vmul.f32 -54.365635, %v5594_v41  ;;  %v5626_v52 = vadd.f32 %v5594_v41, %v5582_v11 }
 0x3f1   : > { %v5602_v42 = vadd.f32 %v5598_v15, %v14649_v24 }
 0x3f3   : > { %vm5606_vm14 = vcmp.ge.f32.partialorder %v5602_v42, 10.0 }
 0x3f4   : > { %v9304_v12 = vsel %vm5606_vm14, 1.0, %v10163_v28 }
 0x3f5   : > { %v5630_v17 = vadd.f32 %v9304_v12, %v5626_v52  ;;  %v5618_v62 = vadd.f32 %v9304_v12, %v5582_v11 }
 0x3f7   : > { %v5634_v53 = vmul.f32 0.36787945, %v5630_v17  ;;  %v5622_v7 = vmul.f32 0.36787945, %v5618_v62 }
 0x3f9   : > { %v5638_v14 = vmul.f32 -54.365635, %v5634_v53  ;;  %v5690_v54 = vadd.f32 %v5634_v53, %v5622_v7 }
 0x3fb   : > { %v5646_v45 = vrot.slane %v5638_v14, 7 }
 0x3fd   : > { %v5654_v25 = vadd.f32 %v5646_v45, %v14649_v24 }
 0x3ff   : > { %vm5658_vm15 = vcmp.ge.f32.partialorder %v5654_v25, 10.0 }
 0x400   : > { %v9308_v44 = vsel %vm5658_vm15, 1.0, %v10163_v28 }
 0x401   : > { %v5674_v61 = vrot.slane %v9308_v44, 1  ;;  %v6081_v55 = vsel %vm6043_vm9, %v9304_v12, %v9308_v44 }
 0x403   : > { %v5694_v31 = vadd.f32 %v5690_v54, %v5674_v61  ;;  %v5682_v19 = vadd.f32 %v5674_v61, %v5622_v7 }
 0x405   : > { %v5698_v23 = vmul.f32 0.36787945, %v5694_v31  ;;  %v5686_v16 = vmul.f32 0.36787945, %v5682_v19 }
 0x407   : > { %v5702_v21 = vmul.f32 -54.365635, %v5698_v23  ;;  %v5754_v27 = vadd.f32 %v5698_v23, %v5686_v16 }
 0x409   : > { %v5710_v63 = vrot.slane %v5702_v21, 6 }
 0x40b   : > { %v5718_v29 = vadd.f32 %v5710_v63, %v14649_v24 }
 0x40d   : > { %vm5722_vm6 = vcmp.ge.f32.partialorder %v5718_v29, 10.0 }
 0x40e   : > { %v9312_v40 = vsel %vm5722_vm6, 1.0, %v10163_v28 }
 0x40f   : > { %v5738_v2 = vrot.slane %v9312_v40, 2  ;;  %v6085_v58 = vsel %vm6048_vm10, %v6081_v55, %v9312_v40 }
 0x411   : > { %v5758_v9 = vadd.f32 %v5754_v27, %v5738_v2  ;;  %v5746_v50 = vadd.f32 %v5738_v2, %v5686_v16 }
 0x413   : > { %v5762_v51 = vmul.f32 0.36787945, %v5758_v9  ;;  %v5750_v38 = vmul.f32 0.36787945, %v5746_v50 }
 0x415   : > { %v5766_v43 = vmul.f32 -54.365635, %v5762_v51  ;;  %v5818_v49 = vadd.f32 %v5762_v51, %v5750_v38 }
 0x417   : > { %v5774_v59 = vrot.slane %v5766_v43, 5 }
 0x419   : > { %v5782_v60 = vadd.f32 %v5774_v59, %v14649_v24 }
 0x41b   : > { %vm5786_vm7 = vcmp.ge.f32.partialorder %v5782_v60, 10.0 }
 0x41c   : > { %v9316_v57 = vsel %vm5786_vm7, 1.0, %v10163_v28 }
 0x41d   : > { %v5802_v39 = vrot.slane %v9316_v57, 3  ;;  %v6089_v54 = vsel %vm6053_vm1, %v6085_v58, %v9316_v57  ;;  %v10154_v57 = vld [vmem:[%s14756_s3 + $0x8] sm:$0xff] }
 0x41f   : > { %v5822_v13 = vadd.f32 %v5818_v49, %v5802_v39  ;;  %v5810_v46 = vadd.f32 %v5802_v39, %v5750_v38 }
 0x421   : > { %v5826_v3 = vmul.f32 0.36787945, %v5822_v13  ;;  %v5814_v30 = vmul.f32 0.36787945, %v5810_v46 }
 0x423   : > { %v5830_v32 = vmul.f32 -54.365635, %v5826_v3  ;;  %v5882_v37 = vadd.f32 %v5826_v3, %v5814_v30 }
 0x425   : > { %v5838_v36 = vrot.slane %v5830_v32, 4 }
 0x427   : > { %v5846_v0 = vadd.f32 %v5838_v36, %v14649_v24 }
 0x429   : > { %vm5850_vm8 = vcmp.ge.f32.partialorder %v5846_v0, 10.0 }
 0x42a   : > { %v9320_v56 = vsel %vm5850_vm8, 1.0, %v10163_v28 }
 0x42b   : > { %v5866_v1 = vrot.slane %v9320_v56, 4  ;;  %v6093_v55 = vsel %vm6058_vm2, %v6089_v54, %v9320_v56 }
 0x42d   : > { %v5886_v22 = vadd.f32 %v5882_v37, %v5866_v1  ;;  %v5874_v5 = vadd.f32 %v5866_v1, %v5814_v30 }
 0x42f   : > { %v5890_v8 = vmul.f32 0.36787945, %v5886_v22  ;;  %v5878_v47 = vmul.f32 0.36787945, %v5874_v5 }
 0x431   : > { %v5894_v35 = vmul.f32 -54.365635, %v5890_v8  ;;  %v5946_v34 = vadd.f32 %v5890_v8, %v5878_v47 }
 0x433   : > { %v5902_v33 = vrot.slane %v5894_v35, 3 }
 0x435   : > { %v5910_v4 = vadd.f32 %v5902_v33, %v14649_v24 }
 0x437   : > { %vm5914_vm11 = vcmp.ge.f32.partialorder %v5910_v4, 10.0 }
 0x438   : > { %v9324_v48 = vsel %vm5914_vm11, 1.0, %v10163_v28 }
 0x439   : > { %v5930_v6 = vrot.slane %v9324_v48, 5  ;;  %v6097_v31 = vsel %vm6063_vm3, %v6093_v55, %v9324_v48 }
 0x43b   : > { %v5950_v41 = vadd.f32 %v5946_v34, %v5930_v6  ;;  %v5938_v15 = vadd.f32 %v5930_v6, %v5878_v47 }
 0x43d   : > { %v5954_v11 = vmul.f32 0.36787945, %v5950_v41  ;;  %v5942_v12 = vmul.f32 0.36787945, %v5938_v15 }
 0x43f   : > { %v5958_v42 = vmul.f32 -54.365635, %v5954_v11  ;;  %v5990_v62 = vadd.f32 %v5954_v11, %v5942_v12 }
 0x441   : > { %v5966_v52 = vrot.slane %v5958_v42, 2 }
 0x443   : > { %v5974_v17 = vadd.f32 %v5966_v52, %v14649_v24 }
 0x445   : > { %vm5978_vm12 = vcmp.ge.f32.partialorder %v5974_v17, 10.0 }
 0x446   : > { %v9328_v53 = vsel %vm5978_vm12, 1.0, %v10163_v28 }
 0x447   : > { %v5998_v14 = vrot.slane %v9328_v53, 6  ;;  %v6101_v19 = vsel %vm6068_vm4, %v6097_v31, %v9328_v53 }
 0x449   : > { %v6006_v45 = vadd.f32 %v5998_v14, %v5990_v62 }
 0x44a   : > { %v6375_v16 = vpop.f32.mrf.mxu0 }
 0x44b   : > { %v6010_v7 = vmul.f32 0.36787945, %v6006_v45  ;;  %v6389_v29 = vpop.f32.mrf.mxu1 }
 0x44c   : > { %v6390_v51 = vadd.f32 %v6389_v29, %v6375_v16 }
 0x44d   : > { %v6014_v25 = vmul.f32 -54.365635, %v6010_v7 }
 0x44f   : > { %v6022_v44 = vrot.slane %v6014_v25, 1 }
 0x451   : > { %v6030_v61 = vadd.f32 %v6022_v44, %v14649_v24 }
 0x452   : > { %v6377_v2 = vpop.f32.mrf.mxu0 }
 0x453   : > { %vm6034_vm13 = vcmp.ge.f32.partialorder %v6030_v61, 10.0  ;;  %v6391_v27 = vpop.f32.mrf.mxu1 }
 0x454   : > { %v9332_v23 = vsel %vm6034_vm13, 1.0, %v10163_v28  ;;  %v6392_v9 = vadd.f32 %v6391_v27, %v6377_v2 }
 0x455   : > { %v6105_v21 = vsel %vm6073_vm5, %v6101_v19, %v9332_v23 }
 0x456   : > { %v6109_v63 = vpack.c.bf16 %v6105_v21, %v14647_v20  ;;  %v10153_v20 = vld [vmem:[%s14756_s3] sm:$0xff] }
 0x458   : > { %6416 = vmatmul.bf16.vlgmr.msra.gmra.mxu3 %v6109_v63 }
 0x463   : > { %v6403_v40 = vpop.f32.mrf.mxu2 }
 0x464   : > { %v6404_v59 = vadd.f32 %v6403_v40, %v6390_v51 }
 0x46b   : > { %v6405_v58 = vpop.f32.mrf.mxu2 }
 0x46c   : > { %v6406_v50 = vadd.f32 %v6405_v58, %v6392_v9 }
 0x4db   : > { %v6417_v24 = vpop.f32.mrf.mxu3 }
 0x4dc   : > { %v6418_v60 = vadd.f32 %v6417_v24, %v6404_v59 }
 0x4e3   : > { %v6419_v43 = vpop.f32.mrf.mxu3 }
 0x4e4   : > { %v6420_v38 = vadd.f32 %v6419_v43, %v6406_v50 }
 0x4e6   : > { %6436 = vmatpush.msrb.mxu0 %v6420_v38  ;;  %10141 = vmatpush.msrb.mxu1 %v6420_v38 }
 0x4e8   : > { %6437 = vmatpush.msrb.mxu0 %v6418_v60  ;;  %10142 = vmatpush.msrb.mxu1 %v6418_v60 }
 0x4e9   : > { %9461 = vmatmul.msk.f32.vlgmr.msrb.gmra.mxu0 %vm5028_vm0, %v10153_v20  ;;  %9462 = vmatmul.msk.f32.vlgmr.msrb.gmra.mxu1 %vm5028_vm0, %v10154_v57 }
 0x566   : > { %v14692_v39 = vpop.f32.mrf.mxu0 }
 0x567   : > { %vm6445_vm14 = vcmp.ge.f32.partialorder %v14692_v39, 10.0 }
 0x568   : > { %v9463_v49 = vsel %vm6445_vm14, 1.0, %v10163_v28 }
 0x569   : > { %v6449_v13 = vmul.f32 0.36787945, %v9463_v49 }
 0x56b   : > { %v6450_v3 = vmul.f32 -54.365635, %v6449_v13  ;;  %v6463_v0 = vadd.f32 %v6449_v13, %v6449_v13 }
 0x56d   : > { %v6452_v46 = vrot.slane %v6450_v3, 7 }
 0x56f   : > { %v6454_v32 = vadd.f32 %v6452_v46, %v14692_v39 }
 0x571   : > { %vm6455_vm15 = vcmp.ge.f32.partialorder %v6454_v32, 10.0 }
 0x572   : > { %v9464_v36 = vsel %vm6455_vm15, 1.0, %v10163_v28 }
 0x573   : > { %v6459_v30 = vrot.slane %v9464_v36, 1  ;;  %v6674_v56 = vsel %vm6043_vm9, %v9463_v49, %v9464_v36 }
 0x575   : > { %v6464_v1 = vadd.f32 %v6463_v0, %v6459_v30  ;;  %v6461_v26 = vadd.f32 %v6459_v30, %v6449_v13 }
 0x577   : > { %v6465_v37 = vmul.f32 0.36787945, %v6464_v1  ;;  %v6462_v8 = vmul.f32 0.36787945, %v6461_v26 }
 0x579   : > { %v6466_v22 = vmul.f32 -54.365635, %v6465_v37  ;;  %v6479_v18 = vadd.f32 %v6465_v37, %v6462_v8 }
 0x57b   : > { %v6468_v10 = vrot.slane %v6466_v22, 6 }
 0x57d   : > { %v6470_v5 = vadd.f32 %v6468_v10, %v14692_v39 }
 0x57f   : > { %vm6471_vm0 = vcmp.ge.f32.partialorder %v6470_v5, 10.0  ;;  %v14724_v5 = vpop.f32.mrf.mxu1 }
 0x580   : > { %v9465_v35 = vsel %vm6471_vm0, 1.0, %v10163_v28 }
 0x581   : > { %v6475_v33 = vrot.slane %v9465_v35, 2  ;;  %v6675_v47 = vsel %vm6048_vm10, %v6674_v56, %v9465_v35 }
 0x583   : > { %v6480_v4 = vadd.f32 %v6479_v18, %v6475_v33  ;;  %v6477_v6 = vadd.f32 %v6475_v33, %v6462_v8 }
 0x585   : > { %v6481_v48 = vmul.f32 0.36787945, %v6480_v4  ;;  %v6478_v11 = vmul.f32 0.36787945, %v6477_v6 }
 0x587   : > { %v6482_v34 = vmul.f32 -54.365635, %v6481_v48  ;;  %v6495_v12 = vadd.f32 %v6481_v48, %v6478_v11 }
 0x589   : > { %v6484_v41 = vrot.slane %v6482_v34, 5 }
 0x58b   : > { %v6486_v15 = vadd.f32 %v6484_v41, %v14692_v39 }
 0x58d   : > { %vm6487_vm6 = vcmp.ge.f32.partialorder %v6486_v15, 10.0 }
 0x58e   : > { %v9466_v42 = vsel %vm6487_vm6, 1.0, %v10163_v28 }
 0x58f   : > { %v6491_v52 = vrot.slane %v9466_v42, 3  ;;  %v6676_v36 = vsel %vm6053_vm1, %v6675_v47, %v9466_v42 }
 0x591   : > { %v6496_v17 = vadd.f32 %v6495_v12, %v6491_v52  ;;  %v6493_v62 = vadd.f32 %v6491_v52, %v6478_v11 }
 0x593   : > { %v6497_v53 = vmul.f32 0.36787945, %v6496_v17  ;;  %v6494_v7 = vmul.f32 0.36787945, %v6493_v62 }
 0x595   : > { %v6498_v14 = vmul.f32 -54.365635, %v6497_v53  ;;  %v6511_v54 = vadd.f32 %v6497_v53, %v6494_v7 }
 0x597   : > { %v6500_v45 = vrot.slane %v6498_v14, 4 }
 0x599   : > { %v6502_v25 = vadd.f32 %v6500_v45, %v14692_v39 }
 0x59b   : > { %vm6503_vm7 = vcmp.ge.f32.partialorder %v6502_v25, 10.0 }
 0x59c   : > { %v9467_v44 = vsel %vm6503_vm7, 1.0, %v10163_v28 }
 0x59d   : > { %v6507_v61 = vrot.slane %v9467_v44, 4  ;;  %v6677_v30 = vsel %vm6058_vm2, %v6676_v36, %v9467_v44 }
 0x59f   : > { %v6512_v55 = vadd.f32 %v6511_v54, %v6507_v61  ;;  %v6509_v23 = vadd.f32 %v6507_v61, %v6494_v7 }
 0x5a1   : > { %v6513_v31 = vmul.f32 0.36787945, %v6512_v55  ;;  %v6510_v63 = vmul.f32 0.36787945, %v6509_v23 }
 0x5a3   : > { %v6514_v19 = vmul.f32 -54.365635, %v6513_v31  ;;  %v6527_v24 = vadd.f32 %v6513_v31, %v6510_v63 }
 0x5a5   : > { %v6516_v21 = vrot.slane %v6514_v19, 3 }
 0x5a7   : > { %v6518_v16 = vadd.f32 %v6516_v21, %v14692_v39 }
 0x5a9   : > { %vm6519_vm8 = vcmp.ge.f32.partialorder %v6518_v16, 10.0 }
 0x5aa   : > { %v9468_v29 = vsel %vm6519_vm8, 1.0, %v10163_v28 }
 0x5ab   : > { %v6523_v40 = vrot.slane %v9468_v29, 5  ;;  %v6678_v0 = vsel %vm6063_vm3, %v6677_v30, %v9468_v29 }
 0x5ad   : > { %v6528_v2 = vadd.f32 %v6527_v24, %v6523_v40  ;;  %v6525_v58 = vadd.f32 %v6523_v40, %v6510_v63 }
 0x5af   : > { %v6529_v27 = vmul.f32 0.36787945, %v6528_v2  ;;  %v6526_v50 = vmul.f32 0.36787945, %v6525_v58 }
 0x5b1   : > { %v6530_v9 = vmul.f32 -54.365635, %v6529_v27  ;;  %v6543_v60 = vadd.f32 %v6529_v27, %v6526_v50 }
 0x5b3   : > { %v6532_v51 = vrot.slane %v6530_v9, 2 }
 0x5b5   : > { %v6534_v43 = vadd.f32 %v6532_v51, %v14692_v39 }
 0x5b7   : > { %vm6535_vm11 = vcmp.ge.f32.partialorder %v6534_v43, 10.0 }
 0x5b8   : > { %v9469_v59 = vsel %vm6535_vm11, 1.0, %v10163_v28 }
 0x5b9   : > { %v6539_v38 = vrot.slane %v9469_v59, 6  ;;  %v6679_v1 = vsel %vm6068_vm4, %v6678_v0, %v9469_v59 }
 0x5bb   : > { %v6544_v20 = vadd.f32 %v6543_v60, %v6539_v38  ;;  %v6541_v49 = vadd.f32 %v6539_v38, %v6526_v50 }
 0x5bd   : > { %v6545_v57 = vmul.f32 0.36787945, %v6544_v20  ;;  %v6542_v46 = vmul.f32 0.36787945, %v6541_v49 }
 0x5bf   : > { %v6546_v13 = vmul.f32 -54.365635, %v6545_v57  ;;  %v6559_v26 = vadd.f32 %v6545_v57, %v6542_v46 }
 0x5c1   : > { %v6548_v3 = vrot.slane %v6546_v13, 1 }
 0x5c3   : > { %v6550_v32 = vadd.f32 %v6548_v3, %v14692_v39 }
 0x5c5   : > { %vm6551_vm12 = vcmp.ge.f32.partialorder %v6550_v32, 10.0 }
 0x5c6   : > { %v9470_v56 = vsel %vm6551_vm12, 1.0, %v10163_v28 }
 0x5c7   : > { %v6555_v37 = vrot.slane %v9470_v56, 7  ;;  %v6680_v39 = vsel %vm6073_vm5, %v6679_v1, %v9470_v56 }
 0x5c8   : > { %6688 = vst [vmem:[%s14717_s28] sm:$0xff] %v6680_v39 }
 0x5c9   : > { %v6557_v22 = vadd.f32 %v6555_v37, %v6542_v46  ;;  %v6560_v10 = vadd.f32 %v6559_v26, %v6555_v37 }
 0x5cb   : > { %v6561_v8 = vmul.f32 0.36787945, %v6560_v10  ;;  %v6558_v35 = vmul.f32 0.36787945, %v6557_v22 }
 0x5cd   : > { %v6562_v33 = vmul.f32 -54.365635, %v6561_v8  ;;  %v6569_v47 = vadd.f32 %v6561_v8, %v6558_v35 }
 0x5cf   : > { %v6563_v18 = vadd.f32 %v6562_v33, %v14724_v5 }
 0x5d1   : > { %vm6564_vm13 = vcmp.ge.f32.partialorder %v6563_v18, 10.0 }
 0x5d2   : > { %v9471_v4 = vsel %vm6564_vm13, 1.0, %v10163_v28 }
 0x5d3   : > { %v6570_v48 = vadd.f32 %v9471_v4, %v6569_v47  ;;  %v6567_v34 = vadd.f32 %v9471_v4, %v6558_v35 }
 0x5d5   : > { %v6571_v6 = vmul.f32 0.36787945, %v6570_v48  ;;  %v6568_v15 = vmul.f32 0.36787945, %v6567_v34 }
 0x5d7   : > { %v6572_v41 = vmul.f32 -54.365635, %v6571_v6  ;;  %v6585_v17 = vadd.f32 %v6571_v6, %v6568_v15 }
 0x5d9   : > { %v6574_v11 = vrot.slane %v6572_v41, 7 }
 0x5db   : > { %v6576_v42 = vadd.f32 %v6574_v11, %v14724_v5 }
 0x5dd   : > { %vm6577_vm14 = vcmp.ge.f32.partialorder %v6576_v42, 10.0 }
 0x5de   : > { %v9472_v52 = vsel %vm6577_vm14, 1.0, %v10163_v28 }
 0x5df   : > { %v6581_v12 = vrot.slane %v9472_v52, 1  ;;  %v6681_v53 = vsel %vm6043_vm9, %v9471_v4, %v9472_v52 }
 0x5e1   : > { %v6586_v62 = vadd.f32 %v6585_v17, %v6581_v12  ;;  %v6583_v45 = vadd.f32 %v6581_v12, %v6568_v15 }
 0x5e3   : > { %v6587_v14 = vmul.f32 0.36787945, %v6586_v62  ;;  %v6584_v44 = vmul.f32 0.36787945, %v6583_v45 }
 0x5e5   : > { %v6588_v7 = vmul.f32 -54.365635, %v6587_v14  ;;  %v6601_v31 = vadd.f32 %v6587_v14, %v6584_v44 }
 0x5e7   : > { %v6590_v25 = vrot.slane %v6588_v7, 6 }
 0x5e9   : > { %v6592_v61 = vadd.f32 %v6590_v25, %v14724_v5 }
 0x5eb   : > { %vm6593_vm15 = vcmp.ge.f32.partialorder %v6592_v61, 10.0 }
 0x5ec   : > { %v9473_v54 = vsel %vm6593_vm15, 1.0, %v10163_v28 }
 0x5ed   : > { %v6597_v55 = vrot.slane %v9473_v54, 2  ;;  %v6682_v23 = vsel %vm6048_vm10, %v6681_v53, %v9473_v54 }
 0x5ef   : > { %v6602_v19 = vadd.f32 %v6601_v31, %v6597_v55  ;;  %v6599_v63 = vadd.f32 %v6597_v55, %v6584_v44 }
 0x5f1   : > { %v6603_v21 = vmul.f32 0.36787945, %v6602_v19  ;;  %v6600_v40 = vmul.f32 0.36787945, %v6599_v63 }
 0x5f3   : > { %v6604_v16 = vmul.f32 -54.365635, %v6603_v21  ;;  %v6617_v58 = vadd.f32 %v6603_v21, %v6600_v40 }
 0x5f5   : > { %v6606_v29 = vrot.slane %v6604_v16, 5 }
 0x5f7   : > { %v6608_v24 = vadd.f32 %v6606_v29, %v14724_v5 }
 0x5f9   : > { %vm6609_vm9 = vcmp.ge.f32.partialorder %v6608_v24, 10.0 }
 0x5fa   : > { %v9474_v2 = vsel %vm6609_vm9, 1.0, %v10163_v28 }
 0x5fb   : > { %v6613_v27 = vrot.slane %v9474_v2, 3  ;;  %v6683_v15 = vsel %vm6053_vm1, %v6682_v23, %v9474_v2 }
 0x5fd   : > { %v6618_v9 = vadd.f32 %v6617_v58, %v6613_v27  ;;  %v6615_v50 = vadd.f32 %v6613_v27, %v6600_v40 }
 0x5ff   : > { %v6619_v51 = vmul.f32 0.36787945, %v6618_v9  ;;  %v6616_v38 = vmul.f32 0.36787945, %v6615_v50 }
 0x601   : > { %v6620_v43 = vmul.f32 -54.365635, %v6619_v51  ;;  %v6633_v49 = vadd.f32 %v6619_v51, %v6616_v38 }
 0x603   : > { %v6622_v59 = vrot.slane %v6620_v43, 4 }
 0x605   : > { %v6624_v60 = vadd.f32 %v6622_v59, %v14724_v5 }
 0x607   : > { %vm6625_vm10 = vcmp.ge.f32.partialorder %v6624_v60, 10.0 }
 0x608   : > { %v9475_v20 = vsel %vm6625_vm10, 1.0, %v10163_v28 }
 0x609   : > { %v6629_v57 = vrot.slane %v9475_v20, 4  ;;  %v6684_v42 = vsel %vm6058_vm2, %v6683_v15, %v9475_v20 }
 0x60b   : > { %v6634_v13 = vadd.f32 %v6633_v49, %v6629_v57  ;;  %v6631_v46 = vadd.f32 %v6629_v57, %v6616_v38 }
 0x60d   : > { %v6635_v3 = vmul.f32 0.36787945, %v6634_v13  ;;  %v6632_v30 = vmul.f32 0.36787945, %v6631_v46 }
 0x60f   : > { %v6636_v32 = vmul.f32 -54.365635, %v6635_v3  ;;  %v6649_v37 = vadd.f32 %v6635_v3, %v6632_v30 }
 0x611   : > { %v6638_v36 = vrot.slane %v6636_v32, 3 }
 0x613   : > { %v6640_v0 = vadd.f32 %v6638_v36, %v14724_v5 }
 0x615   : > { %vm6641_vm0 = vcmp.ge.f32.partialorder %v6640_v0, 10.0 }
 0x616   : > { %v9476_v56 = vsel %vm6641_vm0, 1.0, %v10163_v28 }
 0x617   : > { %v6645_v1 = vrot.slane %v9476_v56, 5  ;;  %v6685_v52 = vsel %vm6063_vm3, %v6684_v42, %v9476_v56 }
 0x619   : > { %v6650_v39 = vadd.f32 %v6649_v37, %v6645_v1  ;;  %v6647_v22 = vadd.f32 %v6645_v1, %v6632_v30 }
 0x61b   : > { %v6651_v26 = vmul.f32 0.36787945, %v6650_v39  ;;  %v6648_v35 = vmul.f32 0.36787945, %v6647_v22 }
 0x61d   : > { %v6652_v10 = vmul.f32 -54.365635, %v6651_v26  ;;  %v6660_v47 = vadd.f32 %v6651_v26, %v6648_v35 }
 0x61f   : > { %v6654_v8 = vrot.slane %v6652_v10, 2 }
 0x621   : > { %v6656_v33 = vadd.f32 %v6654_v8, %v14724_v5 }
 0x623   : > { %vm6657_vm6 = vcmp.ge.f32.partialorder %v6656_v33, 10.0 }
 0x624   : > { %v9477_v18 = vsel %vm6657_vm6, 1.0, %v10163_v28 }
 0x625   : > { %v6662_v4 = vrot.slane %v9477_v18, 6  ;;  %v6686_v17 = vsel %vm6068_vm4, %v6685_v52, %v9477_v18 }
 0x627   : > { %v6664_v48 = vadd.f32 %v6662_v4, %v6660_v47 }
 0x629   : > { %v6665_v6 = vmul.f32 0.36787945, %v6664_v48 }
 0x62b   : > { %v6666_v34 = vmul.f32 -54.365635, %v6665_v6 }
 0x62d   : > { %v6668_v41 = vrot.slane %v6666_v34, 1 }
 0x62f   : > { %v6670_v11 = vadd.f32 %v6668_v41, %v14724_v5 }
 0x631   : > { %vm6671_vm7 = vcmp.ge.f32.partialorder %v6670_v11, 10.0 }
 0x632   : > { %v9478_v12 = vsel %vm6671_vm7, 1.0, %v10163_v28 }
 0x633   : > { %v6687_v53 = vsel %vm6073_vm5, %v6686_v17, %v9478_v12 }
 0x634   : > { %6689 = vst [vmem:[%s14717_s28 + $0x8] sm:$0xff] %v6687_v53 }
 0x635 PF: > { %s14_s15 = sadd.s32 1, %s10161_s15  }
 0x636   : > { %p11_p4 = scmp.ge.s32.totalorder %s14_s15, 4  }
 0x638   :  { %13 = sbr.rel (!%p11_p4) target bundleno = 1 (0x1), region = 66 }

</bundles_post_ra>
